<compile_context>
chip_gen: v7x
topology: tpu7x:2x2x1
jax: 0.10.0
libtpu: 0.0.40
codegen_flags: <defaults>
</compile_context>

<pallas_src>
import functools

import jax
import jax.numpy as jnp
import numpy as np
from jax.experimental import pallas as pl
from jax.experimental.pallas import tpu as pltpu


def feat_int_resnet_kernel(x_ref, ns_ref, nb_ref,
                           w1_ref, b1_ref,
                           w2_ref, b2_ref,
                           fcw_ref, fcb_ref,
                           o_ref, op_ref, *, n_blocks, n_mix):
    TB, S, F = x_ref.shape
    R = TB * S                       # rows of each fused MXU matmul

    # initial BatchNorm2d(feature_per_shell) (eval mode) == per-feature affine (f32 VPU)
    h = x_ref[...] * ns_ref[...] + nb_ref[...]

    # Hoisted row-index masks for zero-padded row shifts (shift in 1..n_mix-1).
    # JAX doesn't CSE broadcasts, so build them once, outside the unrolled block loop.
    if n_mix > 1:
        row = jax.lax.broadcasted_iota(jnp.int32, (TB, S, F), 1)
        shift_masks = [row < s for s in range(1, n_mix)]
    else:
        shift_masks = []

    def build_operand(inp):
        # Fill the (TB*S, n_mix*F) bf16 scratch: lane block ki holds `inp` shifted down
        # by (n_mix-1-ki) shells along axis 1, zero-filled at the top.  Writing straight
        # into the scratch lane slices avoids materializing parts + a K-wide concat.
        for ki in range(n_mix):
            shift = (n_mix - 1) - ki
            if shift == 0:
                part = inp
            else:
                part = pltpu.roll(inp, shift, axis=1)                # XLU, near-free
                part = jnp.where(shift_masks[shift - 1], 0.0, part)  # zero wrapped rows
            op_ref[:, ki * F:(ki + 1) * F] = part.astype(jnp.bfloat16).reshape(R, F)

    for blk in range(n_blocks):
        identity = h
        # conv1 as one K = n_mix*F matmul, f32 accumulation; bn1 scale pre-folded into w1
        build_operand(h)
        h1 = jnp.dot(op_ref[...], w1_ref[blk],
                     preferred_element_type=jnp.float32).reshape(TB, S, F)
        h1 = jnp.maximum(h1 + b1_ref[blk], 0.0)                      # bn1 bias + relu
        # conv2 (bn2 scale pre-folded into w2)
        build_operand(h1)
        h2 = jnp.dot(op_ref[...], w2_ref[blk],
                     preferred_element_type=jnp.float32).reshape(TB, S, F)
        h = jnp.maximum(h2 + b2_ref[blk] + identity, 0.0)            # bn2 bias + residual + relu

    pooled = jnp.mean(h, axis=1)                                     # AvgPool2d((num_shells, 1))
    # fc_layer, padded to a lane-dense (128-wide) output; sliced back in the wrapper.
    o_ref[...] = (jnp.dot(pooled.astype(jnp.bfloat16), fcw_ref[...],
                          preferred_element_type=jnp.float32)
                  + fcb_ref[...])


def feat_int_resnet(x, params, *, n_blocks, n_mix, batch_tile):
    B, S, F = x.shape
    n_class = params["fc_w"].shape[1]
    assert B % batch_tile == 0
    grid = (B // batch_tile,)           # keep >= 2 grid steps so v7x's 2 TCs both get work
    K = n_mix * F
    NCLS_PAD = max(128, pl.cdiv(n_class, 128) * 128)

    # Fold eval-mode BN scales into the conv weights, fuse the n_mix taps into a single
    # K = n_mix*F contraction, and cast to bf16 MXU operands (f32 accumulation in-kernel).
    w1 = (params["w1"] * params["bn1_scale"][:, None, :, :]).reshape(
        n_blocks, K, F).astype(jnp.bfloat16)
    w2 = (params["w2"] * params["bn2_scale"][:, None, :, :]).reshape(
        n_blocks, K, F).astype(jnp.bfloat16)
    # Lane-dense FC: zero-pad n_class -> 128 lanes (unmasked stores), slice after the call.
    fc_w = jnp.zeros((F, NCLS_PAD), jnp.bfloat16).at[:, :n_class].set(
        params["fc_w"].astype(jnp.bfloat16))
    fc_b = jnp.zeros((1, NCLS_PAD), jnp.float32).at[:, :n_class].set(params["fc_b"])

    kernel = functools.partial(feat_int_resnet_kernel, n_blocks=n_blocks, n_mix=n_mix)

    in_specs = [
        pl.BlockSpec((batch_tile, S, F), lambda i: (i, 0, 0)),        # x
        pl.BlockSpec((1, F), lambda i: (0, 0)),                       # norm_layer scale
        pl.BlockSpec((1, F), lambda i: (0, 0)),                       # norm_layer bias
        pl.BlockSpec((n_blocks, K, F), lambda i: (0, 0, 0)),          # conv1 w (bn1 scale folded)
        pl.BlockSpec((n_blocks, 1, F), lambda i: (0, 0, 0)),          # bn1 bias
        pl.BlockSpec((n_blocks, K, F), lambda i: (0, 0, 0)),          # conv2 w (bn2 scale folded)
        pl.BlockSpec((n_blocks, 1, F), lambda i: (0, 0, 0)),          # bn2 bias
        pl.BlockSpec((F, NCLS_PAD), lambda i: (0, 0)),                # fc weight (padded)
        pl.BlockSpec((1, NCLS_PAD), lambda i: (0, 0)),                # fc bias (padded)
    ]
    out_spec = pl.BlockSpec((batch_tile, NCLS_PAD), lambda i: (i, 0))

    flops = 2 * n_blocks * 2 * B * S * K * F + 2 * B * F * NCLS_PAD
    bytes_accessed = int(x.size * 4 + B * NCLS_PAD * 4
                         + (w1.size + w2.size + fc_w.size) * 2
                         + (2 * F + 2 * n_blocks * F + NCLS_PAD) * 4)
    cost = pl.CostEstimate(flops=flops, transcendentals=0,
                           bytes_accessed=bytes_accessed)

    out = pl.pallas_call(
        kernel,
        out_shape=jax.ShapeDtypeStruct((B, NCLS_PAD), jnp.float32),
        grid=grid,
        in_specs=in_specs,
        out_specs=out_spec,
        scratch_shapes=[pltpu.VMEM((batch_tile * S, K), jnp.bfloat16)],  # fused matmul operand
        compiler_params=pltpu.CompilerParams(
            dimension_semantics=("parallel",),
            vmem_limit_bytes=32 * 1024 * 1024),   # safe on v5e/v6e/v7x; tiles are a few MiB
        cost_estimate=cost,
    )(x, params["norm_scale"], params["norm_bias"],
      w1, params["bn1_bias"],
      w2, params["bn2_bias"],
      fc_w, fc_b)
    return out[:, :n_class]


def init_params(key, *, F, n_blocks, n_mix, n_class):
    keys = jax.random.split(key, 7)

    def bn_affine(k, prefix):
        kg, kb, km, kv = jax.random.split(k, 4)
        shape = prefix + (F,)
        gamma = 1.0 + 0.1 * jax.random.normal(kg, shape, jnp.float32)
        beta = 0.1 * jax.random.normal(kb, shape, jnp.float32)
        mean = 0.1 * jax.random.normal(km, shape, jnp.float32)
        var = jax.random.uniform(kv, shape, dtype=jnp.float32, minval=0.5, maxval=1.5)
        scale = gamma * jax.lax.rsqrt(var + 1e-5)
        bias = beta - mean * scale
        return scale, bias

    norm_scale, norm_bias = bn_affine(keys[0], (1,))
    bn1_scale, bn1_bias = bn_affine(keys[1], (n_blocks, 1))
    bn2_scale, bn2_bias = bn_affine(keys[2], (n_blocks, 1))
    # conv weights stored as (block, ki, F_in, F_out) so each conv row does x_row @ W
    w1 = 0.05 * jax.random.normal(keys[3], (n_blocks, n_mix, F, F), jnp.float32)
    w2 = 0.05 * jax.random.normal(keys[4], (n_blocks, n_mix, F, F), jnp.float32)
    fc_w = 0.05 * jax.random.normal(keys[5], (F, n_class), jnp.float32)
    fc_b = 0.1 * jax.random.normal(keys[6], (1, n_class), jnp.float32)
    return dict(norm_scale=norm_scale, norm_bias=norm_bias,
                w1=w1, bn1_scale=bn1_scale, bn1_bias=bn1_bias,
                w2=w2, bn2_scale=bn2_scale, bn2_bias=bn2_bias,
                fc_w=fc_w, fc_b=fc_b)


def reference_forward(x, p, *, n_blocks, n_mix):
    # Plain-JAX (f32) mirror of the PyTorch forward (eval mode), used as a sanity check.
    B, S, F = x.shape
    h = x * p["norm_scale"] + p["norm_bias"]

    def conv(inp, w):
        acc = jnp.zeros((B, S, F), jnp.float32)
        for ki in range(n_mix):
            shift = (n_mix - 1) - ki
            if shift == 0:
                hs = inp
            else:
                hs = jnp.concatenate(
                    [jnp.zeros((B, shift, F), jnp.float32), inp[:, :S - shift, :]], axis=1)
            acc = acc + jnp.einsum("bsf,fo->bso", hs, w[ki])
        return acc

    for blk in range(n_blocks):
        identity = h
        h1 = jnp.maximum(conv(h, p["w1"][blk]) * p["bn1_scale"][blk] + p["bn1_bias"][blk], 0.0)
        h2 = conv(h1, p["w2"][blk]) * p["bn2_scale"][blk] + p["bn2_bias"][blk]
        h = jnp.maximum(h2 + identity, 0.0)
    pooled = jnp.mean(h, axis=1)
    return pooled @ p["fc_w"] + p["fc_b"]


if __name__ == "__main__":
    feature_per_shell = 128   # lane-aligned; module default is 80
    num_shells = 8            # sublane-aligned; module default is 6
    n_blocks = 2
    n_mix = 2
    n_class = 2
    batch = 256               # TB*S = 1024 rows per MXU matmul
    batch_tile = 128          # 2 grid steps -> both v7x TensorCores get work

    key = jax.random.PRNGKey(0)
    kx, kp = jax.random.split(key)
    x = jax.random.normal(kx, (batch, num_shells, feature_per_shell), jnp.float32)
    params = init_params(kp, F=feature_per_shell, n_blocks=n_blocks,
                         n_mix=n_mix, n_class=n_class)

    out = feat_int_resnet(x, params, n_blocks=n_blocks, n_mix=n_mix, batch_tile=batch_tile)
    out = jax.block_until_ready(out)

    ref = reference_forward(x, params, n_blocks=n_blocks, n_mix=n_mix)
    # bf16 matmul operands / folded-scale bf16 weights (f32 accumulation) vs f32 reference
    np.testing.assert_allclose(np.asarray(out), np.asarray(ref), rtol=5e-2, atol=5e-2)
    print("KERNEL_OK")
</pallas_src>

<mosaic_0001>
module attributes {stable_mosaic.version = 11 : i64} {
  func.func @feat_int_resnet_kernel(%arg0: i32, %arg1: memref<128x8x128xf32, #tpu.memory_space<vmem>>, %arg2: memref<1x128xf32, #tpu.memory_space<vmem>>, %arg3: memref<1x128xf32, #tpu.memory_space<vmem>>, %arg4: memref<2x256x128xbf16, #tpu.memory_space<vmem>>, %arg5: memref<2x1x128xf32, #tpu.memory_space<vmem>>, %arg6: memref<2x256x128xbf16, #tpu.memory_space<vmem>>, %arg7: memref<2x1x128xf32, #tpu.memory_space<vmem>>, %arg8: memref<128x128xbf16, #tpu.memory_space<vmem>>, %arg9: memref<1x128xf32, #tpu.memory_space<vmem>>, %arg10: memref<128x128xf32, #tpu.memory_space<vmem>>, %arg11: memref<1024x256xbf16, #tpu.memory_space<vmem>>) attributes {dimension_semantics = [#tpu.dimension_semantics<parallel>], iteration_bounds = array<i64: 2>, scalar_prefetch = 0 : i64, scratch_operands = 1 : i64, tpu.core_type = #tpu.core_type<tc>, window_params = [{transform_indices = @transform_0, window_bounds = array<i64: 128, 8, 128>}, {pipeline_mode = #tpu.pipeline_mode<synchronous>, transform_indices = @transform_1, window_bounds = array<i64: 1, 128>}, {pipeline_mode = #tpu.pipeline_mode<synchronous>, transform_indices = @transform_2, window_bounds = array<i64: 1, 128>}, {pipeline_mode = #tpu.pipeline_mode<synchronous>, transform_indices = @transform_3, window_bounds = array<i64: 2, 256, 128>}, {pipeline_mode = #tpu.pipeline_mode<synchronous>, transform_indices = @transform_4, window_bounds = array<i64: 2, 1, 128>}, {pipeline_mode = #tpu.pipeline_mode<synchronous>, transform_indices = @transform_5, window_bounds = array<i64: 2, 256, 128>}, {pipeline_mode = #tpu.pipeline_mode<synchronous>, transform_indices = @transform_6, window_bounds = array<i64: 2, 1, 128>}, {pipeline_mode = #tpu.pipeline_mode<synchronous>, transform_indices = @transform_7, window_bounds = array<i64: 128, 128>}, {pipeline_mode = #tpu.pipeline_mode<synchronous>, transform_indices = @transform_8, window_bounds = array<i64: 1, 128>}, {transform_indices = @transform_9, window_bounds = array<i64: 128, 128>}]} {
    %c0 = arith.constant 0 : index
    %c0_0 = arith.constant 0 : index
    %c0_1 = arith.constant 0 : index
    %0 = vector.load %arg1[%c0, %c0_0, %c0_1] : memref<128x8x128xf32, #tpu.memory_space<vmem>>, vector<128x8x128xf32>
    %c0_2 = arith.constant 0 : index
    %c0_3 = arith.constant 0 : index
    %1 = vector.load %arg2[%c0_2, %c0_3] : memref<1x128xf32, #tpu.memory_space<vmem>>, vector<1x128xf32>
    %2 = vector.shape_cast %1 : vector<1x128xf32> to vector<1x1x128xf32>
    %3 = vector.broadcast %2 : vector<1x1x128xf32> to vector<128x8x128xf32>
    %4 = arith.mulf %0, %3 : vector<128x8x128xf32>
    %c0_4 = arith.constant 0 : index
    %c0_5 = arith.constant 0 : index
    %5 = vector.load %arg3[%c0_4, %c0_5] : memref<1x128xf32, #tpu.memory_space<vmem>>, vector<1x128xf32>
    %6 = vector.shape_cast %5 : vector<1x128xf32> to vector<1x1x128xf32>
    %7 = vector.broadcast %6 : vector<1x1x128xf32> to vector<128x8x128xf32>
    %8 = arith.addf %4, %7 : vector<128x8x128xf32>
    %9 = tpu.iota {dimensions = array<i32: 1>} : vector<128x8x128xi32>
    %c1_i32 = arith.constant 1 : i32
    %10 = vector.broadcast %c1_i32 : i32 to vector<128x8x128xi32>
    %11 = arith.cmpi slt, %9, %10 : vector<128x8x128xi32>
    %c1_i32_6 = arith.constant 1 : i32
    %12 = tpu.dynamic_rotate %8 by %c1_i32_6 dim 1 : vector<128x8x128xf32>, i32 -> vector<128x8x128xf32>
    %cst = arith.constant 0.000000e+00 : f32
    %13 = vector.broadcast %cst : f32 to vector<128x8x128xf32>
    %14 = arith.select %11, %13, %12 : vector<128x8x128xi1>, vector<128x8x128xf32>
    %15 = arith.truncf %14 : vector<128x8x128xf32> to vector<128x8x128xbf16>
    %16 = vector.shape_cast %15 : vector<128x8x128xbf16> to vector<1024x128xbf16>
    %c0_7 = arith.constant 0 : index
    %c0_8 = arith.constant 0 : index
    %17 = vector.load %arg11[%c0_7, %c0_8] : memref<1024x256xbf16, #tpu.memory_space<vmem>>, vector<1024x128xbf16>
    tpu.vector_store %arg11[%c0_7, %c0_8], %16 {strides = array<i32>} : memref<1024x256xbf16, #tpu.memory_space<vmem>>, vector<1024x128xbf16>,
    %18 = arith.truncf %8 : vector<128x8x128xf32> to vector<128x8x128xbf16>
    %19 = vector.shape_cast %18 : vector<128x8x128xbf16> to vector<1024x128xbf16>
    %c0_9 = arith.constant 0 : index
    %c128 = arith.constant 128 : index
    %20 = vector.load %arg11[%c0_9, %c128] : memref<1024x256xbf16, #tpu.memory_space<vmem>>, vector<1024x128xbf16>
    tpu.vector_store %arg11[%c0_9, %c128], %19 {strides = array<i32>} : memref<1024x256xbf16, #tpu.memory_space<vmem>>, vector<1024x128xbf16>,
    %c0_10 = arith.constant 0 : index
    %c0_11 = arith.constant 0 : index
    %21 = vector.load %arg11[%c0_10, %c0_11] : memref<1024x256xbf16, #tpu.memory_space<vmem>>, vector<1024x256xbf16>
    %c0_12 = arith.constant 0 : index
    %c0_13 = arith.constant 0 : index
    %c0_14 = arith.constant 0 : index
    %22 = vector.load %arg4[%c0_12, %c0_13, %c0_14] : memref<2x256x128xbf16, #tpu.memory_space<vmem>>, vector<1x256x128xbf16>
    %23 = vector.shape_cast %22 : vector<1x256x128xbf16> to vector<256x128xbf16>
    %cst_15 = arith.constant dense<0.000000e+00> : vector<1024x128xf32>
    %24 = tpu.matmul %21, %23, %cst_15 {dimension_numbers = #tpu.dot_dimension_numbers<[1], [0], [0], [1], [0, 0, 1, 1], [], []>} : vector<1024x256xbf16>, vector<256x128xbf16>, vector<1024x128xf32> -> vector<1024x128xf32>
    %25 = vector.shape_cast %24 : vector<1024x128xf32> to vector<128x8x128xf32>
    %c0_16 = arith.constant 0 : index
    %c0_17 = arith.constant 0 : index
    %c0_18 = arith.constant 0 : index
    %26 = vector.load %arg5[%c0_16, %c0_17, %c0_18] : memref<2x1x128xf32, #tpu.memory_space<vmem>>, vector<1x1x128xf32>
    %27 = vector.shape_cast %26 : vector<1x1x128xf32> to vector<1x128xf32>
    %28 = vector.shape_cast %27 : vector<1x128xf32> to vector<1x1x128xf32>
    %29 = vector.broadcast %28 : vector<1x1x128xf32> to vector<128x8x128xf32>
    %30 = arith.addf %25, %29 : vector<128x8x128xf32>
    %cst_19 = arith.constant 0.000000e+00 : f32
    %31 = vector.broadcast %cst_19 : f32 to vector<128x8x128xf32>
    %32 = arith.maximumf %30, %31 : vector<128x8x128xf32>
    %c1_i32_20 = arith.constant 1 : i32
    %33 = tpu.dynamic_rotate %32 by %c1_i32_20 dim 1 : vector<128x8x128xf32>, i32 -> vector<128x8x128xf32>
    %cst_21 = arith.constant 0.000000e+00 : f32
    %34 = vector.broadcast %cst_21 : f32 to vector<128x8x128xf32>
    %35 = arith.select %11, %34, %33 : vector<128x8x128xi1>, vector<128x8x128xf32>
    %36 = arith.truncf %35 : vector<128x8x128xf32> to vector<128x8x128xbf16>
    %37 = vector.shape_cast %36 : vector<128x8x128xbf16> to vector<1024x128xbf16>
    %c0_22 = arith.constant 0 : index
    %c0_23 = arith.constant 0 : index
    %38 = vector.load %arg11[%c0_22, %c0_23] : memref<1024x256xbf16, #tpu.memory_space<vmem>>, vector<1024x128xbf16>
    tpu.vector_store %arg11[%c0_22, %c0_23], %37 {strides = array<i32>} : memref<1024x256xbf16, #tpu.memory_space<vmem>>, vector<1024x128xbf16>,
    %39 = arith.truncf %32 : vector<128x8x128xf32> to vector<128x8x128xbf16>
    %40 = vector.shape_cast %39 : vector<128x8x128xbf16> to vector<1024x128xbf16>
    %c0_24 = arith.constant 0 : index
    %c128_25 = arith.constant 128 : index
    %41 = vector.load %arg11[%c0_24, %c128_25] : memref<1024x256xbf16, #tpu.memory_space<vmem>>, vector<1024x128xbf16>
    tpu.vector_store %arg11[%c0_24, %c128_25], %40 {strides = array<i32>} : memref<1024x256xbf16, #tpu.memory_space<vmem>>, vector<1024x128xbf16>,
    %c0_26 = arith.constant 0 : index
    %c0_27 = arith.constant 0 : index
    %42 = vector.load %arg11[%c0_26, %c0_27] : memref<1024x256xbf16, #tpu.memory_space<vmem>>, vector<1024x256xbf16>
    %c0_28 = arith.constant 0 : index
    %c0_29 = arith.constant 0 : index
    %c0_30 = arith.constant 0 : index
    %43 = vector.load %arg6[%c0_28, %c0_29, %c0_30] : memref<2x256x128xbf16, #tpu.memory_space<vmem>>, vector<1x256x128xbf16>
    %44 = vector.shape_cast %43 : vector<1x256x128xbf16> to vector<256x128xbf16>
    %cst_31 = arith.constant dense<0.000000e+00> : vector<1024x128xf32>
    %45 = tpu.matmul %42, %44, %cst_31 {dimension_numbers = #tpu.dot_dimension_numbers<[1], [0], [0], [1], [0, 0, 1, 1], [], []>} : vector<1024x256xbf16>, vector<256x128xbf16>, vector<1024x128xf32> -> vector<1024x128xf32>
    %46 = vector.shape_cast %45 : vector<1024x128xf32> to vector<128x8x128xf32>
    %c0_32 = arith.constant 0 : index
    %c0_33 = arith.constant 0 : index
    %c0_34 = arith.constant 0 : index
    %47 = vector.load %arg7[%c0_32, %c0_33, %c0_34] : memref<2x1x128xf32, #tpu.memory_space<vmem>>, vector<1x1x128xf32>
    %48 = vector.shape_cast %47 : vector<1x1x128xf32> to vector<1x128xf32>
    %49 = vector.shape_cast %48 : vector<1x128xf32> to vector<1x1x128xf32>
    %50 = vector.broadcast %49 : vector<1x1x128xf32> to vector<128x8x128xf32>
    %51 = arith.addf %46, %50 : vector<128x8x128xf32>
    %52 = arith.addf %51, %8 : vector<128x8x128xf32>
    %cst_35 = arith.constant 0.000000e+00 : f32
    %53 = vector.broadcast %cst_35 : f32 to vector<128x8x128xf32>
    %54 = arith.maximumf %52, %53 : vector<128x8x128xf32>
    %c1_i32_36 = arith.constant 1 : i32
    %55 = tpu.dynamic_rotate %54 by %c1_i32_36 dim 1 : vector<128x8x128xf32>, i32 -> vector<128x8x128xf32>
    %cst_37 = arith.constant 0.000000e+00 : f32
    %56 = vector.broadcast %cst_37 : f32 to vector<128x8x128xf32>
    %57 = arith.select %11, %56, %55 : vector<128x8x128xi1>, vector<128x8x128xf32>
    %58 = arith.truncf %57 : vector<128x8x128xf32> to vector<128x8x128xbf16>
    %59 = vector.shape_cast %58 : vector<128x8x128xbf16> to vector<1024x128xbf16>
    %c0_38 = arith.constant 0 : index
    %c0_39 = arith.constant 0 : index
    %60 = vector.load %arg11[%c0_38, %c0_39] : memref<1024x256xbf16, #tpu.memory_space<vmem>>, vector<1024x128xbf16>
    tpu.vector_store %arg11[%c0_38, %c0_39], %59 {strides = array<i32>} : memref<1024x256xbf16, #tpu.memory_space<vmem>>, vector<1024x128xbf16>,
    %61 = arith.truncf %54 : vector<128x8x128xf32> to vector<128x8x128xbf16>
    %62 = vector.shape_cast %61 : vector<128x8x128xbf16> to vector<1024x128xbf16>
    %c0_40 = arith.constant 0 : index
    %c128_41 = arith.constant 128 : index
    %63 = vector.load %arg11[%c0_40, %c128_41] : memref<1024x256xbf16, #tpu.memory_space<vmem>>, vector<1024x128xbf16>
    tpu.vector_store %arg11[%c0_40, %c128_41], %62 {strides = array<i32>} : memref<1024x256xbf16, #tpu.memory_space<vmem>>, vector<1024x128xbf16>,
    %c0_42 = arith.constant 0 : index
    %c0_43 = arith.constant 0 : index
    %64 = vector.load %arg11[%c0_42, %c0_43] : memref<1024x256xbf16, #tpu.memory_space<vmem>>, vector<1024x256xbf16>
    %c1 = arith.constant 1 : index
    %c0_44 = arith.constant 0 : index
    %c0_45 = arith.constant 0 : index
    %65 = vector.load %arg4[%c1, %c0_44, %c0_45] : memref<2x256x128xbf16, #tpu.memory_space<vmem>>, vector<1x256x128xbf16>
    %66 = vector.shape_cast %65 : vector<1x256x128xbf16> to vector<256x128xbf16>
    %cst_46 = arith.constant dense<0.000000e+00> : vector<1024x128xf32>
    %67 = tpu.matmul %64, %66, %cst_46 {dimension_numbers = #tpu.dot_dimension_numbers<[1], [0], [0], [1], [0, 0, 1, 1], [], []>} : vector<1024x256xbf16>, vector<256x128xbf16>, vector<1024x128xf32> -> vector<1024x128xf32>
    %68 = vector.shape_cast %67 : vector<1024x128xf32> to vector<128x8x128xf32>
    %c1_47 = arith.constant 1 : index
    %c0_48 = arith.constant 0 : index
    %c0_49 = arith.constant 0 : index
    %69 = vector.load %arg5[%c1_47, %c0_48, %c0_49] : memref<2x1x128xf32, #tpu.memory_space<vmem>>, vector<1x1x128xf32>
    %70 = vector.shape_cast %69 : vector<1x1x128xf32> to vector<1x128xf32>
    %71 = vector.shape_cast %70 : vector<1x128xf32> to vector<1x1x128xf32>
    %72 = vector.broadcast %71 : vector<1x1x128xf32> to vector<128x8x128xf32>
    %73 = arith.addf %68, %72 : vector<128x8x128xf32>
    %cst_50 = arith.constant 0.000000e+00 : f32
    %74 = vector.broadcast %cst_50 : f32 to vector<128x8x128xf32>
    %75 = arith.maximumf %73, %74 : vector<128x8x128xf32>
    %c1_i32_51 = arith.constant 1 : i32
    %76 = tpu.dynamic_rotate %75 by %c1_i32_51 dim 1 : vector<128x8x128xf32>, i32 -> vector<128x8x128xf32>
    %cst_52 = arith.constant 0.000000e+00 : f32
    %77 = vector.broadcast %cst_52 : f32 to vector<128x8x128xf32>
    %78 = arith.select %11, %77, %76 : vector<128x8x128xi1>, vector<128x8x128xf32>
    %79 = arith.truncf %78 : vector<128x8x128xf32> to vector<128x8x128xbf16>
    %80 = vector.shape_cast %79 : vector<128x8x128xbf16> to vector<1024x128xbf16>
    %c0_53 = arith.constant 0 : index
    %c0_54 = arith.constant 0 : index
    %81 = vector.load %arg11[%c0_53, %c0_54] : memref<1024x256xbf16, #tpu.memory_space<vmem>>, vector<1024x128xbf16>
    tpu.vector_store %arg11[%c0_53, %c0_54], %80 {strides = array<i32>} : memref<1024x256xbf16, #tpu.memory_space<vmem>>, vector<1024x128xbf16>,
    %82 = arith.truncf %75 : vector<128x8x128xf32> to vector<128x8x128xbf16>
    %83 = vector.shape_cast %82 : vector<128x8x128xbf16> to vector<1024x128xbf16>
    %c0_55 = arith.constant 0 : index
    %c128_56 = arith.constant 128 : index
    %84 = vector.load %arg11[%c0_55, %c128_56] : memref<1024x256xbf16, #tpu.memory_space<vmem>>, vector<1024x128xbf16>
    tpu.vector_store %arg11[%c0_55, %c128_56], %83 {strides = array<i32>} : memref<1024x256xbf16, #tpu.memory_space<vmem>>, vector<1024x128xbf16>,
    %c0_57 = arith.constant 0 : index
    %c0_58 = arith.constant 0 : index
    %85 = vector.load %arg11[%c0_57, %c0_58] : memref<1024x256xbf16, #tpu.memory_space<vmem>>, vector<1024x256xbf16>
    %c1_59 = arith.constant 1 : index
    %c0_60 = arith.constant 0 : index
    %c0_61 = arith.constant 0 : index
    %86 = vector.load %arg6[%c1_59, %c0_60, %c0_61] : memref<2x256x128xbf16, #tpu.memory_space<vmem>>, vector<1x256x128xbf16>
    %87 = vector.shape_cast %86 : vector<1x256x128xbf16> to vector<256x128xbf16>
    %cst_62 = arith.constant dense<0.000000e+00> : vector<1024x128xf32>
    %88 = tpu.matmul %85, %87, %cst_62 {dimension_numbers = #tpu.dot_dimension_numbers<[1], [0], [0], [1], [0, 0, 1, 1], [], []>} : vector<1024x256xbf16>, vector<256x128xbf16>, vector<1024x128xf32> -> vector<1024x128xf32>
    %89 = vector.shape_cast %88 : vector<1024x128xf32> to vector<128x8x128xf32>
    %c1_63 = arith.constant 1 : index
    %c0_64 = arith.constant 0 : index
    %c0_65 = arith.constant 0 : index
    %90 = vector.load %arg7[%c1_63, %c0_64, %c0_65] : memref<2x1x128xf32, #tpu.memory_space<vmem>>, vector<1x1x128xf32>
    %91 = vector.shape_cast %90 : vector<1x1x128xf32> to vector<1x128xf32>
    %92 = vector.shape_cast %91 : vector<1x128xf32> to vector<1x1x128xf32>
    %93 = vector.broadcast %92 : vector<1x1x128xf32> to vector<128x8x128xf32>
    %94 = arith.addf %89, %93 : vector<128x8x128xf32>
    %95 = arith.addf %94, %54 : vector<128x8x128xf32>
    %cst_66 = arith.constant 0.000000e+00 : f32
    %96 = vector.broadcast %cst_66 : f32 to vector<128x8x128xf32>
    %97 = arith.maximumf %95, %96 : vector<128x8x128xf32>
    %cst_67 = arith.constant dense<0.000000e+00> : vector<128x128xf32>
    %98 = vector.multi_reduction <add>, %97, %cst_67 [1] : vector<128x8x128xf32> to vector<128x128xf32>
    %cst_68 = arith.constant 8.000000e+00 : f32
    %99 = vector.broadcast %cst_68 : f32 to vector<128x128xf32>
    %100 = arith.divf %98, %99 : vector<128x128xf32>
    %101 = arith.truncf %100 : vector<128x128xf32> to vector<128x128xbf16>
    %c0_69 = arith.constant 0 : index
    %c0_70 = arith.constant 0 : index
    %102 = vector.load %arg8[%c0_69, %c0_70] : memref<128x128xbf16, #tpu.memory_space<vmem>>, vector<128x128xbf16>
    %cst_71 = arith.constant dense<0.000000e+00> : vector<128x128xf32>
    %103 = tpu.matmul %101, %102, %cst_71 {dimension_numbers = #tpu.dot_dimension_numbers<[1], [0], [0], [1], [0, 0, 1, 1], [], []>} : vector<128x128xbf16>, vector<128x128xbf16>, vector<128x128xf32> -> vector<128x128xf32>
    %c0_72 = arith.constant 0 : index
    %c0_73 = arith.constant 0 : index
    %104 = vector.load %arg9[%c0_72, %c0_73] : memref<1x128xf32, #tpu.memory_space<vmem>>, vector<1x128xf32>
    %105 = vector.broadcast %104 : vector<1x128xf32> to vector<128x128xf32>
    %106 = arith.addf %103, %105 : vector<128x128xf32>
    %c0_74 = arith.constant 0 : index
    %c0_75 = arith.constant 0 : index
    %107 = vector.load %arg10[%c0_74, %c0_75] : memref<128x128xf32, #tpu.memory_space<vmem>>, vector<128x128xf32>
    tpu.vector_store %arg10[%c0_74, %c0_75], %106 {strides = array<i32>} : memref<128x128xf32, #tpu.memory_space<vmem>>, vector<128x128xf32>,
    return
  }
  func.func @transform_0(%arg0: i32) -> (i32, i32, i32) {
    %c0_i32 = arith.constant 0 : i32
    %c0_i32_0 = arith.constant 0 : i32
    %c0_i32_1 = arith.constant 0 : i32
    return %arg0, %c0_i32, %c0_i32_0 : i32, i32, i32
  }
  func.func @transform_1(%arg0: i32) -> (i32, i32) {
    %c0_i32 = arith.constant 0 : i32
    %c0_i32_0 = arith.constant 0 : i32
    %c0_i32_1 = arith.constant 0 : i32
    return %c0_i32, %c0_i32_0 : i32, i32
  }
  func.func @transform_2(%arg0: i32) -> (i32, i32) {
    %c0_i32 = arith.constant 0 : i32
    %c0_i32_0 = arith.constant 0 : i32
    %c0_i32_1 = arith.constant 0 : i32
    return %c0_i32, %c0_i32_0 : i32, i32
  }
  func.func @transform_3(%arg0: i32) -> (i32, i32, i32) {
    %c0_i32 = arith.constant 0 : i32
    %c0_i32_0 = arith.constant 0 : i32
    %c0_i32_1 = arith.constant 0 : i32
    %c0_i32_2 = arith.constant 0 : i32
    return %c0_i32, %c0_i32_0, %c0_i32_1 : i32, i32, i32
  }
  func.func @transform_4(%arg0: i32) -> (i32, i32, i32) {
    %c0_i32 = arith.constant 0 : i32
    %c0_i32_0 = arith.constant 0 : i32
    %c0_i32_1 = arith.constant 0 : i32
    %c0_i32_2 = arith.constant 0 : i32
    return %c0_i32, %c0_i32_0, %c0_i32_1 : i32, i32, i32
  }
  func.func @transform_5(%arg0: i32) -> (i32, i32, i32) {
    %c0_i32 = arith.constant 0 : i32
    %c0_i32_0 = arith.constant 0 : i32
    %c0_i32_1 = arith.constant 0 : i32
    %c0_i32_2 = arith.constant 0 : i32
    return %c0_i32, %c0_i32_0, %c0_i32_1 : i32, i32, i32
  }
  func.func @transform_6(%arg0: i32) -> (i32, i32, i32) {
    %c0_i32 = arith.constant 0 : i32
    %c0_i32_0 = arith.constant 0 : i32
    %c0_i32_1 = arith.constant 0 : i32
    %c0_i32_2 = arith.constant 0 : i32
    return %c0_i32, %c0_i32_0, %c0_i32_1 : i32, i32, i32
  }
  func.func @transform_7(%arg0: i32) -> (i32, i32) {
    %c0_i32 = arith.constant 0 : i32
    %c0_i32_0 = arith.constant 0 : i32
    %c0_i32_1 = arith.constant 0 : i32
    return %c0_i32, %c0_i32_0 : i32, i32
  }
  func.func @transform_8(%arg0: i32) -> (i32, i32) {
    %c0_i32 = arith.constant 0 : i32
    %c0_i32_0 = arith.constant 0 : i32
    %c0_i32_1 = arith.constant 0 : i32
    return %c0_i32, %c0_i32_0 : i32, i32
  }
  func.func @transform_9(%arg0: i32) -> (i32, i32) {
    %c0_i32 = arith.constant 0 : i32
    %c0_i32_0 = arith.constant 0 : i32
    return %arg0, %c0_i32 : i32, i32
  }
}

</mosaic_0001>

<bundles_post_ra>
// kernel: tpu_custom_call.1
= control target key start
LH: loop header
LB: loop body
LE: loop exit
PB: predicated region body
PF: predicated region fallthrough
CT: control target
= control target key end

     0   :  { %s19532_s0 = inlined_call_operand.hbm [shape: f32[256,8,128], index: 0, kind: input, shape index: {}]   ;;  %s19533_s1 = inlined_call_operand.vmem [shape: f32[1,128], index: 1, kind: input, shape index: {}]   ;;  %s19534_s2 = inlined_call_operand.vmem [shape: f32[1,128], index: 2, kind: input, shape index: {}]   ;;  %s19535_s3 = inlined_call_operand.hbm [shape: bf16[2,256,128], index: 3, kind: input, shape index: {}]   ;;  %s19536_s4 = inlined_call_operand.vmem [shape: f32[2,1,128], index: 4, kind: input, shape index: {}]   ;;  %s19537_s5 = inlined_call_operand.hbm [shape: bf16[2,256,128], index: 5, kind: input, shape index: {}]   ;;  %s19538_s6 = inlined_call_operand.vmem [shape: f32[2,1,128], index: 6, kind: input, shape index: {}]   ;;  %s19539_s7 = inlined_call_operand.hbm [shape: bf16[128,128], index: 7, kind: input, shape index: {}]   ;;  %s19540_s8 = inlined_call_operand.vmem [shape: f32[1,128], index: 8, kind: input, shape index: {}]   ;;  %s19541_s9 = inlined_call_operand.hbm [shape: f32[256,128], index: 9, kind: output, shape index: {}]  }
   0x1   :  { %19748 = sst [smem:[#allocation127_spill]] %s19541_s9 }
   0x2   :  { %14 = vsyncpa [#allocation4], 0 }
   0x3   :  { %16 = vsyncpa [#allocation4 + $0x1], 0 }
   0x4   :  { %17 = vsyncpa [#allocation7], 0 }
   0x5   :  { %18 = vsyncpa [#allocation10], 0 }
   0x6   :  { %19 = vsyncpa [#allocation5], 0 }
   0x7   :  { %21 = vsyncpa [#allocation5 + $0x1], 0  ;;  %s15564_s30 = smov 0   ;;  %s15566_s10 = smov 0  }
   0x8   :  { %s15568_s11 = smov 0   ;;  %s15570_s12 = smov 0  }
   0x9 LB: > { %19749 = sst [smem:[#allocation16_spill]] %s15488_s30  ;;  %s15585_s13 = sadd.s32 4294967295, %s15500_s12   ;;  %s15500_s12 = sphi %s15570_s12, %s20182_s12   ;;  %s15496_s11 = sphi %s15568_s11, %s20181_s11   ;;  %s15492_s10 = sphi %s15566_s10, %s20180_s10   ;;  %s15488_s30 = sphi %s15564_s30, %s20179_s30  }
   0xa   : > { %s12663_s14 = sadd.s32 4294967294, %s15500_s12   ;;  %p47_p0 = scmp.ne.s32.totalorder %s15492_s10, %s15488_s30 }
   0xb   : > { %p19542_p1 = scmp.eq.s32.totalorder %s15585_s13, 0  ;;  %p245_p3 = scmp.eq.s32.totalorder %s12663_s14, 1 }
   0xc   : > { %p12664_p5 = scmp.ge.s32.totalorder %s15500_s12, 1  ;;  %p252_p7 = scmp.lt.s32.totalorder %s15500_s12, 3 }
   0xd   : > { %p15594_p4 = por %p19542_p1, %p47_p0  ;;  %p15599_p6 = por %p245_p3, %p47_p0 }
   0xe   : > { %p15604_p8 = pnand %p12664_p5, %p252_p7  ;;  %s15502_s18 = smov [#allocation6]  }
   0xf   : > { %s19750_s15 = scalar_select %p15594_p4, 1, 0 }
  0x10   : > { %s19751_s16 = scalar_select %p15599_p6, 1, 0 }
  0x11   : > { %s19753_s17 = scalar_select %p15604_p8, 1, 0 }
  0x12   : > { %19752 = sst [smem:[#allocation17_spill]] %s19751_s16  ;;  %s270_s19 = sshll.u32 %s15502_s18, 4  ;;  %s15608_s19 = int_to_ptr.vmem [resolvable:$true] %s270_s19 }
  0x13   : > { %p15150_p9 = pneg %p15604_p8  ;;  %s15503_s21 = smov [#allocation8]  }
  0x14   : > { %s286_s22 = sshll.u32 %s15503_s21, 4  ;;  %s15504_s23 = smov [#allocation9]   ;;  %s15619_s22 = int_to_ptr.vmem [resolvable:$true] %s286_s22 }
  0x15   : > { %p15615_p11 = pnand %p15150_p9, %p19542_p1  ;;  %s15621_s24 = sshll.u32 %s15504_s23, 4  ;;  %s303_s24 = int_to_ptr.vmem [resolvable:$true] %s15621_s24 }
  0x16   : > { %s15312_s27 = scalar_lea.hbm %s19535_s3, 4096 }
  0x17   : > { %p15313_p12 = scmp.ne.s32.totalorder %s19535_s3, %s15312_s27  ;;  %p15631_p13 = pneg %p15615_p11 }
  0x18   : > { %p15319_p5 = scmp.lt.u32.totalorder %s15312_s27, %s19535_s3 }
  0x19   : > { %p15315_p0 = pnand %p15631_p13, %p15313_p12 }
  0x1b   : > { %p15316_p3 = pneg %p15315_p0 }
  0x1d   : > { %p15321_p7 = pnand %p15319_p5, %p15316_p3 }
  0x1f   : > { %15324 = shalt.err (!%p15321_p7)
}
  0x20   : > { %s15325_s23 = scalar_lea.vmem %s15608_s19, 4096  ;;  %p15333_p2 = scmp.lt.s32.totalorder %s15608_s19, %s15608_s19 }
  0x21   : > { %p15326_p9 = scmp.ne.s32.totalorder %s15608_s19, %s15325_s23  ;;  %p15334_p6 = scmp.lt.s32.totalorder %s15325_s23, %s15325_s23 }
  0x23   : > { %p15328_p10 = pnand %p15326_p9, %p15631_p13  ;;  %p15335_p12 = por %p15334_p6, %p15333_p2 }
  0x25   : > { %p15329_p1 = pneg %p15328_p10 }
  0x27   : > { %p15336_p0 = pnand %p15335_p12, %p15329_p1 }
  0x29   : > { %15339 = shalt.err (!%p15336_p0)
}
  0x2a   : > { %s15505_s25 = smov 64   ;;  %s15506_s26 = smov 4  }
  0x2b   : > { %15153 = dma.hbm_to_vmem [thread:$0]  (!%p15615_p11), %s19535_s3, 4096, %s15608_s19, [#allocation7], %s15505_s25, %s15505_s25, %s15506_s26  }
  0x2c   : > { %s15340_s21 = scalar_lea.hbm %s19537_s5, 4096 }
  0x2d   : > { %p15341_p1 = scmp.ne.s32.totalorder %s19537_s5, %s15340_s21  ;;  %p15347_p10 = scmp.lt.u32.totalorder %s15340_s21, %s19537_s5 }
  0x2f   : > { %p15343_p2 = pnand %p15341_p1, %p15631_p13 }
  0x31   : > { %p15344_p6 = pneg %p15343_p2 }
  0x33   : > { %p15349_p3 = pnand %p15347_p10, %p15344_p6 }
  0x35   : > { %15352 = shalt.err (!%p15349_p3)
}
  0x36   : > { %s15353_s19 = scalar_lea.vmem %s15619_s22, 4096  ;;  %p15361_p12 = scmp.lt.s32.totalorder %s15619_s22, %s15619_s22 }
  0x37   : > { %p15354_p5 = scmp.ne.s32.totalorder %s15619_s22, %s15353_s19  ;;  %p15362_p0 = scmp.lt.s32.totalorder %s15353_s19, %s15353_s19 }
  0x39   : > { %p15356_p7 = pnand %p15354_p5, %p15631_p13  ;;  %p15363_p1 = por %p15362_p0, %p15361_p12 }
  0x3b   : > { %p15357_p9 = pneg %p15356_p7 }
  0x3d   : > { %p15364_p2 = pnand %p15363_p1, %p15357_p9 }
  0x3f   : > { %15367 = shalt.err (!%p15364_p2)
}
  0x40   : > { %15156 = dma.hbm_to_vmem [thread:$0]  (!%p15615_p11), %s19537_s5, 4096, %s15619_s22, [#allocation7], %s15505_s25, %s15505_s25, %s15506_s26  }
  0x41   : > { %s15368_s28 = scalar_lea.hbm %s19539_s7, 1024 }
  0x42   : > { %p15369_p6 = scmp.ne.s32.totalorder %s19539_s7, %s15368_s28  ;;  %p15375_p5 = scmp.lt.u32.totalorder %s15368_s28, %s19539_s7 }
  0x44   : > { %p15371_p10 = pnand %p15369_p6, %p15631_p13 }
  0x46   : > { %p15372_p3 = pneg %p15371_p10 }
  0x48   : > { %p15377_p7 = pnand %p15375_p5, %p15372_p3 }
  0x4a   : > { %15380 = shalt.err (!%p15377_p7)
}
  0x4b   : > { %s15381_s19 = scalar_lea.vmem %s303_s24, 1024  ;;  %p15389_p1 = scmp.lt.s32.totalorder %s303_s24, %s303_s24 }
  0x4c   : > { %p15382_p9 = scmp.ne.s32.totalorder %s303_s24, %s15381_s19  ;;  %p15390_p2 = scmp.lt.s32.totalorder %s15381_s19, %s15381_s19 }
  0x4e   : > { %p15384_p12 = pnand %p15382_p9, %p15631_p13  ;;  %p15391_p4 = por %p15390_p2, %p15389_p1 }
  0x50   : > { %p15385_p0 = pneg %p15384_p12 }
  0x52   : > { %p15392_p8 = pnand %p15391_p4, %p15385_p0 }
  0x54   : > { %15395 = shalt.err (!%p15392_p8)
}
  0x55   : > { %15159 = dma.hbm_to_vmem [thread:$0]  (!%p15615_p11), %s19539_s7, 1024, %s303_s24, [#allocation10], %s15505_s25, %s15505_s25, %s15506_s26  }
  0x56   : > { %s15704_s14 = sadd.s32 1, %s15500_s12   ;;  %s34_s30 = sadd.s32 1, %s15496_s11 }
  0x57   : > { %s31_s20 = ssub.s32 %s15500_s12, %s15704_s14  ;;  %p41_p8 = scmp.ne.s32.totalorder %s15496_s11, %s15492_s10 }
  0x58   : > { %p32_p4 = scmp.eq.s32.totalorder %s31_s20, 0  ;;  %p42_p13 = scmp.eq.s32.totalorder %s15500_s12, 0 }
  0x59   : > { %p15171_p6 = scmp.lt.s32.totalorder %s15500_s12, 2  ;;  %p19756_p3 = scmp.eq.s32.totalorder %s15585_s13, 1 }
  0x5a   : > { %s15714_s16 = scalar_select %p32_p4, %s15496_s11, %s34_s30  }
  0x5b   : > { %p43_p10 = por %p42_p13, %p41_p8  ;;  %p15718_p5 = por %p19756_p3, %p41_p8 }
  0x5c   : > { %s319_s28 = sand.u32 1, %s15496_s11   ;;  %s13276_s29 = sshll.u32 %s15500_s12, 14 }
  0x5d   : > { %s12669_s24 = sshll.u32 %s319_s28, 10  ;;  %s15727_s18 = scalar_lea.hbm %s19532_s0, %s13276_s29 }
  0x5e   : > { %s323_s21 = scalar_lea.vmem [#allocation3], %s12669_s24  ;;  %p15729_p11 = pnand %p15171_p6, %p43_p10 }
  0x5f   : > { %s330_s23 = sshll.u32 %s323_s21, 4  ;;  %s15735_s22 = scalar_lea.sflag [#allocation4], %s319_s28  ;;  %s15733_s23 = int_to_ptr.vmem [resolvable:$true] %s330_s23 }
  0x60   : > { %s15396_s9 = scalar_lea.hbm %s15727_s18, 16384  ;;  %p15398_p9 = pneg %p15729_p11 }
  0x61   : > { %p15397_p7 = scmp.ne.s32.totalorder %s15727_s18, %s15396_s9  ;;  %s15401_s29 = scalar_lea.hbm %s19532_s0, 32768 }
  0x62   : > { %p15402_p1 = scmp.lt.u32.totalorder %s15727_s18, %s19532_s0  ;;  %p15403_p2 = scmp.lt.u32.totalorder %s15401_s29, %s15396_s9 }
  0x63   : > { %p15399_p12 = pnand %p15398_p9, %p15397_p7  ;;  %p15405_p8 = scmp.lt.u32.totalorder %s15396_s9, %s15727_s18 }
  0x64   : > { %p15404_p4 = por %p15403_p2, %p15402_p1 }
  0x65   : > { %p15400_p0 = pneg %p15399_p12 }
  0x66   : > { %p15406_p13 = por %p15405_p8, %p15404_p4 }
  0x68   : > { %p15407_p6 = pnand %p15406_p13, %p15400_p0 }
  0x6a   : > { %15410 = shalt.err (!%p15407_p6)
}
  0x6b   : > { %s15411_s28 = scalar_lea.vmem %s15733_s23, 16384  ;;  %s15507_s26 = smov [#allocation3]  }
  0x6c   : > { %p15412_p10 = scmp.ne.s32.totalorder %s15733_s23, %s15411_s28  ;;  %s15416_s21 = sshll.u32 %s15507_s26, 4  ;;  %s15417_s21 = int_to_ptr.vmem [resolvable:$false] %s15416_s21 }
  0x6d   : > { %s15418_s20 = scalar_lea.vmem %s15417_s21, 32768  ;;  %p15419_p12 = scmp.lt.s32.totalorder %s15733_s23, %s15417_s21 }
  0x6e   : > { %p15414_p3 = pnand %p15412_p10, %p15398_p9  ;;  %p15420_p1 = scmp.lt.s32.totalorder %s15418_s20, %s15411_s28 }
  0x70   : > { %p15415_p7 = pneg %p15414_p3  ;;  %p15421_p2 = por %p15420_p1, %p15419_p12 }
  0x72   : > { %p15422_p4 = pnand %p15421_p2, %p15415_p7 }
  0x74   : > { %15425 = shalt.err (!%p15422_p4)
}
  0x75   : > { %s15508_s9 = smov 128   ;;  %s15509_s30 = smov 8  }
  0x76   : > { %15163 = dma.hbm_to_vmem [thread:$0]  (!%p15729_p11), %s15727_s18, 16384, %s15733_s23, %s15735_s22, %s15508_s9, %s15508_s9, %s15509_s30  }
  0x77   : > { %p19759_p9 = scmp.ne.s32.totalorder %s19753_s17, 0 }
  0x79   : > { %342 = sbr.rel (%p19759_p9) target bundleno = 1935 (0x78f), region = 56 }
  0x80   : > { %s15766_s29 = sand.u32 1, %s15492_s10   ;;  %p19760_p0 = scmp.ne.s32.totalorder %s19750_s15, 0 }
  0x81   : > { %s12673_s24 = sshll.u32 %s15766_s29, 10  ;;  %s345_s25 = scalar_lea.sflag [#allocation4], %s15766_s29 }
  0x82   : > { %s15770_s28 = scalar_lea.vmem [#allocation3], %s12673_s24 }
  0x83   : > { %15471 = dma.done.wait (%p19760_p0), %s345_s25, 16384  }
  0x84   : > { %15473 = vsyncadd (%p19760_p0), %s345_s25, 4294950912  ;;  %p19761_p11 = scmp.eq.s32.totalorder %s15585_s13, 0 }
  0x86   : > { %15475 = dma.done.wait (%p19761_p11), [#allocation7], 8192   ;;  %p19762_p8 = pmov %p19761_p11 }
  0x88   : > { %15477 = vsyncadd (%p19762_p8), [#allocation7], 4294959104  ;;  %p19763_p13 = pmov %p19762_p8 }
  0x89   : > { %p19764_p6 = pmov %p19762_p8 }
  0x8a   : > { %15479 = dma.done.wait (%p19763_p13), [#allocation10], 1024  }
  0x8b   : > { %15481 = vsyncadd (%p19764_p6), [#allocation10], 4294966272  ;;  %v796_v0 = vlaneseq  ;;  %v19548_v1 = vmov 0   ;;  %v15219_v3 = vld [vmem:[#allocation6] sm:$0xff]   ;;  %v15220_v4 = vld [vmem:[#allocation6 + $0x8] sm:$0xff]   ;;  %vm12251_vm2 = vcmask 1041409  }
  0x8c   : > { %2463 = vmatprep.subr.bf16.mxu0 %v19548_v1  ;;  %4935 = vmatprep.subr.bf16.mxu1 %v19548_v1  ;;  %v15221_v5 = vld [vmem:[#allocation6 + $0x10] sm:$0xff]   ;;  %v15222_v6 = vld [vmem:[#allocation6 + $0x18] sm:$0xff]   ;;  %v15223_v7 = vld [vmem:[#allocation6 + $0x20] sm:$0xff]   ;;  %vm12253_vm3 = vcmask 1042434   ;;  %vm12255_vm4 = vcmask 1043459   ;;  %vm12257_vm5 = vcmask 1044484  }
  0x8d   : > { %v797_v2 = vshrl.u32 %v796_v0, 7  ;;  %2464 = vmatpush1.bf16.msra.mxu0 %v15219_v3  ;;  %v398_v8 = vld [vmem:[%s15770_s28] sm:$0xff]  ;;  %v399_v9 = vld [vmem:[%s15770_s28 + $0x8] sm:$0xff]  ;;  %v15225_v18 = vld [vmem:[#allocation6 + $0x30] sm:$0xff]   ;;  %vm12259_vm6 = vcmask 1045509   ;;  %vm12261_vm7 = vcmask 1046534  }
  0x8e   : > { %2465 = vmatprep.subr.bf16.mxu0 %v19548_v1  ;;  %v15795_v10 = vld [vmem:[%s19533_s1] ss:$0 sm:$0xff]  ;;  %v15224_v14 = vld [vmem:[#allocation6 + $0x28] sm:$0xff]   ;;  %v15226_v19 = vld [vmem:[#allocation6 + $0x38] sm:$0xff]   ;;  %vm12263_vm8 = vcmask 1047559   ;;  %s12677_s20 = sshll.u32 %s15766_s29, 7 }
  0x8f   : > { %v533_v11 = vmul.f32 %v15795_v10, %v398_v8  ;;  %v534_v12 = vmul.f32 %v15795_v10, %v399_v9  ;;  %v15802_v13 = vld [vmem:[%s19534_s2] ss:$0 sm:$0xff]  ;;  %v15228_v21 = vld [vmem:[#allocation6 + $0x48] sm:$0xff]   ;;  %v15229_v22 = vld [vmem:[#allocation6 + $0x50] sm:$0xff]   ;;  %vm15175_vm0 = vcmp.ge.s32.totalorder %v797_v2, 1  ;;  %s19319_s24 = scalar_lea.vmem [#allocation11], %s12677_s20 }
  0x90   : > { %v15227_v20 = vld [vmem:[#allocation6 + $0x40] sm:$0xff]   ;;  %v15230_v23 = vld [vmem:[#allocation6 + $0x58] sm:$0xff]   ;;  %v15232_v25 = vld [vmem:[#allocation6 + $0x68] sm:$0xff]   ;;  %s13789_s23 = sshll.u32 %s15585_s13, 11  ;;  %s20174_s26 = sld [smem:[#allocation127_spill]] }
  0x91   : > { %2466 = vmatpush1.bf16.msra.mxu0 %v15220_v4  ;;  %v15806_v15 = vadd.f32 %v15802_v13, %v533_v11  ;;  %v15809_v16 = vadd.f32 %v15802_v13, %v534_v12  ;;  %v15231_v24 = vld [vmem:[#allocation6 + $0x60] sm:$0xff]   ;;  %v400_v26 = vld [vmem:[%s15770_s28 + $0x10] sm:$0xff]  ;;  %v401_v27 = vld [vmem:[%s15770_s28 + $0x18] sm:$0xff]  ;;  %s12548_s13 = scalar_lea.sflag [#allocation5], %s15766_s29  ;;  %s15511_s9 = smov [#allocation11]  }
  0x92   : > { %2467 = vmatprep.subr.bf16.mxu0 %v19548_v1  ;;  %v15233_v28 = vld [vmem:[#allocation6 + $0x70] sm:$0xff]   ;;  %v535_v29 = vmul.f32 %v15795_v10, %v400_v26  ;;  %v536_v30 = vmul.f32 %v15795_v10, %v401_v27  ;;  %v15234_v31 = vld [vmem:[#allocation6 + $0x78] sm:$0xff]   ;;  %vm15828_vm1 = vmpackc.low %vm15175_vm0, %vm15175_vm0  ;;  %s15430_s30 = sshll.u32 %s15511_s9, 4  ;;  %s15431_s30 = int_to_ptr.vmem [resolvable:$false] %s15430_s30 }
  0x93   : > { %v13341_v17 = vpack.c.bf16 %v15809_v16, %v15806_v15  ;;  %v799_v32 = vrot.slane %v15806_v15, 7  ;;  %v800_v33 = vrot.slane %v15809_v16, 7  ;;  %v402_v35 = vld [vmem:[%s15770_s28 + $0x20] sm:$0xff]  ;;  %v403_v36 = vld [vmem:[%s15770_s28 + $0x28] sm:$0xff]  ;;  %v404_v47 = vld [vmem:[%s15770_s28 + $0x30] sm:$0xff]  ;;  %s15432_s25 = scalar_lea.vmem %s15431_s30, 4096 }
  0x94   : > { %v15835_v37 = vadd.f32 %v15802_v13, %v535_v29  ;;  %v15838_v38 = vadd.f32 %v15802_v13, %v536_v30  ;;  %v15235_v40 = vld [vmem:[#allocation6 + $0x80] sm:$0xff]   ;;  %v537_v42 = vmul.f32 %v15795_v10, %v402_v35  ;;  %v538_v43 = vmul.f32 %v15795_v10, %v403_v36  ;;  %v15236_v44 = vld [vmem:[#allocation6 + $0x88] sm:$0xff]   ;;  %v405_v48 = vld [vmem:[%s15770_s28 + $0x38] sm:$0xff] }
  0x95   : > { %2468 = vmatpush1.bf16.msra.mxu0 %v15221_v5  ;;  %2495 = vmatprep.mubr.bf16.mxu0 %v13341_v17  ;;  %v13793_v39 = vpack.c.bf16 %v800_v33, %v799_v32  ;;  %v15237_v52 = vld [vmem:[#allocation6 + $0x90] sm:$0xff]   ;;  %v539_v54 = vmul.f32 %v15795_v10, %v404_v47  ;;  %v540_v55 = vmul.f32 %v15795_v10, %v405_v48  ;;  %v15238_v60 = vld [vmem:[#allocation6 + $0x98] sm:$0xff]   ;;  %v406_v61 = vld [vmem:[%s15770_s28 + $0x40] sm:$0xff] }
  0x96   : > { %2469 = vmatprep.subr.bf16.mxu0 %v19548_v1  ;;  %v13342_v41 = vpack.c.bf16 %v15838_v38, %v15835_v37  ;;  %v801_v45 = vrot.slane %v15835_v37, 7  ;;  %v802_v46 = vrot.slane %v15838_v38, 7  ;;  %v15853_v49 = vadd.f32 %v15802_v13, %v537_v42  ;;  %v407_v62 = vld [vmem:[%s15770_s28 + $0x48] sm:$0xff]  ;;  %v15239_v4 = vld [vmem:[#allocation6 + $0xa0] sm:$0xff]   ;;  %v408_v9 = vld [vmem:[%s15770_s28 + $0x50] sm:$0xff]  ;;  %s19482_s21 = scalar_lea.hbm %s20174_s26, %s13789_s23 }
  0x97   : > { %v15856_v50 = vadd.f32 %v15802_v13, %v538_v43  ;;  %v15869_v58 = vadd.f32 %v15802_v13, %v539_v54  ;;  %v15872_v59 = vadd.f32 %v15802_v13, %v540_v55  ;;  %v541_v2 = vmul.f32 %v15795_v10, %v406_v61  ;;  %v409_v11 = vld [vmem:[%s15770_s28 + $0x58] sm:$0xff]  ;;  %v15241_v32 = vld [vmem:[#allocation6 + $0xa8] sm:$0xff]   ;;  %v15245_v55 = vld [vmem:[#allocation8 + $0x20] sm:$0xff]  }
  0x98   : > { %v13798_v51 = vpack.c.bf16 %v802_v46, %v801_v45  ;;  %v803_v56 = vrot.slane %v15853_v49, 7  ;;  %v542_v3 = vmul.f32 %v15795_v10, %v407_v62  ;;  %v543_v17 = vmul.f32 %v15795_v10, %v408_v9  ;;  %v15242_v33 = vld [vmem:[#allocation8 + $0x8] sm:$0xff]   ;;  %v15244_v48 = vld [vmem:[#allocation8 + $0x18] sm:$0xff]  }
  0x99   : > { %2470 = vmatpush1.bf16.msra.mxu0 %v15222_v6  ;;  %v13343_v53 = vpack.c.bf16 %v15856_v50, %v15853_v49  ;;  %v804_v57 = vrot.slane %v15856_v50, 7  ;;  %v13344_v0 = vpack.c.bf16 %v15872_v59, %v15869_v58  ;;  %v805_v5 = vrot.slane %v15869_v58, 7  ;;  %v415_v54 = vld [vmem:[%s15770_s28 + $0x88] sm:$0xff] }
  0x9a   : > { %2471 = vmatprep.subr.bf16.mxu0 %v19548_v1  ;;  %v806_v6 = vrot.slane %v15872_v59, 7  ;;  %v15890_v8 = vadd.f32 %v15802_v13, %v542_v3  ;;  %v550_v61 = vmul.f32 %v15795_v10, %v415_v54 }
  0x9b   : > { %v13803_v63 = vpack.c.bf16 %v804_v57, %v803_v56 }
  0x9c   : > { %v13808_v12 = vpack.c.bf16 %v806_v6, %v805_v5  ;;  %v15961_v3 = vadd.f32 %v15802_v13, %v550_v61  ;;  %v417_v5 = vld [vmem:[%s15770_s28 + $0x98] sm:$0xff]  ;;  %v15247_v6 = vld [vmem:[#allocation8 + $0x30] sm:$0xff]   ;;  %v423_v61 = vld [vmem:[%s15770_s28 + $0xc8] sm:$0xff] }
  0x9d   : > { %2472 = vmatpush1.bf16.msra.mxu0 %v15223_v7  ;;  %v15887_v7 = vadd.f32 %v15802_v13, %v541_v2 }
  0x9e   : > { %2473 = vmatprep.subr.bf16.mxu0 %v19548_v1 }
  0xa1   : > { %2474 = vmatpush1.bf16.msra.mxu0 %v15224_v14  ;;  %v13345_v14 = vpack.c.bf16 %v15890_v8, %v15887_v7 }
  0xa2   : > { %2475 = vmatprep.subr.bf16.mxu0 %v19548_v1 }
  0xa5   : > { %2476 = vmatpush1.bf16.msra.mxu0 %v15225_v18  ;;  %v544_v18 = vmul.f32 %v15795_v10, %v409_v11 }
  0xa6   : > { %2477 = vmatprep.subr.bf16.mxu0 %v19548_v1 }
  0xa9   : > { %2478 = vmatpush1.bf16.msra.mxu0 %v15226_v19  ;;  %v807_v19 = vrot.slane %v15887_v7, 7 }
  0xaa   : > { %2479 = vmatprep.subr.bf16.mxu0 %v19548_v1 }
  0xad   : > { %2480 = vmatpush1.bf16.msra.mxu0 %v15227_v20  ;;  %v808_v20 = vrot.slane %v15890_v8, 7 }
  0xae   : > { %2481 = vmatprep.subr.bf16.mxu0 %v19548_v1 }
  0xaf   : > { %v13813_v26 = vpack.c.bf16 %v808_v20, %v807_v19  ;;  %v15248_v19 = vld [vmem:[#allocation8 + $0x38] sm:$0xff]  }
  0xb1   : > { %2482 = vmatpush1.bf16.msra.mxu0 %v15228_v21  ;;  %v15904_v21 = vadd.f32 %v15802_v13, %v543_v17 }
  0xb2   : > { %2483 = vmatprep.subr.bf16.mxu0 %v19548_v1 }
  0xb3   : > { %v809_v30 = vrot.slane %v15904_v21, 7 }
  0xb5   : > { %2484 = vmatpush1.bf16.msra.mxu0 %v15229_v22  ;;  %v15907_v22 = vadd.f32 %v15802_v13, %v544_v18  ;;  %v816_v18 = vrot.slane %v15961_v3, 7 }
  0xb6   : > { %2485 = vmatprep.subr.bf16.mxu0 %v19548_v1 }
  0xb7   : > { %v13346_v27 = vpack.c.bf16 %v15907_v22, %v15904_v21 }
  0xb9   : > { %2486 = vmatpush1.bf16.msra.mxu0 %v15230_v23  ;;  %v15240_v23 = vld [vmem:[#allocation8] sm:$0xff]  }
  0xba   : > { %2487 = vmatprep.subr.bf16.mxu0 %v19548_v1  ;;  %4936 = vmatpush1.bf16.msra.mxu1 %v15240_v23 }
  0xbb   : > { %4937 = vmatprep.subr.bf16.mxu1 %v19548_v1 }
  0xbd   : > { %2488 = vmatpush1.bf16.msra.mxu0 %v15231_v24  ;;  %v410_v24 = vld [vmem:[%s15770_s28 + $0x60] sm:$0xff] }
  0xbe   : > { %2489 = vmatprep.subr.bf16.mxu0 %v19548_v1  ;;  %4938 = vmatpush1.bf16.msra.mxu1 %v15242_v33  ;;  %v15250_v33 = vld [vmem:[#allocation6 + $0xb0] sm:$0xff]  }
  0xbf   : > { %4939 = vmatprep.subr.bf16.mxu1 %v19548_v1 }
  0xc1   : > { %2490 = vmatpush1.bf16.msra.mxu0 %v15232_v25  ;;  %v411_v25 = vld [vmem:[%s15770_s28 + $0x68] sm:$0xff] }
  0xc2   : > { %2491 = vmatprep.subr.bf16.mxu0 %v19548_v1  ;;  %v546_v29 = vmul.f32 %v15795_v10, %v411_v25  ;;  %v419_v25 = vld [vmem:[%s15770_s28 + $0xa8] sm:$0xff] }
  0xc4   : > { %v15924_v36 = vadd.f32 %v15802_v13, %v546_v29 }
  0xc5   : > { %2492 = vmatpush1.bf16.msra.mxu0 %v15233_v28  ;;  %v545_v28 = vmul.f32 %v15795_v10, %v410_v24  ;;  %v418_v24 = vld [vmem:[%s15770_s28 + $0xa0] sm:$0xff] }
  0xc6   : > { %2493 = vmatprep.subr.bf16.mxu0 %v19548_v1  ;;  %v812_v47 = vrot.slane %v15924_v36, 7  ;;  %v553_v29 = vmul.f32 %v15795_v10, %v418_v24 }
  0xc7   : > { %v15921_v35 = vadd.f32 %v15802_v13, %v545_v28 }
  0xc9   : > { %2494 = vmatpush1.bf16.msra.mxu0 %v15234_v31  ;;  %v810_v31 = vrot.slane %v15907_v22, 7  ;;  %v13347_v43 = vpack.c.bf16 %v15924_v36, %v15921_v35  ;;  %v811_v46 = vrot.slane %v15921_v35, 7 }
  0xca   : > { %7536 = vmatprep.subr.bf16.mxu0 %v19548_v1 }
  0xcb   : > { %v13818_v42 = vpack.c.bf16 %v810_v31, %v809_v30  ;;  %v13823_v56 = vpack.c.bf16 %v812_v47, %v811_v46  ;;  %v554_v30 = vmul.f32 %v15795_v10, %v419_v25 }
  0xcc   : > { %13794 = vmatmul.mubr.msk.bf16.vlgmr.msra.gmra.mrb[0].mxu0 %vm15828_vm1, %v13793_v39  ;;  %v412_v39 = vld [vmem:[%s15770_s28 + $0x70] sm:$0xff] }
  0xcd   : > { %7537 = vmatpush1.bf16.msra.mxu0 %v15235_v40  ;;  %2503 = vmatprep.mubr.bf16.mxu0 %v13342_v41  ;;  %v413_v40 = vld [vmem:[%s15770_s28 + $0x78] sm:$0xff]  ;;  %v15243_v41 = vld [vmem:[#allocation8 + $0x10] sm:$0xff]  }
  0xce   : > { %7538 = vmatprep.subr.bf16.mxu0 %v19548_v1  ;;  %v548_v45 = vmul.f32 %v15795_v10, %v413_v40  ;;  %4940 = vmatpush1.bf16.msra.mxu1 %v15243_v41  ;;  %v15994_v40 = vadd.f32 %v15802_v13, %v553_v29  ;;  %v15997_v41 = vadd.f32 %v15802_v13, %v554_v30 }
  0xcf   : > { %4941 = vmatprep.subr.bf16.mxu1 %v19548_v1 }
  0xd0   : > { %v13351_v46 = vpack.c.bf16 %v15997_v41, %v15994_v40  ;;  %v820_v54 = vrot.slane %v15997_v41, 7 }
  0xd1   : > { %7539 = vmatpush1.bf16.msra.mxu0 %v15236_v44  ;;  %v547_v44 = vmul.f32 %v15795_v10, %v412_v39  ;;  %v15251_v39 = vld [vmem:[#allocation8 + $0x48] sm:$0xff]  }
  0xd2   : > { %7540 = vmatprep.subr.bf16.mxu0 %v19548_v1  ;;  %4942 = vmatpush1.bf16.msra.mxu1 %v15244_v48 }
  0xd3   : > { %4943 = vmatprep.subr.bf16.mxu1 %v19548_v1 }
  0xd4   : > { %13799 = vmatmul.mubr.msk.bf16.gmra.mrb[4].mxu0 %vm15828_vm1, %v13798_v51  ;;  %v15940_v51 = vadd.f32 %v15802_v13, %v547_v44  ;;  %v15252_v44 = vld [vmem:[#allocation8 + $0x50] sm:$0xff]  }
  0xd5   : > { %2511 = vmatprep.mubr.bf16.mxu0 %v13343_v53  ;;  %7541 = vmatpush1.bf16.msra.mxu0 %v15237_v52  ;;  %v15943_v52 = vadd.f32 %v15802_v13, %v548_v45  ;;  %v414_v53 = vld [vmem:[%s15770_s28 + $0x80] sm:$0xff] }
  0xd6   : > { %7542 = vmatprep.subr.bf16.mxu0 %v19548_v1  ;;  %4944 = vmatpush1.bf16.msra.mxu1 %v15245_v55  ;;  %v813_v62 = vrot.slane %v15940_v51, 7  ;;  %v15253_v55 = vld [vmem:[#allocation8 + $0x58] sm:$0xff]  }
  0xd7   : > { %v13348_v57 = vpack.c.bf16 %v15943_v52, %v15940_v51  ;;  %4945 = vmatprep.subr.bf16.mxu1 %v19548_v1 }
  0xd9   : > { %7543 = vmatpush1.bf16.msra.mxu0 %v15238_v60  ;;  %v549_v60 = vmul.f32 %v15795_v10, %v414_v53  ;;  %v819_v53 = vrot.slane %v15994_v40, 7 }
  0xda   : > { %7544 = vmatprep.subr.bf16.mxu0 %v19548_v1 }
  0xdb   : > { %v15958_v2 = vadd.f32 %v15802_v13, %v549_v60  ;;  %v422_v60 = vld [vmem:[%s15770_s28 + $0xc0] sm:$0xff] }
  0xdc   : > { %13804 = vmatmul.mubr.msk.bf16.gmra.mrb[8].mxu0 %vm15828_vm1, %v13803_v63  ;;  %v814_v63 = vrot.slane %v15943_v52, 7 }
  0xdd   : > { %2519 = vmatprep.mubr.bf16.mxu0 %v13344_v0  ;;  %7545 = vmatpush1.bf16.msra.mxu0 %v15239_v4  ;;  %v15246_v0 = vld [vmem:[#allocation8 + $0x28] sm:$0xff]   ;;  %v416_v4 = vld [vmem:[%s15770_s28 + $0x90] sm:$0xff]  ;;  %v13349_v11 = vpack.c.bf16 %v15961_v3, %v15958_v2  ;;  %v815_v17 = vrot.slane %v15958_v2, 7 }
  0xde   : > { %7546 = vmatprep.subr.bf16.mxu0 %v19548_v1  ;;  %4946 = vmatpush1.bf16.msra.mxu1 %v15246_v0  ;;  %v13828_v9 = vpack.c.bf16 %v814_v63, %v813_v62  ;;  %v15254_v62 = vld [vmem:[#allocation8 + $0x60] sm:$0xff]   ;;  %v13843_v63 = vpack.c.bf16 %v820_v54, %v819_v53  ;;  %v428_v54 = vld [vmem:[%s15770_s28 + $0xf0] sm:$0xff] }
  0xdf   : > { %4947 = vmatprep.subr.bf16.mxu1 %v19548_v1 }
  0xe1   : > { %7547 = vmatpush1.bf16.msra.mxu0 %v15241_v32 }
  0xe2   : > { %7548 = vmatprep.subr.bf16.mxu0 %v19548_v1  ;;  %4948 = vmatpush1.bf16.msra.mxu1 %v15247_v6 }
  0xe3   : > { %4949 = vmatprep.subr.bf16.mxu1 %v19548_v1 }
  0xe4   : > { %13809 = vmatmul.mubr.msk.bf16.gmra.mrb[12].mxu0 %vm15828_vm1, %v13808_v12  ;;  %v551_v12 = vmul.f32 %v15795_v10, %v416_v4  ;;  %v557_v4 = vmul.f32 %v15795_v10, %v422_v60  ;;  %v15259_v60 = vld [vmem:[#allocation6 + $0xb8] sm:$0xff]  }
  0xe5   : > { %2527 = vmatprep.mubr.bf16.mxu0 %v13345_v14  ;;  %v552_v14 = vmul.f32 %v15795_v10, %v417_v5  ;;  %7549 = vmatpush1.bf16.msra.mxu0 %v15250_v33  ;;  %v558_v5 = vmul.f32 %v15795_v10, %v423_v61  ;;  %v426_v33 = vld [vmem:[%s15770_s28 + $0xe0] sm:$0xff] }
  0xe6   : > { %v15976_v20 = vadd.f32 %v15802_v13, %v551_v12  ;;  %4950 = vmatpush1.bf16.msra.mxu1 %v15248_v19  ;;  %7550 = vmatprep.subr.bf16.mxu0 %v19548_v1 }
  0xe7   : > { %v15979_v23 = vadd.f32 %v15802_v13, %v552_v14  ;;  %4951 = vmatprep.subr.bf16.mxu1 %v19548_v1  ;;  %v16034_v12 = vadd.f32 %v15802_v13, %v558_v5  ;;  %v15255_v14 = vld [vmem:[#allocation8 + $0x68] sm:$0xff]  }
  0xe8   : > { %v817_v31 = vrot.slane %v15976_v20, 7 }
  0xe9   : > { %v13350_v28 = vpack.c.bf16 %v15979_v23, %v15976_v20  ;;  %v818_v32 = vrot.slane %v15979_v23, 7  ;;  %19768 = vst [vmem:[#allocation19_spill] sm:$0xff] %v16034_v12  ;;  %v824_v29 = vrot.slane %v16034_v12, 7  ;;  %7551 = vmatpush1.bf16.msra.mxu0 %v15259_v60  ;;  %v435_v60 = vld [vmem:[%s15770_s28 + $0x128] sm:$0xff] }
  0xea   : > { %7552 = vmatprep.subr.bf16.mxu0 %v19548_v1 }
  0xeb   : > { %v13838_v45 = vpack.c.bf16 %v818_v32, %v817_v31  ;;  %v15257_v32 = vld [vmem:[#allocation8 + $0x78] sm:$0xff]  }
  0xec   : > { %13814 = vmatmul.mubr.msk.bf16.gmra.mrb[16].mxu0 %vm15828_vm1, %v13813_v26  ;;  %v15249_v26 = vld [vmem:[#allocation8 + $0x40] sm:$0xff]  }
  0xed   : > { %2535 = vmatprep.mubr.bf16.mxu0 %v13346_v27  ;;  %v13833_v27 = vpack.c.bf16 %v816_v18, %v815_v17  ;;  %4952 = vmatpush1.bf16.msra.mxu1 %v15249_v26  ;;  %v424_v17 = vld [vmem:[%s15770_s28 + $0xd0] sm:$0xff]  ;;  %v425_v18 = vld [vmem:[%s15770_s28 + $0xd8] sm:$0xff] }
  0xee   : > { %4953 = vmatprep.subr.bf16.mxu1 %v19548_v1  ;;  %v559_v25 = vmul.f32 %v15795_v10, %v424_v17  ;;  %v560_v26 = vmul.f32 %v15795_v10, %v425_v18  ;;  %v431_v17 = vld [vmem:[%s15770_s28 + $0x108] sm:$0xff] }
  0xf0   : > { %v16049_v30 = vadd.f32 %v15802_v13, %v559_v25  ;;  %v16052_v31 = vadd.f32 %v15802_v13, %v560_v26  ;;  %v566_v25 = vmul.f32 %v15795_v10, %v431_v17 }
  0xf1   : > { %4954 = vmatpush1.bf16.msra.mxu1 %v15251_v39  ;;  %v427_v39 = vld [vmem:[%s15770_s28 + $0xe8] sm:$0xff] }
  0xf2   : > { %4955 = vmatprep.subr.bf16.mxu1 %v19548_v1  ;;  %19769 = vst [vmem:[#allocation20_spill] sm:$0xff] %v16049_v30  ;;  %19770 = vst [vmem:[#allocation21_spill] sm:$0xff] %v16052_v31 }
  0xf4   : > { %13819 = vmatmul.mubr.msk.bf16.gmra.mrb[20].mxu0 %vm15828_vm1, %v13818_v42  ;;  %v420_v42 = vld [vmem:[%s15770_s28 + $0xb0] sm:$0xff] }
  0xf5   : > { %2543 = vmatprep.mubr.bf16.mxu0 %v13347_v43  ;;  %v421_v43 = vld [vmem:[%s15770_s28 + $0xb8] sm:$0xff]  ;;  %v555_v47 = vmul.f32 %v15795_v10, %v420_v42  ;;  %4956 = vmatpush1.bf16.msra.mxu1 %v15252_v44  ;;  %v561_v44 = vmul.f32 %v15795_v10, %v426_v33 }
  0xf6   : > { %v556_v48 = vmul.f32 %v15795_v10, %v421_v43  ;;  %4957 = vmatprep.subr.bf16.mxu1 %v19548_v1  ;;  %v13354_v43 = vpack.c.bf16 %v16052_v31, %v16049_v30  ;;  %v433_v33 = vld [vmem:[%s15770_s28 + $0x118] sm:$0xff] }
  0xf9   : > { %4958 = vmatpush1.bf16.msra.mxu1 %v15253_v55  ;;  %v429_v55 = vld [vmem:[%s15770_s28 + $0xf8] sm:$0xff] }
  0xfa   : > { %4959 = vmatprep.subr.bf16.mxu1 %v19548_v1 }
  0xfc   : > { %13824 = vmatmul.mubr.msk.bf16.gmra.mrb[24].mxu0 %vm15828_vm1, %v13823_v56  ;;  %v16013_v56 = vadd.f32 %v15802_v13, %v555_v47  ;;  %v826_v47 = vrot.slane %v16052_v31, 7 }
  0xfd   : > { %2551 = vmatprep.mubr.bf16.mxu0 %v13348_v57  ;;  %v16016_v57 = vadd.f32 %v15802_v13, %v556_v48  ;;  %4960 = vmatpush1.bf16.msra.mxu1 %v15254_v62  ;;  %v16066_v48 = vadd.f32 %v15802_v13, %v561_v44  ;;  %v568_v44 = vmul.f32 %v15795_v10, %v433_v33 }
  0xfe   : > { %4961 = vmatprep.subr.bf16.mxu1 %v19548_v1  ;;  %v821_v6 = vrot.slane %v16013_v56, 7 }
  0xff   : > { %v13352_v0 = vpack.c.bf16 %v16016_v57, %v16013_v56  ;;  %19771 = vst [vmem:[#allocation22_spill] sm:$0xff] %v16066_v48 }
 0x101   : > { %4962 = vmatpush1.bf16.msra.mxu1 %v15255_v14  ;;  %v430_v14 = vld [vmem:[%s15770_s28 + $0x100] sm:$0xff] }
 0x102   : > { %4963 = vmatprep.subr.bf16.mxu1 %v19548_v1 }
 0x104   : > { %13829 = vmatmul.mubr.msk.bf16.gmra.mrb[28].mxu0 %vm15828_vm1, %v13828_v9  ;;  %v822_v9 = vrot.slane %v16016_v57, 7 }
 0x105   : > { %2559 = vmatprep.mubr.bf16.mxu0 %v13349_v11  ;;  %v16031_v11 = vadd.f32 %v15802_v13, %v557_v4  ;;  %v827_v4 = vrot.slane %v16066_v48, 7 }
 0x106   : > { %v13848_v19 = vpack.c.bf16 %v822_v9, %v821_v6 }
 0x107   : > { %19767 = vst [vmem:[#allocation18_spill] sm:$0xff] %v16031_v11  ;;  %v13353_v24 = vpack.c.bf16 %v16034_v12, %v16031_v11 }
 0x10c   : > { %13834 = vmatmul.mubr.msk.bf16.gmra.mrb[32].mxu0 %vm15828_vm1, %v13833_v27  ;;  %v15256_v27 = vld [vmem:[#allocation8 + $0x70] sm:$0xff]  }
 0x10d   : > { %2567 = vmatprep.mubr.bf16.mxu0 %v13350_v28  ;;  %4964 = vmatpush1.bf16.msra.mxu1 %v15256_v27  ;;  %v823_v28 = vrot.slane %v16031_v11, 7 }
 0x10e   : > { %4965 = vmatprep.subr.bf16.mxu1 %v19548_v1 }
 0x10f   : > { %v13853_v42 = vpack.c.bf16 %v824_v29, %v823_v28  ;;  %v16102_v29 = vadd.f32 %v15802_v13, %v566_v25 }
 0x111   : > { %4966 = vmatpush1.bf16.msra.mxu1 %v15257_v32  ;;  %19776 = vst [vmem:[#allocation27_spill] sm:$0xff] %v16102_v29  ;;  %v432_v32 = vld [vmem:[%s15770_s28 + $0x110] sm:$0xff] }
 0x112   : > { %10010 = vmatprep.subr.bf16.mxu1 %v19548_v1 }
 0x114   : > { %13839 = vmatmul.mubr.msk.bf16.gmra.mrb[36].mxu0 %vm15828_vm1, %v13838_v45  ;;  %v562_v45 = vmul.f32 %v15795_v10, %v427_v39 }
 0x115   : > { %2575 = vmatprep.mubr.bf16.mxu0 %v13351_v46  ;;  %v825_v46 = vrot.slane %v16049_v30, 7 }
 0x116   : > { %v16069_v53 = vadd.f32 %v15802_v13, %v562_v45 }
 0x117   : > { %v13858_v61 = vpack.c.bf16 %v826_v47, %v825_v46  ;;  %v832_v46 = vrot.slane %v16102_v29, 7 }
 0x118   : > { %19772 = vst [vmem:[#allocation23_spill] sm:$0xff] %v16069_v53  ;;  %v13355_v62 = vpack.c.bf16 %v16069_v53, %v16066_v48  ;;  %v828_v5 = vrot.slane %v16069_v53, 7 }
 0x11a   : > { %v13863_v18 = vpack.c.bf16 %v828_v5, %v827_v4 }
 0x11c   : > { %13844 = vmatmul.mubr.msk.bf16.gmra.mrb[40].mxu0 %vm15828_vm1, %v13843_v63  ;;  %v563_v63 = vmul.f32 %v15795_v10, %v428_v54  ;;  %v16118_v54 = vadd.f32 %v15802_v13, %v568_v44  ;;  %v438_v44 = vld [vmem:[%s15770_s28 + $0x140] sm:$0xff] }
 0x11d   : > { %2583 = vmatprep.mubr.bf16.mxu0 %v13352_v0  ;;  %v564_v0 = vmul.f32 %v15795_v10, %v429_v55  ;;  %v434_v55 = vld [vmem:[%s15770_s28 + $0x120] sm:$0xff] }
 0x11e   : > { %v16083_v6 = vadd.f32 %v15802_v13, %v563_v63  ;;  %19778 = vst [vmem:[#allocation29_spill] sm:$0xff] %v16118_v54  ;;  %v569_v63 = vmul.f32 %v15795_v10, %v434_v55  ;;  %v834_v5 = vrot.slane %v16118_v54, 7 }
 0x11f   : > { %v16086_v9 = vadd.f32 %v15802_v13, %v564_v0  ;;  %v570_v0 = vmul.f32 %v15795_v10, %v435_v60  ;;  %v573_v60 = vmul.f32 %v15795_v10, %v438_v44  ;;  %v442_v44 = vld [vmem:[%s15770_s28 + $0x160] sm:$0xff] }
 0x120   : > { %19773 = vst [vmem:[#allocation24_spill] sm:$0xff] %v16083_v6  ;;  %v829_v26 = vrot.slane %v16083_v6, 7 }
 0x121   : > { %19774 = vst [vmem:[#allocation25_spill] sm:$0xff] %v16086_v9  ;;  %v830_v27 = vrot.slane %v16086_v9, 7  ;;  %v16134_v17 = vadd.f32 %v15802_v13, %v570_v0  ;;  %v16164_v0 = vadd.f32 %v15802_v13, %v573_v60  ;;  %v577_v60 = vmul.f32 %v15795_v10, %v442_v44 }
 0x123   : > { %v13868_v39 = vpack.c.bf16 %v830_v27, %v829_v26  ;;  %19780 = vst [vmem:[#allocation31_spill] sm:$0xff] %v16134_v17  ;;  %19783 = vst [vmem:[#allocation34_spill] sm:$0xff] %v16164_v0 }
 0x124   : > { %13849 = vmatmul.mubr.msk.bf16.gmra.mrb[44].mxu0 %vm15828_vm1, %v13848_v19  ;;  %v13356_v19 = vpack.c.bf16 %v16086_v9, %v16083_v6 }
 0x125   : > { %2591 = vmatprep.mubr.bf16.mxu0 %v13353_v24  ;;  %v565_v24 = vmul.f32 %v15795_v10, %v430_v14  ;;  %v16131_v14 = vadd.f32 %v15802_v13, %v569_v63 }
 0x127   : > { %v16099_v28 = vadd.f32 %v15802_v13, %v565_v24  ;;  %19779 = vst [vmem:[#allocation30_spill] sm:$0xff] %v16131_v14  ;;  %v15261_v24 = vld [vmem:[#allocation6 + $0xc0] sm:$0xff]   ;;  %v13359_v26 = vpack.c.bf16 %v16134_v17, %v16131_v14  ;;  %v835_v33 = vrot.slane %v16131_v14, 7 }
 0x128   : > { %7553 = vmatpush1.bf16.msra.mxu0 %v15261_v24 }
 0x129   : > { %19775 = vst [vmem:[#allocation26_spill] sm:$0xff] %v16099_v28  ;;  %v831_v45 = vrot.slane %v16099_v28, 7  ;;  %7554 = vmatprep.subr.bf16.mxu0 %v19548_v1 }
 0x12c   : > { %13854 = vmatmul.mubr.msk.bf16.gmra.mrb[48].mxu0 %vm15828_vm1, %v13853_v42  ;;  %v13357_v42 = vpack.c.bf16 %v16102_v29, %v16099_v28 }
 0x12d   : > { %2599 = vmatprep.mubr.bf16.mxu0 %v13354_v43  ;;  %v567_v43 = vmul.f32 %v15795_v10, %v432_v32 }
 0x12f   : > { %v16115_v47 = vadd.f32 %v15802_v13, %v567_v43 }
 0x131   : > { %19777 = vst [vmem:[#allocation28_spill] sm:$0xff] %v16115_v47  ;;  %v833_v4 = vrot.slane %v16115_v47, 7 }
 0x133   : > { %v13878_v25 = vpack.c.bf16 %v834_v5, %v833_v4  ;;  %v440_v5 = vld [vmem:[%s15770_s28 + $0x150] sm:$0xff] }
 0x134   : > { %13859 = vmatmul.mubr.msk.bf16.gmra.mrb[52].mxu0 %vm15828_vm1, %v13858_v61  ;;  %v13873_v61 = vpack.c.bf16 %v832_v46, %v831_v45  ;;  %v439_v45 = vld [vmem:[%s15770_s28 + $0x148] sm:$0xff] }
 0x135   : > { %2607 = vmatprep.mubr.bf16.mxu0 %v13355_v62  ;;  %v13358_v62 = vpack.c.bf16 %v16118_v54, %v16115_v47 }
 0x13c   : > { %13864 = vmatmul.mubr.msk.bf16.gmra.mrb[56].mxu0 %vm15828_vm1, %v13863_v18  ;;  %v436_v18 = vld [vmem:[%s15770_s28 + $0x130] sm:$0xff] }
 0x13d   : > { %2615 = vmatprep.mubr.bf16.mxu0 %v13356_v19  ;;  %v437_v19 = vld [vmem:[%s15770_s28 + $0x138] sm:$0xff]  ;;  %v571_v27 = vmul.f32 %v15795_v10, %v436_v18 }
 0x13e   : > { %v572_v32 = vmul.f32 %v15795_v10, %v437_v19  ;;  %v441_v18 = vld [vmem:[%s15770_s28 + $0x158] sm:$0xff] }
 0x140   : > { %v16151_v43 = vadd.f32 %v15802_v13, %v572_v32 }
 0x142   : > { %19782 = vst [vmem:[#allocation33_spill] sm:$0xff] %v16151_v43  ;;  %v838_v63 = vrot.slane %v16151_v43, 7 }
 0x144   : > { %13869 = vmatmul.mubr.msk.bf16.gmra.mrb[60].mxu0 %vm15828_vm1, %v13868_v39  ;;  %v836_v39 = vrot.slane %v16134_v17, 7 }
 0x145   : > { %2623 = vmatprep.mubr.bf16.mxu0 %v13357_v42  ;;  %v16148_v42 = vadd.f32 %v15802_v13, %v571_v27  ;;  %v839_v27 = vrot.slane %v16164_v0, 7 }
 0x146   : > { %v13883_v46 = vpack.c.bf16 %v836_v39, %v835_v33 }
 0x147   : > { %19781 = vst [vmem:[#allocation32_spill] sm:$0xff] %v16148_v42  ;;  %v13360_v55 = vpack.c.bf16 %v16151_v43, %v16148_v42 }
 0x14c   : > { %13874 = vmatmul.mubr.msk.bf16.gmra.mrb[64].mxu0 %vm15828_vm1, %v13873_v61  ;;  %v574_v61 = vmul.f32 %v15795_v10, %v439_v45  ;;  %v443_v45 = vld [vmem:[%s15770_s28 + $0x168] sm:$0xff] }
 0x14d   : > { %2631 = vmatprep.mubr.bf16.mxu0 %v13358_v62  ;;  %v837_v62 = vrot.slane %v16148_v42, 7  ;;  %v15258_v42 = vld [vmem:[#allocation8 + $0x80] sm:$0xff]  }
 0x14e   : > { %v16167_v4 = vadd.f32 %v15802_v13, %v574_v61  ;;  %v578_v61 = vmul.f32 %v15795_v10, %v443_v45 }
 0x14f   : > { %v13888_v19 = vpack.c.bf16 %v838_v63, %v837_v62 }
 0x150   : > { %19784 = vst [vmem:[#allocation35_spill] sm:$0xff] %v16167_v4  ;;  %v13361_v24 = vpack.c.bf16 %v16167_v4, %v16164_v0  ;;  %v840_v32 = vrot.slane %v16167_v4, 7 }
 0x154   : > { %13879 = vmatmul.mubr.msk.bf16.gmra.mrb[68].mxu0 %vm15828_vm1, %v13878_v25  ;;  %v575_v25 = vmul.f32 %v15795_v10, %v440_v5  ;;  %v16196_v5 = vadd.f32 %v15802_v13, %v577_v60 }
 0x155   : > { %2639 = vmatprep.mubr.bf16.mxu0 %v13359_v26  ;;  %v576_v26 = vmul.f32 %v15795_v10, %v441_v18  ;;  %v16199_v18 = vadd.f32 %v15802_v13, %v578_v61  ;;  %v446_v61 = vld [vmem:[%s15770_s28 + $0x180] sm:$0xff] }
 0x156   : > { %v16180_v33 = vadd.f32 %v15802_v13, %v575_v25  ;;  %19787 = vst [vmem:[#allocation38_spill] sm:$0xff] %v16196_v5  ;;  %v15263_v25 = vld [vmem:[#allocation6 + $0xc8] sm:$0xff]   ;;  %v843_v45 = vrot.slane %v16196_v5, 7 }
 0x157   : > { %v16183_v39 = vadd.f32 %v15802_v13, %v576_v26  ;;  %19788 = vst [vmem:[#allocation39_spill] sm:$0xff] %v16199_v18  ;;  %7555 = vmatpush1.bf16.msra.mxu0 %v15263_v25  ;;  %v16226_v25 = vld [vmem:[%s19533_s1] ss:$0 sm:$0xff] }
 0x158   : > { %19785 = vst [vmem:[#allocation36_spill] sm:$0xff] %v16180_v33  ;;  %v841_v62 = vrot.slane %v16180_v33, 7  ;;  %7556 = vmatprep.subr.bf16.mxu0 %v19548_v1 }
 0x159   : > { %19786 = vst [vmem:[#allocation37_spill] sm:$0xff] %v16183_v39  ;;  %v842_v63 = vrot.slane %v16183_v39, 7 }
 0x15b   : > { %v13898_v26 = vpack.c.bf16 %v842_v63, %v841_v62  ;;  %v447_v62 = vld [vmem:[%s15770_s28 + $0x188] sm:$0xff] }
 0x15c   : > { %13884 = vmatmul.mubr.msk.bf16.gmra.mrb[72].mxu0 %vm15828_vm1, %v13883_v46  ;;  %v13893_v46 = vpack.c.bf16 %v840_v32, %v839_v27  ;;  %v13363_v27 = vpack.c.bf16 %v16199_v18, %v16196_v5 }
 0x15d   : > { %2647 = vmatprep.mubr.bf16.mxu0 %v13360_v55  ;;  %v13362_v55 = vpack.c.bf16 %v16183_v39, %v16180_v33 }
 0x164   : > { %13889 = vmatmul.mubr.msk.bf16.gmra.mrb[76].mxu0 %vm15828_vm1, %v13888_v19  ;;  %v444_v19 = vld [vmem:[%s15770_s28 + $0x170] sm:$0xff] }
 0x165   : > { %2655 = vmatprep.mubr.bf16.mxu0 %v13361_v24  ;;  %v445_v24 = vld [vmem:[%s15770_s28 + $0x178] sm:$0xff]  ;;  %v579_v32 = vmul.f32 %v15795_v10, %v444_v19 }
 0x166   : > { %v580_v44 = vmul.f32 %v15795_v10, %v445_v24  ;;  %v581_v24 = vmul.f32 %v15795_v10, %v446_v61  ;;  %v16236_v10 = vld [vmem:[%s19534_s2] ss:$0 sm:$0xff] }
 0x168   : > { %v16216_v60 = vadd.f32 %v15802_v13, %v580_v44 }
 0x16a   : > { %19790 = vst [vmem:[#allocation41_spill] sm:$0xff] %v16216_v60 }
 0x16c   : > { %13894 = vmatmul.mubr.msk.bf16.gmra.mrb[80].mxu0 %vm15828_vm1, %v13893_v46  ;;  %v844_v46 = vrot.slane %v16199_v18, 7 }
 0x16d   : > { %2663 = vmatprep.mubr.bf16.mxu0 %v13362_v55  ;;  %v16213_v55 = vadd.f32 %v15802_v13, %v579_v32  ;;  %v16239_v32 = vadd.f32 %v16236_v10, %v581_v24 }
 0x16e   : > { %v13903_v63 = vpack.c.bf16 %v844_v46, %v843_v45  ;;  %v448_v45 = vld [vmem:[%s15770_s28 + $0x190] sm:$0xff]  ;;  %v449_v46 = vld [vmem:[%s15770_s28 + $0x198] sm:$0xff] }
 0x16f   : > { %19789 = vst [vmem:[#allocation40_spill] sm:$0xff] %v16213_v55  ;;  %v13364_v19 = vpack.c.bf16 %v16216_v60, %v16213_v55  ;;  %v845_v13 = vrot.slane %v16213_v55, 7  ;;  %19791 = vst [vmem:[#allocation42_spill] sm:$0xff] %v16239_v32  ;;  %v847_v1 = vrot.slane %v16239_v32, 7 }
 0x174   : > { %13899 = vmatmul.mubr.msk.bf16.gmra.mrb[84].mxu0 %vm15828_vm1, %v13898_v26  ;;  %v582_v26 = vmul.f32 %v16226_v25, %v447_v62 }
 0x175   : > { %2671 = vmatprep.mubr.bf16.mxu0 %v13363_v27  ;;  %v846_v27 = vrot.slane %v16216_v60, 7 }
 0x176   : > { %v16242_v44 = vadd.f32 %v16236_v10, %v582_v26 }
 0x177   : > { %v13908_v61 = vpack.c.bf16 %v846_v27, %v845_v13  ;;  %v450_v27 = vld [vmem:[%s15770_s28 + $0x1a0] sm:$0xff] }
 0x178   : > { %19792 = vst [vmem:[#allocation43_spill] sm:$0xff] %v16242_v44  ;;  %v13365_v62 = vpack.c.bf16 %v16242_v44, %v16239_v32  ;;  %v848_v24 = vrot.slane %v16242_v44, 7  ;;  %v15265_v44 = vld [vmem:[#allocation6 + $0xd0] sm:$0xff]  }
 0x179   : > { %7557 = vmatpush1.bf16.msra.mxu0 %v15265_v44 }
 0x17a   : > { %v13913_v55 = vpack.c.bf16 %v848_v24, %v847_v1  ;;  %v452_v24 = vld [vmem:[%s15770_s28 + $0x1b0] sm:$0xff] }
 0x17c   : > { %13904 = vmatmul.mubr.msk.bf16.gmra.mrb[88].mxu0 %vm15828_vm1, %v13903_v63  ;;  %v583_v63 = vmul.f32 %v16226_v25, %v448_v45  ;;  %v451_v45 = vld [vmem:[%s15770_s28 + $0x1a8] sm:$0xff] }
 0x17d   : > { %2679 = vmatprep.mubr.bf16.mxu0 %v13364_v19  ;;  %v584_v19 = vmul.f32 %v16226_v25, %v449_v46  ;;  %v586_v32 = vmul.f32 %v16226_v25, %v451_v45 }
 0x17e   : > { %v16255_v26 = vadd.f32 %v16236_v10, %v583_v63 }
 0x17f   : > { %v16258_v13 = vadd.f32 %v16236_v10, %v584_v19  ;;  %v16274_v1 = vadd.f32 %v16236_v10, %v586_v32 }
 0x180   : > { %19793 = vst [vmem:[#allocation44_spill] sm:$0xff] %v16255_v26 }
 0x181   : > { %19794 = vst [vmem:[#allocation45_spill] sm:$0xff] %v16258_v13  ;;  %v13366_v46 = vpack.c.bf16 %v16258_v13, %v16255_v26  ;;  %v850_v63 = vrot.slane %v16258_v13, 7  ;;  %19796 = vst [vmem:[#allocation47_spill] sm:$0xff] %v16274_v1  ;;  %v19797_v13 = vmov 0  }
 0x182   : > { %7558 = vmatprep.subr.bf16.mxu0 %v19797_v13 }
 0x184   : > { %13909 = vmatmul.mubr.msk.bf16.gmra.mrb[92].mxu0 %vm15828_vm1, %v13908_v61  ;;  %v585_v61 = vmul.f32 %v16226_v25, %v450_v27  ;;  %v453_v27 = vld [vmem:[%s15770_s28 + $0x1b8] sm:$0xff] }
 0x185   : > { %2687 = vmatprep.mubr.bf16.mxu0 %v13365_v62  ;;  %v849_v62 = vrot.slane %v16255_v26, 7  ;;  %v587_v26 = vmul.f32 %v16226_v25, %v452_v24  ;;  %v455_v24 = vld [vmem:[%s15770_s28 + $0x1c8] sm:$0xff] }
 0x186   : > { %v16271_v19 = vadd.f32 %v16236_v10, %v585_v61  ;;  %v852_v61 = vrot.slane %v16274_v1, 7 }
 0x187   : > { %v13918_v45 = vpack.c.bf16 %v850_v63, %v849_v62  ;;  %v16288_v44 = vadd.f32 %v16236_v10, %v587_v26  ;;  %v454_v63 = vld [vmem:[%s15770_s28 + $0x1c0] sm:$0xff] }
 0x188   : > { %19795 = vst [vmem:[#allocation46_spill] sm:$0xff] %v16271_v19  ;;  %v851_v32 = vrot.slane %v16271_v19, 7 }
 0x189   : > { %19798 = vst [vmem:[#allocation48_spill] sm:$0xff] %v16288_v44  ;;  %v853_v26 = vrot.slane %v16288_v44, 7 }
 0x18c   : > { %13914 = vmatmul.mubr.msk.bf16.gmra.mrb[96].mxu0 %vm15828_vm1, %v13913_v55  ;;  %v13367_v55 = vpack.c.bf16 %v16274_v1, %v16271_v19  ;;  %v590_v19 = vmul.f32 %v16226_v25, %v455_v24  ;;  %v457_v24 = vld [vmem:[%s15770_s28 + $0x1d8] sm:$0xff] }
 0x18d   : > { %2695 = vmatprep.mubr.bf16.mxu0 %v13366_v46  ;;  %v588_v46 = vmul.f32 %v16226_v25, %v453_v27  ;;  %v13923_v27 = vpack.c.bf16 %v852_v61, %v851_v32 }
 0x18e   : > { %v16312_v61 = vadd.f32 %v16236_v10, %v590_v19 }
 0x18f   : > { %v16291_v62 = vadd.f32 %v16236_v10, %v588_v46  ;;  %v16306_v46 = vld [vmem:[%s19536_s4] ss:$0 sm:$0xff] }
 0x190   : > { %19801 = vst [vmem:[#allocation51_spill] sm:$0xff] %v16312_v61 }
 0x191   : > { %19799 = vst [vmem:[#allocation49_spill] sm:$0xff] %v16291_v62  ;;  %v13368_v60 = vpack.c.bf16 %v16291_v62, %v16288_v44 }
 0x194   : > { %13919 = vmatmul.mubr.msk.bf16.gmra.mrb[100].mxu0 %vm15828_vm1, %v13918_v45  ;;  %v589_v45 = vmul.f32 %v16226_v25, %v454_v63  ;;  %v456_v63 = vld [vmem:[%s15770_s28 + $0x1d0] sm:$0xff] }
 0x195   : > { %2703 = vmatprep.mubr.bf16.mxu0 %v13367_v55  ;;  %v854_v55 = vrot.slane %v16291_v62, 7  ;;  %v591_v18 = vmul.f32 %v16226_v25, %v456_v63 }
 0x196   : > { %v16309_v32 = vadd.f32 %v16236_v10, %v589_v45  ;;  %v592_v45 = vmul.f32 %v16226_v25, %v457_v24 }
 0x197   : > { %v13928_v5 = vpack.c.bf16 %v854_v55, %v853_v26  ;;  %v856_v55 = vrot.slane %v16312_v61, 7 }
 0x198   : > { %19800 = vst [vmem:[#allocation50_spill] sm:$0xff] %v16309_v32  ;;  %v16330_v63 = vadd.f32 %v16236_v10, %v592_v45 }
 0x19a   : > { %19803 = vst [vmem:[#allocation53_spill] sm:$0xff] %v16330_v63 }
 0x19c   : > { %13924 = vmatmul.mubr.msk.bf16.gmra.mrb[104].mxu0 %vm15828_vm1, %v13923_v27 }
 0x19d   : > { %2711 = vmatprep.mubr.bf16.mxu0 %v13368_v60  ;;  %v13369_v60 = vpack.c.bf16 %v16312_v61, %v16309_v32 }
 0x19f   : > { %v2497_v1 = vpop.f32.mrb[0].mxu0 }
 0x1a0   : > { %v2499_v27 = vpop.f32.mrb[1].mxu0  ;;  %v3015_v44 = vadd.f32 %v16306_v46, %v2497_v1  ;;  %v855_v1 = vrot.slane %v16309_v32, 7 }
 0x1a1   : > { %v2500_v62 = vpop.f32.mrb[2].mxu0  ;;  %v16327_v27 = vadd.f32 %v16236_v10, %v591_v18 }
 0x1a2   : > { %v2502_v33 = vpop.f32.mrb[3].mxu0  ;;  %v3016_v19 = vadd.f32 %v16306_v46, %v2500_v62  ;;  %v3143_v39 = vmax.f32 %v3015_v44, 0.0  ;;  %v458_v62 = vld [vmem:[%s15770_s28 + $0x1e0] sm:$0xff]  ;;  %v459_v44 = vld [vmem:[%s15770_s28 + $0x1e8] sm:$0xff]  ;;  %v13933_v61 = vpack.c.bf16 %v856_v55, %v855_v1  ;;  %v858_v55 = vrot.slane %v16330_v63, 7 }
 0x1a3   : > { %19802 = vst [vmem:[#allocation52_spill] sm:$0xff] %v16327_v27  ;;  %v13370_v18 = vpack.c.bf16 %v16330_v63, %v16327_v27  ;;  %v593_v45 = vmul.f32 %v16226_v25, %v458_v62  ;;  %v594_v43 = vmul.f32 %v16226_v25, %v459_v44  ;;  %v857_v1 = vrot.slane %v16327_v27, 7  ;;  %v460_v44 = vld [vmem:[%s15770_s28 + $0x1f0] sm:$0xff] }
 0x1a4   : > { %13929 = vmatmul.mubr.msk.bf16.gmra.mrb[108].mxu0 %vm15828_vm1, %v13928_v5  ;;  %v3144_v26 = vmax.f32 %v3016_v19, 0.0  ;;  %v3271_v24 = vrot.slane %v3143_v39, 7 }
 0x1a5   : > { %2719 = vmatprep.mubr.bf16.mxu0 %v13369_v60  ;;  %v13938_v27 = vpack.c.bf16 %v858_v55, %v857_v1  ;;  %v15264_v1 = vld [vmem:[#allocation8 + $0x98] sm:$0xff]  }
 0x1a6   : > { %v3272_v33 = vrot.slane %v3144_v26, 7  ;;  %v13469_v0 = vpack.c.bf16 %v3144_v26, %v3143_v39 }
 0x1a7   : > { %v2505_v4 = vpop.f32.mrb[4].mxu0 }
 0x1a8   : > { %v3017_v5 = vadd.f32 %v16306_v46, %v2505_v4  ;;  %v2507_v19 = vpop.f32.mrb[5].mxu0  ;;  %4967 = vmatprep.mubr.bf16.mxu1 %v13469_v0  ;;  %v14113_v32 = vpack.c.bf16 %v3272_v33, %v3271_v24  ;;  %v15260_v0 = vld [vmem:[#allocation8 + $0x88] sm:$0xff]   ;;  %v16348_v24 = vadd.f32 %v16236_v10, %v593_v45  ;;  %v16351_v33 = vadd.f32 %v16236_v10, %v594_v43 }
 0x1a9   : > { %v2508_v60 = vpop.f32.mrb[6].mxu0  ;;  %v15267_v19 = vld [vmem:[#allocation6 + $0xd8] sm:$0xff]  }
 0x1aa   : > { %v3145_v14 = vmax.f32 %v3017_v5, 0.0  ;;  %v3018_v39 = vadd.f32 %v16306_v46, %v2508_v60  ;;  %v2510_v26 = vpop.f32.mrb[7].mxu0  ;;  %14114 = vmatmul.mubr.msk.bf16.vlgmr.msra.gmra.mrb[0].mxu1 %vm15828_vm1, %v14113_v32  ;;  %19804 = vst [vmem:[#allocation54_spill] sm:$0xff] %v16348_v24  ;;  %19805 = vst [vmem:[#allocation55_spill] sm:$0xff] %v16351_v33  ;;  %v461_v5 = vld [vmem:[%s15770_s28 + $0x1f8] sm:$0xff]  ;;  %v15262_v60 = vld [vmem:[#allocation8 + $0x90] sm:$0xff]   ;;  %v13371_v43 = vpack.c.bf16 %v16351_v33, %v16348_v24  ;;  %7559 = vmatpush1.bf16.msra.mxu0 %v15267_v19 }
 0x1ab   : > { %10011 = vmatpush1.bf16.msra.mxu1 %v15258_v42  ;;  %7560 = vmatprep.subr.bf16.mxu0 %v19797_v13 }
 0x1ac   : > { %v3146_v4 = vmax.f32 %v3018_v39, 0.0  ;;  %13934 = vmatmul.mubr.msk.bf16.gmra.mrb[112].mxu0 %vm15828_vm1, %v13933_v61  ;;  %10012 = vmatprep.subr.bf16.mxu1 %v19797_v13  ;;  %v3273_v32 = vrot.slane %v3145_v14, 7 }
 0x1ad   : > { %2727 = vmatprep.mubr.bf16.mxu0 %v13370_v18 }
 0x1ae   : > { %v3274_v42 = vrot.slane %v3146_v4, 7  ;;  %v13470_v62 = vpack.c.bf16 %v3146_v4, %v3145_v14  ;;  %v595_v14 = vmul.f32 %v16226_v25, %v460_v44  ;;  %v596_v4 = vmul.f32 %v16226_v25, %v461_v5 }
 0x1af   : > { %v2513_v61 = vpop.f32.mrb[8].mxu0  ;;  %10013 = vmatpush1.bf16.msra.mxu1 %v15260_v0 }
 0x1b0   : > { %v3019_v39 = vadd.f32 %v16306_v46, %v2513_v61  ;;  %v2515_v26 = vpop.f32.mrb[9].mxu0  ;;  %4975 = vmatprep.mubr.bf16.mxu1 %v13470_v62  ;;  %v14118_v18 = vpack.c.bf16 %v3274_v42, %v3273_v32  ;;  %10014 = vmatprep.subr.bf16.mxu1 %v19797_v13  ;;  %v859_v32 = vrot.slane %v16348_v24, 7  ;;  %v860_v42 = vrot.slane %v16351_v33, 7  ;;  %v462_v61 = vld [vmem:[%s15770_s28 + $0x200] sm:$0xff] }
 0x1b1   : > { %v2516_v45 = vpop.f32.mrb[10].mxu0  ;;  %v16374_v62 = vadd.f32 %v16236_v10, %v596_v4 }
 0x1b2   : > { %v3147_v63 = vmax.f32 %v3019_v39, 0.0  ;;  %v3020_v0 = vadd.f32 %v16306_v46, %v2516_v45  ;;  %v2518_v17 = vpop.f32.mrb[11].mxu0  ;;  %14119 = vmatmul.mubr.msk.bf16.gmra.mrb[4].mxu1 %vm15828_vm1, %v14118_v18 }
 0x1b3   : > { %10015 = vmatpush1.bf16.msra.mxu1 %v15262_v60  ;;  %v16371_v17 = vadd.f32 %v16236_v10, %v595_v14  ;;  %19807 = vst [vmem:[#allocation57_spill] sm:$0xff] %v16374_v62  ;;  %v463_v60 = vld [vmem:[%s15770_s28 + $0x208] sm:$0xff] }
 0x1b4   : > { %v3148_v55 = vmax.f32 %v3020_v0, 0.0  ;;  %13939 = vmatmul.mubr.msk.bf16.gmra.mrb[116].mxu0 %vm15828_vm1, %v13938_v27  ;;  %10016 = vmatprep.subr.bf16.mxu1 %v19797_v13  ;;  %v3275_v44 = vrot.slane %v3147_v63, 7  ;;  %v15266_v27 = vld [vmem:[#allocation8 + $0xa0] sm:$0xff]   ;;  %v597_v0 = vmul.f32 %v16226_v25, %v462_v61 }
 0x1b5   : > { %2735 = vmatprep.mubr.bf16.mxu0 %v13371_v43  ;;  %19806 = vst [vmem:[#allocation56_spill] sm:$0xff] %v16371_v17  ;;  %v13943_v43 = vpack.c.bf16 %v860_v42, %v859_v32  ;;  %v13372_v4 = vpack.c.bf16 %v16374_v62, %v16371_v17  ;;  %v861_v42 = vrot.slane %v16371_v17, 7 }
 0x1b6   : > { %v3276_v5 = vrot.slane %v3148_v55, 7  ;;  %v13471_v19 = vpack.c.bf16 %v3148_v55, %v3147_v63  ;;  %v598_v63 = vmul.f32 %v16226_v25, %v463_v60 }
 0x1b7   : > { %v2521_v39 = vpop.f32.mrb[12].mxu0  ;;  %10017 = vmatpush1.bf16.msra.mxu1 %v15264_v1 }
 0x1b8   : > { %v3021_v26 = vadd.f32 %v16306_v46, %v2521_v39  ;;  %v2523_v18 = vpop.f32.mrb[13].mxu0  ;;  %4983 = vmatprep.mubr.bf16.mxu1 %v13471_v19  ;;  %v14123_v45 = vpack.c.bf16 %v3276_v5, %v3275_v44  ;;  %10018 = vmatprep.subr.bf16.mxu1 %v19797_v13  ;;  %v862_v44 = vrot.slane %v16374_v62, 7  ;;  %v16393_v5 = vadd.f32 %v16236_v10, %v597_v0 }
 0x1b9   : > { %v2524_v14 = vpop.f32.mrb[14].mxu0  ;;  %v16396_v19 = vadd.f32 %v16236_v10, %v598_v63  ;;  %v465_v18 = vld [vmem:[%s15770_s28 + $0x218] sm:$0xff] }
 0x1ba   : > { %v3149_v55 = vmax.f32 %v3021_v26, 0.0  ;;  %v3022_v1 = vadd.f32 %v16306_v46, %v2524_v14  ;;  %v2526_v39 = vpop.f32.mrb[15].mxu0  ;;  %14124 = vmatmul.mubr.msk.bf16.gmra.mrb[8].mxu1 %vm15828_vm1, %v14123_v45  ;;  %19808 = vst [vmem:[#allocation58_spill] sm:$0xff] %v16393_v5  ;;  %v464_v26 = vld [vmem:[%s15770_s28 + $0x210] sm:$0xff]  ;;  %v600_v63 = vmul.f32 %v16226_v25, %v465_v18  ;;  %v466_v18 = vld [vmem:[%s15770_s28 + $0x220] sm:$0xff] }
 0x1bb   : > { %10019 = vmatpush1.bf16.msra.mxu1 %v15266_v27  ;;  %19809 = vst [vmem:[#allocation59_spill] sm:$0xff] %v16396_v19  ;;  %v13948_v39 = vpack.c.bf16 %v862_v44, %v861_v42  ;;  %v599_v0 = vmul.f32 %v16226_v25, %v464_v26  ;;  %v863_v42 = vrot.slane %v16393_v5, 7  ;;  %v864_v44 = vrot.slane %v16396_v19, 7 }
 0x1bc   : > { %v3150_v32 = vmax.f32 %v3022_v1, 0.0  ;;  %13944 = vmatmul.mubr.msk.bf16.gmra.mrb[120].mxu0 %vm15828_vm1, %v13943_v43  ;;  %10020 = vmatprep.subr.bf16.mxu1 %v19797_v13  ;;  %v3277_v61 = vrot.slane %v3149_v55, 7 }
 0x1bd   : > { %2743 = vmatprep.mubr.bf16.mxu0 %v13372_v4  ;;  %v13373_v4 = vpack.c.bf16 %v16396_v19, %v16393_v5 }
 0x1be   : > { %v3278_v60 = vrot.slane %v3150_v32, 7  ;;  %v13472_v27 = vpack.c.bf16 %v3150_v32, %v3149_v55 }
 0x1bf   : > { %v2529_v45 = vpop.f32.mrb[16].mxu0 }
 0x1c0   : > { %v3023_v43 = vadd.f32 %v16306_v46, %v2529_v45  ;;  %v2531_v14 = vpop.f32.mrb[17].mxu0  ;;  %4991 = vmatprep.mubr.bf16.mxu1 %v13472_v27  ;;  %v14128_v1 = vpack.c.bf16 %v3278_v60, %v3277_v61  ;;  %v16413_v61 = vadd.f32 %v16236_v10, %v599_v0  ;;  %v16416_v60 = vadd.f32 %v16236_v10, %v600_v63  ;;  %v467_v45 = vld [vmem:[%s15770_s28 + $0x228] sm:$0xff] }
 0x1c1   : > { %v2532_v17 = vpop.f32.mrb[18].mxu0  ;;  %v601_v63 = vmul.f32 %v16226_v25, %v466_v18  ;;  %v602_v5 = vmul.f32 %v16226_v25, %v467_v45  ;;  %v468_v18 = vld [vmem:[%s15770_s28 + $0x230] sm:$0xff] }
 0x1c2   : > { %v3151_v55 = vmax.f32 %v3023_v43, 0.0  ;;  %v3024_v32 = vadd.f32 %v16306_v46, %v2532_v17  ;;  %v2534_v62 = vpop.f32.mrb[19].mxu0  ;;  %14129 = vmatmul.mubr.msk.bf16.gmra.mrb[12].mxu1 %vm15828_vm1, %v14128_v1  ;;  %19810 = vst [vmem:[#allocation60_spill] sm:$0xff] %v16413_v61  ;;  %19811 = vst [vmem:[#allocation61_spill] sm:$0xff] %v16416_v60  ;;  %v13374_v0 = vpack.c.bf16 %v16416_v60, %v16413_v61 }
 0x1c4   : > { %v3152_v27 = vmax.f32 %v3024_v32, 0.0  ;;  %13949 = vmatmul.mubr.msk.bf16.gmra.mrb[124].mxu0 %vm15828_vm1, %v13948_v39  ;;  %v3279_v17 = vrot.slane %v3151_v55, 7  ;;  %v13953_v32 = vpack.c.bf16 %v864_v44, %v863_v42  ;;  %v865_v42 = vrot.slane %v16413_v61, 7 }
 0x1c5   : > { %2751 = vmatprep.mubr.bf16.mxu0 %v13373_v4  ;;  %v866_v44 = vrot.slane %v16416_v60, 7  ;;  %v603_v60 = vmul.f32 %v16226_v25, %v468_v18 }
 0x1c6   : > { %v3280_v62 = vrot.slane %v3152_v27, 7  ;;  %v13473_v26 = vpack.c.bf16 %v3152_v27, %v3151_v55 }
 0x1c7   : > { %v2537_v43 = vpop.f32.mrb[20].mxu0 }
 0x1c8   : > { %v3025_v14 = vadd.f32 %v16306_v46, %v2537_v43  ;;  %v2539_v1 = vpop.f32.mrb[21].mxu0  ;;  %4999 = vmatprep.mubr.bf16.mxu1 %v13473_v26  ;;  %v14133_v39 = vpack.c.bf16 %v3280_v62, %v3279_v17  ;;  %v16433_v17 = vadd.f32 %v16236_v10, %v601_v63  ;;  %v16436_v62 = vadd.f32 %v16236_v10, %v602_v5 }
 0x1c9   : > { %v2540_v4 = vpop.f32.mrb[22].mxu0  ;;  %v15268_v1 = vld [vmem:[#allocation8 + $0xa8] sm:$0xff]  }
 0x1ca   : > { %v3153_v55 = vmax.f32 %v3025_v14, 0.0  ;;  %v3026_v27 = vadd.f32 %v16306_v46, %v2540_v4  ;;  %v2542_v19 = vpop.f32.mrb[23].mxu0  ;;  %14134 = vmatmul.mubr.msk.bf16.gmra.mrb[16].mxu1 %vm15828_vm1, %v14133_v39  ;;  %19812 = vst [vmem:[#allocation62_spill] sm:$0xff] %v16433_v17  ;;  %19813 = vst [vmem:[#allocation63_spill] sm:$0xff] %v16436_v62  ;;  %v469_v14 = vld [vmem:[%s15770_s28 + $0x238] sm:$0xff]  ;;  %v15269_v39 = vld [vmem:[#allocation6 + $0xe0] sm:$0xff]   ;;  %v13375_v5 = vpack.c.bf16 %v16436_v62, %v16433_v17 }
 0x1cb   : > { %10021 = vmatpush1.bf16.msra.mxu1 %v15268_v1  ;;  %v604_v24 = vmul.f32 %v16226_v25, %v469_v14  ;;  %7561 = vmatpush1.bf16.msra.mxu0 %v15269_v39  ;;  %v868_v18 = vrot.slane %v16436_v62, 7  ;;  %v470_v39 = vld [vmem:[%s15770_s28 + $0x240] sm:$0xff] }
 0x1cc   : > { %v3154_v26 = vmax.f32 %v3026_v27, 0.0  ;;  %13954 = vmatmul.mubr.msk.bf16.gmra.mrb[128].mxu0 %vm15828_vm1, %v13953_v32  ;;  %v3281_v19 = vrot.slane %v3153_v55, 7  ;;  %10022 = vmatprep.subr.bf16.mxu1 %v19797_v13 }
 0x1cd   : > { %2759 = vmatprep.mubr.bf16.mxu0 %v13374_v0  ;;  %v13958_v0 = vpack.c.bf16 %v866_v44, %v865_v42  ;;  %7562 = vmatprep.subr.bf16.mxu0 %v19797_v13  ;;  %v867_v44 = vrot.slane %v16433_v17, 7 }
 0x1ce   : > { %v3282_v45 = vrot.slane %v3154_v26, 7  ;;  %v13474_v43 = vpack.c.bf16 %v3154_v26, %v3153_v55 }
 0x1cf   : > { %v2545_v4 = vpop.f32.mrb[24].mxu0 }
 0x1d0   : > { %v3027_v32 = vadd.f32 %v16306_v46, %v2545_v4  ;;  %v2547_v27 = vpop.f32.mrb[25].mxu0  ;;  %5007 = vmatprep.mubr.bf16.mxu1 %v13474_v43  ;;  %v14138_v61 = vpack.c.bf16 %v3282_v45, %v3281_v19  ;;  %v16455_v19 = vadd.f32 %v16236_v10, %v603_v60  ;;  %v16458_v45 = vadd.f32 %v16236_v10, %v604_v24  ;;  %v471_v4 = vld [vmem:[%s15770_s28 + $0x248] sm:$0xff] }
 0x1d1   : > { %v2548_v63 = vpop.f32.mrb[26].mxu0  ;;  %v606_v24 = vmul.f32 %v16226_v25, %v471_v4 }
 0x1d2   : > { %v3155_v55 = vmax.f32 %v3027_v32, 0.0  ;;  %v3028_v26 = vadd.f32 %v16306_v46, %v2548_v63  ;;  %v2550_v43 = vpop.f32.mrb[27].mxu0  ;;  %14139 = vmatmul.mubr.msk.bf16.gmra.mrb[20].mxu1 %vm15828_vm1, %v14138_v61  ;;  %19814 = vst [vmem:[#allocation64_spill] sm:$0xff] %v16455_v19  ;;  %19815 = vst [vmem:[#allocation65_spill] sm:$0xff] %v16458_v45  ;;  %v13376_v60 = vpack.c.bf16 %v16458_v45, %v16455_v19 }
 0x1d4   : > { %v3156_v42 = vmax.f32 %v3028_v26, 0.0  ;;  %13959 = vmatmul.mubr.msk.bf16.gmra.mrb[132].mxu0 %vm15828_vm1, %v13958_v0  ;;  %v3283_v14 = vrot.slane %v3155_v55, 7  ;;  %v13963_v26 = vpack.c.bf16 %v868_v18, %v867_v44  ;;  %v869_v44 = vrot.slane %v16455_v19, 7 }
 0x1d5   : > { %2767 = vmatprep.mubr.bf16.mxu0 %v13375_v5  ;;  %v605_v5 = vmul.f32 %v16226_v25, %v470_v39  ;;  %v870_v18 = vrot.slane %v16458_v45, 7 }
 0x1d6   : > { %v3284_v1 = vrot.slane %v3156_v42, 7  ;;  %v13475_v61 = vpack.c.bf16 %v3156_v42, %v3155_v55 }
 0x1d7   : > { %v2553_v32 = vpop.f32.mrb[28].mxu0 }
 0x1d8   : > { %v3029_v27 = vadd.f32 %v16306_v46, %v2553_v32  ;;  %v2555_v0 = vpop.f32.mrb[29].mxu0  ;;  %5015 = vmatprep.mubr.bf16.mxu1 %v13475_v61  ;;  %v14143_v63 = vpack.c.bf16 %v3284_v1, %v3283_v14  ;;  %v16475_v14 = vadd.f32 %v16236_v10, %v605_v5  ;;  %v16478_v1 = vadd.f32 %v16236_v10, %v606_v24  ;;  %v472_v32 = vld [vmem:[%s15770_s28 + $0x250] sm:$0xff] }
 0x1d9   : > { %v2556_v43 = vpop.f32.mrb[30].mxu0  ;;  %v607_v5 = vmul.f32 %v16226_v25, %v472_v32 }
 0x1da   : > { %v3157_v55 = vmax.f32 %v3029_v27, 0.0  ;;  %v3030_v42 = vadd.f32 %v16306_v46, %v2556_v43  ;;  %v2558_v17 = vpop.f32.mrb[31].mxu0  ;;  %14144 = vmatmul.mubr.msk.bf16.gmra.mrb[24].mxu1 %vm15828_vm1, %v14143_v63  ;;  %19816 = vst [vmem:[#allocation66_spill] sm:$0xff] %v16475_v14  ;;  %19817 = vst [vmem:[#allocation67_spill] sm:$0xff] %v16478_v1  ;;  %v473_v27 = vld [vmem:[%s15770_s28 + $0x258] sm:$0xff] }
 0x1db   : > { %v608_v24 = vmul.f32 %v16226_v25, %v473_v27  ;;  %v474_v27 = vld [vmem:[%s15770_s28 + $0x260] sm:$0xff] }
 0x1dc   : > { %v3158_v61 = vmax.f32 %v3030_v42, 0.0  ;;  %13964 = vmatmul.mubr.msk.bf16.gmra.mrb[136].mxu0 %vm15828_vm1, %v13963_v26  ;;  %v3285_v39 = vrot.slane %v3157_v55, 7  ;;  %v13968_v42 = vpack.c.bf16 %v870_v18, %v869_v44  ;;  %v871_v44 = vrot.slane %v16475_v14, 7 }
 0x1dd   : > { %2775 = vmatprep.mubr.bf16.mxu0 %v13376_v60  ;;  %v13377_v60 = vpack.c.bf16 %v16478_v1, %v16475_v14  ;;  %v872_v18 = vrot.slane %v16478_v1, 7 }
 0x1de   : > { %v3286_v17 = vrot.slane %v3158_v61, 7  ;;  %v13476_v4 = vpack.c.bf16 %v3158_v61, %v3157_v55 }
 0x1df   : > { %v2561_v0 = vpop.f32.mrb[32].mxu0 }
 0x1e0   : > { %v3031_v63 = vadd.f32 %v16306_v46, %v2561_v0  ;;  %v2563_v26 = vpop.f32.mrb[33].mxu0  ;;  %5023 = vmatprep.mubr.bf16.mxu1 %v13476_v4  ;;  %v14148_v43 = vpack.c.bf16 %v3286_v17, %v3285_v39  ;;  %v16495_v39 = vadd.f32 %v16236_v10, %v607_v5  ;;  %v16498_v17 = vadd.f32 %v16236_v10, %v608_v24  ;;  %v475_v0 = vld [vmem:[%s15770_s28 + $0x268] sm:$0xff] }
 0x1e1   : > { %v2564_v19 = vpop.f32.mrb[34].mxu0  ;;  %v609_v24 = vmul.f32 %v16226_v25, %v474_v27  ;;  %v610_v14 = vmul.f32 %v16226_v25, %v475_v0  ;;  %v476_v27 = vld [vmem:[%s15770_s28 + $0x270] sm:$0xff] }
 0x1e2   : > { %v3159_v55 = vmax.f32 %v3031_v63, 0.0  ;;  %v3032_v61 = vadd.f32 %v16306_v46, %v2564_v19  ;;  %v2566_v45 = vpop.f32.mrb[35].mxu0  ;;  %14149 = vmatmul.mubr.msk.bf16.gmra.mrb[28].mxu1 %vm15828_vm1, %v14148_v43  ;;  %19818 = vst [vmem:[#allocation68_spill] sm:$0xff] %v16495_v39  ;;  %19819 = vst [vmem:[#allocation69_spill] sm:$0xff] %v16498_v17  ;;  %v13378_v5 = vpack.c.bf16 %v16498_v17, %v16495_v39 }
 0x1e4   : > { %v3160_v4 = vmax.f32 %v3032_v61, 0.0  ;;  %13969 = vmatmul.mubr.msk.bf16.gmra.mrb[140].mxu0 %vm15828_vm1, %v13968_v42  ;;  %v3287_v19 = vrot.slane %v3159_v55, 7  ;;  %v13973_v61 = vpack.c.bf16 %v872_v18, %v871_v44  ;;  %v873_v44 = vrot.slane %v16495_v39, 7 }
 0x1e5   : > { %2783 = vmatprep.mubr.bf16.mxu0 %v13377_v60  ;;  %v874_v18 = vrot.slane %v16498_v17, 7  ;;  %v611_v17 = vmul.f32 %v16226_v25, %v476_v27 }
 0x1e6   : > { %v3288_v45 = vrot.slane %v3160_v4, 7  ;;  %v13477_v32 = vpack.c.bf16 %v3160_v4, %v3159_v55 }
 0x1e7   : > { %v2569_v63 = vpop.f32.mrb[36].mxu0 }
 0x1e8   : > { %v3033_v26 = vadd.f32 %v16306_v46, %v2569_v63  ;;  %v2571_v43 = vpop.f32.mrb[37].mxu0  ;;  %5031 = vmatprep.mubr.bf16.mxu1 %v13477_v32  ;;  %v14153_v42 = vpack.c.bf16 %v3288_v45, %v3287_v19  ;;  %v16515_v19 = vadd.f32 %v16236_v10, %v609_v24  ;;  %v16518_v45 = vadd.f32 %v16236_v10, %v610_v14 }
 0x1e9   : > { %v2572_v60 = vpop.f32.mrb[38].mxu0  ;;  %v15270_v43 = vld [vmem:[#allocation8 + $0xb0] sm:$0xff]  }
 0x1ea   : > { %v3161_v55 = vmax.f32 %v3033_v26, 0.0  ;;  %v3034_v4 = vadd.f32 %v16306_v46, %v2572_v60  ;;  %v2574_v1 = vpop.f32.mrb[39].mxu0  ;;  %14154 = vmatmul.mubr.msk.bf16.gmra.mrb[32].mxu1 %vm15828_vm1, %v14153_v42  ;;  %19820 = vst [vmem:[#allocation70_spill] sm:$0xff] %v16515_v19  ;;  %19821 = vst [vmem:[#allocation71_spill] sm:$0xff] %v16518_v45  ;;  %v477_v26 = vld [vmem:[%s15770_s28 + $0x278] sm:$0xff]  ;;  %v15271_v42 = vld [vmem:[#allocation6 + $0xe8] sm:$0xff]   ;;  %v13379_v14 = vpack.c.bf16 %v16518_v45, %v16515_v19 }
 0x1eb   : > { %10023 = vmatpush1.bf16.msra.mxu1 %v15270_v43  ;;  %v612_v62 = vmul.f32 %v16226_v25, %v477_v26  ;;  %7563 = vmatpush1.bf16.msra.mxu0 %v15271_v42  ;;  %v876_v27 = vrot.slane %v16518_v45, 7  ;;  %v478_v42 = vld [vmem:[%s15770_s28 + $0x280] sm:$0xff] }
 0x1ec   : > { %v3162_v32 = vmax.f32 %v3034_v4, 0.0  ;;  %13974 = vmatmul.mubr.msk.bf16.gmra.mrb[144].mxu0 %vm15828_vm1, %v13973_v61  ;;  %v3289_v1 = vrot.slane %v3161_v55, 7  ;;  %10024 = vmatprep.subr.bf16.mxu1 %v19797_v13 }
 0x1ed   : > { %2791 = vmatprep.mubr.bf16.mxu0 %v13378_v5  ;;  %v13978_v5 = vpack.c.bf16 %v874_v18, %v873_v44  ;;  %7564 = vmatprep.subr.bf16.mxu0 %v19797_v13  ;;  %v875_v18 = vrot.slane %v16515_v19, 7 }
 0x1ee   : > { %v3290_v0 = vrot.slane %v3162_v32, 7  ;;  %v13478_v63 = vpack.c.bf16 %v3162_v32, %v3161_v55 }
 0x1ef   : > { %v2577_v60 = vpop.f32.mrb[40].mxu0 }
 0x1f0   : > { %v3035_v61 = vadd.f32 %v16306_v46, %v2577_v60  ;;  %v2579_v4 = vpop.f32.mrb[41].mxu0  ;;  %5039 = vmatprep.mubr.bf16.mxu1 %v13478_v63  ;;  %v14158_v39 = vpack.c.bf16 %v3290_v0, %v3289_v1  ;;  %v16537_v1 = vadd.f32 %v16236_v10, %v611_v17  ;;  %v16540_v0 = vadd.f32 %v16236_v10, %v612_v62  ;;  %v479_v60 = vld [vmem:[%s15770_s28 + $0x288] sm:$0xff] }
 0x1f1   : > { %v2580_v24 = vpop.f32.mrb[42].mxu0  ;;  %v614_v62 = vmul.f32 %v16226_v25, %v479_v60 }
 0x1f2   : > { %v3163_v55 = vmax.f32 %v3035_v61, 0.0  ;;  %v3036_v32 = vadd.f32 %v16306_v46, %v2580_v24  ;;  %v2582_v63 = vpop.f32.mrb[43].mxu0  ;;  %14159 = vmatmul.mubr.msk.bf16.gmra.mrb[36].mxu1 %vm15828_vm1, %v14158_v39  ;;  %19822 = vst [vmem:[#allocation72_spill] sm:$0xff] %v16537_v1  ;;  %19823 = vst [vmem:[#allocation73_spill] sm:$0xff] %v16540_v0  ;;  %v13380_v17 = vpack.c.bf16 %v16540_v0, %v16537_v1 }
 0x1f4   : > { %v3164_v44 = vmax.f32 %v3036_v32, 0.0  ;;  %13979 = vmatmul.mubr.msk.bf16.gmra.mrb[148].mxu0 %vm15828_vm1, %v13978_v5  ;;  %v3291_v26 = vrot.slane %v3163_v55, 7  ;;  %v13983_v32 = vpack.c.bf16 %v876_v27, %v875_v18  ;;  %v877_v18 = vrot.slane %v16537_v1, 7 }
 0x1f5   : > { %2799 = vmatprep.mubr.bf16.mxu0 %v13379_v14  ;;  %v613_v14 = vmul.f32 %v16226_v25, %v478_v42  ;;  %v878_v27 = vrot.slane %v16540_v0, 7 }
 0x1f6   : > { %v3292_v43 = vrot.slane %v3164_v44, 7  ;;  %v13479_v39 = vpack.c.bf16 %v3164_v44, %v3163_v55 }
 0x1f7   : > { %v2585_v61 = vpop.f32.mrb[44].mxu0 }
 0x1f8   : > { %v3037_v4 = vadd.f32 %v16306_v46, %v2585_v61  ;;  %v2587_v5 = vpop.f32.mrb[45].mxu0  ;;  %5047 = vmatprep.mubr.bf16.mxu1 %v13479_v39  ;;  %v14163_v24 = vpack.c.bf16 %v3292_v43, %v3291_v26  ;;  %v16557_v26 = vadd.f32 %v16236_v10, %v613_v14  ;;  %v16560_v43 = vadd.f32 %v16236_v10, %v614_v62  ;;  %v480_v61 = vld [vmem:[%s15770_s28 + $0x290] sm:$0xff] }
 0x1f9   : > { %v2588_v63 = vpop.f32.mrb[46].mxu0  ;;  %v615_v14 = vmul.f32 %v16226_v25, %v480_v61 }
 0x1fa   : > { %v3165_v55 = vmax.f32 %v3037_v4, 0.0  ;;  %v3038_v44 = vadd.f32 %v16306_v46, %v2588_v63  ;;  %v2590_v19 = vpop.f32.mrb[47].mxu0  ;;  %14164 = vmatmul.mubr.msk.bf16.gmra.mrb[40].mxu1 %vm15828_vm1, %v14163_v24  ;;  %19824 = vst [vmem:[#allocation74_spill] sm:$0xff] %v16557_v26  ;;  %19825 = vst [vmem:[#allocation75_spill] sm:$0xff] %v16560_v43  ;;  %v481_v4 = vld [vmem:[%s15770_s28 + $0x298] sm:$0xff] }
 0x1fb   : > { %v616_v62 = vmul.f32 %v16226_v25, %v481_v4  ;;  %v482_v4 = vld [vmem:[%s15770_s28 + $0x2a0] sm:$0xff] }
 0x1fc   : > { %v3166_v39 = vmax.f32 %v3038_v44, 0.0  ;;  %13984 = vmatmul.mubr.msk.bf16.gmra.mrb[152].mxu0 %vm15828_vm1, %v13983_v32  ;;  %v3293_v42 = vrot.slane %v3165_v55, 7  ;;  %v13988_v44 = vpack.c.bf16 %v878_v27, %v877_v18  ;;  %v879_v18 = vrot.slane %v16557_v26, 7 }
 0x1fd   : > { %2807 = vmatprep.mubr.bf16.mxu0 %v13380_v17  ;;  %v13381_v17 = vpack.c.bf16 %v16560_v43, %v16557_v26  ;;  %v880_v27 = vrot.slane %v16560_v43, 7 }
 0x1fe   : > { %v3294_v19 = vrot.slane %v3166_v39, 7  ;;  %v13480_v60 = vpack.c.bf16 %v3166_v39, %v3165_v55 }
 0x1ff   : > { %v2593_v5 = vpop.f32.mrb[48].mxu0 }
 0x200   : > { %v3039_v24 = vadd.f32 %v16306_v46, %v2593_v5  ;;  %v2595_v32 = vpop.f32.mrb[49].mxu0  ;;  %5055 = vmatprep.mubr.bf16.mxu1 %v13480_v60  ;;  %v14168_v63 = vpack.c.bf16 %v3294_v19, %v3293_v42  ;;  %v16577_v42 = vadd.f32 %v16236_v10, %v615_v14  ;;  %v16580_v19 = vadd.f32 %v16236_v10, %v616_v62  ;;  %v483_v5 = vld [vmem:[%s15770_s28 + $0x2a8] sm:$0xff] }
 0x201   : > { %v2596_v1 = vpop.f32.mrb[50].mxu0  ;;  %v617_v14 = vmul.f32 %v16226_v25, %v482_v4  ;;  %v618_v62 = vmul.f32 %v16226_v25, %v483_v5  ;;  %v484_v5 = vld [vmem:[%s15770_s28 + $0x2b0] sm:$0xff] }
 0x202   : > { %v3167_v55 = vmax.f32 %v3039_v24, 0.0  ;;  %v3040_v39 = vadd.f32 %v16306_v46, %v2596_v1  ;;  %v2598_v0 = vpop.f32.mrb[51].mxu0  ;;  %14169 = vmatmul.mubr.msk.bf16.gmra.mrb[44].mxu1 %vm15828_vm1, %v14168_v63  ;;  %19826 = vst [vmem:[#allocation76_spill] sm:$0xff] %v16577_v42  ;;  %19827 = vst [vmem:[#allocation77_spill] sm:$0xff] %v16580_v19 }
 0x204   : > { %v3168_v60 = vmax.f32 %v3040_v39, 0.0  ;;  %13989 = vmatmul.mubr.msk.bf16.gmra.mrb[156].mxu0 %vm15828_vm1, %v13988_v44  ;;  %v3295_v1 = vrot.slane %v3167_v55, 7  ;;  %v13993_v39 = vpack.c.bf16 %v880_v27, %v879_v18  ;;  %v881_v18 = vrot.slane %v16577_v42, 7 }
 0x205   : > { %2815 = vmatprep.mubr.bf16.mxu0 %v13381_v17  ;;  %v13382_v17 = vpack.c.bf16 %v16580_v19, %v16577_v42  ;;  %v882_v27 = vrot.slane %v16580_v19, 7  ;;  %v15272_v42 = vld [vmem:[#allocation8 + $0xb8] sm:$0xff]  }
 0x206   : > { %v3296_v0 = vrot.slane %v3168_v60, 7  ;;  %v13481_v61 = vpack.c.bf16 %v3168_v60, %v3167_v55  ;;  %10025 = vmatpush1.bf16.msra.mxu1 %v15272_v42 }
 0x207   : > { %v2601_v24 = vpop.f32.mrb[52].mxu0  ;;  %10026 = vmatprep.subr.bf16.mxu1 %v19797_v13 }
 0x208   : > { %v3041_v32 = vadd.f32 %v16306_v46, %v2601_v24  ;;  %v2603_v63 = vpop.f32.mrb[53].mxu0  ;;  %5063 = vmatprep.mubr.bf16.mxu1 %v13481_v61  ;;  %v14173_v44 = vpack.c.bf16 %v3296_v0, %v3295_v1  ;;  %v16597_v1 = vadd.f32 %v16236_v10, %v617_v14  ;;  %v16600_v0 = vadd.f32 %v16236_v10, %v618_v62  ;;  %v485_v24 = vld [vmem:[%s15770_s28 + $0x2b8] sm:$0xff] }
 0x209   : > { %v2604_v26 = vpop.f32.mrb[54].mxu0  ;;  %v619_v62 = vmul.f32 %v16226_v25, %v484_v5  ;;  %v620_v19 = vmul.f32 %v16226_v25, %v485_v24 }
 0x20a   : > { %v3169_v55 = vmax.f32 %v3041_v32, 0.0  ;;  %v3042_v60 = vadd.f32 %v16306_v46, %v2604_v26  ;;  %v2606_v43 = vpop.f32.mrb[55].mxu0  ;;  %14174 = vmatmul.mubr.msk.bf16.gmra.mrb[48].mxu1 %vm15828_vm1, %v14173_v44  ;;  %19828 = vst [vmem:[#allocation78_spill] sm:$0xff] %v16597_v1  ;;  %19829 = vst [vmem:[#allocation79_spill] sm:$0xff] %v16600_v0  ;;  %v13383_v14 = vpack.c.bf16 %v16600_v0, %v16597_v1 }
 0x20b   : > { %v16621_v5 = vadd.f32 %v16236_v10, %v620_v19 }
 0x20c   : > { %v3170_v61 = vmax.f32 %v3042_v60, 0.0  ;;  %13994 = vmatmul.mubr.msk.bf16.gmra.mrb[160].mxu0 %vm15828_vm1, %v13993_v39  ;;  %v3297_v26 = vrot.slane %v3169_v55, 7  ;;  %v13998_v60 = vpack.c.bf16 %v882_v27, %v881_v18  ;;  %v883_v27 = vrot.slane %v16597_v1, 7 }
 0x20d   : > { %2823 = vmatprep.mubr.bf16.mxu0 %v13382_v17  ;;  %19831 = vst [vmem:[#allocation81_spill] sm:$0xff] %v16621_v5 }
 0x20e   : > { %v3298_v43 = vrot.slane %v3170_v61, 7  ;;  %v13482_v4 = vpack.c.bf16 %v3170_v61, %v3169_v55 }
 0x20f   : > { %v2609_v32 = vpop.f32.mrb[56].mxu0 }
 0x210   : > { %v3043_v63 = vadd.f32 %v16306_v46, %v2609_v32  ;;  %v2611_v44 = vpop.f32.mrb[57].mxu0  ;;  %5071 = vmatprep.mubr.bf16.mxu1 %v13482_v4  ;;  %v14178_v39 = vpack.c.bf16 %v3298_v43, %v3297_v26  ;;  %v884_v26 = vrot.slane %v16600_v0, 7  ;;  %v15273_v43 = vld [vmem:[#allocation6 + $0xf0] sm:$0xff]   ;;  %v16618_v4 = vadd.f32 %v16236_v10, %v619_v62 }
 0x211   : > { %v2612_v17 = vpop.f32.mrb[58].mxu0  ;;  %v487_v44 = vld [vmem:[%s15770_s28 + $0x2c8] sm:$0xff]  ;;  %7565 = vmatpush1.bf16.msra.mxu0 %v15273_v43 }
 0x212   : > { %v3171_v45 = vmax.f32 %v3043_v63, 0.0  ;;  %v3044_v55 = vadd.f32 %v16306_v46, %v2612_v17  ;;  %v2614_v61 = vpop.f32.mrb[59].mxu0  ;;  %14179 = vmatmul.mubr.msk.bf16.gmra.mrb[52].mxu1 %vm15828_vm1, %v14178_v39  ;;  %19830 = vst [vmem:[#allocation80_spill] sm:$0xff] %v16618_v4  ;;  %v486_v63 = vld [vmem:[%s15770_s28 + $0x2c0] sm:$0xff]  ;;  %7566 = vmatprep.subr.bf16.mxu0 %v19797_v13  ;;  %v13384_v19 = vpack.c.bf16 %v16621_v5, %v16618_v4 }
 0x213   : > { %v621_v61 = vmul.f32 %v16226_v25, %v486_v63 }
 0x214   : > { %v3172_v18 = vmax.f32 %v3044_v55, 0.0  ;;  %13999 = vmatmul.mubr.msk.bf16.gmra.mrb[164].mxu0 %vm15828_vm1, %v13998_v60  ;;  %v3299_v24 = vrot.slane %v3171_v45, 7  ;;  %v14003_v55 = vpack.c.bf16 %v884_v26, %v883_v27  ;;  %v885_v27 = vrot.slane %v16618_v4, 7 }
 0x215   : > { %2831 = vmatprep.mubr.bf16.mxu0 %v13383_v14  ;;  %v886_v26 = vrot.slane %v16621_v5, 7 }
 0x216   : > { %v3300_v42 = vrot.slane %v3172_v18, 7  ;;  %v13483_v32 = vpack.c.bf16 %v3172_v18, %v3171_v45  ;;  %v622_v45 = vmul.f32 %v16226_v25, %v487_v44  ;;  %v488_v44 = vld [vmem:[%s15770_s28 + $0x2d0] sm:$0xff] }
 0x217   : > { %v2617_v39 = vpop.f32.mrb[60].mxu0 }
 0x218   : > { %v3045_v60 = vadd.f32 %v16306_v46, %v2617_v39  ;;  %v2619_v17 = vpop.f32.mrb[61].mxu0  ;;  %5079 = vmatprep.mubr.bf16.mxu1 %v13483_v32  ;;  %v14183_v14 = vpack.c.bf16 %v3300_v42, %v3299_v24  ;;  %v16639_v24 = vadd.f32 %v16236_v10, %v621_v61  ;;  %v16642_v25 = vadd.f32 %v16236_v10, %v622_v45  ;;  %v489_v39 = vld [vmem:[%s15770_s28 + $0x2d8] sm:$0xff]  ;;  %v16652_v10 = vld [vmem:[%s19533_s1] ss:$0 sm:$0xff] }
 0x219   : > { %v2620_v62 = vpop.f32.mrb[62].mxu0  ;;  %v623_v61 = vmul.f32 %v16652_v10, %v488_v44  ;;  %v624_v45 = vmul.f32 %v16652_v10, %v489_v39 }
 0x21a   : > { %v3173_v18 = vmax.f32 %v3045_v60, 0.0  ;;  %v3046_v43 = vadd.f32 %v16306_v46, %v2620_v62  ;;  %v2622_v1 = vpop.f32.mrb[63].mxu0  ;;  %14184 = vmatmul.mubr.msk.bf16.gmra.mrb[56].mxu1 %vm15828_vm1, %v14183_v14  ;;  %19832 = vst [vmem:[#allocation82_spill] sm:$0xff] %v16639_v24  ;;  %19833 = vst [vmem:[#allocation83_spill] sm:$0xff] %v16642_v25  ;;  %v14008_v62 = vpack.c.bf16 %v886_v26, %v885_v27  ;;  %v887_v26 = vrot.slane %v16639_v24, 7 }
 0x21c   : > { %v3174_v32 = vmax.f32 %v3046_v43, 0.0  ;;  %14004 = vmatmul.mubr.msk.bf16.gmra.mrb[168].mxu0 %vm15828_vm1, %v14003_v55  ;;  %v3301_v42 = vrot.slane %v3173_v18, 7 }
 0x21d   : > { %2839 = vmatprep.mubr.bf16.mxu0 %v13384_v19  ;;  %v13385_v19 = vpack.c.bf16 %v16642_v25, %v16639_v24 }
 0x21e   : > { %v3302_v1 = vrot.slane %v3174_v32, 7  ;;  %v13484_v63 = vpack.c.bf16 %v3174_v32, %v3173_v18 }
 0x21f   : > { %v2625_v60 = vpop.f32.mrb[64].mxu0 }
 0x220   : > { %v3047_v17 = vadd.f32 %v16306_v46, %v2625_v60  ;;  %v2627_v14 = vpop.f32.mrb[65].mxu0  ;;  %5087 = vmatprep.mubr.bf16.mxu1 %v13484_v63  ;;  %v14188_v55 = vpack.c.bf16 %v3302_v1, %v3301_v42  ;;  %v888_v1 = vrot.slane %v16642_v25, 7  ;;  %v16666_v63 = vld [vmem:[%s19534_s2] ss:$0 sm:$0xff] }
 0x221   : > { %v2628_v43 = vpop.f32.mrb[66].mxu0  ;;  %v16669_v44 = vadd.f32 %v16666_v63, %v623_v61  ;;  %v16672_v39 = vadd.f32 %v16666_v63, %v624_v45 }
 0x222   : > { %v3175_v18 = vmax.f32 %v3047_v17, 0.0  ;;  %v3048_v32 = vadd.f32 %v16306_v46, %v2628_v43  ;;  %v2630_v42 = vpop.f32.mrb[67].mxu0  ;;  %14189 = vmatmul.mubr.msk.bf16.gmra.mrb[60].mxu1 %vm15828_vm1, %v14188_v55  ;;  %v490_v55 = vld [vmem:[%s15770_s28 + $0x2e0] sm:$0xff]  ;;  %v14013_v24 = vpack.c.bf16 %v888_v1, %v887_v26 }
 0x223   : > { %19834 = vst [vmem:[#allocation84_spill] sm:$0xff] %v16669_v44  ;;  %19835 = vst [vmem:[#allocation85_spill] sm:$0xff] %v16672_v39  ;;  %v13386_v61 = vpack.c.bf16 %v16672_v39, %v16669_v44  ;;  %v625_v4 = vmul.f32 %v16652_v10, %v490_v55  ;;  %v889_v26 = vrot.slane %v16669_v44, 7  ;;  %v890_v1 = vrot.slane %v16672_v39, 7  ;;  %v15274_v44 = vld [vmem:[#allocation8 + $0xc0] sm:$0xff]  }
 0x224   : > { %v3176_v27 = vmax.f32 %v3048_v32, 0.0  ;;  %14009 = vmatmul.mubr.msk.bf16.gmra.mrb[172].mxu0 %vm15828_vm1, %v14008_v62  ;;  %v3303_v60 = vrot.slane %v3175_v18, 7  ;;  %v491_v62 = vld [vmem:[%s15770_s28 + $0x2e8] sm:$0xff]  ;;  %10027 = vmatpush1.bf16.msra.mxu1 %v15274_v44 }
 0x225   : > { %2847 = vmatprep.mubr.bf16.mxu0 %v13385_v19  ;;  %v626_v45 = vmul.f32 %v16652_v10, %v491_v62  ;;  %v492_v62 = vld [vmem:[%s15770_s28 + $0x2f0] sm:$0xff]  ;;  %10028 = vmatprep.subr.bf16.mxu1 %v19797_v13 }
 0x226   : > { %v3304_v17 = vrot.slane %v3176_v27, 7  ;;  %v13485_v14 = vpack.c.bf16 %v3176_v27, %v3175_v18 }
 0x227   : > { %v2633_v43 = vpop.f32.mrb[68].mxu0 }
 0x228   : > { %v3049_v32 = vadd.f32 %v16306_v46, %v2633_v43  ;;  %v2635_v19 = vpop.f32.mrb[69].mxu0  ;;  %5095 = vmatprep.mubr.bf16.mxu1 %v13485_v14  ;;  %v14193_v42 = vpack.c.bf16 %v3304_v17, %v3303_v60  ;;  %v16689_v60 = vadd.f32 %v16666_v63, %v625_v4  ;;  %v16692_v17 = vadd.f32 %v16666_v63, %v626_v45  ;;  %v493_v43 = vld [vmem:[%s15770_s28 + $0x2f8] sm:$0xff] }
 0x229   : > { %v2636_v25 = vpop.f32.mrb[70].mxu0  ;;  %v627_v45 = vmul.f32 %v16652_v10, %v492_v62  ;;  %v628_v39 = vmul.f32 %v16652_v10, %v493_v43 }
 0x22a   : > { %v3177_v18 = vmax.f32 %v3049_v32, 0.0  ;;  %v3050_v27 = vadd.f32 %v16306_v46, %v2636_v25  ;;  %v2638_v5 = vpop.f32.mrb[71].mxu0  ;;  %14194 = vmatmul.mubr.msk.bf16.gmra.mrb[64].mxu1 %vm15828_vm1, %v14193_v42  ;;  %19836 = vst [vmem:[#allocation86_spill] sm:$0xff] %v16689_v60  ;;  %19837 = vst [vmem:[#allocation87_spill] sm:$0xff] %v16692_v17  ;;  %v13387_v4 = vpack.c.bf16 %v16692_v17, %v16689_v60 }
 0x22b   : > { %v16718_v62 = vadd.f32 %v16666_v63, %v628_v39 }
 0x22c   : > { %v3178_v14 = vmax.f32 %v3050_v27, 0.0  ;;  %14014 = vmatmul.mubr.msk.bf16.gmra.mrb[176].mxu0 %vm15828_vm1, %v14013_v24  ;;  %v3305_v25 = vrot.slane %v3177_v18, 7  ;;  %v14018_v27 = vpack.c.bf16 %v890_v1, %v889_v26  ;;  %v891_v1 = vrot.slane %v16689_v60, 7 }
 0x22d   : > { %2855 = vmatprep.mubr.bf16.mxu0 %v13386_v61  ;;  %19839 = vst [vmem:[#allocation89_spill] sm:$0xff] %v16718_v62 }
 0x22e   : > { %v3306_v5 = vrot.slane %v3178_v14, 7  ;;  %v13486_v55 = vpack.c.bf16 %v3178_v14, %v3177_v18  ;;  %v16704_v18 = vld [vmem:[%s19536_s4] ss:$0 sm:$0xff] }
 0x22f   : > { %v2641_v32 = vpop.f32.mrb[72].mxu0 }
 0x230   : > { %v3051_v19 = vadd.f32 %v16306_v46, %v2641_v32  ;;  %v2643_v24 = vpop.f32.mrb[73].mxu0  ;;  %5103 = vmatprep.mubr.bf16.mxu1 %v13486_v55  ;;  %v14198_v42 = vpack.c.bf16 %v3306_v5, %v3305_v25  ;;  %v892_v25 = vrot.slane %v16692_v17, 7  ;;  %v15275_v5 = vld [vmem:[#allocation6 + $0xf8] sm:$0xff]   ;;  %v16715_v55 = vadd.f32 %v16666_v63, %v627_v45 }
 0x231   : > { %v2644_v61 = vpop.f32.mrb[74].mxu0  ;;  %v495_v24 = vld [vmem:[%s15770_s28 + $0x308] sm:$0xff]  ;;  %7567 = vmatpush1.bf16.msra.mxu0 %v15275_v5 }
 0x232   : > { %v3179_v0 = vmax.f32 %v3051_v19, 0.0  ;;  %v3052_v46 = vadd.f32 %v16704_v18, %v2644_v61  ;;  %v2646_v14 = vpop.f32.mrb[75].mxu0  ;;  %14199 = vmatmul.mubr.msk.bf16.gmra.mrb[68].mxu1 %vm15828_vm1, %v14198_v42  ;;  %19838 = vst [vmem:[#allocation88_spill] sm:$0xff] %v16715_v55  ;;  %v494_v19 = vld [vmem:[%s15770_s28 + $0x300] sm:$0xff]  ;;  %v13388_v45 = vpack.c.bf16 %v16718_v62, %v16715_v55  ;;  %v630_v60 = vmul.f32 %v16652_v10, %v495_v24 }
 0x233   : > { %v14023_v14 = vpack.c.bf16 %v892_v25, %v891_v1  ;;  %v629_v39 = vmul.f32 %v16652_v10, %v494_v19  ;;  %v893_v1 = vrot.slane %v16715_v55, 7  ;;  %v894_v25 = vrot.slane %v16718_v62, 7 }
 0x234   : > { %v3180_v26 = vmax.f32 %v3052_v46, 0.0  ;;  %14019 = vmatmul.mubr.msk.bf16.gmra.mrb[180].mxu0 %vm15828_vm1, %v14018_v27  ;;  %v3307_v43 = vrot.slane %v3179_v0, 7 }
 0x235   : > { %2863 = vmatprep.mubr.bf16.mxu0 %v13387_v4 }
 0x236   : > { %v3308_v44 = vrot.slane %v3180_v26, 7  ;;  %v13487_v32 = vpack.c.bf16 %v3180_v26, %v3179_v0 }
 0x237   : > { %v2649_v42 = vpop.f32.mrb[76].mxu0 }
 0x238   : > { %v3053_v27 = vadd.f32 %v16704_v18, %v2649_v42  ;;  %v2651_v61 = vpop.f32.mrb[77].mxu0  ;;  %5111 = vmatprep.mubr.bf16.mxu1 %v13487_v32  ;;  %v14203_v46 = vpack.c.bf16 %v3308_v44, %v3307_v43  ;;  %v16735_v43 = vadd.f32 %v16666_v63, %v629_v39  ;;  %v16738_v44 = vadd.f32 %v16666_v63, %v630_v60 }
 0x239   : > { %v2652_v4 = vpop.f32.mrb[78].mxu0  ;;  %v497_v61 = vld [vmem:[%s15770_s28 + $0x318] sm:$0xff] }
 0x23a   : > { %v3181_v0 = vmax.f32 %v3053_v27, 0.0  ;;  %v3054_v26 = vadd.f32 %v16704_v18, %v2652_v4  ;;  %v2654_v5 = vpop.f32.mrb[79].mxu0  ;;  %14204 = vmatmul.mubr.msk.bf16.gmra.mrb[72].mxu1 %vm15828_vm1, %v14203_v46  ;;  %19840 = vst [vmem:[#allocation90_spill] sm:$0xff] %v16735_v43  ;;  %19841 = vst [vmem:[#allocation91_spill] sm:$0xff] %v16738_v44  ;;  %v496_v27 = vld [vmem:[%s15770_s28 + $0x310] sm:$0xff]  ;;  %v632_v60 = vmul.f32 %v16652_v10, %v497_v61  ;;  %v498_v61 = vld [vmem:[%s15770_s28 + $0x320] sm:$0xff] }
 0x23b   : > { %v14028_v5 = vpack.c.bf16 %v894_v25, %v893_v1  ;;  %v631_v39 = vmul.f32 %v16652_v10, %v496_v27  ;;  %v895_v1 = vrot.slane %v16735_v43, 7  ;;  %v896_v25 = vrot.slane %v16738_v44, 7 }
 0x23c   : > { %v3182_v32 = vmax.f32 %v3054_v26, 0.0  ;;  %14024 = vmatmul.mubr.msk.bf16.gmra.mrb[184].mxu0 %vm15828_vm1, %v14023_v14  ;;  %v3309_v19 = vrot.slane %v3181_v0, 7 }
 0x23d   : > { %2871 = vmatprep.mubr.bf16.mxu0 %v13388_v45  ;;  %v13389_v45 = vpack.c.bf16 %v16738_v44, %v16735_v43 }
 0x23e   : > { %v3310_v24 = vrot.slane %v3182_v32, 7  ;;  %v13488_v42 = vpack.c.bf16 %v3182_v32, %v3181_v0 }
 0x23f   : > { %v2657_v46 = vpop.f32.mrb[80].mxu0 }
 0x240   : > { %v3055_v4 = vadd.f32 %v16704_v18, %v2657_v46  ;;  %v2659_v14 = vpop.f32.mrb[81].mxu0  ;;  %5119 = vmatprep.mubr.bf16.mxu1 %v13488_v42  ;;  %v14208_v26 = vpack.c.bf16 %v3310_v24, %v3309_v19  ;;  %v16755_v19 = vadd.f32 %v16666_v63, %v631_v39  ;;  %v16758_v24 = vadd.f32 %v16666_v63, %v632_v60  ;;  %v499_v46 = vld [vmem:[%s15770_s28 + $0x328] sm:$0xff] }
 0x241   : > { %v2660_v55 = vpop.f32.mrb[82].mxu0  ;;  %v633_v39 = vmul.f32 %v16652_v10, %v498_v61  ;;  %v634_v60 = vmul.f32 %v16652_v10, %v499_v46  ;;  %v500_v46 = vld [vmem:[%s15770_s28 + $0x330] sm:$0xff] }
 0x242   : > { %v3183_v0 = vmax.f32 %v3055_v4, 0.0  ;;  %v3056_v32 = vadd.f32 %v16704_v18, %v2660_v55  ;;  %v2662_v62 = vpop.f32.mrb[83].mxu0  ;;  %14209 = vmatmul.mubr.msk.bf16.gmra.mrb[76].mxu1 %vm15828_vm1, %v14208_v26  ;;  %19842 = vst [vmem:[#allocation92_spill] sm:$0xff] %v16755_v19  ;;  %19843 = vst [vmem:[#allocation93_spill] sm:$0xff] %v16758_v24 }
 0x244   : > { %v3184_v42 = vmax.f32 %v3056_v32, 0.0  ;;  %14029 = vmatmul.mubr.msk.bf16.gmra.mrb[188].mxu0 %vm15828_vm1, %v14028_v5  ;;  %v3311_v55 = vrot.slane %v3183_v0, 7  ;;  %v14033_v32 = vpack.c.bf16 %v896_v25, %v895_v1  ;;  %v897_v1 = vrot.slane %v16755_v19, 7 }
 0x245   : > { %2879 = vmatprep.mubr.bf16.mxu0 %v13389_v45  ;;  %v13390_v45 = vpack.c.bf16 %v16758_v24, %v16755_v19  ;;  %v898_v25 = vrot.slane %v16758_v24, 7  ;;  %v15276_v19 = vld [vmem:[#allocation8 + $0xc8] sm:$0xff]  }
 0x246   : > { %v3312_v62 = vrot.slane %v3184_v42, 7  ;;  %v13489_v27 = vpack.c.bf16 %v3184_v42, %v3183_v0  ;;  %10029 = vmatpush1.bf16.msra.mxu1 %v15276_v19 }
 0x247   : > { %v2665_v4 = vpop.f32.mrb[84].mxu0  ;;  %10030 = vmatprep.subr.bf16.mxu1 %v19797_v13 }
 0x248   : > { %v3057_v14 = vadd.f32 %v16704_v18, %v2665_v4  ;;  %v2667_v26 = vpop.f32.mrb[85].mxu0  ;;  %5127 = vmatprep.mubr.bf16.mxu1 %v13489_v27  ;;  %v14213_v5 = vpack.c.bf16 %v3312_v62, %v3311_v55  ;;  %v16775_v55 = vadd.f32 %v16666_v63, %v633_v39  ;;  %v16778_v62 = vadd.f32 %v16666_v63, %v634_v60  ;;  %v501_v4 = vld [vmem:[%s15770_s28 + $0x338] sm:$0xff] }
 0x249   : > { %v2668_v43 = vpop.f32.mrb[86].mxu0  ;;  %v635_v60 = vmul.f32 %v16652_v10, %v500_v46  ;;  %v636_v24 = vmul.f32 %v16652_v10, %v501_v4 }
 0x24a   : > { %v3185_v0 = vmax.f32 %v3057_v14, 0.0  ;;  %v3058_v42 = vadd.f32 %v16704_v18, %v2668_v43  ;;  %v2670_v44 = vpop.f32.mrb[87].mxu0  ;;  %14214 = vmatmul.mubr.msk.bf16.gmra.mrb[80].mxu1 %vm15828_vm1, %v14213_v5  ;;  %19844 = vst [vmem:[#allocation94_spill] sm:$0xff] %v16775_v55  ;;  %19845 = vst [vmem:[#allocation95_spill] sm:$0xff] %v16778_v62  ;;  %v13391_v39 = vpack.c.bf16 %v16778_v62, %v16775_v55 }
 0x24c   : > { %v3186_v27 = vmax.f32 %v3058_v42, 0.0  ;;  %14034 = vmatmul.mubr.msk.bf16.gmra.mrb[192].mxu0 %vm15828_vm1, %v14033_v32  ;;  %v3313_v43 = vrot.slane %v3185_v0, 7  ;;  %v14038_v42 = vpack.c.bf16 %v898_v25, %v897_v1  ;;  %v899_v25 = vrot.slane %v16775_v55, 7 }
 0x24d   : > { %2887 = vmatprep.mubr.bf16.mxu0 %v13390_v45 }
 0x24e   : > { %v3314_v44 = vrot.slane %v3186_v27, 7  ;;  %v13490_v61 = vpack.c.bf16 %v3186_v27, %v3185_v0 }
 0x24f   : > { %v2673_v14 = vpop.f32.mrb[88].mxu0 }
 0x250   : > { %v3059_v26 = vadd.f32 %v16704_v18, %v2673_v14  ;;  %v2675_v5 = vpop.f32.mrb[89].mxu0  ;;  %5135 = vmatprep.mubr.bf16.mxu1 %v13490_v61  ;;  %v14218_v32 = vpack.c.bf16 %v3314_v44, %v3313_v43  ;;  %v900_v43 = vrot.slane %v16778_v62, 7  ;;  %v16796_v44 = vadd.f32 %v16666_v63, %v635_v60  ;;  %v502_v14 = vld [vmem:[%s15770_s28 + $0x340] sm:$0xff] }
 0x251   : > { %v2676_v45 = vpop.f32.mrb[90].mxu0  ;;  %v16799_v61 = vadd.f32 %v16666_v63, %v636_v24  ;;  %v637_v60 = vmul.f32 %v16652_v10, %v502_v14 }
 0x252   : > { %v3187_v17 = vmax.f32 %v3059_v26, 0.0  ;;  %v3060_v0 = vadd.f32 %v16704_v18, %v2676_v45  ;;  %v2678_v27 = vpop.f32.mrb[91].mxu0  ;;  %14219 = vmatmul.mubr.msk.bf16.gmra.mrb[84].mxu1 %vm15828_vm1, %v14218_v32  ;;  %19846 = vst [vmem:[#allocation96_spill] sm:$0xff] %v16796_v44  ;;  %v503_v26 = vld [vmem:[%s15770_s28 + $0x348] sm:$0xff] }
 0x253   : > { %19847 = vst [vmem:[#allocation97_spill] sm:$0xff] %v16799_v61  ;;  %v638_v24 = vmul.f32 %v16652_v10, %v503_v26 }
 0x254   : > { %v3188_v1 = vmax.f32 %v3060_v0, 0.0  ;;  %14039 = vmatmul.mubr.msk.bf16.gmra.mrb[196].mxu0 %vm15828_vm1, %v14038_v42  ;;  %v3315_v46 = vrot.slane %v3187_v17, 7  ;;  %v14043_v0 = vpack.c.bf16 %v900_v43, %v899_v25  ;;  %v901_v25 = vrot.slane %v16796_v44, 7 }
 0x255   : > { %2895 = vmatprep.mubr.bf16.mxu0 %v13391_v39  ;;  %v13392_v39 = vpack.c.bf16 %v16799_v61, %v16796_v44  ;;  %v902_v43 = vrot.slane %v16799_v61, 7 }
 0x256   : > { %v3316_v4 = vrot.slane %v3188_v1, 7  ;;  %v13491_v19 = vpack.c.bf16 %v3188_v1, %v3187_v17 }
 0x257   : > { %v2681_v5 = vpop.f32.mrb[92].mxu0 }
 0x258   : > { %v3061_v32 = vadd.f32 %v16704_v18, %v2681_v5  ;;  %v2683_v42 = vpop.f32.mrb[93].mxu0  ;;  %5143 = vmatprep.mubr.bf16.mxu1 %v13491_v19  ;;  %v14223_v45 = vpack.c.bf16 %v3316_v4, %v3315_v46  ;;  %v16816_v46 = vadd.f32 %v16666_v63, %v637_v60  ;;  %v16819_v4 = vadd.f32 %v16666_v63, %v638_v24  ;;  %v504_v5 = vld [vmem:[%s15770_s28 + $0x350] sm:$0xff] }
 0x259   : > { %v2684_v27 = vpop.f32.mrb[94].mxu0  ;;  %v639_v60 = vmul.f32 %v16652_v10, %v504_v5 }
 0x25a   : > { %v3189_v17 = vmax.f32 %v3061_v32, 0.0  ;;  %v3062_v1 = vadd.f32 %v16704_v18, %v2684_v27  ;;  %v2686_v55 = vpop.f32.mrb[95].mxu0  ;;  %14224 = vmatmul.mubr.msk.bf16.gmra.mrb[88].mxu1 %vm15828_vm1, %v14223_v45  ;;  %19848 = vst [vmem:[#allocation98_spill] sm:$0xff] %v16816_v46  ;;  %19849 = vst [vmem:[#allocation99_spill] sm:$0xff] %v16819_v4  ;;  %v505_v32 = vld [vmem:[%s15770_s28 + $0x358] sm:$0xff] }
 0x25b   : > { %v640_v24 = vmul.f32 %v16652_v10, %v505_v32  ;;  %v506_v32 = vld [vmem:[%s15770_s28 + $0x360] sm:$0xff] }
 0x25c   : > { %v3190_v19 = vmax.f32 %v3062_v1, 0.0  ;;  %14044 = vmatmul.mubr.msk.bf16.gmra.mrb[200].mxu0 %vm15828_vm1, %v14043_v0  ;;  %v3317_v14 = vrot.slane %v3189_v17, 7  ;;  %v14048_v1 = vpack.c.bf16 %v902_v43, %v901_v25  ;;  %v903_v25 = vrot.slane %v16816_v46, 7 }
 0x25d   : > { %2903 = vmatprep.mubr.bf16.mxu0 %v13392_v39  ;;  %v13393_v39 = vpack.c.bf16 %v16819_v4, %v16816_v46  ;;  %v904_v43 = vrot.slane %v16819_v4, 7 }
 0x25e   : > { %v3318_v55 = vrot.slane %v3190_v19, 7  ;;  %v13492_v26 = vpack.c.bf16 %v3190_v19, %v3189_v17 }
 0x25f   : > { %v2689_v42 = vpop.f32.mrb[96].mxu0 }
 0x260   : > { %v3063_v45 = vadd.f32 %v16704_v18, %v2689_v42  ;;  %v2691_v0 = vpop.f32.mrb[97].mxu0  ;;  %5151 = vmatprep.mubr.bf16.mxu1 %v13492_v26  ;;  %v14228_v27 = vpack.c.bf16 %v3318_v55, %v3317_v14  ;;  %v16836_v14 = vadd.f32 %v16666_v63, %v639_v60  ;;  %v16839_v55 = vadd.f32 %v16666_v63, %v640_v24  ;;  %v507_v42 = vld [vmem:[%s15770_s28 + $0x368] sm:$0xff] }
 0x261   : > { %v2692_v44 = vpop.f32.mrb[98].mxu0  ;;  %v641_v60 = vmul.f32 %v16652_v10, %v506_v32  ;;  %v642_v24 = vmul.f32 %v16652_v10, %v507_v42  ;;  %v508_v42 = vld [vmem:[%s15770_s28 + $0x370] sm:$0xff] }
 0x262   : > { %v3191_v17 = vmax.f32 %v3063_v45, 0.0  ;;  %v3064_v19 = vadd.f32 %v16704_v18, %v2692_v44  ;;  %v2694_v61 = vpop.f32.mrb[99].mxu0  ;;  %14229 = vmatmul.mubr.msk.bf16.gmra.mrb[92].mxu1 %vm15828_vm1, %v14228_v27  ;;  %19850 = vst [vmem:[#allocation100_spill] sm:$0xff] %v16836_v14  ;;  %19851 = vst [vmem:[#allocation101_spill] sm:$0xff] %v16839_v55 }
 0x264   : > { %v3192_v26 = vmax.f32 %v3064_v19, 0.0  ;;  %14049 = vmatmul.mubr.msk.bf16.gmra.mrb[204].mxu0 %vm15828_vm1, %v14048_v1  ;;  %v3319_v44 = vrot.slane %v3191_v17, 7  ;;  %v14053_v19 = vpack.c.bf16 %v904_v43, %v903_v25  ;;  %v905_v25 = vrot.slane %v16836_v14, 7 }
 0x265   : > { %2911 = vmatprep.mubr.bf16.mxu0 %v13393_v39  ;;  %v13394_v39 = vpack.c.bf16 %v16839_v55, %v16836_v14  ;;  %v906_v43 = vrot.slane %v16839_v55, 7  ;;  %v15277_v14 = vld [vmem:[#allocation8 + $0xd0] sm:$0xff]  }
 0x266   : > { %v3320_v61 = vrot.slane %v3192_v26, 7  ;;  %v13493_v5 = vpack.c.bf16 %v3192_v26, %v3191_v17  ;;  %10031 = vmatpush1.bf16.msra.mxu1 %v15277_v14 }
 0x267   : > { %v2697_v45 = vpop.f32.mrb[100].mxu0  ;;  %10032 = vmatprep.subr.bf16.mxu1 %v19797_v13 }
 0x268   : > { %v3065_v0 = vadd.f32 %v16704_v18, %v2697_v45  ;;  %v2699_v27 = vpop.f32.mrb[101].mxu0  ;;  %5159 = vmatprep.mubr.bf16.mxu1 %v13493_v5  ;;  %v14233_v1 = vpack.c.bf16 %v3320_v61, %v3319_v44  ;;  %v16856_v44 = vadd.f32 %v16666_v63, %v641_v60  ;;  %v16859_v61 = vadd.f32 %v16666_v63, %v642_v24  ;;  %v509_v45 = vld [vmem:[%s15770_s28 + $0x378] sm:$0xff] }
 0x269   : > { %v2700_v46 = vpop.f32.mrb[102].mxu0  ;;  %v643_v24 = vmul.f32 %v16652_v10, %v508_v42  ;;  %v644_v55 = vmul.f32 %v16652_v10, %v509_v45 }
 0x26a   : > { %v3193_v17 = vmax.f32 %v3065_v0, 0.0  ;;  %v3066_v26 = vadd.f32 %v16704_v18, %v2700_v46  ;;  %v2702_v4 = vpop.f32.mrb[103].mxu0  ;;  %14234 = vmatmul.mubr.msk.bf16.gmra.mrb[96].mxu1 %vm15828_vm1, %v14233_v1  ;;  %19852 = vst [vmem:[#allocation102_spill] sm:$0xff] %v16856_v44  ;;  %19853 = vst [vmem:[#allocation103_spill] sm:$0xff] %v16859_v61  ;;  %v13395_v60 = vpack.c.bf16 %v16859_v61, %v16856_v44 }
 0x26c   : > { %v3194_v5 = vmax.f32 %v3066_v26, 0.0  ;;  %14054 = vmatmul.mubr.msk.bf16.gmra.mrb[208].mxu0 %vm15828_vm1, %v14053_v19  ;;  %v3321_v46 = vrot.slane %v3193_v17, 7  ;;  %v14058_v26 = vpack.c.bf16 %v906_v43, %v905_v25  ;;  %v907_v43 = vrot.slane %v16856_v44, 7 }
 0x26d   : > { %2919 = vmatprep.mubr.bf16.mxu0 %v13394_v39 }
 0x26e   : > { %v3322_v4 = vrot.slane %v3194_v5, 7  ;;  %v13494_v32 = vpack.c.bf16 %v3194_v5, %v3193_v17 }
 0x26f   : > { %v2705_v0 = vpop.f32.mrb[104].mxu0 }
 0x270   : > { %v3067_v27 = vadd.f32 %v16704_v18, %v2705_v0  ;;  %v2707_v1 = vpop.f32.mrb[105].mxu0  ;;  %5167 = vmatprep.mubr.bf16.mxu1 %v13494_v32  ;;  %v14238_v19 = vpack.c.bf16 %v3322_v4, %v3321_v46  ;;  %v908_v46 = vrot.slane %v16859_v61, 7  ;;  %v16877_v4 = vadd.f32 %v16666_v63, %v643_v24  ;;  %v510_v0 = vld [vmem:[%s15770_s28 + $0x380] sm:$0xff] }
 0x271   : > { %v2708_v39 = vpop.f32.mrb[106].mxu0  ;;  %v16880_v32 = vadd.f32 %v16666_v63, %v644_v55  ;;  %v645_v24 = vmul.f32 %v16652_v10, %v510_v0 }
 0x272   : > { %v3195_v62 = vmax.f32 %v3067_v27, 0.0  ;;  %v3068_v17 = vadd.f32 %v16704_v18, %v2708_v39  ;;  %v2710_v5 = vpop.f32.mrb[107].mxu0  ;;  %14239 = vmatmul.mubr.msk.bf16.gmra.mrb[100].mxu1 %vm15828_vm1, %v14238_v19  ;;  %19854 = vst [vmem:[#allocation104_spill] sm:$0xff] %v16877_v4  ;;  %v511_v27 = vld [vmem:[%s15770_s28 + $0x388] sm:$0xff] }
 0x273   : > { %19855 = vst [vmem:[#allocation105_spill] sm:$0xff] %v16880_v32  ;;  %v646_v55 = vmul.f32 %v16652_v10, %v511_v27 }
 0x274   : > { %v3196_v25 = vmax.f32 %v3068_v17, 0.0  ;;  %14059 = vmatmul.mubr.msk.bf16.gmra.mrb[212].mxu0 %vm15828_vm1, %v14058_v26  ;;  %v3323_v42 = vrot.slane %v3195_v62, 7  ;;  %v14063_v17 = vpack.c.bf16 %v908_v46, %v907_v43  ;;  %v909_v43 = vrot.slane %v16877_v4, 7 }
 0x275   : > { %2927 = vmatprep.mubr.bf16.mxu0 %v13395_v60  ;;  %v13396_v60 = vpack.c.bf16 %v16880_v32, %v16877_v4  ;;  %v910_v46 = vrot.slane %v16880_v32, 7  ;;  %v16902_v0 = vadd.f32 %v16666_v63, %v646_v55 }
 0x276   : > { %v3324_v45 = vrot.slane %v3196_v25, 7  ;;  %v13495_v14 = vpack.c.bf16 %v3196_v25, %v3195_v62 }
 0x277   : > { %v2713_v1 = vpop.f32.mrb[108].mxu0  ;;  %19857 = vst [vmem:[#allocation107_spill] sm:$0xff] %v16902_v0 }
 0x278   : > { %v3069_v19 = vadd.f32 %v16704_v18, %v2713_v1  ;;  %v2715_v26 = vpop.f32.mrb[109].mxu0  ;;  %5175 = vmatprep.mubr.bf16.mxu1 %v13495_v14  ;;  %v14243_v39 = vpack.c.bf16 %v3324_v45, %v3323_v42  ;;  %v16899_v45 = vadd.f32 %v16666_v63, %v645_v24  ;;  %v14068_v24 = vpack.c.bf16 %v910_v46, %v909_v43 }
 0x279   : > { %v2716_v5 = vpop.f32.mrb[110].mxu0  ;;  %v912_v46 = vrot.slane %v16902_v0, 7 }
 0x27a   : > { %v3197_v61 = vmax.f32 %v3069_v19, 0.0  ;;  %v3070_v62 = vadd.f32 %v16704_v18, %v2716_v5  ;;  %v2718_v25 = vpop.f32.mrb[111].mxu0  ;;  %14244 = vmatmul.mubr.msk.bf16.gmra.mrb[104].mxu1 %vm15828_vm1, %v14243_v39  ;;  %19856 = vst [vmem:[#allocation106_spill] sm:$0xff] %v16899_v45  ;;  %v512_v39 = vld [vmem:[%s15770_s28 + $0x390] sm:$0xff]  ;;  %v513_v5 = vld [vmem:[%s15770_s28 + $0x398] sm:$0xff]  ;;  %v13397_v55 = vpack.c.bf16 %v16902_v0, %v16899_v45  ;;  %v911_v43 = vrot.slane %v16899_v45, 7 }
 0x27b   : > { %v647_v33 = vmul.f32 %v16652_v10, %v512_v39 }
 0x27c   : > { %v3198_v14 = vmax.f32 %v3070_v62, 0.0  ;;  %14064 = vmatmul.mubr.msk.bf16.gmra.mrb[216].mxu0 %vm15828_vm1, %v14063_v17  ;;  %v3325_v27 = vrot.slane %v3197_v61, 7 }
 0x27d   : > { %v16896_v42 = vpop.f32.mrb[0].mxu1  ;;  %2935 = vmatprep.mubr.bf16.mxu0 %v13396_v60 }
 0x27e   : > { %v3326_v1 = vrot.slane %v3198_v14, 7  ;;  %v4971_v19 = vpop.f32.mrb[1].mxu1  ;;  %v13496_v26 = vpack.c.bf16 %v3198_v14, %v3197_v61  ;;  %v648_v61 = vmul.f32 %v16652_v10, %v513_v5 }
 0x27f   : > { %v2721_v17 = vpop.f32.mrb[112].mxu0  ;;  %v16906_v62 = vpop.f32.mrb[2].mxu1 }
 0x280   : > { %v3071_v25 = vadd.f32 %v16704_v18, %v2721_v17  ;;  %v2723_v4 = vpop.f32.mrb[113].mxu0  ;;  %v4974_v32 = vpop.f32.mrb[3].mxu1  ;;  %5183 = vmatprep.mubr.bf16.mxu1 %v13496_v26  ;;  %v14248_v60 = vpack.c.bf16 %v3326_v1, %v3325_v27  ;;  %v16923_v1 = vadd.f32 %v16666_v63, %v647_v33  ;;  %v514_v17 = vld [vmem:[%s15770_s28 + $0x3a0] sm:$0xff] }
 0x281   : > { %v2724_v44 = vpop.f32.mrb[114].mxu0 }
 0x282   : > { %v3072_v14 = vadd.f32 %v16704_v18, %v2724_v44  ;;  %v2726_v19 = vpop.f32.mrb[115].mxu0  ;;  %14249 = vmatmul.mubr.msk.bf16.gmra.mrb[108].mxu1 %vm15828_vm1, %v14248_v60  ;;  %v3199_v4 = vmax.f32 %v3071_v25, 0.0  ;;  %19858 = vst [vmem:[#allocation108_spill] sm:$0xff] %v16923_v1  ;;  %v16926_v44 = vadd.f32 %v16666_v63, %v648_v61  ;;  %v515_v25 = vld [vmem:[%s15770_s28 + $0x3a8] sm:$0xff] }
 0x284   : > { %v3200_v32 = vmax.f32 %v3072_v14, 0.0  ;;  %14069 = vmatmul.mubr.msk.bf16.gmra.mrb[220].mxu0 %vm15828_vm1, %v14068_v24  ;;  %19859 = vst [vmem:[#allocation109_spill] sm:$0xff] %v16926_v44  ;;  %v3327_v60 = vrot.slane %v3199_v4, 7  ;;  %v13398_v61 = vpack.c.bf16 %v16926_v44, %v16923_v1 }
 0x285   : > { %v16920_v27 = vpop.f32.mrb[4].mxu1  ;;  %2943 = vmatprep.mubr.bf16.mxu0 %v13397_v55  ;;  %v14073_v55 = vpack.c.bf16 %v912_v46, %v911_v43  ;;  %v914_v43 = vrot.slane %v16926_v44, 7 }
 0x286   : > { %v3328_v26 = vrot.slane %v3200_v32, 7  ;;  %v4979_v39 = vpop.f32.mrb[5].mxu1  ;;  %v13497_v5 = vpack.c.bf16 %v3200_v32, %v3199_v4  ;;  %v650_v32 = vmul.f32 %v16652_v10, %v515_v25  ;;  %v516_v25 = vld [vmem:[%s15770_s28 + $0x3b0] sm:$0xff] }
 0x287   : > { %v2729_v24 = vpop.f32.mrb[116].mxu0  ;;  %v16930_v14 = vpop.f32.mrb[6].mxu1  ;;  %v649_v39 = vmul.f32 %v16652_v10, %v514_v17 }
 0x288   : > { %v3073_v19 = vadd.f32 %v16704_v18, %v2729_v24  ;;  %v2731_v0 = vpop.f32.mrb[117].mxu0  ;;  %v4982_v45 = vpop.f32.mrb[7].mxu1  ;;  %5191 = vmatprep.mubr.bf16.mxu1 %v13497_v5  ;;  %v14253_v47 = vpack.c.bf16 %v3328_v26, %v3327_v60  ;;  %v517_v60 = vld [vmem:[%s15770_s28 + $0x3b8] sm:$0xff] }
 0x289   : > { %v2732_v33 = vpop.f32.mrb[118].mxu0  ;;  %v913_v0 = vrot.slane %v16923_v1, 7  ;;  %v16947_v26 = vadd.f32 %v16666_v63, %v649_v39  ;;  %v15278_v39 = vld [vmem:[#allocation8 + $0xd8] sm:$0xff]  }
 0x28a   : > { %v3074_v4 = vadd.f32 %v16704_v18, %v2732_v33  ;;  %v2734_v54 = vpop.f32.mrb[119].mxu0  ;;  %v3201_v28 = vmax.f32 %v3073_v19, 0.0  ;;  %14254 = vmatmul.mubr.msk.bf16.gmra.mrb[112].mxu1 %vm15828_vm1, %v14253_v47 }
 0x28b   : > { %19860 = vst [vmem:[#allocation110_spill] sm:$0xff] %v16947_v26  ;;  %v16950_v54 = vadd.f32 %v16666_v63, %v650_v32  ;;  %10033 = vmatpush1.bf16.msra.mxu1 %v15278_v39 }
 0x28c   : > { %v3202_v45 = vmax.f32 %v3074_v4, 0.0  ;;  %14074 = vmatmul.mubr.msk.bf16.gmra.mrb[224].mxu0 %vm15828_vm1, %v14073_v55  ;;  %v3329_v24 = vrot.slane %v3201_v28, 7  ;;  %10034 = vmatprep.subr.bf16.mxu1 %v19797_v13 }
 0x28d   : > { %v16944_v46 = vpop.f32.mrb[8].mxu1  ;;  %2951 = vmatprep.mubr.bf16.mxu0 %v13398_v61  ;;  %19861 = vst [vmem:[#allocation111_spill] sm:$0xff] %v16950_v54  ;;  %v14078_v61 = vpack.c.bf16 %v914_v43, %v913_v0  ;;  %v13399_v32 = vpack.c.bf16 %v16950_v54, %v16947_v26  ;;  %v915_v0 = vrot.slane %v16947_v26, 7  ;;  %v916_v43 = vrot.slane %v16950_v54, 7 }
 0x28e   : > { %v3330_v5 = vrot.slane %v3202_v45, 7  ;;  %v4987_v17 = vpop.f32.mrb[9].mxu1  ;;  %v13498_v47 = vpack.c.bf16 %v3202_v45, %v3201_v28  ;;  %v651_v45 = vmul.f32 %v16652_v10, %v516_v25 }
 0x28f   : > { %v2737_v19 = vpop.f32.mrb[120].mxu0  ;;  %v16954_v55 = vpop.f32.mrb[10].mxu1  ;;  %v652_v17 = vmul.f32 %v16652_v10, %v517_v60  ;;  %v518_v60 = vld [vmem:[%s15770_s28 + $0x3c0] sm:$0xff] }
 0x290   : > { %v3075_v33 = vadd.f32 %v16704_v18, %v2737_v19  ;;  %v2739_v4 = vpop.f32.mrb[121].mxu0  ;;  %v4990_v1 = vpop.f32.mrb[11].mxu1  ;;  %5199 = vmatprep.mubr.bf16.mxu1 %v13498_v47  ;;  %v14258_v29 = vpack.c.bf16 %v3330_v5, %v3329_v24  ;;  %v519_v24 = vld [vmem:[%s15770_s28 + $0x3c8] sm:$0xff] }
 0x291   : > { %v2740_v44 = vpop.f32.mrb[122].mxu0 }
 0x292   : > { %v3076_v28 = vadd.f32 %v16704_v18, %v2740_v44  ;;  %v2742_v6 = vpop.f32.mrb[123].mxu0  ;;  %v3203_v19 = vmax.f32 %v3075_v33, 0.0  ;;  %14259 = vmatmul.mubr.msk.bf16.gmra.mrb[116].mxu1 %vm15828_vm1, %v14258_v29  ;;  %v16975_v44 = vadd.f32 %v16666_v63, %v652_v17 }
 0x293   : > { %v16972_v6 = vadd.f32 %v16666_v63, %v651_v45 }
 0x294   : > { %v3204_v1 = vmax.f32 %v3076_v28, 0.0  ;;  %14079 = vmatmul.mubr.msk.bf16.gmra.mrb[228].mxu0 %vm15828_vm1, %v14078_v61  ;;  %19863 = vst [vmem:[#allocation113_spill] sm:$0xff] %v16975_v44  ;;  %v3331_v33 = vrot.slane %v3203_v19, 7 }
 0x295   : > { %v16969_v5 = vpop.f32.mrb[12].mxu1  ;;  %2959 = vmatprep.mubr.bf16.mxu0 %v13399_v32  ;;  %19862 = vst [vmem:[#allocation112_spill] sm:$0xff] %v16972_v6  ;;  %v14083_v32 = vpack.c.bf16 %v916_v43, %v915_v0  ;;  %v13400_v17 = vpack.c.bf16 %v16975_v44, %v16972_v6  ;;  %v917_v0 = vrot.slane %v16972_v6, 7  ;;  %v918_v43 = vrot.slane %v16975_v44, 7 }
 0x296   : > { %v3332_v29 = vrot.slane %v3204_v1, 7  ;;  %v4995_v47 = vpop.f32.mrb[13].mxu1  ;;  %v13499_v25 = vpack.c.bf16 %v3204_v1, %v3203_v19  ;;  %v654_v1 = vmul.f32 %v16652_v10, %v519_v24 }
 0x297   : > { %v2745_v4 = vpop.f32.mrb[124].mxu0  ;;  %v16979_v61 = vpop.f32.mrb[14].mxu1  ;;  %v653_v47 = vmul.f32 %v16652_v10, %v518_v60 }
 0x298   : > { %v3077_v39 = vadd.f32 %v16704_v18, %v2745_v4  ;;  %v2747_v28 = vpop.f32.mrb[125].mxu0  ;;  %v4998_v26 = vpop.f32.mrb[15].mxu1  ;;  %5207 = vmatprep.mubr.bf16.mxu1 %v13499_v25  ;;  %v14263_v54 = vpack.c.bf16 %v3332_v29, %v3331_v33  ;;  %v520_v33 = vld [vmem:[%s15770_s28 + $0x3d0] sm:$0xff]  ;;  %v521_v4 = vld [vmem:[%s15770_s28 + $0x3d8] sm:$0xff] }
 0x299   : > { %v2748_v45 = vpop.f32.mrb[126].mxu0  ;;  %v16996_v25 = vadd.f32 %v16666_v63, %v653_v47 }
 0x29a   : > { %v3078_v19 = vadd.f32 %v16704_v18, %v2748_v45  ;;  %v2750_v9 = vpop.f32.mrb[127].mxu0  ;;  %v3205_v48 = vmax.f32 %v3077_v39, 0.0  ;;  %14264 = vmatmul.mubr.msk.bf16.gmra.mrb[120].mxu1 %vm15828_vm1, %v14263_v54 }
 0x29b   : > { %19864 = vst [vmem:[#allocation114_spill] sm:$0xff] %v16996_v25  ;;  %v16999_v9 = vadd.f32 %v16666_v63, %v654_v1 }
 0x29c   : > { %v3206_v26 = vmax.f32 %v3078_v19, 0.0  ;;  %14084 = vmatmul.mubr.msk.bf16.gmra.mrb[232].mxu0 %vm15828_vm1, %v14083_v32  ;;  %v3333_v39 = vrot.slane %v3205_v48, 7 }
 0x29d   : > { %v16993_v29 = vpop.f32.mrb[16].mxu1  ;;  %2967 = vmatprep.mubr.bf16.mxu0 %v13400_v17  ;;  %19865 = vst [vmem:[#allocation115_spill] sm:$0xff] %v16999_v9  ;;  %v14088_v17 = vpack.c.bf16 %v918_v43, %v917_v0  ;;  %v13401_v1 = vpack.c.bf16 %v16999_v9, %v16996_v25  ;;  %v919_v0 = vrot.slane %v16996_v25, 7  ;;  %v920_v43 = vrot.slane %v16999_v9, 7 }
 0x29e   : > { %v3334_v60 = vrot.slane %v3206_v26, 7  ;;  %v5003_v24 = vpop.f32.mrb[17].mxu1  ;;  %v13500_v54 = vpack.c.bf16 %v3206_v26, %v3205_v48  ;;  %v656_v26 = vmul.f32 %v16652_v10, %v521_v4 }
 0x29f   : > { %v2753_v28 = vpop.f32.mrb[128].mxu0  ;;  %v17003_v32 = vpop.f32.mrb[18].mxu1  ;;  %v655_v24 = vmul.f32 %v16652_v10, %v520_v33 }
 0x2a0   : > { %v3079_v45 = vadd.f32 %v16704_v18, %v2753_v28  ;;  %v2755_v19 = vpop.f32.mrb[129].mxu0  ;;  %v5006_v6 = vpop.f32.mrb[19].mxu1  ;;  %5215 = vmatprep.mubr.bf16.mxu1 %v13500_v54  ;;  %v14268_v44 = vpack.c.bf16 %v3334_v60, %v3333_v39  ;;  %v522_v39 = vld [vmem:[%s15770_s28 + $0x3e0] sm:$0xff]  ;;  %v523_v28 = vld [vmem:[%s15770_s28 + $0x3e8] sm:$0xff] }
 0x2a1   : > { %v2756_v47 = vpop.f32.mrb[130].mxu0  ;;  %v17020_v54 = vadd.f32 %v16666_v63, %v655_v24 }
 0x2a2   : > { %v3080_v48 = vadd.f32 %v16704_v18, %v2756_v47  ;;  %v2758_v53 = vpop.f32.mrb[131].mxu0  ;;  %v3207_v30 = vmax.f32 %v3079_v45, 0.0  ;;  %14269 = vmatmul.mubr.msk.bf16.gmra.mrb[124].mxu1 %vm15828_vm1, %v14268_v44 }
 0x2a3   : > { %19866 = vst [vmem:[#allocation116_spill] sm:$0xff] %v17020_v54  ;;  %v17023_v53 = vadd.f32 %v16666_v63, %v656_v26 }
 0x2a4   : > { %v3208_v6 = vmax.f32 %v3080_v48, 0.0  ;;  %14089 = vmatmul.mubr.msk.bf16.gmra.mrb[236].mxu0 %vm15828_vm1, %v14088_v17  ;;  %v3335_v45 = vrot.slane %v3207_v30, 7 }
 0x2a5   : > { %v17017_v60 = vpop.f32.mrb[20].mxu1  ;;  %2975 = vmatprep.mubr.bf16.mxu0 %v13401_v1  ;;  %19867 = vst [vmem:[#allocation117_spill] sm:$0xff] %v17023_v53  ;;  %v14093_v1 = vpack.c.bf16 %v920_v43, %v919_v0  ;;  %v13402_v26 = vpack.c.bf16 %v17023_v53, %v17020_v54  ;;  %v921_v0 = vrot.slane %v17020_v54, 7  ;;  %v922_v43 = vrot.slane %v17023_v53, 7 }
 0x2a6   : > { %v3336_v33 = vrot.slane %v3208_v6, 7  ;;  %v5011_v4 = vpop.f32.mrb[21].mxu1  ;;  %v13501_v44 = vpack.c.bf16 %v3208_v6, %v3207_v30  ;;  %v658_v6 = vmul.f32 %v16652_v10, %v523_v28 }
 0x2a7   : > { %v2761_v19 = vpop.f32.mrb[132].mxu0  ;;  %v17027_v17 = vpop.f32.mrb[22].mxu1  ;;  %v657_v4 = vmul.f32 %v16652_v10, %v522_v39 }
 0x2a8   : > { %v3081_v47 = vadd.f32 %v16704_v18, %v2761_v19  ;;  %v2763_v48 = vpop.f32.mrb[133].mxu0  ;;  %v5014_v25 = vpop.f32.mrb[23].mxu1  ;;  %5223 = vmatprep.mubr.bf16.mxu1 %v13501_v44  ;;  %v14273_v9 = vpack.c.bf16 %v3336_v33, %v3335_v45  ;;  %v524_v45 = vld [vmem:[%s15770_s28 + $0x3f0] sm:$0xff]  ;;  %v525_v19 = vld [vmem:[%s15770_s28 + $0x3f8] sm:$0xff]  ;;  %s12561_s28 = sshll.u32 %s19319_s24, 4  ;;  %s19484_s28 = int_to_ptr.vmem [resolvable:$true] %s12561_s28 }
 0x2a9   : > { %v2764_v24 = vpop.f32.mrb[134].mxu0  ;;  %v17044_v44 = vadd.f32 %v16666_v63, %v657_v4  ;;  %v15279_v4 = vld [vmem:[#allocation8 + $0xe0] sm:$0xff]   ;;  %s15426_s20 = scalar_lea.vmem %s19484_s28, 2048  ;;  %p15433_p12 = scmp.lt.s32.totalorder %s19484_s28, %s15431_s30 }
 0x2aa   : > { %v3082_v30 = vadd.f32 %v16704_v18, %v2764_v24  ;;  %v2766_v31 = vpop.f32.mrb[135].mxu0  ;;  %v3209_v11 = vmax.f32 %v3081_v47, 0.0  ;;  %14274 = vmatmul.mubr.msk.bf16.gmra.mrb[128].mxu1 %vm15828_vm1, %v14273_v9  ;;  %p15427_p10 = scmp.ne.s32.totalorder %s19484_s28, %s15426_s20  ;;  %p15434_p1 = scmp.lt.s32.totalorder %s15432_s25, %s15426_s20 }
 0x2ab   : > { %19868 = vst [vmem:[#allocation118_spill] sm:$0xff] %v17044_v44  ;;  %v17047_v31 = vadd.f32 %v16666_v63, %v658_v6  ;;  %v659_v6 = vmul.f32 %v16652_v10, %v524_v45  ;;  %10035 = vmatpush1.bf16.msra.mxu1 %v15279_v4  ;;  %v923_v10 = vrot.slane %v17044_v44, 7  ;;  %v17080_v45 = vld [vmem:[%s19538_s6] ss:$0 sm:$0xff] }
 0x2ac   : > { %v3210_v25 = vmax.f32 %v3082_v30, 0.0  ;;  %14094 = vmatmul.mubr.msk.bf16.gmra.mrb[240].mxu0 %vm15828_vm1, %v14093_v1  ;;  %v3337_v47 = vrot.slane %v3209_v11, 7  ;;  %10036 = vmatprep.subr.bf16.mxu1 %v19797_v13  ;;  %p15428_p3 = pnand %p15427_p10, %p15718_p5  ;;  %p15435_p2 = por %p15434_p1, %p15433_p12 }
 0x2ad   : > { %v17041_v33 = vpop.f32.mrb[24].mxu1  ;;  %2983 = vmatprep.mubr.bf16.mxu0 %v13402_v26  ;;  %19869 = vst [vmem:[#allocation119_spill] sm:$0xff] %v17047_v31  ;;  %v14098_v26 = vpack.c.bf16 %v922_v43, %v921_v0  ;;  %v13403_v63 = vpack.c.bf16 %v17047_v31, %v17044_v44  ;;  %v924_v43 = vrot.slane %v17047_v31, 7 }
 0x2ae   : > { %v3338_v39 = vrot.slane %v3210_v25, 7  ;;  %v5019_v28 = vpop.f32.mrb[25].mxu1  ;;  %v13502_v9 = vpack.c.bf16 %v3210_v25, %v3209_v11  ;;  %v15296_v11 = vld [vmem:[%s19533_s1] ss:$0 sm:$0xff]  ;;  %p15429_p7 = pneg %p15428_p3 }
 0x2af   : > { %v2769_v48 = vpop.f32.mrb[136].mxu0  ;;  %v17051_v1 = vpop.f32.mrb[26].mxu1  ;;  %v660_v25 = vmul.f32 %v15296_v11, %v525_v19 }
 0x2b0   : > { %v3083_v24 = vadd.f32 %v16704_v18, %v2769_v48  ;;  %v2771_v30 = vpop.f32.mrb[137].mxu0  ;;  %v5022_v53 = vpop.f32.mrb[27].mxu1  ;;  %5231 = vmatprep.mubr.bf16.mxu1 %v13502_v9  ;;  %v14278_v12 = vpack.c.bf16 %v3338_v39, %v3337_v47  ;;  %p15436_p4 = pnand %p15435_p2, %p15429_p7 }
 0x2b1   : > { %v2772_v54 = vpop.f32.mrb[138].mxu0  ;;  %v5488_v30 = vadd.f32 %v17080_v45, %v16906_v62 }
 0x2b2   : > { %v3084_v28 = vadd.f32 %v16704_v18, %v2772_v54  ;;  %v2774_v48 = vpop.f32.mrb[139].mxu0  ;;  %v3211_v53 = vmax.f32 %v3083_v24, 0.0  ;;  %14279 = vmatmul.mubr.msk.bf16.gmra.mrb[132].mxu1 %vm15828_vm1, %v14278_v12  ;;  %v15297_v54 = vld [vmem:[%s19534_s2] ss:$0 sm:$0xff] }
 0x2b3   : > { %v17073_v9 = vadd.f32 %v15297_v54, %v659_v6  ;;  %v17075_v12 = vadd.f32 %v15297_v54, %v660_v25  ;;  %v5487_v48 = vadd.f32 %v17080_v45, %v16896_v42 }
 0x2b4   : > { %v3212_v0 = vmax.f32 %v3084_v28, 0.0  ;;  %14099 = vmatmul.mubr.msk.bf16.gmra.mrb[244].mxu0 %vm15828_vm1, %v14098_v26  ;;  %v3339_v26 = vrot.slane %v3211_v53, 7  ;;  %v14103_v28 = vpack.c.bf16 %v924_v43, %v923_v10 }
 0x2b5   : > { %v17068_v39 = vpop.f32.mrb[28].mxu1  ;;  %2991 = vmatprep.mubr.bf16.mxu0 %v13403_v63  ;;  %v925_v42 = vrot.slane %v17073_v9, 7  ;;  %v926_v10 = vrot.slane %v17075_v12, 7  ;;  %v5615_v43 = vadd.f32 %v5487_v48, %v15806_v15 }
 0x2b6   : > { %v3340_v19 = vrot.slane %v3212_v0, 7  ;;  %v5027_v47 = vpop.f32.mrb[29].mxu1  ;;  %v13503_v24 = vpack.c.bf16 %v3212_v0, %v3211_v53  ;;  %v13404_v0 = vpack.c.bf16 %v17075_v12, %v17073_v9 }
 0x2b7   : > { %v2777_v4 = vpop.f32.mrb[140].mxu0  ;;  %v17084_v63 = vpop.f32.mrb[30].mxu1  ;;  %v5616_v47 = vadd.f32 %v5488_v30, %v15809_v16  ;;  %v14108_v15 = vpack.c.bf16 %v926_v10, %v925_v42  ;;  %v17109_v48 = vmax.f32 %v5615_v43, 0.0 }
 0x2b8   : > { %v3085_v6 = vadd.f32 %v16704_v18, %v2777_v4  ;;  %v2779_v11 = vpop.f32.mrb[141].mxu0  ;;  %v5030_v25 = vpop.f32.mrb[31].mxu1  ;;  %5239 = vmatprep.mubr.bf16.mxu1 %v13503_v24  ;;  %v14283_v44 = vpack.c.bf16 %v3340_v19, %v3339_v26 }
 0x2b9   : > { %v2780_v54 = vpop.f32.mrb[142].mxu0  ;;  %v17102_v30 = vmax.f32 %v5616_v47, 0.0 }
 0x2ba   : > { %v3086_v62 = vadd.f32 %v16704_v18, %v2780_v54  ;;  %v2782_v53 = vpop.f32.mrb[143].mxu0  ;;  %v3213_v31 = vmax.f32 %v3085_v6, 0.0  ;;  %14284 = vmatmul.mubr.msk.bf16.gmra.mrb[136].mxu1 %vm15828_vm1, %v14283_v44  ;;  %v5490_v44 = vadd.f32 %v17080_v45, %v16930_v14  ;;  %v17116_v14 = vld [vmem:[%s19536_s4] ss:$0 sm:$0xff] }
 0x2bb   : > { %v13597_v42 = vpack.c.bf16 %v17102_v30, %v17109_v48 }
 0x2bc   : > { %v3214_v4 = vmax.f32 %v3086_v62, 0.0  ;;  %14104 = vmatmul.mubr.msk.bf16.gmra.mrb[248].mxu0 %vm15828_vm1, %v14103_v28  ;;  %v3341_v6 = vrot.slane %v3213_v31, 7 }
 0x2bd   : > { %v17100_v19 = vpop.f32.mrb[32].mxu1  ;;  %2999 = vmatprep.mubr.bf16.mxu0 %v13404_v0  ;;  %v5489_v0 = vadd.f32 %v17080_v45, %v16920_v27 }
 0x2be   : > { %v3342_v24 = vrot.slane %v3214_v4, 7  ;;  %v5035_v26 = vpop.f32.mrb[33].mxu1  ;;  %v13504_v16 = vpack.c.bf16 %v3214_v4, %v3213_v31 }
 0x2bf   : > { %v2785_v11 = vpop.f32.mrb[144].mxu0  ;;  %v17106_v25 = vpop.f32.mrb[34].mxu1  ;;  %v5617_v10 = vadd.f32 %v5489_v0, %v15835_v37 }
 0x2c0   : > { %v3087_v28 = vadd.f32 %v16704_v18, %v2785_v11  ;;  %v2787_v54 = vpop.f32.mrb[145].mxu0  ;;  %v5038_v62 = vpop.f32.mrb[35].mxu1  ;;  %5247 = vmatprep.mubr.bf16.mxu1 %v13504_v16  ;;  %v14288_v47 = vpack.c.bf16 %v3342_v24, %v3341_v6  ;;  %v5618_v18 = vadd.f32 %v5490_v44, %v15838_v38  ;;  %v5872_v24 = vrot.slane %v17102_v30, 7 }
 0x2c1   : > { %v2788_v53 = vpop.f32.mrb[146].mxu0  ;;  %v5492_v11 = vadd.f32 %v17080_v45, %v16954_v55 }
 0x2c2   : > { %v3088_v31 = vadd.f32 %v17116_v14, %v2788_v53  ;;  %v2790_v4 = vpop.f32.mrb[147].mxu0  ;;  %v3215_v26 = vmax.f32 %v3087_v28, 0.0  ;;  %14289 = vmatmul.mubr.msk.bf16.gmra.mrb[140].mxu1 %vm15828_vm1, %v14288_v47  ;;  %v17130_v6 = vmax.f32 %v5618_v18, 0.0  ;;  %v17138_v47 = vmax.f32 %v5617_v10, 0.0 }
 0x2c4   : > { %v3216_v27 = vmax.f32 %v3088_v31, 0.0  ;;  %14109 = vmatmul.mubr.msk.bf16.gmra.mrb[252].mxu0 %vm15828_vm1, %v14108_v15  ;;  %19870 = vst [vmem:[#allocation120_spill] sm:$0xff] %v17130_v6  ;;  %v3343_v28 = vrot.slane %v3215_v26, 7  ;;  %v5871_v15 = vrot.slane %v17109_v48, 7  ;;  %v5491_v31 = vadd.f32 %v17080_v45, %v16944_v46 }
 0x2c5   : > { %v17127_v43 = vpop.f32.mrb[36].mxu1  ;;  %7568 = vmatprep.mubr.bf16.mxu0 %v13597_v42 }
 0x2c6   : > { %v3344_v16 = vrot.slane %v3216_v27, 7  ;;  %v5043_v38 = vpop.f32.mrb[37].mxu1  ;;  %v13505_v44 = vpack.c.bf16 %v3216_v27, %v3215_v26  ;;  %v14433_v42 = vpack.c.bf16 %v5872_v24, %v5871_v15  ;;  %v5620_v27 = vadd.f32 %v5492_v11, %v15856_v50 }
 0x2c7   : > { %v2793_v54 = vpop.f32.mrb[148].mxu0  ;;  %v17134_v62 = vpop.f32.mrb[38].mxu1  ;;  %v5619_v46 = vadd.f32 %v5491_v31, %v15853_v49  ;;  %v5874_v24 = vrot.slane %v17130_v6, 7  ;;  %v5494_v15 = vadd.f32 %v17080_v45, %v16979_v61 }
 0x2c8   : > { %v3089_v37 = vadd.f32 %v17116_v14, %v2793_v54  ;;  %v2795_v0 = vpop.f32.mrb[149].mxu0  ;;  %v5046_v53 = vpop.f32.mrb[39].mxu1  ;;  %5255 = vmatprep.mubr.bf16.mxu1 %v13505_v44  ;;  %v14293_v18 = vpack.c.bf16 %v3344_v16, %v3343_v28  ;;  %v13598_v44 = vpack.c.bf16 %v17130_v6, %v17138_v47  ;;  %v17154_v54 = vmax.f32 %v5620_v27, 0.0 }
 0x2c9   : > { %v2796_v4 = vpop.f32.mrb[150].mxu0 }
 0x2ca   : > { %v3090_v55 = vadd.f32 %v17116_v14, %v2796_v4  ;;  %v2798_v26 = vpop.f32.mrb[151].mxu0  ;;  %v3217_v38 = vmax.f32 %v3089_v37, 0.0  ;;  %14294 = vmatmul.mubr.msk.bf16.gmra.mrb[144].mxu1 %vm15828_vm1, %v14293_v18  ;;  %v5873_v4 = vrot.slane %v17138_v47, 7 }
 0x2cb   : > { %v5493_v26 = vadd.f32 %v17080_v45, %v16969_v5 }
 0x2cc   : > { %v3218_v10 = vmax.f32 %v3090_v55, 0.0  ;;  %14434 = vmatmul.mubr.msk.bf16.vlgmr.msra.gmra.mrb[0].mxu0 %vm15828_vm1, %v14433_v42  ;;  %v3345_v37 = vrot.slane %v3217_v38, 7  ;;  %v15280_v42 = vld [vmem:[#allocation8 + $0xe8] sm:$0xff]   ;;  %v17162_v55 = vmax.f32 %v5619_v46, 0.0  ;;  %v14438_v61 = vpack.c.bf16 %v5874_v24, %v5873_v4 }
 0x2cd   : > { %v17151_v16 = vpop.f32.mrb[40].mxu1  ;;  %7576 = vmatprep.mubr.bf16.mxu0 %v13598_v44  ;;  %10037 = vmatpush1.bf16.msra.mxu1 %v15280_v42  ;;  %v5621_v5 = vadd.f32 %v5493_v26, %v15869_v58  ;;  %v5496_v4 = vadd.f32 %v17080_v45, %v17003_v32 }
 0x2ce   : > { %v3346_v28 = vrot.slane %v3218_v10, 7  ;;  %v5051_v50 = vpop.f32.mrb[41].mxu1  ;;  %v13506_v11 = vpack.c.bf16 %v3218_v10, %v3217_v38  ;;  %v13599_v46 = vpack.c.bf16 %v17154_v54, %v17162_v55  ;;  %10038 = vmatprep.subr.bf16.mxu1 %v19797_v13  ;;  %v5875_v42 = vrot.slane %v17162_v55, 7 }
 0x2cf   : > { %v2801_v0 = vpop.f32.mrb[152].mxu0  ;;  %v17158_v53 = vpop.f32.mrb[42].mxu1  ;;  %v5622_v50 = vadd.f32 %v5494_v15, %v15872_v59  ;;  %v5876_v59 = vrot.slane %v17154_v54, 7 }
 0x2d0   : > { %v3091_v49 = vadd.f32 %v17116_v14, %v2801_v0  ;;  %v2803_v31 = vpop.f32.mrb[153].mxu0  ;;  %v5054_v18 = vpop.f32.mrb[43].mxu1  ;;  %5263 = vmatprep.mubr.bf16.mxu1 %v13506_v11  ;;  %v14298_v44 = vpack.c.bf16 %v3346_v28, %v3345_v37 }
 0x2d1   : > { %v2804_v27 = vpop.f32.mrb[154].mxu0  ;;  %v17179_v0 = vmax.f32 %v5622_v50, 0.0  ;;  %v14443_v50 = vpack.c.bf16 %v5876_v59, %v5875_v42 }
 0x2d2   : > { %v3092_v38 = vadd.f32 %v17116_v14, %v2804_v27  ;;  %v2806_v10 = vpop.f32.mrb[155].mxu0  ;;  %v3219_v6 = vmax.f32 %v3091_v49, 0.0  ;;  %14299 = vmatmul.mubr.msk.bf16.gmra.mrb[148].mxu1 %vm15828_vm1, %v14298_v44  ;;  %v17187_v44 = vmax.f32 %v5621_v5, 0.0 }
 0x2d3   : > { %v5878_v59 = vrot.slane %v17179_v0, 7 }
 0x2d4   : > { %v3220_v11 = vmax.f32 %v3092_v38, 0.0  ;;  %14439 = vmatmul.mubr.msk.bf16.gmra.mrb[4].mxu0 %vm15828_vm1, %v14438_v61  ;;  %v3347_v49 = vrot.slane %v3219_v6, 7  ;;  %v5495_v61 = vadd.f32 %v17080_v45, %v16993_v29 }
 0x2d5   : > { %v17176_v24 = vpop.f32.mrb[44].mxu1  ;;  %7584 = vmatprep.mubr.bf16.mxu0 %v13599_v46  ;;  %v5624_v46 = vadd.f32 %v5496_v4, %v15890_v8 }
 0x2d6   : > { %v3348_v28 = vrot.slane %v3220_v11, 7  ;;  %v5059_v15 = vpop.f32.mrb[45].mxu1  ;;  %v13507_v37 = vpack.c.bf16 %v3220_v11, %v3219_v6  ;;  %v5623_v29 = vadd.f32 %v5495_v61, %v15887_v7 }
 0x2d7   : > { %v2809_v31 = vpop.f32.mrb[156].mxu0  ;;  %v17183_v18 = vpop.f32.mrb[46].mxu1  ;;  %v13600_v15 = vpack.c.bf16 %v17179_v0, %v17187_v44 }
 0x2d8   : > { %v3093_v58 = vadd.f32 %v17116_v14, %v2809_v31  ;;  %v2811_v26 = vpop.f32.mrb[157].mxu0  ;;  %v5062_v27 = vpop.f32.mrb[47].mxu1  ;;  %5271 = vmatprep.mubr.bf16.mxu1 %v13507_v37  ;;  %v14303_v10 = vpack.c.bf16 %v3348_v28, %v3347_v49  ;;  %v17203_v49 = vmax.f32 %v5624_v46, 0.0  ;;  %v5498_v31 = vadd.f32 %v17080_v45, %v17027_v17 }
 0x2d9   : > { %v2812_v38 = vpop.f32.mrb[158].mxu0  ;;  %v5877_v27 = vrot.slane %v17187_v44, 7 }
 0x2da   : > { %v3094_v32 = vadd.f32 %v17116_v14, %v2812_v38  ;;  %v2814_v6 = vpop.f32.mrb[159].mxu0  ;;  %v3221_v11 = vmax.f32 %v3093_v58, 0.0  ;;  %14304 = vmatmul.mubr.msk.bf16.gmra.mrb[152].mxu1 %vm15828_vm1, %v14303_v10  ;;  %v17211_v10 = vmax.f32 %v5623_v29, 0.0 }
 0x2db   : > { %v14448_v46 = vpack.c.bf16 %v5878_v59, %v5877_v27  ;;  %v5880_v59 = vrot.slane %v17203_v49, 7 }
 0x2dc   : > { %v3222_v5 = vmax.f32 %v3094_v32, 0.0  ;;  %14444 = vmatmul.mubr.msk.bf16.gmra.mrb[8].mxu0 %vm15828_vm1, %v14443_v50  ;;  %v3349_v42 = vrot.slane %v3221_v11, 7  ;;  %v5497_v50 = vadd.f32 %v17080_v45, %v17017_v60 }
 0x2dd   : > { %v17200_v28 = vpop.f32.mrb[48].mxu1  ;;  %7592 = vmatprep.mubr.bf16.mxu0 %v13600_v15  ;;  %v5626_v15 = vadd.f32 %v5498_v31, %v15907_v22 }
 0x2de   : > { %v3350_v37 = vrot.slane %v3222_v5, 7  ;;  %v5067_v8 = vpop.f32.mrb[49].mxu1  ;;  %v13508_v4 = vpack.c.bf16 %v3222_v5, %v3221_v11  ;;  %v5625_v60 = vadd.f32 %v5497_v50, %v15904_v21 }
 0x2df   : > { %v2817_v58 = vpop.f32.mrb[160].mxu0  ;;  %v17207_v26 = vpop.f32.mrb[50].mxu1  ;;  %v13601_v8 = vpack.c.bf16 %v17203_v49, %v17211_v10 }
 0x2e0   : > { %v3095_v7 = vadd.f32 %v17116_v14, %v2817_v58  ;;  %v2819_v61 = vpop.f32.mrb[161].mxu0  ;;  %v5070_v38 = vpop.f32.mrb[51].mxu1  ;;  %5279 = vmatprep.mubr.bf16.mxu1 %v13508_v4  ;;  %v14308_v6 = vpack.c.bf16 %v3350_v37, %v3349_v42  ;;  %v17227_v42 = vmax.f32 %v5626_v15, 0.0  ;;  %v5500_v58 = vadd.f32 %v17080_v45, %v17051_v1 }
 0x2e1   : > { %v2820_v32 = vpop.f32.mrb[162].mxu0  ;;  %v5879_v38 = vrot.slane %v17211_v10, 7 }
 0x2e2   : > { %v3096_v17 = vadd.f32 %v17116_v14, %v2820_v32  ;;  %v2822_v11 = vpop.f32.mrb[163].mxu0  ;;  %v3223_v5 = vmax.f32 %v3095_v7, 0.0  ;;  %14309 = vmatmul.mubr.msk.bf16.gmra.mrb[156].mxu1 %vm15828_vm1, %v14308_v6  ;;  %v17235_v6 = vmax.f32 %v5625_v60, 0.0 }
 0x2e3   : > { %v14453_v15 = vpack.c.bf16 %v5880_v59, %v5879_v38  ;;  %v5882_v59 = vrot.slane %v17227_v42, 7 }
 0x2e4   : > { %v3224_v29 = vmax.f32 %v3096_v17, 0.0  ;;  %14449 = vmatmul.mubr.msk.bf16.gmra.mrb[12].mxu0 %vm15828_vm1, %v14448_v46  ;;  %v3351_v27 = vrot.slane %v3223_v5, 7  ;;  %v5499_v46 = vadd.f32 %v17080_v45, %v17041_v33 }
 0x2e5   : > { %v17224_v37 = vpop.f32.mrb[52].mxu1  ;;  %7600 = vmatprep.mubr.bf16.mxu0 %v13601_v8  ;;  %v5628_v8 = vadd.f32 %v5500_v58, %v15924_v36 }
 0x2e6   : > { %v3352_v4 = vrot.slane %v3224_v29, 7  ;;  %v5075_v22 = vpop.f32.mrb[53].mxu1  ;;  %v13509_v31 = vpack.c.bf16 %v3224_v29, %v3223_v5  ;;  %v5627_v33 = vadd.f32 %v5499_v46, %v15921_v35 }
 0x2e7   : > { %v2825_v7 = vpop.f32.mrb[164].mxu0  ;;  %v17231_v61 = vpop.f32.mrb[54].mxu1  ;;  %v13602_v22 = vpack.c.bf16 %v17227_v42, %v17235_v6 }
 0x2e8   : > { %v3097_v21 = vadd.f32 %v17116_v14, %v2825_v7  ;;  %v2827_v50 = vpop.f32.mrb[165].mxu0  ;;  %v5078_v32 = vpop.f32.mrb[55].mxu1  ;;  %5287 = vmatprep.mubr.bf16.mxu1 %v13509_v31  ;;  %v14313_v11 = vpack.c.bf16 %v3352_v4, %v3351_v27  ;;  %v17251_v27 = vmax.f32 %v5628_v8, 0.0  ;;  %v5502_v7 = vadd.f32 %v17080_v45, %v17084_v63  ;;  %v15281_v8 = vld [vmem:[#allocation8 + $0xf0] sm:$0xff]  }
 0x2e9   : > { %v2828_v17 = vpop.f32.mrb[166].mxu0  ;;  %v5881_v32 = vrot.slane %v17235_v6, 7  ;;  %10039 = vmatpush1.bf16.msra.mxu1 %v15281_v8  ;;  %v5503_v8 = vadd.f32 %v17080_v45, %v17100_v19 }
 0x2ea   : > { %v3098_v1 = vadd.f32 %v17116_v14, %v2828_v17  ;;  %v2830_v5 = vpop.f32.mrb[167].mxu0  ;;  %v3225_v29 = vmax.f32 %v3097_v21, 0.0  ;;  %14314 = vmatmul.mubr.msk.bf16.gmra.mrb[160].mxu1 %vm15828_vm1, %v14313_v11  ;;  %v17259_v11 = vmax.f32 %v5627_v33, 0.0  ;;  %10040 = vmatprep.subr.bf16.mxu1 %v19797_v13 }
 0x2eb   : > { %v14458_v63 = vpack.c.bf16 %v5882_v59, %v5881_v32  ;;  %v5504_v32 = vadd.f32 %v17080_v45, %v17106_v25  ;;  %v5631_v19 = vadd.f32 %v5503_v8, %v15958_v2 }
 0x2ec   : > { %v3226_v60 = vmax.f32 %v3098_v1, 0.0  ;;  %14454 = vmatmul.mubr.msk.bf16.gmra.mrb[16].mxu0 %vm15828_vm1, %v14453_v15  ;;  %v3353_v38 = vrot.slane %v3225_v29, 7  ;;  %v5501_v15 = vadd.f32 %v17080_v45, %v17068_v39  ;;  %v13603_v33 = vpack.c.bf16 %v17251_v27, %v17259_v11 }
 0x2ed   : > { %v17248_v4 = vpop.f32.mrb[56].mxu1  ;;  %7608 = vmatprep.mubr.bf16.mxu0 %v13602_v22 }
 0x2ee   : > { %v3354_v31 = vrot.slane %v3226_v60, 7  ;;  %v5083_v36 = vpop.f32.mrb[57].mxu1  ;;  %v13510_v58 = vpack.c.bf16 %v3226_v60, %v3225_v29  ;;  %v5630_v60 = vadd.f32 %v5502_v7, %v15943_v52  ;;  %v5629_v39 = vadd.f32 %v5501_v15, %v15940_v51 }
 0x2ef   : > { %v2833_v21 = vpop.f32.mrb[168].mxu0  ;;  %v17255_v50 = vpop.f32.mrb[58].mxu1  ;;  %v5884_v52 = vrot.slane %v17251_v27, 7  ;;  %v5883_v51 = vrot.slane %v17259_v11, 7 }
 0x2f0   : > { %v3099_v35 = vadd.f32 %v17116_v14, %v2833_v21  ;;  %v2835_v46 = vpop.f32.mrb[169].mxu0  ;;  %v5086_v17 = vpop.f32.mrb[59].mxu1  ;;  %5295 = vmatprep.mubr.bf16.mxu1 %v13510_v58  ;;  %v14318_v5 = vpack.c.bf16 %v3354_v31, %v3353_v38  ;;  %v17276_v21 = vmax.f32 %v5630_v60, 0.0 }
 0x2f1   : > { %v2836_v1 = vpop.f32.mrb[170].mxu0 }
 0x2f2   : > { %v3100_v29 = vadd.f32 %v17116_v14, %v2836_v1  ;;  %v2838_v22 = vpop.f32.mrb[171].mxu0  ;;  %v3227_v36 = vmax.f32 %v3099_v35, 0.0  ;;  %14319 = vmatmul.mubr.msk.bf16.gmra.mrb[164].mxu1 %vm15828_vm1, %v14318_v5  ;;  %v17284_v5 = vmax.f32 %v5629_v39, 0.0 }
 0x2f3   : > { %v14463_v22 = vpack.c.bf16 %v5884_v52, %v5883_v51  ;;  %v5886_v52 = vrot.slane %v17276_v21, 7 }
 0x2f4   : > { %v3228_v58 = vmax.f32 %v3100_v29, 0.0  ;;  %14459 = vmatmul.mubr.msk.bf16.gmra.mrb[20].mxu0 %vm15828_vm1, %v14458_v63  ;;  %v3355_v35 = vrot.slane %v3227_v36, 7 }
 0x2f5   : > { %v17272_v59 = vpop.f32.mrb[60].mxu1  ;;  %7616 = vmatprep.mubr.bf16.mxu0 %v13603_v33 }
 0x2f6   : > { %v3356_v31 = vrot.slane %v3228_v58, 7  ;;  %v5091_v7 = vpop.f32.mrb[61].mxu1  ;;  %v13511_v38 = vpack.c.bf16 %v3228_v58, %v3227_v36  ;;  %v5632_v36 = vadd.f32 %v5504_v32, %v15961_v3  ;;  %v13604_v58 = vpack.c.bf16 %v17276_v21, %v17284_v5 }
 0x2f7   : > { %v2841_v46 = vpop.f32.mrb[172].mxu0  ;;  %v17280_v17 = vpop.f32.mrb[62].mxu1 }
 0x2f8   : > { %v3101_v15 = vadd.f32 %v17116_v14, %v2841_v46  ;;  %v2843_v1 = vpop.f32.mrb[173].mxu0  ;;  %v5094_v13 = vpop.f32.mrb[63].mxu1  ;;  %5303 = vmatprep.mubr.bf16.mxu1 %v13511_v38  ;;  %v14323_v29 = vpack.c.bf16 %v3356_v31, %v3355_v35  ;;  %v17300_v32 = vmax.f32 %v5632_v36, 0.0  ;;  %v5506_v35 = vadd.f32 %v17080_v45, %v17134_v62 }
 0x2f9   : > { %v2844_v63 = vpop.f32.mrb[174].mxu0  ;;  %v5885_v1 = vrot.slane %v17284_v5, 7 }
 0x2fa   : > { %v3102_v25 = vadd.f32 %v17116_v14, %v2844_v63  ;;  %v2846_v60 = vpop.f32.mrb[175].mxu0  ;;  %v3229_v33 = vmax.f32 %v3101_v15, 0.0  ;;  %14324 = vmatmul.mubr.msk.bf16.gmra.mrb[168].mxu1 %vm15828_vm1, %v14323_v29  ;;  %v17308_v63 = vmax.f32 %v5631_v19, 0.0  ;;  %v5505_v29 = vadd.f32 %v17080_v45, %v17127_v43 }
 0x2fb   : > { %v14468_v60 = vpack.c.bf16 %v5886_v52, %v5885_v1  ;;  %v5888_v52 = vrot.slane %v17300_v32, 7 }
 0x2fc   : > { %v3230_v39 = vmax.f32 %v3102_v25, 0.0  ;;  %14464 = vmatmul.mubr.msk.bf16.gmra.mrb[24].mxu0 %vm15828_vm1, %v14463_v22  ;;  %v3357_v46 = vrot.slane %v3229_v33, 7  ;;  %v5633_v43 = vadd.f32 %v5505_v29, %v15976_v20 }
 0x2fd   : > { %v17297_v31 = vpop.f32.mrb[64].mxu1  ;;  %7624 = vmatprep.mubr.bf16.mxu0 %v13604_v58 }
 0x2fe   : > { %v3358_v7 = vrot.slane %v3230_v39, 7  ;;  %v5099_v3 = vpop.f32.mrb[65].mxu1  ;;  %v13512_v38 = vpack.c.bf16 %v3230_v39, %v3229_v33  ;;  %v5634_v33 = vadd.f32 %v5506_v35, %v15979_v23  ;;  %v13605_v39 = vpack.c.bf16 %v17300_v32, %v17308_v63 }
 0x2ff   : > { %v2849_v51 = vpop.f32.mrb[176].mxu0  ;;  %v17304_v15 = vpop.f32.mrb[66].mxu1 }
 0x300   : > { %v3103_v2 = vadd.f32 %v17116_v14, %v2849_v51  ;;  %v2851_v13 = vpop.f32.mrb[177].mxu0  ;;  %v5102_v8 = vpop.f32.mrb[67].mxu1  ;;  %5311 = vmatprep.mubr.bf16.mxu1 %v13512_v38  ;;  %v14328_v25 = vpack.c.bf16 %v3358_v7, %v3357_v46  ;;  %v17324_v35 = vmax.f32 %v5634_v33, 0.0  ;;  %v5508_v46 = vadd.f32 %v17080_v45, %v17158_v53 }
 0x301   : > { %v2852_v22 = vpop.f32.mrb[178].mxu0  ;;  %v5887_v13 = vrot.slane %v17308_v63, 7 }
 0x302   : > { %v3104_v62 = vadd.f32 %v17116_v14, %v2852_v22  ;;  %v2854_v36 = vpop.f32.mrb[179].mxu0  ;;  %v3231_v58 = vmax.f32 %v3103_v2, 0.0  ;;  %14329 = vmatmul.mubr.msk.bf16.gmra.mrb[172].mxu1 %vm15828_vm1, %v14328_v25  ;;  %19871 = vst [vmem:[#allocation121_spill] sm:$0xff] %v17324_v35  ;;  %v17332_v22 = vmax.f32 %v5633_v43, 0.0  ;;  %v5507_v25 = vadd.f32 %v17080_v45, %v17151_v16 }
 0x303   : > { %v14473_v36 = vpack.c.bf16 %v5888_v52, %v5887_v13  ;;  %v5890_v52 = vrot.slane %v17324_v35, 7 }
 0x304   : > { %v3232_v19 = vmax.f32 %v3104_v62, 0.0  ;;  %14469 = vmatmul.mubr.msk.bf16.gmra.mrb[28].mxu0 %vm15828_vm1, %v14468_v60  ;;  %v3359_v51 = vrot.slane %v3231_v58, 7  ;;  %19872 = vst [vmem:[#allocation122_spill] sm:$0xff] %v17332_v22  ;;  %v5635_v16 = vadd.f32 %v5507_v25, %v15994_v40 }
 0x305   : > { %v17321_v7 = vpop.f32.mrb[68].mxu1  ;;  %7632 = vmatprep.mubr.bf16.mxu0 %v13605_v39 }
 0x306   : > { %v3360_v3 = vrot.slane %v3232_v19, 7  ;;  %v5107_v23 = vpop.f32.mrb[69].mxu1  ;;  %v13513_v38 = vpack.c.bf16 %v3232_v19, %v3231_v58  ;;  %v5636_v58 = vadd.f32 %v5508_v46, %v15997_v41  ;;  %v13606_v19 = vpack.c.bf16 %v17324_v35, %v17332_v22 }
 0x307   : > { %v2857_v1 = vpop.f32.mrb[180].mxu0  ;;  %v17328_v2 = vpop.f32.mrb[70].mxu1 }
 0x308   : > { %v3105_v20 = vadd.f32 %v17116_v14, %v2857_v1  ;;  %v2859_v8 = vpop.f32.mrb[181].mxu0  ;;  %v5110_v29 = vpop.f32.mrb[71].mxu1  ;;  %5319 = vmatprep.mubr.bf16.mxu1 %v13513_v38  ;;  %v14333_v62 = vpack.c.bf16 %v3360_v3, %v3359_v51  ;;  %v17348_v46 = vmax.f32 %v5636_v58, 0.0  ;;  %v5510_v51 = vadd.f32 %v17080_v45, %v17183_v18 }
 0x309   : > { %v2860_v60 = vpop.f32.mrb[182].mxu0  ;;  %v5889_v8 = vrot.slane %v17332_v22, 7 }
 0x30a   : > { %v3106_v53 = vadd.f32 %v17116_v14, %v2860_v60  ;;  %v2862_v33 = vpop.f32.mrb[183].mxu0  ;;  %v3233_v39 = vmax.f32 %v3105_v20, 0.0  ;;  %14334 = vmatmul.mubr.msk.bf16.gmra.mrb[176].mxu1 %vm15828_vm1, %v14333_v62  ;;  %19873 = vst [vmem:[#allocation123_spill] sm:$0xff] %v17348_v46  ;;  %v17356_v60 = vmax.f32 %v5635_v16, 0.0  ;;  %v5509_v62 = vadd.f32 %v17080_v45, %v17176_v24 }
 0x30b   : > { %v15282_v33 = vld [vmem:[#allocation8 + $0xf8] sm:$0xff]   ;;  %v14478_v18 = vpack.c.bf16 %v5890_v52, %v5889_v8 }
 0x30c   : > { %v3234_v43 = vmax.f32 %v3106_v53, 0.0  ;;  %14474 = vmatmul.mubr.msk.bf16.gmra.mrb[32].mxu0 %vm15828_vm1, %v14473_v36  ;;  %v3361_v1 = vrot.slane %v3233_v39, 7  ;;  %19874 = vst [vmem:[#allocation124_spill] sm:$0xff] %v17356_v60  ;;  %v13607_v16 = vpack.c.bf16 %v17348_v46, %v17356_v60  ;;  %10041 = vmatpush1.bf16.msra.mxu1 %v15282_v33  ;;  %v5637_v24 = vadd.f32 %v5509_v62, %v16013_v56 }
 0x30d   : > { %v17345_v3 = vpop.f32.mrb[72].mxu1  ;;  %7640 = vmatprep.mubr.bf16.mxu0 %v13606_v19  ;;  %v5638_v19 = vadd.f32 %v5510_v51, %v16016_v57  ;;  %v5511_v33 = vadd.f32 %v17080_v45, %v17200_v28  ;;  %v19878_v28 = vld [vmem:[#allocation18_spill] sm:$0xff] }
 0x30e   : > { %v3362_v23 = vrot.slane %v3234_v43, 7  ;;  %v5115_v41 = vpop.f32.mrb[73].mxu1  ;;  %v13514_v38 = vpack.c.bf16 %v3234_v43, %v3233_v39 }
 0x30f   : > { %v2865_v13 = vpop.f32.mrb[184].mxu0  ;;  %v17352_v20 = vpop.f32.mrb[74].mxu1 }
 0x310   : > { %v3107_v40 = vadd.f32 %v17116_v14, %v2865_v13  ;;  %v2867_v29 = vpop.f32.mrb[185].mxu0  ;;  %v5118_v25 = vpop.f32.mrb[75].mxu1  ;;  %5327 = vmatprep.mubr.bf16.mxu1 %v13514_v38  ;;  %v14338_v53 = vpack.c.bf16 %v3362_v23, %v3361_v1  ;;  %v5892_v23 = vrot.slane %v17348_v46, 7  ;;  %v17372_v1 = vmax.f32 %v5638_v19, 0.0  ;;  %v20053_v46 = vld [vmem:[#allocation107_spill] sm:$0xff] }
 0x311   : > { %v2868_v36 = vpop.f32.mrb[186].mxu0  ;;  %v5512_v13 = vadd.f32 %v17080_v45, %v17207_v26  ;;  %v5891_v25 = vrot.slane %v17356_v60, 7 }
 0x312   : > { %v3108_v58 = vadd.f32 %v17116_v14, %v2868_v36  ;;  %v2870_v39 = vpop.f32.mrb[187].mxu0  ;;  %v3235_v43 = vmax.f32 %v3107_v40, 0.0  ;;  %14339 = vmatmul.mubr.msk.bf16.gmra.mrb[180].mxu1 %vm15828_vm1, %v14338_v53  ;;  %19875 = vst [vmem:[#allocation125_spill] sm:$0xff] %v17372_v1  ;;  %v17380_v53 = vmax.f32 %v5637_v24, 0.0 }
 0x313   : > { %v14483_v39 = vpack.c.bf16 %v5892_v23, %v5891_v25  ;;  %v5894_v23 = vrot.slane %v17372_v1, 7 }
 0x314   : > { %v3236_v41 = vmax.f32 %v3108_v58, 0.0  ;;  %14479 = vmatmul.mubr.msk.bf16.gmra.mrb[36].mxu0 %vm15828_vm1, %v14478_v18  ;;  %v3363_v8 = vrot.slane %v3235_v43, 7  ;;  %19876 = vst [vmem:[#allocation126_spill] sm:$0xff] %v17380_v53 }
 0x315   : > { %v17369_v52 = vpop.f32.mrb[76].mxu1  ;;  %7648 = vmatprep.mubr.bf16.mxu0 %v13607_v16 }
 0x316   : > { %v3364_v57 = vrot.slane %v3236_v41, 7  ;;  %v5123_v38 = vpop.f32.mrb[77].mxu1  ;;  %v13515_v51 = vpack.c.bf16 %v3236_v41, %v3235_v43  ;;  %v19877_v43 = vld [vmem:[#allocation19_spill] sm:$0xff] }
 0x317   : > { %v2873_v40 = vpop.f32.mrb[188].mxu0  ;;  %v17376_v29 = vpop.f32.mrb[78].mxu1  ;;  %v5640_v16 = vadd.f32 %v5512_v13, %v19877_v43  ;;  %v13608_v38 = vpack.c.bf16 %v17372_v1, %v17380_v53  ;;  %v5513_v43 = vadd.f32 %v17080_v45, %v17224_v37  ;;  %v19882_v37 = vld [vmem:[#allocation20_spill] sm:$0xff] }
 0x318   : > { %v3109_v56 = vadd.f32 %v17116_v14, %v2873_v40  ;;  %v2875_v62 = vpop.f32.mrb[189].mxu0  ;;  %v5126_v36 = vpop.f32.mrb[79].mxu1  ;;  %5335 = vmatprep.mubr.bf16.mxu1 %v13515_v51  ;;  %v14343_v58 = vpack.c.bf16 %v3364_v57, %v3363_v8  ;;  %v5639_v51 = vadd.f32 %v5511_v33, %v19878_v28  ;;  %v19881_v28 = vld [vmem:[#allocation21_spill] sm:$0xff] }
 0x319   : > { %v2876_v18 = vpop.f32.mrb[190].mxu0  ;;  %v17396_v25 = vmax.f32 %v5640_v16, 0.0 }
 0x31a   : > { %v3110_v26 = vadd.f32 %v17116_v14, %v2876_v18  ;;  %v2878_v19 = vpop.f32.mrb[191].mxu0  ;;  %v3237_v41 = vmax.f32 %v3109_v56, 0.0  ;;  %14344 = vmatmul.mubr.msk.bf16.gmra.mrb[184].mxu1 %vm15828_vm1, %v14343_v58  ;;  %v5514_v56 = vadd.f32 %v17080_v45, %v17231_v61  ;;  %v5893_v58 = vrot.slane %v17380_v53, 7 }
 0x31b   : > { %19879 = vst [vmem:[#allocation19_spill] sm:$0xff] %v17396_v25  ;;  %v17404_v19 = vmax.f32 %v5639_v51, 0.0 }
 0x31c   : > { %v3238_v24 = vmax.f32 %v3110_v26, 0.0  ;;  %14484 = vmatmul.mubr.msk.bf16.gmra.mrb[40].mxu0 %vm15828_vm1, %v14483_v39  ;;  %v3365_v62 = vrot.slane %v3237_v41, 7 }
 0x31d   : > { %v17393_v57 = vpop.f32.mrb[80].mxu1  ;;  %7656 = vmatprep.mubr.bf16.mxu0 %v13608_v38  ;;  %19880 = vst [vmem:[#allocation18_spill] sm:$0xff] %v17404_v19 }
 0x31e   : > { %v3366_v8 = vrot.slane %v3238_v24, 7  ;;  %v5131_v13 = vpop.f32.mrb[81].mxu1  ;;  %v13516_v40 = vpack.c.bf16 %v3238_v24, %v3237_v41  ;;  %v14488_v24 = vpack.c.bf16 %v5894_v23, %v5893_v58  ;;  %v5896_v23 = vrot.slane %v17396_v25, 7 }
 0x31f   : > { %v2881_v36 = vpop.f32.mrb[192].mxu0  ;;  %v17400_v18 = vpop.f32.mrb[82].mxu1  ;;  %v5642_v13 = vadd.f32 %v5514_v56, %v19881_v28 }
 0x320   : > { %v3111_v33 = vadd.f32 %v17116_v14, %v2881_v36  ;;  %v2883_v39 = vpop.f32.mrb[193].mxu0  ;;  %v5134_v26 = vpop.f32.mrb[83].mxu1  ;;  %5343 = vmatprep.mubr.bf16.mxu1 %v13516_v40  ;;  %v14348_v38 = vpack.c.bf16 %v3366_v8, %v3365_v62  ;;  %v13609_v40 = vpack.c.bf16 %v17396_v25, %v17404_v19  ;;  %v5641_v36 = vadd.f32 %v5513_v43, %v19882_v37 }
 0x321   : > { %v2884_v16 = vpop.f32.mrb[194].mxu0  ;;  %v5516_v39 = vadd.f32 %v17080_v45, %v17255_v50 }
 0x322   : > { %v3112_v61 = vadd.f32 %v17116_v14, %v2884_v16  ;;  %v2886_v41 = vpop.f32.mrb[195].mxu0  ;;  %v3239_v1 = vmax.f32 %v3111_v33, 0.0  ;;  %14349 = vmatmul.mubr.msk.bf16.gmra.mrb[188].mxu1 %vm15828_vm1, %v14348_v38  ;;  %v17420_v33 = vmax.f32 %v5642_v13, 0.0  ;;  %v17428_v28 = vmax.f32 %v5641_v36, 0.0 }
 0x323   : > { %v5515_v13 = vadd.f32 %v17080_v45, %v17248_v4  ;;  %v19886_v4 = vld [vmem:[#allocation22_spill] sm:$0xff] }
 0x324   : > { %v3240_v51 = vmax.f32 %v3112_v61, 0.0  ;;  %14489 = vmatmul.mubr.msk.bf16.gmra.mrb[44].mxu0 %vm15828_vm1, %v14488_v24  ;;  %19883 = vst [vmem:[#allocation21_spill] sm:$0xff] %v17420_v33  ;;  %v3367_v26 = vrot.slane %v3239_v1, 7  ;;  %v5895_v24 = vrot.slane %v17404_v19, 7  ;;  %19884 = vst [vmem:[#allocation20_spill] sm:$0xff] %v17428_v28 }
 0x325   : > { %v17417_v8 = vpop.f32.mrb[84].mxu1  ;;  %7664 = vmatprep.mubr.bf16.mxu0 %v13609_v40 }
 0x326   : > { %v3368_v62 = vrot.slane %v3240_v51, 7  ;;  %v5139_v56 = vpop.f32.mrb[85].mxu1  ;;  %v13517_v58 = vpack.c.bf16 %v3240_v51, %v3239_v1  ;;  %v14493_v37 = vpack.c.bf16 %v5896_v23, %v5895_v24  ;;  %v5898_v23 = vrot.slane %v17420_v33, 7 }
 0x327   : > { %v2889_v16 = vpop.f32.mrb[196].mxu0  ;;  %v17424_v38 = vpop.f32.mrb[86].mxu1  ;;  %v19885_v56 = vld [vmem:[#allocation23_spill] sm:$0xff] }
 0x328   : > { %v3113_v43 = vadd.f32 %v17116_v14, %v2889_v16  ;;  %v2891_v61 = vpop.f32.mrb[197].mxu0  ;;  %v5142_v41 = vpop.f32.mrb[87].mxu1  ;;  %5351 = vmatprep.mubr.bf16.mxu1 %v13517_v58  ;;  %v14353_v51 = vpack.c.bf16 %v3368_v62, %v3367_v26  ;;  %v5644_v25 = vadd.f32 %v5516_v39, %v19885_v56  ;;  %v13610_v58 = vpack.c.bf16 %v17420_v33, %v17428_v28 }
 0x329   : > { %v2892_v40 = vpop.f32.mrb[198].mxu0  ;;  %v5643_v16 = vadd.f32 %v5515_v13, %v19886_v4  ;;  %v5518_v61 = vadd.f32 %v17080_v45, %v17280_v17 }
 0x32a   : > { %v3114_v50 = vadd.f32 %v17116_v14, %v2892_v40  ;;  %v2894_v1 = vpop.f32.mrb[199].mxu0  ;;  %v3241_v53 = vmax.f32 %v3113_v43, 0.0  ;;  %14354 = vmatmul.mubr.msk.bf16.gmra.mrb[192].mxu1 %vm15828_vm1, %v14353_v51  ;;  %v17444_v43 = vmax.f32 %v5644_v25, 0.0  ;;  %v5517_v25 = vadd.f32 %v17080_v45, %v17272_v59  ;;  %v19890_v59 = vld [vmem:[#allocation24_spill] sm:$0xff] }
 0x32b   : > { %v17452_v56 = vmax.f32 %v5643_v16, 0.0 }
 0x32c   : > { %v3242_v36 = vmax.f32 %v3114_v50, 0.0  ;;  %14494 = vmatmul.mubr.msk.bf16.gmra.mrb[48].mxu0 %vm15828_vm1, %v14493_v37  ;;  %19887 = vst [vmem:[#allocation23_spill] sm:$0xff] %v17444_v43  ;;  %v3369_v41 = vrot.slane %v3241_v53, 7  ;;  %v5897_v37 = vrot.slane %v17428_v28, 7 }
 0x32d   : > { %v17441_v62 = vpop.f32.mrb[88].mxu1  ;;  %7672 = vmatprep.mubr.bf16.mxu0 %v13610_v58  ;;  %19888 = vst [vmem:[#allocation22_spill] sm:$0xff] %v17452_v56 }
 0x32e   : > { %v3370_v26 = vrot.slane %v3242_v36, 7  ;;  %v5147_v39 = vpop.f32.mrb[89].mxu1  ;;  %v13518_v24 = vpack.c.bf16 %v3242_v36, %v3241_v53  ;;  %v14498_v4 = vpack.c.bf16 %v5898_v23, %v5897_v37  ;;  %v5900_v23 = vrot.slane %v17444_v43, 7 }
 0x32f   : > { %v2897_v40 = vpop.f32.mrb[200].mxu0  ;;  %v17448_v51 = vpop.f32.mrb[90].mxu1  ;;  %v19889_v39 = vld [vmem:[#allocation25_spill] sm:$0xff] }
 0x330   : > { %v3115_v13 = vadd.f32 %v17116_v14, %v2897_v40  ;;  %v2899_v50 = vpop.f32.mrb[201].mxu0  ;;  %v5150_v1 = vpop.f32.mrb[91].mxu1  ;;  %5359 = vmatprep.mubr.bf16.mxu1 %v13518_v24  ;;  %v14358_v36 = vpack.c.bf16 %v3370_v26, %v3369_v41  ;;  %v5646_v33 = vadd.f32 %v5518_v61, %v19889_v39  ;;  %v13611_v24 = vpack.c.bf16 %v17444_v43, %v17452_v56 }
 0x331   : > { %v2900_v58 = vpop.f32.mrb[202].mxu0  ;;  %v5645_v40 = vadd.f32 %v5517_v25, %v19890_v59  ;;  %v5520_v50 = vadd.f32 %v17080_v45, %v17304_v15 }
 0x332   : > { %v3116_v17 = vadd.f32 %v17116_v14, %v2900_v58  ;;  %v2902_v53 = vpop.f32.mrb[203].mxu0  ;;  %v3243_v19 = vmax.f32 %v3115_v13, 0.0  ;;  %14359 = vmatmul.mubr.msk.bf16.gmra.mrb[196].mxu1 %vm15828_vm1, %v14358_v36  ;;  %v17468_v13 = vmax.f32 %v5646_v33, 0.0  ;;  %v5519_v33 = vadd.f32 %v17080_v45, %v17297_v31  ;;  %v19894_v45 = vld [vmem:[#allocation26_spill] sm:$0xff] }
 0x333   : > { %v17476_v39 = vmax.f32 %v5645_v40, 0.0 }
 0x334   : > { %v3244_v16 = vmax.f32 %v3116_v17, 0.0  ;;  %14499 = vmatmul.mubr.msk.bf16.gmra.mrb[52].mxu0 %vm15828_vm1, %v14498_v4  ;;  %19891 = vst [vmem:[#allocation25_spill] sm:$0xff] %v17468_v13  ;;  %v3371_v1 = vrot.slane %v3243_v19, 7  ;;  %v5899_v4 = vrot.slane %v17452_v56, 7  ;;  %v5647_v31 = vadd.f32 %v5519_v33, %v19894_v45 }
 0x335   : > { %v17465_v26 = vpop.f32.mrb[92].mxu1  ;;  %7680 = vmatprep.mubr.bf16.mxu0 %v13611_v24  ;;  %19892 = vst [vmem:[#allocation24_spill] sm:$0xff] %v17476_v39 }
 0x336   : > { %v3372_v41 = vrot.slane %v3244_v16, 7  ;;  %v5155_v61 = vpop.f32.mrb[93].mxu1  ;;  %v13519_v37 = vpack.c.bf16 %v3244_v16, %v3243_v19  ;;  %v14503_v59 = vpack.c.bf16 %v5900_v23, %v5899_v4  ;;  %v5902_v23 = vrot.slane %v17468_v13, 7 }
 0x337   : > { %v2905_v58 = vpop.f32.mrb[204].mxu0  ;;  %v17472_v36 = vpop.f32.mrb[94].mxu1  ;;  %v19893_v61 = vld [vmem:[#allocation27_spill] sm:$0xff] }
 0x338   : > { %v3117_v25 = vadd.f32 %v17116_v14, %v2905_v58  ;;  %v2907_v17 = vpop.f32.mrb[205].mxu0  ;;  %v5158_v53 = vpop.f32.mrb[95].mxu1  ;;  %5367 = vmatprep.mubr.bf16.mxu1 %v13519_v37  ;;  %v14363_v16 = vpack.c.bf16 %v3372_v41, %v3371_v1  ;;  %v5648_v43 = vadd.f32 %v5520_v50, %v19893_v61  ;;  %v13612_v37 = vpack.c.bf16 %v17468_v13, %v17476_v39 }
 0x339   : > { %v2908_v24 = vpop.f32.mrb[206].mxu0 }
 0x33a   : > { %v3118_v15 = vadd.f32 %v17116_v14, %v2908_v24  ;;  %v2910_v19 = vpop.f32.mrb[207].mxu0  ;;  %v3245_v28 = vmax.f32 %v3117_v25, 0.0  ;;  %14364 = vmatmul.mubr.msk.bf16.gmra.mrb[200].mxu1 %vm15828_vm1, %v14363_v16  ;;  %v17492_v4 = vmax.f32 %v5648_v43, 0.0  ;;  %v17497_v25 = vld [vmem:[%s19538_s6] ss:$0 sm:$0xff]  ;;  %v5901_v16 = vrot.slane %v17476_v39, 7 }
 0x33b   : > { %v5522_v17 = vadd.f32 %v17497_v25, %v17328_v2  ;;  %v17505_v43 = vmax.f32 %v5647_v31, 0.0  ;;  %v5521_v61 = vadd.f32 %v17497_v25, %v17321_v7  ;;  %v19898_v7 = vld [vmem:[#allocation28_spill] sm:$0xff] }
 0x33c   : > { %v3246_v40 = vmax.f32 %v3118_v15, 0.0  ;;  %14504 = vmatmul.mubr.msk.bf16.gmra.mrb[56].mxu0 %vm15828_vm1, %v14503_v59  ;;  %19895 = vst [vmem:[#allocation27_spill] sm:$0xff] %v17492_v4  ;;  %v3373_v53 = vrot.slane %v3245_v28, 7  ;;  %v14508_v45 = vpack.c.bf16 %v5902_v23, %v5901_v16  ;;  %v5904_v23 = vrot.slane %v17492_v4, 7 }
 0x33d   : > { %v17489_v41 = vpop.f32.mrb[96].mxu1  ;;  %7688 = vmatprep.mubr.bf16.mxu0 %v13612_v37  ;;  %19896 = vst [vmem:[#allocation26_spill] sm:$0xff] %v17505_v43 }
 0x33e   : > { %v3374_v1 = vrot.slane %v3246_v40, 7  ;;  %v5163_v50 = vpop.f32.mrb[97].mxu1  ;;  %v13520_v58 = vpack.c.bf16 %v3246_v40, %v3245_v28 }
 0x33f   : > { %v2913_v33 = vpop.f32.mrb[208].mxu0  ;;  %v17501_v24 = vpop.f32.mrb[98].mxu1  ;;  %v19897_v50 = vld [vmem:[#allocation29_spill] sm:$0xff] }
 0x340   : > { %v3119_v59 = vadd.f32 %v17116_v14, %v2913_v33  ;;  %v2915_v15 = vpop.f32.mrb[209].mxu0  ;;  %v5166_v19 = vpop.f32.mrb[99].mxu1  ;;  %5375 = vmatprep.mubr.bf16.mxu1 %v13520_v58  ;;  %v14368_v40 = vpack.c.bf16 %v3374_v1, %v3373_v53  ;;  %v5650_v13 = vadd.f32 %v5522_v17, %v19897_v50  ;;  %v13613_v58 = vpack.c.bf16 %v17492_v4, %v17505_v43  ;;  %v19905_v4 = vld [vmem:[#allocation33_spill] sm:$0xff] }
 0x341   : > { %v2916_v37 = vpop.f32.mrb[210].mxu0  ;;  %v5649_v33 = vadd.f32 %v5521_v61, %v19898_v7  ;;  %v5524_v15 = vadd.f32 %v17497_v25, %v17352_v20  ;;  %v17536_v20 = vld [vmem:[%s19536_s4] ss:$0 sm:$0xff] }
 0x342   : > { %v3120_v2 = vadd.f32 %v17116_v14, %v2916_v37  ;;  %v2918_v28 = vpop.f32.mrb[211].mxu0  ;;  %v3247_v56 = vmax.f32 %v3119_v59, 0.0  ;;  %14369 = vmatmul.mubr.msk.bf16.gmra.mrb[204].mxu1 %vm15828_vm1, %v14368_v40  ;;  %v17521_v59 = vmax.f32 %v5650_v13, 0.0  ;;  %v5523_v13 = vadd.f32 %v17497_v25, %v17345_v3 }
 0x343   : > { %v17529_v50 = vmax.f32 %v5649_v33, 0.0 }
 0x344   : > { %v3248_v31 = vmax.f32 %v3120_v2, 0.0  ;;  %14509 = vmatmul.mubr.msk.bf16.gmra.mrb[60].mxu0 %vm15828_vm1, %v14508_v45  ;;  %19899 = vst [vmem:[#allocation29_spill] sm:$0xff] %v17521_v59  ;;  %v3375_v19 = vrot.slane %v3247_v56, 7  ;;  %v5903_v45 = vrot.slane %v17505_v43, 7 }
 0x345   : > { %v17518_v1 = vpop.f32.mrb[100].mxu1  ;;  %7696 = vmatprep.mubr.bf16.mxu0 %v13613_v58  ;;  %19900 = vst [vmem:[#allocation28_spill] sm:$0xff] %v17529_v50  ;;  %v13614_v3 = vpack.c.bf16 %v17521_v59, %v17529_v50 }
 0x346   : > { %v3376_v53 = vrot.slane %v3248_v31, 7  ;;  %v5171_v17 = vpop.f32.mrb[101].mxu1  ;;  %v13521_v16 = vpack.c.bf16 %v3248_v31, %v3247_v56  ;;  %v14513_v7 = vpack.c.bf16 %v5904_v23, %v5903_v45  ;;  %v19902_v23 = vld [vmem:[#allocation30_spill] sm:$0xff] }
 0x347   : > { %v2921_v37 = vpop.f32.mrb[212].mxu0  ;;  %v17525_v40 = vpop.f32.mrb[102].mxu1 }
 0x348   : > { %v3121_v61 = vadd.f32 %v17116_v14, %v2921_v37  ;;  %v2923_v2 = vpop.f32.mrb[213].mxu0  ;;  %v5174_v28 = vpop.f32.mrb[103].mxu1  ;;  %5383 = vmatprep.mubr.bf16.mxu1 %v13521_v16  ;;  %v14373_v31 = vpack.c.bf16 %v3376_v53, %v3375_v19  ;;  %v19901_v14 = vld [vmem:[#allocation31_spill] sm:$0xff]  ;;  %v5651_v53 = vadd.f32 %v5523_v13, %v19902_v23  ;;  %v5906_v19 = vrot.slane %v17521_v59, 7 }
 0x349   : > { %v2924_v58 = vpop.f32.mrb[214].mxu0  ;;  %v5652_v37 = vadd.f32 %v5524_v15, %v19901_v14 }
 0x34a   : > { %v3122_v56 = vadd.f32 %v17536_v20, %v2924_v58  ;;  %v2926_v17 = vpop.f32.mrb[215].mxu0  ;;  %v3249_v2 = vmax.f32 %v3121_v61, 0.0  ;;  %14374 = vmatmul.mubr.msk.bf16.gmra.mrb[208].mxu1 %vm15828_vm1, %v14373_v31  ;;  %v5526_v58 = vadd.f32 %v17497_v25, %v17376_v29  ;;  %v17558_v23 = vmax.f32 %v5651_v53, 0.0 }
 0x34b   : > { %v17550_v28 = vmax.f32 %v5652_v37, 0.0  ;;  %v5525_v37 = vadd.f32 %v17497_v25, %v17369_v52  ;;  %v19906_v52 = vld [vmem:[#allocation32_spill] sm:$0xff] }
 0x34c   : > { %v3250_v33 = vmax.f32 %v3122_v56, 0.0  ;;  %14514 = vmatmul.mubr.msk.bf16.gmra.mrb[64].mxu0 %vm15828_vm1, %v14513_v7  ;;  %v3377_v31 = vrot.slane %v3249_v2, 7  ;;  %v5905_v7 = vrot.slane %v17529_v50, 7  ;;  %19904 = vst [vmem:[#allocation30_spill] sm:$0xff] %v17558_v23  ;;  %v5654_v43 = vadd.f32 %v5526_v58, %v19905_v4 }
 0x34d   : > { %v17547_v16 = vpop.f32.mrb[104].mxu1  ;;  %7704 = vmatprep.mubr.bf16.mxu0 %v13614_v3  ;;  %19903 = vst [vmem:[#allocation31_spill] sm:$0xff] %v17550_v28 }
 0x34e   : > { %v3378_v45 = vrot.slane %v3250_v33, 7  ;;  %v5179_v15 = vpop.f32.mrb[105].mxu1  ;;  %v13522_v61 = vpack.c.bf16 %v3250_v33, %v3249_v2  ;;  %v14518_v59 = vpack.c.bf16 %v5906_v19, %v5905_v7  ;;  %v5908_v19 = vrot.slane %v17550_v28, 7 }
 0x34f   : > { %v2929_v56 = vpop.f32.mrb[216].mxu0  ;;  %v17554_v17 = vpop.f32.mrb[106].mxu1  ;;  %v17574_v7 = vmax.f32 %v5654_v43, 0.0  ;;  %v5527_v43 = vadd.f32 %v17497_v25, %v17393_v57  ;;  %v19910_v57 = vld [vmem:[#allocation34_spill] sm:$0xff] }
 0x350   : > { %v3123_v13 = vadd.f32 %v17536_v20, %v2929_v56  ;;  %v2931_v14 = vpop.f32.mrb[217].mxu0  ;;  %v5182_v3 = vpop.f32.mrb[107].mxu1  ;;  %5391 = vmatprep.mubr.bf16.mxu1 %v13522_v61  ;;  %v14378_v15 = vpack.c.bf16 %v3378_v45, %v3377_v31  ;;  %v13615_v61 = vpack.c.bf16 %v17550_v28, %v17558_v23  ;;  %v5653_v56 = vadd.f32 %v5525_v37, %v19906_v52  ;;  %v19909_v28 = vld [vmem:[#allocation35_spill] sm:$0xff] }
 0x351   : > { %v2932_v33 = vpop.f32.mrb[218].mxu0  ;;  %19907 = vst [vmem:[#allocation33_spill] sm:$0xff] %v17574_v7 }
 0x352   : > { %v3124_v29 = vadd.f32 %v17536_v20, %v2932_v33  ;;  %v2934_v2 = vpop.f32.mrb[219].mxu0  ;;  %v3251_v39 = vmax.f32 %v3123_v13, 0.0  ;;  %14379 = vmatmul.mubr.msk.bf16.gmra.mrb[212].mxu1 %vm15828_vm1, %v14378_v15  ;;  %v5528_v13 = vadd.f32 %v17497_v25, %v17400_v18 }
 0x353   : > { %v17582_v2 = vmax.f32 %v5653_v56, 0.0 }
 0x354   : > { %v3252_v53 = vmax.f32 %v3124_v29, 0.0  ;;  %14519 = vmatmul.mubr.msk.bf16.gmra.mrb[68].mxu0 %vm15828_vm1, %v14518_v59  ;;  %v3379_v14 = vrot.slane %v3251_v39, 7  ;;  %v5907_v59 = vrot.slane %v17558_v23, 7  ;;  %v5656_v50 = vadd.f32 %v5528_v13, %v19909_v28 }
 0x355   : > { %v17571_v45 = vpop.f32.mrb[108].mxu1  ;;  %7712 = vmatprep.mubr.bf16.mxu0 %v13615_v61  ;;  %19908 = vst [vmem:[#allocation32_spill] sm:$0xff] %v17582_v2 }
 0x356   : > { %v3380_v31 = vrot.slane %v3252_v53, 7  ;;  %v5187_v4 = vpop.f32.mrb[109].mxu1  ;;  %v13523_v58 = vpack.c.bf16 %v3252_v53, %v3251_v39  ;;  %v14523_v52 = vpack.c.bf16 %v5908_v19, %v5907_v59  ;;  %v5910_v19 = vrot.slane %v17574_v7, 7 }
 0x357   : > { %v2937_v3 = vpop.f32.mrb[220].mxu0  ;;  %v17578_v33 = vpop.f32.mrb[110].mxu1  ;;  %v17598_v13 = vmax.f32 %v5656_v50, 0.0  ;;  %v5529_v50 = vadd.f32 %v17497_v25, %v17417_v8  ;;  %v19914_v8 = vld [vmem:[#allocation36_spill] sm:$0xff] }
 0x358   : > { %v3125_v37 = vadd.f32 %v17536_v20, %v2937_v3  ;;  %v2939_v15 = vpop.f32.mrb[221].mxu0  ;;  %v5190_v29 = vpop.f32.mrb[111].mxu1  ;;  %5399 = vmatprep.mubr.bf16.mxu1 %v13523_v58  ;;  %v14383_v53 = vpack.c.bf16 %v3380_v31, %v3379_v14  ;;  %v13616_v58 = vpack.c.bf16 %v17574_v7, %v17582_v2  ;;  %v5655_v3 = vadd.f32 %v5527_v43, %v19910_v57  ;;  %v19913_v7 = vld [vmem:[#allocation37_spill] sm:$0xff] }
 0x359   : > { %v2940_v61 = vpop.f32.mrb[222].mxu0  ;;  %19911 = vst [vmem:[#allocation35_spill] sm:$0xff] %v17598_v13 }
 0x35a   : > { %v3253_v18 = vmax.f32 %v3125_v37, 0.0  ;;  %v3126_v39 = vadd.f32 %v17536_v20, %v2940_v61  ;;  %v2942_v4 = vpop.f32.mrb[223].mxu0  ;;  %14384 = vmatmul.mubr.msk.bf16.gmra.mrb[216].mxu1 %vm15828_vm1, %v14383_v53  ;;  %v5530_v37 = vadd.f32 %v17497_v25, %v17424_v38  ;;  %v5909_v61 = vrot.slane %v17582_v2, 7 }
 0x35b   : > { %v17606_v4 = vmax.f32 %v5655_v3, 0.0 }
 0x35c   : > { %v3254_v56 = vmax.f32 %v3126_v39, 0.0  ;;  %14524 = vmatmul.mubr.msk.bf16.gmra.mrb[72].mxu0 %vm15828_vm1, %v14523_v52  ;;  %v3381_v31 = vrot.slane %v3253_v18, 7  ;;  %v5658_v2 = vadd.f32 %v5530_v37, %v19913_v7 }
 0x35d   : > { %7720 = vmatprep.mubr.bf16.mxu0 %v13616_v58  ;;  %v17596_v59 = vpop.f32.mrb[112].mxu1  ;;  %19912 = vst [vmem:[#allocation34_spill] sm:$0xff] %v17606_v4 }
 0x35e   : > { %v3382_v14 = vrot.slane %v3254_v56, 7  ;;  %v13524_v28 = vpack.c.bf16 %v3254_v56, %v3253_v18  ;;  %v5195_v15 = vpop.f32.mrb[113].mxu1  ;;  %v14528_v56 = vpack.c.bf16 %v5910_v19, %v5909_v61  ;;  %v5912_v19 = vrot.slane %v17598_v13, 7 }
 0x35f   : > { %v2945_v29 = vpop.f32.mrb[224].mxu0  ;;  %v17604_v43 = vpop.f32.mrb[114].mxu1  ;;  %v17622_v37 = vmax.f32 %v5658_v2, 0.0  ;;  %v5531_v2 = vadd.f32 %v17497_v25, %v17441_v62  ;;  %v19918_v62 = vld [vmem:[#allocation38_spill] sm:$0xff] }
 0x360   : > { %v3127_v53 = vadd.f32 %v17536_v20, %v2945_v29  ;;  %v2947_v52 = vpop.f32.mrb[225].mxu0  ;;  %5407 = vmatprep.mubr.bf16.mxu1 %v13524_v28  ;;  %v14388_v39 = vpack.c.bf16 %v3382_v14, %v3381_v31  ;;  %v5198_v18 = vpop.f32.mrb[115].mxu1  ;;  %v13617_v31 = vpack.c.bf16 %v17598_v13, %v17606_v4  ;;  %v5657_v14 = vadd.f32 %v5529_v50, %v19914_v8  ;;  %v19917_v13 = vld [vmem:[#allocation39_spill] sm:$0xff] }
 0x361   : > { %v2948_v58 = vpop.f32.mrb[226].mxu0  ;;  %19915 = vst [vmem:[#allocation37_spill] sm:$0xff] %v17622_v37  ;;  %v5911_v18 = vrot.slane %v17606_v4, 7 }
 0x362   : > { %v3255_v38 = vmax.f32 %v3127_v53, 0.0  ;;  %v3128_v57 = vadd.f32 %v17536_v20, %v2948_v58  ;;  %v2950_v15 = vpop.f32.mrb[227].mxu0  ;;  %14389 = vmatmul.mubr.msk.bf16.gmra.mrb[220].mxu1 %vm15828_vm1, %v14388_v39  ;;  %v5532_v53 = vadd.f32 %v17497_v25, %v17448_v51 }
 0x363   : > { %v17630_v15 = vmax.f32 %v5657_v14, 0.0 }
 0x364   : > { %v3256_v3 = vmax.f32 %v3128_v57, 0.0  ;;  %14529 = vmatmul.mubr.msk.bf16.gmra.mrb[76].mxu0 %vm15828_vm1, %v14528_v56  ;;  %v3383_v28 = vrot.slane %v3255_v38, 7  ;;  %v5660_v4 = vadd.f32 %v5532_v53, %v19917_v13 }
 0x365   : > { %7728 = vmatprep.mubr.bf16.mxu0 %v13617_v31  ;;  %v17620_v61 = vpop.f32.mrb[116].mxu1  ;;  %19916 = vst [vmem:[#allocation36_spill] sm:$0xff] %v17630_v15 }
 0x366   : > { %v3384_v29 = vrot.slane %v3256_v3, 7  ;;  %v13525_v7 = vpack.c.bf16 %v3256_v3, %v3255_v38  ;;  %v5203_v52 = vpop.f32.mrb[117].mxu1  ;;  %v14533_v3 = vpack.c.bf16 %v5912_v19, %v5911_v18  ;;  %v5914_v19 = vrot.slane %v17622_v37, 7 }
 0x367   : > { %v2953_v39 = vpop.f32.mrb[228].mxu0  ;;  %v17628_v50 = vpop.f32.mrb[118].mxu1  ;;  %v17646_v53 = vmax.f32 %v5660_v4, 0.0  ;;  %v5533_v4 = vadd.f32 %v17497_v25, %v17465_v26  ;;  %v19922_v26 = vld [vmem:[#allocation40_spill] sm:$0xff] }
 0x368   : > { %v3129_v58 = vadd.f32 %v17536_v20, %v2953_v39  ;;  %v2955_v56 = vpop.f32.mrb[229].mxu0  ;;  %5415 = vmatprep.mubr.bf16.mxu1 %v13525_v7  ;;  %v14393_v57 = vpack.c.bf16 %v3384_v29, %v3383_v28  ;;  %v5206_v38 = vpop.f32.mrb[119].mxu1  ;;  %v13618_v28 = vpack.c.bf16 %v17622_v37, %v17630_v15  ;;  %v5659_v29 = vadd.f32 %v5531_v2, %v19918_v62  ;;  %v19921_v37 = vld [vmem:[#allocation41_spill] sm:$0xff] }
 0x369   : > { %v2956_v31 = vpop.f32.mrb[230].mxu0  ;;  %19919 = vst [vmem:[#allocation39_spill] sm:$0xff] %v17646_v53  ;;  %v5913_v38 = vrot.slane %v17630_v15, 7 }
 0x36a   : > { %v3257_v51 = vmax.f32 %v3129_v58, 0.0  ;;  %v3130_v8 = vadd.f32 %v17536_v20, %v2956_v31  ;;  %v2958_v52 = vpop.f32.mrb[231].mxu0  ;;  %14394 = vmatmul.mubr.msk.bf16.gmra.mrb[224].mxu1 %vm15828_vm1, %v14393_v57  ;;  %v5534_v58 = vadd.f32 %v17497_v25, %v17472_v36 }
 0x36b   : > { %v17654_v52 = vmax.f32 %v5659_v29, 0.0 }
 0x36c   : > { %v3258_v14 = vmax.f32 %v3130_v8, 0.0  ;;  %14534 = vmatmul.mubr.msk.bf16.gmra.mrb[80].mxu0 %vm15828_vm1, %v14533_v3  ;;  %v3385_v7 = vrot.slane %v3257_v51, 7  ;;  %v5662_v15 = vadd.f32 %v5534_v58, %v19921_v37 }
 0x36d   : > { %7736 = vmatprep.mubr.bf16.mxu0 %v13618_v28  ;;  %v17644_v18 = vpop.f32.mrb[120].mxu1  ;;  %19920 = vst [vmem:[#allocation38_spill] sm:$0xff] %v17654_v52 }
 0x36e   : > { %v3386_v39 = vrot.slane %v3258_v14, 7  ;;  %v13526_v13 = vpack.c.bf16 %v3258_v14, %v3257_v51  ;;  %v5211_v56 = vpop.f32.mrb[121].mxu1  ;;  %v14538_v14 = vpack.c.bf16 %v5914_v19, %v5913_v38  ;;  %v5916_v19 = vrot.slane %v17646_v53, 7 }
 0x36f   : > { %v2961_v57 = vpop.f32.mrb[232].mxu0  ;;  %v17652_v2 = vpop.f32.mrb[122].mxu1  ;;  %v17670_v58 = vmax.f32 %v5662_v15, 0.0  ;;  %v5535_v15 = vadd.f32 %v17497_v25, %v17489_v41  ;;  %v19926_v41 = vld [vmem:[#allocation42_spill] sm:$0xff] }
 0x370   : > { %v3131_v31 = vadd.f32 %v17536_v20, %v2961_v57  ;;  %v2963_v3 = vpop.f32.mrb[233].mxu0  ;;  %5423 = vmatprep.mubr.bf16.mxu1 %v13526_v13  ;;  %v14398_v8 = vpack.c.bf16 %v3386_v39, %v3385_v7  ;;  %v5214_v51 = vpop.f32.mrb[123].mxu1  ;;  %v13619_v7 = vpack.c.bf16 %v17646_v53, %v17654_v52  ;;  %v5661_v39 = vadd.f32 %v5533_v4, %v19922_v26  ;;  %v19925_v53 = vld [vmem:[#allocation43_spill] sm:$0xff] }
 0x371   : > { %v2964_v28 = vpop.f32.mrb[234].mxu0  ;;  %19923 = vst [vmem:[#allocation41_spill] sm:$0xff] %v17670_v58  ;;  %v5915_v51 = vrot.slane %v17654_v52, 7 }
 0x372   : > { %v3259_v36 = vmax.f32 %v3131_v31, 0.0  ;;  %v3132_v62 = vadd.f32 %v17536_v20, %v2964_v28  ;;  %v2966_v56 = vpop.f32.mrb[235].mxu0  ;;  %14399 = vmatmul.mubr.msk.bf16.gmra.mrb[228].mxu1 %vm15828_vm1, %v14398_v8  ;;  %v5536_v31 = vadd.f32 %v17497_v25, %v17501_v24 }
 0x373   : > { %v17678_v56 = vmax.f32 %v5661_v39, 0.0 }
 0x374   : > { %v3260_v29 = vmax.f32 %v3132_v62, 0.0  ;;  %14539 = vmatmul.mubr.msk.bf16.gmra.mrb[84].mxu0 %vm15828_vm1, %v14538_v14  ;;  %v3387_v13 = vrot.slane %v3259_v36, 7  ;;  %v5664_v52 = vadd.f32 %v5536_v31, %v19925_v53 }
 0x375   : > { %7744 = vmatprep.mubr.bf16.mxu0 %v13619_v7  ;;  %v17668_v38 = vpop.f32.mrb[124].mxu1  ;;  %19924 = vst [vmem:[#allocation40_spill] sm:$0xff] %v17678_v56 }
 0x376   : > { %v3388_v57 = vrot.slane %v3260_v29, 7  ;;  %v13527_v37 = vpack.c.bf16 %v3260_v29, %v3259_v36  ;;  %v5219_v3 = vpop.f32.mrb[125].mxu1  ;;  %v14543_v29 = vpack.c.bf16 %v5916_v19, %v5915_v51  ;;  %v5918_v19 = vrot.slane %v17670_v58, 7 }
 0x377   : > { %v2969_v8 = vpop.f32.mrb[236].mxu0  ;;  %v17676_v4 = vpop.f32.mrb[126].mxu1  ;;  %v17694_v31 = vmax.f32 %v5664_v52, 0.0  ;;  %v5537_v52 = vadd.f32 %v17497_v25, %v17518_v1  ;;  %v19930_v1 = vld [vmem:[#allocation44_spill] sm:$0xff] }
 0x378   : > { %v3133_v28 = vadd.f32 %v17536_v20, %v2969_v8  ;;  %v2971_v14 = vpop.f32.mrb[237].mxu0  ;;  %5431 = vmatprep.mubr.bf16.mxu1 %v13527_v37  ;;  %v14403_v62 = vpack.c.bf16 %v3388_v57, %v3387_v13  ;;  %v5222_v36 = vpop.f32.mrb[127].mxu1  ;;  %v13620_v13 = vpack.c.bf16 %v17670_v58, %v17678_v56  ;;  %v5663_v57 = vadd.f32 %v5535_v15, %v19926_v41  ;;  %v19929_v58 = vld [vmem:[#allocation45_spill] sm:$0xff] }
 0x379   : > { %v2972_v7 = vpop.f32.mrb[238].mxu0  ;;  %19927 = vst [vmem:[#allocation43_spill] sm:$0xff] %v17694_v31  ;;  %v5917_v36 = vrot.slane %v17678_v56, 7 }
 0x37a   : > { %v3261_v24 = vmax.f32 %v3133_v28, 0.0  ;;  %v3134_v26 = vadd.f32 %v17536_v20, %v2972_v7  ;;  %v2974_v3 = vpop.f32.mrb[239].mxu0  ;;  %14404 = vmatmul.mubr.msk.bf16.gmra.mrb[232].mxu1 %vm15828_vm1, %v14403_v62  ;;  %v5538_v28 = vadd.f32 %v17497_v25, %v17525_v40 }
 0x37b   : > { %v17702_v3 = vmax.f32 %v5663_v57, 0.0 }
 0x37c   : > { %v3262_v39 = vmax.f32 %v3134_v26, 0.0  ;;  %14544 = vmatmul.mubr.msk.bf16.gmra.mrb[88].mxu0 %vm15828_vm1, %v14543_v29  ;;  %v3389_v37 = vrot.slane %v3261_v24, 7  ;;  %v5666_v56 = vadd.f32 %v5538_v28, %v19929_v58 }
 0x37d   : > { %7752 = vmatprep.mubr.bf16.mxu0 %v13620_v13  ;;  %v17692_v51 = vpop.f32.mrb[128].mxu1  ;;  %19928 = vst [vmem:[#allocation42_spill] sm:$0xff] %v17702_v3 }
 0x37e   : > { %v3390_v8 = vrot.slane %v3262_v39, 7  ;;  %v13528_v53 = vpack.c.bf16 %v3262_v39, %v3261_v24  ;;  %v5227_v14 = vpop.f32.mrb[129].mxu1  ;;  %v14548_v39 = vpack.c.bf16 %v5918_v19, %v5917_v36  ;;  %v5920_v19 = vrot.slane %v17694_v31, 7 }
 0x37f   : > { %v2977_v62 = vpop.f32.mrb[240].mxu0  ;;  %v17700_v15 = vpop.f32.mrb[130].mxu1  ;;  %v17718_v28 = vmax.f32 %v5666_v56, 0.0  ;;  %v5539_v56 = vadd.f32 %v17497_v25, %v17547_v16  ;;  %v19934_v16 = vld [vmem:[#allocation46_spill] sm:$0xff] }
 0x380   : > { %v3135_v7 = vadd.f32 %v17536_v20, %v2977_v62  ;;  %v2979_v29 = vpop.f32.mrb[241].mxu0  ;;  %5439 = vmatprep.mubr.bf16.mxu1 %v13528_v53  ;;  %v14408_v26 = vpack.c.bf16 %v3390_v8, %v3389_v37  ;;  %v5230_v24 = vpop.f32.mrb[131].mxu1  ;;  %v13621_v37 = vpack.c.bf16 %v17694_v31, %v17702_v3  ;;  %v5665_v8 = vadd.f32 %v5537_v52, %v19930_v1  ;;  %v19933_v31 = vld [vmem:[#allocation47_spill] sm:$0xff] }
 0x381   : > { %v2980_v13 = vpop.f32.mrb[242].mxu0  ;;  %19931 = vst [vmem:[#allocation45_spill] sm:$0xff] %v17718_v28  ;;  %v5919_v24 = vrot.slane %v17702_v3, 7 }
 0x382   : > { %v3263_v40 = vmax.f32 %v3135_v7, 0.0  ;;  %v3136_v41 = vadd.f32 %v17536_v20, %v2980_v13  ;;  %v2982_v14 = vpop.f32.mrb[243].mxu0  ;;  %14409 = vmatmul.mubr.msk.bf16.gmra.mrb[236].mxu1 %vm15828_vm1, %v14408_v26  ;;  %v5540_v7 = vadd.f32 %v17497_v25, %v17554_v17 }
 0x383   : > { %v17726_v14 = vmax.f32 %v5665_v8, 0.0 }
 0x384   : > { %v3264_v57 = vmax.f32 %v3136_v41, 0.0  ;;  %14549 = vmatmul.mubr.msk.bf16.gmra.mrb[92].mxu0 %vm15828_vm1, %v14548_v39  ;;  %v3391_v53 = vrot.slane %v3263_v40, 7  ;;  %v5668_v3 = vadd.f32 %v5540_v7, %v19933_v31 }
 0x385   : > { %7760 = vmatprep.mubr.bf16.mxu0 %v13621_v37  ;;  %v17716_v36 = vpop.f32.mrb[132].mxu1  ;;  %19932 = vst [vmem:[#allocation44_spill] sm:$0xff] %v17726_v14 }
 0x386   : > { %v3392_v62 = vrot.slane %v3264_v57, 7  ;;  %v13529_v58 = vpack.c.bf16 %v3264_v57, %v3263_v40  ;;  %v5235_v29 = vpop.f32.mrb[133].mxu1  ;;  %v14553_v57 = vpack.c.bf16 %v5920_v19, %v5919_v24  ;;  %v5922_v19 = vrot.slane %v17718_v28, 7 }
 0x387   : > { %v2985_v26 = vpop.f32.mrb[244].mxu0  ;;  %v17724_v52 = vpop.f32.mrb[134].mxu1  ;;  %v17742_v7 = vmax.f32 %v5668_v3, 0.0  ;;  %v5541_v3 = vadd.f32 %v17497_v25, %v17571_v45  ;;  %v19938_v45 = vld [vmem:[#allocation48_spill] sm:$0xff] }
 0x388   : > { %v3137_v13 = vadd.f32 %v17536_v20, %v2985_v26  ;;  %v2987_v39 = vpop.f32.mrb[245].mxu0  ;;  %5447 = vmatprep.mubr.bf16.mxu1 %v13529_v58  ;;  %v14413_v41 = vpack.c.bf16 %v3392_v62, %v3391_v53  ;;  %v5238_v40 = vpop.f32.mrb[135].mxu1  ;;  %v13622_v53 = vpack.c.bf16 %v17718_v28, %v17726_v14  ;;  %v5667_v62 = vadd.f32 %v5539_v56, %v19934_v16  ;;  %v19937_v28 = vld [vmem:[#allocation49_spill] sm:$0xff] }
 0x389   : > { %v2988_v37 = vpop.f32.mrb[246].mxu0  ;;  %19935 = vst [vmem:[#allocation47_spill] sm:$0xff] %v17742_v7  ;;  %v5921_v40 = vrot.slane %v17726_v14, 7 }
 0x38a   : > { %v3265_v17 = vmax.f32 %v3137_v13, 0.0  ;;  %v3138_v1 = vadd.f32 %v17536_v20, %v2988_v37  ;;  %v2990_v29 = vpop.f32.mrb[247].mxu0  ;;  %14414 = vmatmul.mubr.msk.bf16.gmra.mrb[240].mxu1 %vm15828_vm1, %v14413_v41  ;;  %v5542_v13 = vadd.f32 %v17497_v25, %v17578_v33 }
 0x38b   : > { %v17750_v29 = vmax.f32 %v5667_v62, 0.0 }
 0x38c   : > { %v3266_v8 = vmax.f32 %v3138_v1, 0.0  ;;  %14554 = vmatmul.mubr.msk.bf16.gmra.mrb[96].mxu0 %vm15828_vm1, %v14553_v57  ;;  %v3393_v58 = vrot.slane %v3265_v17, 7  ;;  %v5670_v14 = vadd.f32 %v5542_v13, %v19937_v28 }
 0x38d   : > { %7768 = vmatprep.mubr.bf16.mxu0 %v13622_v53  ;;  %v17740_v24 = vpop.f32.mrb[136].mxu1  ;;  %19936 = vst [vmem:[#allocation46_spill] sm:$0xff] %v17750_v29 }
 0x38e   : > { %v3394_v26 = vrot.slane %v3266_v8, 7  ;;  %v13530_v31 = vpack.c.bf16 %v3266_v8, %v3265_v17  ;;  %v5243_v39 = vpop.f32.mrb[137].mxu1  ;;  %v14558_v8 = vpack.c.bf16 %v5922_v19, %v5921_v40  ;;  %v5924_v19 = vrot.slane %v17742_v7, 7 }
 0x38f   : > { %v2993_v41 = vpop.f32.mrb[248].mxu0  ;;  %v17748_v56 = vpop.f32.mrb[138].mxu1  ;;  %v17766_v13 = vmax.f32 %v5670_v14, 0.0  ;;  %v5543_v14 = vadd.f32 %v17497_v25, %v17596_v59  ;;  %v19942_v59 = vld [vmem:[#allocation50_spill] sm:$0xff] }
 0x390   : > { %v3139_v37 = vadd.f32 %v17536_v20, %v2993_v41  ;;  %v2995_v57 = vpop.f32.mrb[249].mxu0  ;;  %5455 = vmatprep.mubr.bf16.mxu1 %v13530_v31  ;;  %v14418_v1 = vpack.c.bf16 %v3394_v26, %v3393_v58  ;;  %v5246_v17 = vpop.f32.mrb[139].mxu1  ;;  %v13623_v58 = vpack.c.bf16 %v17742_v7, %v17750_v29  ;;  %v5669_v26 = vadd.f32 %v5541_v3, %v19938_v45  ;;  %v19941_v7 = vld [vmem:[#allocation51_spill] sm:$0xff] }
 0x391   : > { %v2996_v53 = vpop.f32.mrb[250].mxu0  ;;  %19939 = vst [vmem:[#allocation49_spill] sm:$0xff] %v17766_v13  ;;  %v5923_v17 = vrot.slane %v17750_v29, 7 }
 0x392   : > { %v3267_v33 = vmax.f32 %v3139_v37, 0.0  ;;  %v3140_v16 = vadd.f32 %v17536_v20, %v2996_v53  ;;  %v2998_v39 = vpop.f32.mrb[251].mxu0  ;;  %14419 = vmatmul.mubr.msk.bf16.gmra.mrb[244].mxu1 %vm15828_vm1, %v14418_v1  ;;  %v5544_v37 = vadd.f32 %v17497_v25, %v17604_v43 }
 0x393   : > { %v17774_v39 = vmax.f32 %v5669_v26, 0.0 }
 0x394   : > { %v3268_v62 = vmax.f32 %v3140_v16, 0.0  ;;  %14559 = vmatmul.mubr.msk.bf16.gmra.mrb[100].mxu0 %vm15828_vm1, %v14558_v8  ;;  %v3395_v31 = vrot.slane %v3267_v33, 7  ;;  %v5672_v29 = vadd.f32 %v5544_v37, %v19941_v7  ;;  %v5926_v7 = vrot.slane %v17766_v13, 7 }
 0x395   : > { %7776 = vmatprep.mubr.bf16.mxu0 %v13623_v58  ;;  %v17764_v40 = vpop.f32.mrb[140].mxu1  ;;  %19940 = vst [vmem:[#allocation48_spill] sm:$0xff] %v17774_v39 }
 0x396   : > { %v3396_v41 = vrot.slane %v3268_v62, 7  ;;  %v13531_v28 = vpack.c.bf16 %v3268_v62, %v3267_v33  ;;  %v5251_v57 = vpop.f32.mrb[141].mxu1  ;;  %v14563_v62 = vpack.c.bf16 %v5924_v19, %v5923_v17  ;;  %v17795_v17 = vmax.f32 %v5672_v29, 0.0 }
 0x397   : > { %v3001_v1 = vpop.f32.mrb[252].mxu0  ;;  %v17772_v3 = vpop.f32.mrb[142].mxu1  ;;  %v5545_v29 = vadd.f32 %v17497_v25, %v17620_v61  ;;  %v19946_v61 = vld [vmem:[#allocation52_spill] sm:$0xff] }
 0x398   : > { %v3141_v53 = vadd.f32 %v17536_v20, %v3001_v1  ;;  %v3003_v8 = vpop.f32.mrb[253].mxu0  ;;  %5463 = vmatprep.mubr.bf16.mxu1 %v13531_v28  ;;  %v14423_v16 = vpack.c.bf16 %v3396_v41, %v3395_v31  ;;  %v5254_v33 = vpop.f32.mrb[143].mxu1  ;;  %v13624_v31 = vpack.c.bf16 %v17766_v13, %v17774_v39  ;;  %v5671_v41 = vadd.f32 %v5543_v14, %v19942_v59  ;;  %v19945_v13 = vld [vmem:[#allocation53_spill] sm:$0xff] }
 0x399   : > { %v3004_v58 = vpop.f32.mrb[254].mxu0  ;;  %19943 = vst [vmem:[#allocation51_spill] sm:$0xff] %v17795_v17  ;;  %v5925_v14 = vrot.slane %v17774_v39, 7 }
 0x39a   : > { %v3269_v43 = vmax.f32 %v3141_v53, 0.0  ;;  %v3142_v45 = vadd.f32 %v17536_v20, %v3004_v58  ;;  %v3006_v57 = vpop.f32.mrb[255].mxu0  ;;  %14424 = vmatmul.mubr.msk.bf16.gmra.mrb[248].mxu1 %vm15828_vm1, %v14423_v16  ;;  %v17790_v20 = vld [vmem:[%s19536_s4 + $0x1] ss:$0 sm:$0xff]  ;;  %v5546_v53 = vadd.f32 %v17497_v25, %v17628_v50 }
 0x39b   : > { %v17803_v57 = vmax.f32 %v5671_v41, 0.0 }
 0x39c   : > { %v3270_v26 = vmax.f32 %v3142_v45, 0.0  ;;  %14564 = vmatmul.mubr.msk.bf16.gmra.mrb[104].mxu0 %vm15828_vm1, %v14563_v62  ;;  %v3397_v19 = vrot.slane %v3269_v43, 7  ;;  %v5674_v39 = vadd.f32 %v5546_v53, %v19945_v13 }
 0x39d   : > { %7784 = vmatprep.mubr.bf16.mxu0 %v13624_v31  ;;  %v17793_v37 = vpop.f32.mrb[144].mxu1  ;;  %19944 = vst [vmem:[#allocation50_spill] sm:$0xff] %v17803_v57 }
 0x39e   : > { %v3398_v28 = vrot.slane %v3270_v26, 7  ;;  %v13532_v1 = vpack.c.bf16 %v3270_v26, %v3269_v43  ;;  %v5259_v8 = vpop.f32.mrb[145].mxu1  ;;  %v14568_v26 = vpack.c.bf16 %v5926_v7, %v5925_v14  ;;  %v5928_v7 = vrot.slane %v17795_v17, 7 }
 0x39f   : > { %v7570_v16 = vpop.f32.mrb[0].mxu0  ;;  %v17800_v33 = vpop.f32.mrb[146].mxu1  ;;  %v17819_v53 = vmax.f32 %v5674_v39, 0.0  ;;  %v5547_v39 = vadd.f32 %v17497_v25, %v17644_v18  ;;  %v19950_v18 = vld [vmem:[#allocation54_spill] sm:$0xff] }
 0x3a0   : > { %v8089_v58 = vadd.f32 %v17790_v20, %v7570_v16  ;;  %5471 = vmatprep.mubr.bf16.mxu1 %v13532_v1  ;;  %v7572_v62 = vpop.f32.mrb[1].mxu0  ;;  %v14428_v45 = vpack.c.bf16 %v3398_v28, %v3397_v19  ;;  %v5262_v43 = vpop.f32.mrb[147].mxu1  ;;  %v13625_v19 = vpack.c.bf16 %v17795_v17, %v17803_v57  ;;  %v5673_v28 = vadd.f32 %v5545_v29, %v19946_v61  ;;  %v19949_v17 = vld [vmem:[#allocation55_spill] sm:$0xff] }
 0x3a1   : > { %v7573_v31 = vpop.f32.mrb[2].mxu0  ;;  %19947 = vst [vmem:[#allocation53_spill] sm:$0xff] %v17819_v53  ;;  %v5927_v43 = vrot.slane %v17803_v57, 7 }
 0x3a2   : > { %v8217_v50 = vmax.f32 %v8089_v58, 0.0  ;;  %v8090_v59 = vadd.f32 %v17790_v20, %v7573_v31  ;;  %v7575_v8 = vpop.f32.mrb[3].mxu0  ;;  %14429 = vmatmul.mubr.msk.bf16.gmra.mrb[252].mxu1 %vm15828_vm1, %v14428_v45  ;;  %v5548_v58 = vadd.f32 %v17497_v25, %v17652_v2 }
 0x3a3   : > { %v17827_v8 = vmax.f32 %v5673_v28, 0.0 }
 0x3a4   : > { %v8218_v41 = vmax.f32 %v8090_v59, 0.0  ;;  %14569 = vmatmul.mubr.msk.bf16.gmra.mrb[108].mxu0 %vm15828_vm1, %v14568_v26  ;;  %v8345_v1 = vrot.slane %v8217_v50, 7 }
 0x3a5   : > { %7792 = vmatprep.mubr.bf16.mxu0 %v13625_v19  ;;  %v17817_v14 = vpop.f32.mrb[148].mxu1  ;;  %19948 = vst [vmem:[#allocation52_spill] sm:$0xff] %v17827_v8 }
 0x3a6   : > { %v8346_v16 = vrot.slane %v8218_v41, 7  ;;  %v13725_v13 = vpack.c.bf16 %v8218_v41, %v8217_v50  ;;  %v5267_v62 = vpop.f32.mrb[149].mxu1  ;;  %v14573_v41 = vpack.c.bf16 %v5928_v7, %v5927_v43  ;;  %v5930_v7 = vrot.slane %v17819_v53, 7 }
 0x3a7   : > { %v7578_v45 = vpop.f32.mrb[4].mxu0  ;;  %v17824_v26 = vpop.f32.mrb[150].mxu1 }
 0x3a8   : > { %v14753_v31 = vpack.c.bf16 %v8346_v16, %v8345_v1  ;;  %v8091_v29 = vadd.f32 %v17790_v20, %v7578_v45  ;;  %v7580_v59 = vpop.f32.mrb[5].mxu0  ;;  %10042 = vmatprep.mubr.bf16.mxu1 %v13725_v13  ;;  %v5270_v50 = vpop.f32.mrb[151].mxu1  ;;  %v5676_v1 = vadd.f32 %v5548_v58, %v19949_v17  ;;  %v13626_v16 = vpack.c.bf16 %v17819_v53, %v17827_v8 }
 0x3a9   : > { %v7581_v19 = vpop.f32.mrb[6].mxu0  ;;  %v5675_v13 = vadd.f32 %v5547_v39, %v19950_v18 }
 0x3aa   : > { %v8219_v2 = vmax.f32 %v8091_v29, 0.0  ;;  %v8092_v61 = vadd.f32 %v17790_v20, %v7581_v19  ;;  %v7583_v62 = vpop.f32.mrb[7].mxu0  ;;  %14754 = vmatmul.mubr.msk.bf16.vlgmr.msra.gmra.mrb[0].mxu1 %vm15828_vm1, %v14753_v31  ;;  %v17843_v58 = vmax.f32 %v5676_v1, 0.0  ;;  %v5550_v31 = vadd.f32 %v17497_v25, %v17676_v4 }
 0x3ab   : > { %v5929_v19 = vrot.slane %v17827_v8, 7  ;;  %v19953_v8 = vld [vmem:[#allocation57_spill] sm:$0xff] }
 0x3ac   : > { %v8220_v28 = vmax.f32 %v8092_v61, 0.0  ;;  %14574 = vmatmul.mubr.msk.bf16.gmra.mrb[112].mxu0 %vm15828_vm1, %v14573_v41  ;;  %v8347_v45 = vrot.slane %v8219_v2, 7  ;;  %19951 = vst [vmem:[#allocation55_spill] sm:$0xff] %v17843_v58 }
 0x3ad   : > { %7800 = vmatprep.mubr.bf16.mxu0 %v13626_v16  ;;  %v17841_v29 = vpop.f32.mrb[152].mxu1  ;;  %v17851_v16 = vmax.f32 %v5675_v13, 0.0  ;;  %v14578_v18 = vpack.c.bf16 %v5930_v7, %v5929_v19  ;;  %v5932_v7 = vrot.slane %v17843_v58, 7 }
 0x3ae   : > { %v8348_v43 = vrot.slane %v8220_v28, 7  ;;  %v13726_v17 = vpack.c.bf16 %v8220_v28, %v8219_v2  ;;  %v5275_v59 = vpop.f32.mrb[153].mxu1  ;;  %v5549_v2 = vadd.f32 %v17497_v25, %v17668_v38  ;;  %v19954_v38 = vld [vmem:[#allocation56_spill] sm:$0xff] }
 0x3af   : > { %v7586_v50 = vpop.f32.mrb[8].mxu0  ;;  %v17848_v61 = vpop.f32.mrb[154].mxu1  ;;  %19952 = vst [vmem:[#allocation54_spill] sm:$0xff] %v17851_v16 }
 0x3b0   : > { %v14758_v41 = vpack.c.bf16 %v8348_v43, %v8347_v45  ;;  %v8093_v39 = vadd.f32 %v17790_v20, %v7586_v50  ;;  %v7588_v62 = vpop.f32.mrb[9].mxu0  ;;  %10050 = vmatprep.mubr.bf16.mxu1 %v13726_v17  ;;  %v5278_v1 = vpop.f32.mrb[155].mxu1  ;;  %v5678_v45 = vadd.f32 %v5550_v31, %v19953_v8  ;;  %v13627_v43 = vpack.c.bf16 %v17843_v58, %v17851_v16 }
 0x3b1   : > { %v7589_v28 = vpop.f32.mrb[10].mxu0  ;;  %v5677_v17 = vadd.f32 %v5549_v2, %v19954_v38  ;;  %v5552_v31 = vadd.f32 %v17497_v25, %v17700_v15  ;;  %v5931_v1 = vrot.slane %v17851_v16, 7  ;;  %v19957_v16 = vld [vmem:[#allocation59_spill] sm:$0xff] }
 0x3b2   : > { %v8221_v4 = vmax.f32 %v8093_v39, 0.0  ;;  %v8094_v59 = vadd.f32 %v17790_v20, %v7589_v28  ;;  %v7591_v53 = vpop.f32.mrb[11].mxu0  ;;  %14759 = vmatmul.mubr.msk.bf16.gmra.mrb[4].mxu1 %vm15828_vm1, %v14758_v41  ;;  %v17867_v8 = vmax.f32 %v5678_v45, 0.0 }
 0x3b3   : > { %v14583_v38 = vpack.c.bf16 %v5932_v7, %v5931_v1 }
 0x3b4   : > { %v8222_v13 = vmax.f32 %v8094_v59, 0.0  ;;  %14579 = vmatmul.mubr.msk.bf16.gmra.mrb[116].mxu0 %vm15828_vm1, %v14578_v18  ;;  %v8349_v50 = vrot.slane %v8221_v4, 7  ;;  %19955 = vst [vmem:[#allocation57_spill] sm:$0xff] %v17867_v8  ;;  %v5934_v7 = vrot.slane %v17867_v8, 7 }
 0x3b5   : > { %7808 = vmatprep.mubr.bf16.mxu0 %v13627_v43  ;;  %v17865_v39 = vpop.f32.mrb[156].mxu1  ;;  %v17875_v43 = vmax.f32 %v5677_v17, 0.0 }
 0x3b6   : > { %v8350_v19 = vrot.slane %v8222_v13, 7  ;;  %v13727_v53 = vpack.c.bf16 %v8222_v13, %v8221_v4  ;;  %v5283_v41 = vpop.f32.mrb[157].mxu1  ;;  %v5551_v4 = vadd.f32 %v17497_v25, %v17692_v51  ;;  %v19958_v51 = vld [vmem:[#allocation58_spill] sm:$0xff] }
 0x3b7   : > { %v7594_v62 = vpop.f32.mrb[12].mxu0  ;;  %v17872_v18 = vpop.f32.mrb[158].mxu1  ;;  %19956 = vst [vmem:[#allocation56_spill] sm:$0xff] %v17875_v43 }
 0x3b8   : > { %v14763_v28 = vpack.c.bf16 %v8350_v19, %v8349_v50  ;;  %v8095_v2 = vadd.f32 %v17790_v20, %v7594_v62  ;;  %v7596_v59 = vpop.f32.mrb[13].mxu0  ;;  %10058 = vmatprep.mubr.bf16.mxu1 %v13727_v53  ;;  %v5286_v45 = vpop.f32.mrb[159].mxu1  ;;  %v5680_v50 = vadd.f32 %v5552_v31, %v19957_v16  ;;  %v13628_v19 = vpack.c.bf16 %v17867_v8, %v17875_v43 }
 0x3b9   : > { %v7597_v13 = vpop.f32.mrb[14].mxu0  ;;  %v5679_v53 = vadd.f32 %v5551_v4, %v19958_v51  ;;  %v5554_v31 = vadd.f32 %v17497_v25, %v17724_v52  ;;  %v5933_v45 = vrot.slane %v17875_v43, 7  ;;  %v19961_v43 = vld [vmem:[#allocation61_spill] sm:$0xff] }
 0x3ba   : > { %v8223_v15 = vmax.f32 %v8095_v2, 0.0  ;;  %v8096_v41 = vadd.f32 %v17790_v20, %v7597_v13  ;;  %v7599_v58 = vpop.f32.mrb[15].mxu0  ;;  %14764 = vmatmul.mubr.msk.bf16.gmra.mrb[8].mxu1 %vm15828_vm1, %v14763_v28  ;;  %v17891_v16 = vmax.f32 %v5680_v50, 0.0 }
 0x3bb   : > { %v14588_v51 = vpack.c.bf16 %v5934_v7, %v5933_v45 }
 0x3bc   : > { %v8224_v17 = vmax.f32 %v8096_v41, 0.0  ;;  %14584 = vmatmul.mubr.msk.bf16.gmra.mrb[120].mxu0 %vm15828_vm1, %v14583_v38  ;;  %v8351_v62 = vrot.slane %v8223_v15, 7  ;;  %19959 = vst [vmem:[#allocation59_spill] sm:$0xff] %v17891_v16  ;;  %v5936_v7 = vrot.slane %v17891_v16, 7 }
 0x3bd   : > { %7816 = vmatprep.mubr.bf16.mxu0 %v13628_v19  ;;  %v17889_v2 = vpop.f32.mrb[160].mxu1  ;;  %v17899_v19 = vmax.f32 %v5679_v53, 0.0 }
 0x3be   : > { %v8352_v1 = vrot.slane %v8224_v17, 7  ;;  %v13728_v58 = vpack.c.bf16 %v8224_v17, %v8223_v15  ;;  %v5291_v28 = vpop.f32.mrb[161].mxu1  ;;  %v5553_v15 = vadd.f32 %v17497_v25, %v17716_v36  ;;  %v19962_v36 = vld [vmem:[#allocation60_spill] sm:$0xff] }
 0x3bf   : > { %v7602_v59 = vpop.f32.mrb[16].mxu0  ;;  %v17896_v38 = vpop.f32.mrb[162].mxu1  ;;  %19960 = vst [vmem:[#allocation58_spill] sm:$0xff] %v17899_v19 }
 0x3c0   : > { %v14768_v13 = vpack.c.bf16 %v8352_v1, %v8351_v62  ;;  %v8097_v4 = vadd.f32 %v17790_v20, %v7602_v59  ;;  %v7604_v41 = vpop.f32.mrb[17].mxu0  ;;  %10066 = vmatprep.mubr.bf16.mxu1 %v13728_v58  ;;  %v5294_v50 = vpop.f32.mrb[163].mxu1  ;;  %v5682_v62 = vadd.f32 %v5554_v31, %v19961_v43  ;;  %v13629_v1 = vpack.c.bf16 %v17891_v16, %v17899_v19 }
 0x3c1   : > { %v7605_v17 = vpop.f32.mrb[18].mxu0  ;;  %v5681_v58 = vadd.f32 %v5553_v15, %v19962_v36  ;;  %v5556_v31 = vadd.f32 %v17497_v25, %v17748_v56  ;;  %v5935_v50 = vrot.slane %v17899_v19, 7 }
 0x3c2   : > { %v8225_v52 = vmax.f32 %v8097_v4, 0.0  ;;  %v8098_v28 = vadd.f32 %v17790_v20, %v7605_v17  ;;  %v7607_v8 = vpop.f32.mrb[19].mxu0  ;;  %14769 = vmatmul.mubr.msk.bf16.gmra.mrb[12].mxu1 %vm15828_vm1, %v14768_v13  ;;  %v17915_v43 = vmax.f32 %v5682_v62, 0.0 }
 0x3c4   : > { %v8226_v53 = vmax.f32 %v8098_v28, 0.0  ;;  %14589 = vmatmul.mubr.msk.bf16.gmra.mrb[124].mxu0 %vm15828_vm1, %v14588_v51  ;;  %v8353_v59 = vrot.slane %v8225_v52, 7  ;;  %19963 = vst [vmem:[#allocation61_spill] sm:$0xff] %v17915_v43 }
 0x3c5   : > { %7824 = vmatprep.mubr.bf16.mxu0 %v13629_v1  ;;  %v17913_v4 = vpop.f32.mrb[164].mxu1  ;;  %v17923_v1 = vmax.f32 %v5681_v58, 0.0 }
 0x3c6   : > { %v8354_v45 = vrot.slane %v8226_v53, 7  ;;  %v13729_v8 = vpack.c.bf16 %v8226_v53, %v8225_v52  ;;  %v5299_v13 = vpop.f32.mrb[165].mxu1  ;;  %v17928_v52 = vld [vmem:[%s19538_s6] ss:$0 sm:$0xff]  ;;  %v14593_v53 = vpack.c.bf16 %v5936_v7, %v5935_v50  ;;  %v5938_v7 = vrot.slane %v17915_v43, 7 }
 0x3c7   : > { %v7610_v41 = vpop.f32.mrb[20].mxu0  ;;  %v17920_v51 = vpop.f32.mrb[166].mxu1  ;;  %19964 = vst [vmem:[#allocation60_spill] sm:$0xff] %v17923_v1  ;;  %v5555_v25 = vadd.f32 %v17928_v52, %v17740_v24  ;;  %v19965_v13 = vld [vmem:[#allocation63_spill] sm:$0xff]  ;;  %v13630_v58 = vpack.c.bf16 %v17915_v43, %v17923_v1  ;;  %v19966_v24 = vld [vmem:[#allocation62_spill] sm:$0xff] }
 0x3c8   : > { %v14773_v17 = vpack.c.bf16 %v8354_v45, %v8353_v59  ;;  %v8099_v15 = vadd.f32 %v17790_v20, %v7610_v41  ;;  %v7612_v28 = vpop.f32.mrb[21].mxu0  ;;  %10074 = vmatprep.mubr.bf16.mxu1 %v13729_v8  ;;  %v5302_v56 = vpop.f32.mrb[167].mxu1  ;;  %v5684_v41 = vadd.f32 %v5556_v31, %v19965_v13  ;;  %v5937_v13 = vrot.slane %v17923_v1, 7  ;;  %v19969_v1 = vld [vmem:[#allocation65_spill] sm:$0xff] }
 0x3c9   : > { %v7613_v62 = vpop.f32.mrb[22].mxu0  ;;  %v5683_v28 = vadd.f32 %v5555_v25, %v19966_v24 }
 0x3ca   : > { %v8227_v36 = vmax.f32 %v8099_v15, 0.0  ;;  %v8100_v59 = vadd.f32 %v17790_v20, %v7613_v62  ;;  %v7615_v45 = vpop.f32.mrb[23].mxu0  ;;  %14774 = vmatmul.mubr.msk.bf16.gmra.mrb[16].mxu1 %vm15828_vm1, %v14773_v17  ;;  %v17944_v31 = vmax.f32 %v5684_v41, 0.0  ;;  %v5558_v17 = vadd.f32 %v17928_v52, %v17772_v3 }
 0x3cb   : > { %v17952_v24 = vmax.f32 %v5683_v28, 0.0  ;;  %v14598_v43 = vpack.c.bf16 %v5938_v7, %v5937_v13 }
 0x3cc   : > { %v8228_v8 = vmax.f32 %v8100_v59, 0.0  ;;  %14594 = vmatmul.mubr.msk.bf16.gmra.mrb[128].mxu0 %vm15828_vm1, %v14593_v53  ;;  %v8355_v50 = vrot.slane %v8227_v36, 7  ;;  %19967 = vst [vmem:[#allocation63_spill] sm:$0xff] %v17944_v31  ;;  %v5940_v7 = vrot.slane %v17944_v31, 7 }
 0x3cd   : > { %7832 = vmatprep.mubr.bf16.mxu0 %v13630_v58  ;;  %v17942_v62 = vpop.f32.mrb[168].mxu1  ;;  %19968 = vst [vmem:[#allocation62_spill] sm:$0xff] %v17952_v24 }
 0x3ce   : > { %v8356_v15 = vrot.slane %v8228_v8, 7  ;;  %v13730_v56 = vpack.c.bf16 %v8228_v8, %v8227_v36  ;;  %v5307_v45 = vpop.f32.mrb[169].mxu1  ;;  %v5557_v36 = vadd.f32 %v17928_v52, %v17764_v40  ;;  %v19970_v40 = vld [vmem:[#allocation64_spill] sm:$0xff] }
 0x3cf   : > { %v7618_v59 = vpop.f32.mrb[24].mxu0  ;;  %v17949_v16 = vpop.f32.mrb[170].mxu1 }
 0x3d0   : > { %v14778_v53 = vpack.c.bf16 %v8356_v15, %v8355_v50  ;;  %v8101_v25 = vadd.f32 %v17790_v20, %v7618_v59  ;;  %v7620_v58 = vpop.f32.mrb[25].mxu0  ;;  %10082 = vmatprep.mubr.bf16.mxu1 %v13730_v56  ;;  %v5310_v41 = vpop.f32.mrb[171].mxu1  ;;  %v5686_v50 = vadd.f32 %v5558_v17, %v19969_v1  ;;  %v13631_v15 = vpack.c.bf16 %v17944_v31, %v17952_v24 }
 0x3d1   : > { %v7621_v8 = vpop.f32.mrb[26].mxu0  ;;  %v5685_v56 = vadd.f32 %v5557_v36, %v19970_v40  ;;  %v5560_v17 = vadd.f32 %v17928_v52, %v17800_v33  ;;  %v5939_v41 = vrot.slane %v17952_v24, 7  ;;  %v19973_v24 = vld [vmem:[#allocation67_spill] sm:$0xff] }
 0x3d2   : > { %v8229_v3 = vmax.f32 %v8101_v25, 0.0  ;;  %v8102_v45 = vadd.f32 %v17790_v20, %v7621_v8  ;;  %v7623_v19 = vpop.f32.mrb[27].mxu0  ;;  %14779 = vmatmul.mubr.msk.bf16.gmra.mrb[20].mxu1 %vm15828_vm1, %v14778_v53  ;;  %v17968_v1 = vmax.f32 %v5686_v50, 0.0 }
 0x3d3   : > { %v14603_v40 = vpack.c.bf16 %v5940_v7, %v5939_v41 }
 0x3d4   : > { %v8230_v28 = vmax.f32 %v8102_v45, 0.0  ;;  %14599 = vmatmul.mubr.msk.bf16.gmra.mrb[132].mxu0 %vm15828_vm1, %v14598_v43  ;;  %v8357_v59 = vrot.slane %v8229_v3, 7  ;;  %19971 = vst [vmem:[#allocation65_spill] sm:$0xff] %v17968_v1  ;;  %v5942_v7 = vrot.slane %v17968_v1, 7 }
 0x3d5   : > { %7840 = vmatprep.mubr.bf16.mxu0 %v13631_v15  ;;  %v17966_v25 = vpop.f32.mrb[172].mxu1  ;;  %v17976_v15 = vmax.f32 %v5685_v56, 0.0 }
 0x3d6   : > { %v8358_v13 = vrot.slane %v8230_v28, 7  ;;  %v13731_v19 = vpack.c.bf16 %v8230_v28, %v8229_v3  ;;  %v5315_v53 = vpop.f32.mrb[173].mxu1  ;;  %v5559_v3 = vadd.f32 %v17928_v52, %v17793_v37  ;;  %v19974_v37 = vld [vmem:[#allocation66_spill] sm:$0xff] }
 0x3d7   : > { %v7626_v58 = vpop.f32.mrb[28].mxu0  ;;  %v17973_v8 = vpop.f32.mrb[174].mxu1  ;;  %19972 = vst [vmem:[#allocation64_spill] sm:$0xff] %v17976_v15 }
 0x3d8   : > { %v14783_v43 = vpack.c.bf16 %v8358_v13, %v8357_v59  ;;  %v8103_v36 = vadd.f32 %v17790_v20, %v7626_v58  ;;  %v7628_v45 = vpop.f32.mrb[29].mxu0  ;;  %10090 = vmatprep.mubr.bf16.mxu1 %v13731_v19  ;;  %v5318_v50 = vpop.f32.mrb[175].mxu1  ;;  %v5688_v59 = vadd.f32 %v5560_v17, %v19973_v24  ;;  %v13632_v13 = vpack.c.bf16 %v17968_v1, %v17976_v15 }
 0x3d9   : > { %v7629_v28 = vpop.f32.mrb[30].mxu0  ;;  %v5687_v19 = vadd.f32 %v5559_v3, %v19974_v37  ;;  %v5562_v17 = vadd.f32 %v17928_v52, %v17824_v26  ;;  %v5941_v50 = vrot.slane %v17976_v15, 7  ;;  %v19977_v15 = vld [vmem:[#allocation69_spill] sm:$0xff] }
 0x3da   : > { %v8231_v33 = vmax.f32 %v8103_v36, 0.0  ;;  %v8104_v53 = vadd.f32 %v17790_v20, %v7629_v28  ;;  %v7631_v31 = vpop.f32.mrb[31].mxu0  ;;  %14784 = vmatmul.mubr.msk.bf16.gmra.mrb[24].mxu1 %vm15828_vm1, %v14783_v43  ;;  %v17992_v24 = vmax.f32 %v5688_v59, 0.0 }
 0x3db   : > { %v14608_v37 = vpack.c.bf16 %v5942_v7, %v5941_v50 }
 0x3dc   : > { %v8232_v56 = vmax.f32 %v8104_v53, 0.0  ;;  %14604 = vmatmul.mubr.msk.bf16.gmra.mrb[136].mxu0 %vm15828_vm1, %v14603_v40  ;;  %v8359_v58 = vrot.slane %v8231_v33, 7  ;;  %19975 = vst [vmem:[#allocation67_spill] sm:$0xff] %v17992_v24  ;;  %v5944_v7 = vrot.slane %v17992_v24, 7 }
 0x3dd   : > { %7848 = vmatprep.mubr.bf16.mxu0 %v13632_v13  ;;  %v17990_v36 = vpop.f32.mrb[176].mxu1  ;;  %v18000_v13 = vmax.f32 %v5687_v19, 0.0 }
 0x3de   : > { %v8360_v41 = vrot.slane %v8232_v56, 7  ;;  %v13732_v31 = vpack.c.bf16 %v8232_v56, %v8231_v33  ;;  %v5323_v43 = vpop.f32.mrb[177].mxu1  ;;  %v5561_v33 = vadd.f32 %v17928_v52, %v17817_v14  ;;  %v19978_v14 = vld [vmem:[#allocation68_spill] sm:$0xff] }
 0x3df   : > { %v7634_v45 = vpop.f32.mrb[32].mxu0  ;;  %v17997_v40 = vpop.f32.mrb[178].mxu1  ;;  %19976 = vst [vmem:[#allocation66_spill] sm:$0xff] %v18000_v13 }
 0x3e0   : > { %v14788_v28 = vpack.c.bf16 %v8360_v41, %v8359_v58  ;;  %v8105_v3 = vadd.f32 %v17790_v20, %v7634_v45  ;;  %v7636_v53 = vpop.f32.mrb[33].mxu0  ;;  %10098 = vmatprep.mubr.bf16.mxu1 %v13732_v31  ;;  %v5326_v59 = vpop.f32.mrb[179].mxu1  ;;  %v5690_v58 = vadd.f32 %v5562_v17, %v19977_v15  ;;  %v13633_v41 = vpack.c.bf16 %v17992_v24, %v18000_v13 }
 0x3e1   : > { %v7637_v56 = vpop.f32.mrb[34].mxu0  ;;  %v5689_v31 = vadd.f32 %v5561_v33, %v19978_v14  ;;  %v5564_v17 = vadd.f32 %v17928_v52, %v17848_v61  ;;  %v5943_v59 = vrot.slane %v18000_v13, 7  ;;  %v19981_v13 = vld [vmem:[#allocation71_spill] sm:$0xff] }
 0x3e2   : > { %v8233_v26 = vmax.f32 %v8105_v3, 0.0  ;;  %v8106_v43 = vadd.f32 %v17790_v20, %v7637_v56  ;;  %v7639_v1 = vpop.f32.mrb[35].mxu0  ;;  %14789 = vmatmul.mubr.msk.bf16.gmra.mrb[28].mxu1 %vm15828_vm1, %v14788_v28  ;;  %v18016_v15 = vmax.f32 %v5690_v58, 0.0 }
 0x3e3   : > { %v14613_v14 = vpack.c.bf16 %v5944_v7, %v5943_v59 }
 0x3e4   : > { %v8234_v19 = vmax.f32 %v8106_v43, 0.0  ;;  %14609 = vmatmul.mubr.msk.bf16.gmra.mrb[140].mxu0 %vm15828_vm1, %v14608_v37  ;;  %v8361_v45 = vrot.slane %v8233_v26, 7  ;;  %19979 = vst [vmem:[#allocation69_spill] sm:$0xff] %v18016_v15  ;;  %v5946_v7 = vrot.slane %v18016_v15, 7 }
 0x3e5   : > { %7856 = vmatprep.mubr.bf16.mxu0 %v13633_v41  ;;  %v18014_v3 = vpop.f32.mrb[180].mxu1  ;;  %v18024_v41 = vmax.f32 %v5689_v31, 0.0 }
 0x3e6   : > { %v8362_v50 = vrot.slane %v8234_v19, 7  ;;  %v13733_v1 = vpack.c.bf16 %v8234_v19, %v8233_v26  ;;  %v5331_v28 = vpop.f32.mrb[181].mxu1  ;;  %v5563_v26 = vadd.f32 %v17928_v52, %v17841_v29  ;;  %v19982_v29 = vld [vmem:[#allocation70_spill] sm:$0xff] }
 0x3e7   : > { %v7642_v53 = vpop.f32.mrb[36].mxu0  ;;  %v18021_v37 = vpop.f32.mrb[182].mxu1  ;;  %19980 = vst [vmem:[#allocation68_spill] sm:$0xff] %v18024_v41 }
 0x3e8   : > { %v14793_v56 = vpack.c.bf16 %v8362_v50, %v8361_v45  ;;  %v8107_v33 = vadd.f32 %v17790_v20, %v7642_v53  ;;  %v7644_v43 = vpop.f32.mrb[37].mxu0  ;;  %10106 = vmatprep.mubr.bf16.mxu1 %v13733_v1  ;;  %v5334_v58 = vpop.f32.mrb[183].mxu1  ;;  %v5692_v45 = vadd.f32 %v5564_v17, %v19981_v13  ;;  %v13634_v50 = vpack.c.bf16 %v18016_v15, %v18024_v41 }
 0x3e9   : > { %v7645_v19 = vpop.f32.mrb[38].mxu0  ;;  %v5691_v1 = vadd.f32 %v5563_v26, %v19982_v29  ;;  %v5566_v17 = vadd.f32 %v17928_v52, %v17872_v18  ;;  %v5945_v58 = vrot.slane %v18024_v41, 7  ;;  %v19985_v41 = vld [vmem:[#allocation73_spill] sm:$0xff] }
 0x3ea   : > { %v8235_v61 = vmax.f32 %v8107_v33, 0.0  ;;  %v8108_v28 = vadd.f32 %v17790_v20, %v7645_v19  ;;  %v7647_v24 = vpop.f32.mrb[39].mxu0  ;;  %14794 = vmatmul.mubr.msk.bf16.gmra.mrb[32].mxu1 %vm15828_vm1, %v14793_v56  ;;  %v18040_v13 = vmax.f32 %v5692_v45, 0.0 }
 0x3eb   : > { %v14618_v29 = vpack.c.bf16 %v5946_v7, %v5945_v58 }
 0x3ec   : > { %v8236_v31 = vmax.f32 %v8108_v28, 0.0  ;;  %14614 = vmatmul.mubr.msk.bf16.gmra.mrb[144].mxu0 %vm15828_vm1, %v14613_v14  ;;  %v8363_v53 = vrot.slane %v8235_v61, 7  ;;  %19983 = vst [vmem:[#allocation71_spill] sm:$0xff] %v18040_v13  ;;  %v5948_v7 = vrot.slane %v18040_v13, 7 }
 0x3ed   : > { %7864 = vmatprep.mubr.bf16.mxu0 %v13634_v50  ;;  %v18038_v33 = vpop.f32.mrb[184].mxu1  ;;  %v18048_v50 = vmax.f32 %v5691_v1, 0.0 }
 0x3ee   : > { %v8364_v59 = vrot.slane %v8236_v31, 7  ;;  %v13734_v24 = vpack.c.bf16 %v8236_v31, %v8235_v61  ;;  %v5339_v56 = vpop.f32.mrb[185].mxu1  ;;  %v5565_v61 = vadd.f32 %v17928_v52, %v17865_v39  ;;  %v19986_v39 = vld [vmem:[#allocation72_spill] sm:$0xff] }
 0x3ef   : > { %v7650_v43 = vpop.f32.mrb[40].mxu0  ;;  %v18045_v14 = vpop.f32.mrb[186].mxu1  ;;  %19984 = vst [vmem:[#allocation70_spill] sm:$0xff] %v18048_v50 }
 0x3f0   : > { %v14798_v19 = vpack.c.bf16 %v8364_v59, %v8363_v53  ;;  %v8109_v26 = vadd.f32 %v17790_v20, %v7650_v43  ;;  %v7652_v28 = vpop.f32.mrb[41].mxu0  ;;  %10114 = vmatprep.mubr.bf16.mxu1 %v13734_v24  ;;  %v5342_v45 = vpop.f32.mrb[187].mxu1  ;;  %v5694_v53 = vadd.f32 %v5566_v17, %v19985_v41  ;;  %v13635_v59 = vpack.c.bf16 %v18040_v13, %v18048_v50 }
 0x3f1   : > { %v7653_v31 = vpop.f32.mrb[42].mxu0  ;;  %v5693_v24 = vadd.f32 %v5565_v61, %v19986_v39  ;;  %v5568_v17 = vadd.f32 %v17928_v52, %v17896_v38  ;;  %v5947_v45 = vrot.slane %v18048_v50, 7  ;;  %v19989_v50 = vld [vmem:[#allocation75_spill] sm:$0xff] }
 0x3f2   : > { %v8237_v18 = vmax.f32 %v8109_v26, 0.0  ;;  %v8110_v56 = vadd.f32 %v17790_v20, %v7653_v31  ;;  %v7655_v15 = vpop.f32.mrb[43].mxu0  ;;  %14799 = vmatmul.mubr.msk.bf16.gmra.mrb[36].mxu1 %vm15828_vm1, %v14798_v19  ;;  %v18064_v41 = vmax.f32 %v5694_v53, 0.0 }
 0x3f3   : > { %v14623_v39 = vpack.c.bf16 %v5948_v7, %v5947_v45 }
 0x3f4   : > { %v8238_v1 = vmax.f32 %v8110_v56, 0.0  ;;  %14619 = vmatmul.mubr.msk.bf16.gmra.mrb[148].mxu0 %vm15828_vm1, %v14618_v29  ;;  %v8365_v43 = vrot.slane %v8237_v18, 7  ;;  %19987 = vst [vmem:[#allocation73_spill] sm:$0xff] %v18064_v41  ;;  %v5950_v7 = vrot.slane %v18064_v41, 7 }
 0x3f5   : > { %7872 = vmatprep.mubr.bf16.mxu0 %v13635_v59  ;;  %v18062_v26 = vpop.f32.mrb[188].mxu1  ;;  %v18072_v59 = vmax.f32 %v5693_v24, 0.0 }
 0x3f6   : > { %v8366_v58 = vrot.slane %v8238_v1, 7  ;;  %v13735_v15 = vpack.c.bf16 %v8238_v1, %v8237_v18  ;;  %v5347_v19 = vpop.f32.mrb[189].mxu1  ;;  %v5567_v18 = vadd.f32 %v17928_v52, %v17889_v2  ;;  %v19990_v2 = vld [vmem:[#allocation74_spill] sm:$0xff] }
 0x3f7   : > { %v7658_v28 = vpop.f32.mrb[44].mxu0  ;;  %v18069_v29 = vpop.f32.mrb[190].mxu1  ;;  %19988 = vst [vmem:[#allocation72_spill] sm:$0xff] %v18072_v59 }
 0x3f8   : > { %v14803_v31 = vpack.c.bf16 %v8366_v58, %v8365_v43  ;;  %v8111_v61 = vadd.f32 %v17790_v20, %v7658_v28  ;;  %v7660_v56 = vpop.f32.mrb[45].mxu0  ;;  %10122 = vmatprep.mubr.bf16.mxu1 %v13735_v15  ;;  %v5350_v53 = vpop.f32.mrb[191].mxu1  ;;  %v5696_v43 = vadd.f32 %v5568_v17, %v19989_v50  ;;  %v13636_v58 = vpack.c.bf16 %v18064_v41, %v18072_v59 }
 0x3f9   : > { %v7661_v1 = vpop.f32.mrb[46].mxu0  ;;  %v5695_v15 = vadd.f32 %v5567_v18, %v19990_v2  ;;  %v5570_v17 = vadd.f32 %v17928_v52, %v17920_v51  ;;  %v5949_v53 = vrot.slane %v18072_v59, 7  ;;  %v19993_v59 = vld [vmem:[#allocation77_spill] sm:$0xff] }
 0x3fa   : > { %v8239_v38 = vmax.f32 %v8111_v61, 0.0  ;;  %v8112_v19 = vadd.f32 %v17790_v20, %v7661_v1  ;;  %v7663_v13 = vpop.f32.mrb[47].mxu0  ;;  %14804 = vmatmul.mubr.msk.bf16.gmra.mrb[40].mxu1 %vm15828_vm1, %v14803_v31  ;;  %v18088_v50 = vmax.f32 %v5696_v43, 0.0 }
 0x3fb   : > { %v14628_v2 = vpack.c.bf16 %v5950_v7, %v5949_v53 }
 0x3fc   : > { %v8240_v24 = vmax.f32 %v8112_v19, 0.0  ;;  %14624 = vmatmul.mubr.msk.bf16.gmra.mrb[152].mxu0 %vm15828_vm1, %v14623_v39  ;;  %v8367_v28 = vrot.slane %v8239_v38, 7  ;;  %19991 = vst [vmem:[#allocation75_spill] sm:$0xff] %v18088_v50  ;;  %v5952_v7 = vrot.slane %v18088_v50, 7 }
 0x3fd   : > { %7880 = vmatprep.mubr.bf16.mxu0 %v13636_v58  ;;  %v18086_v61 = vpop.f32.mrb[192].mxu1  ;;  %v18096_v58 = vmax.f32 %v5695_v15, 0.0 }
 0x3fe   : > { %v8368_v45 = vrot.slane %v8240_v24, 7  ;;  %v13736_v13 = vpack.c.bf16 %v8240_v24, %v8239_v38  ;;  %v5355_v31 = vpop.f32.mrb[193].mxu1  ;;  %v5569_v38 = vadd.f32 %v17928_v52, %v17913_v4  ;;  %v19994_v4 = vld [vmem:[#allocation76_spill] sm:$0xff] }
 0x3ff   : > { %v7666_v56 = vpop.f32.mrb[48].mxu0  ;;  %v18093_v39 = vpop.f32.mrb[194].mxu1  ;;  %19992 = vst [vmem:[#allocation74_spill] sm:$0xff] %v18096_v58 }
 0x400   : > { %v14808_v1 = vpack.c.bf16 %v8368_v45, %v8367_v28  ;;  %v8113_v18 = vadd.f32 %v17790_v20, %v7666_v56  ;;  %v7668_v19 = vpop.f32.mrb[49].mxu0  ;;  %10130 = vmatprep.mubr.bf16.mxu1 %v13736_v13  ;;  %v5358_v43 = vpop.f32.mrb[195].mxu1  ;;  %v5698_v28 = vadd.f32 %v5570_v17, %v19993_v59  ;;  %v13637_v45 = vpack.c.bf16 %v18088_v50, %v18096_v58 }
 0x401   : > { %v7669_v24 = vpop.f32.mrb[50].mxu0  ;;  %v5697_v13 = vadd.f32 %v5569_v38, %v19994_v4  ;;  %v5572_v17 = vadd.f32 %v17928_v52, %v17949_v16  ;;  %v5951_v43 = vrot.slane %v18096_v58, 7  ;;  %v19997_v58 = vld [vmem:[#allocation79_spill] sm:$0xff] }
 0x402   : > { %v8241_v51 = vmax.f32 %v8113_v18, 0.0  ;;  %v8114_v31 = vadd.f32 %v17790_v20, %v7669_v24  ;;  %v7671_v41 = vpop.f32.mrb[51].mxu0  ;;  %14809 = vmatmul.mubr.msk.bf16.gmra.mrb[44].mxu1 %vm15828_vm1, %v14808_v1  ;;  %v18112_v59 = vmax.f32 %v5698_v28, 0.0 }
 0x403   : > { %v14633_v4 = vpack.c.bf16 %v5952_v7, %v5951_v43 }
 0x404   : > { %v8242_v15 = vmax.f32 %v8114_v31, 0.0  ;;  %14629 = vmatmul.mubr.msk.bf16.gmra.mrb[156].mxu0 %vm15828_vm1, %v14628_v2  ;;  %v8369_v56 = vrot.slane %v8241_v51, 7  ;;  %19995 = vst [vmem:[#allocation77_spill] sm:$0xff] %v18112_v59  ;;  %v5954_v7 = vrot.slane %v18112_v59, 7 }
 0x405   : > { %7888 = vmatprep.mubr.bf16.mxu0 %v13637_v45  ;;  %v18110_v18 = vpop.f32.mrb[196].mxu1  ;;  %v18120_v45 = vmax.f32 %v5697_v13, 0.0 }
 0x406   : > { %v8370_v53 = vrot.slane %v8242_v15, 7  ;;  %v13737_v41 = vpack.c.bf16 %v8242_v15, %v8241_v51  ;;  %v5363_v1 = vpop.f32.mrb[197].mxu1  ;;  %v5571_v51 = vadd.f32 %v17928_v52, %v17942_v62  ;;  %v19998_v62 = vld [vmem:[#allocation78_spill] sm:$0xff] }
 0x407   : > { %v7674_v19 = vpop.f32.mrb[52].mxu0  ;;  %v18117_v2 = vpop.f32.mrb[198].mxu1  ;;  %19996 = vst [vmem:[#allocation76_spill] sm:$0xff] %v18120_v45 }
 0x408   : > { %v14813_v24 = vpack.c.bf16 %v8370_v53, %v8369_v56  ;;  %v8115_v38 = vadd.f32 %v17790_v20, %v7674_v19  ;;  %v7676_v31 = vpop.f32.mrb[53].mxu0  ;;  %10138 = vmatprep.mubr.bf16.mxu1 %v13737_v41  ;;  %v5366_v28 = vpop.f32.mrb[199].mxu1  ;;  %v5700_v56 = vadd.f32 %v5572_v17, %v19997_v58  ;;  %v13638_v53 = vpack.c.bf16 %v18112_v59, %v18120_v45 }
 0x409   : > { %v7677_v15 = vpop.f32.mrb[54].mxu0  ;;  %v5699_v41 = vadd.f32 %v5571_v51, %v19998_v62  ;;  %v5574_v17 = vadd.f32 %v17928_v52, %v17973_v8  ;;  %v5953_v28 = vrot.slane %v18120_v45, 7  ;;  %v20001_v45 = vld [vmem:[#allocation81_spill] sm:$0xff] }
 0x40a   : > { %v8243_v16 = vmax.f32 %v8115_v38, 0.0  ;;  %v8116_v1 = vadd.f32 %v17790_v20, %v7677_v15  ;;  %v7679_v50 = vpop.f32.mrb[55].mxu0  ;;  %14814 = vmatmul.mubr.msk.bf16.gmra.mrb[48].mxu1 %vm15828_vm1, %v14813_v24  ;;  %v18136_v58 = vmax.f32 %v5700_v56, 0.0 }
 0x40b   : > { %v14638_v62 = vpack.c.bf16 %v5954_v7, %v5953_v28 }
 0x40c   : > { %v8244_v13 = vmax.f32 %v8116_v1, 0.0  ;;  %14634 = vmatmul.mubr.msk.bf16.gmra.mrb[160].mxu0 %vm15828_vm1, %v14633_v4  ;;  %v8371_v19 = vrot.slane %v8243_v16, 7  ;;  %19999 = vst [vmem:[#allocation79_spill] sm:$0xff] %v18136_v58  ;;  %v5956_v7 = vrot.slane %v18136_v58, 7 }
 0x40d   : > { %7896 = vmatprep.mubr.bf16.mxu0 %v13638_v53  ;;  %v18134_v38 = vpop.f32.mrb[200].mxu1  ;;  %v18144_v53 = vmax.f32 %v5699_v41, 0.0 }
 0x40e   : > { %v8372_v43 = vrot.slane %v8244_v13, 7  ;;  %v13738_v50 = vpack.c.bf16 %v8244_v13, %v8243_v16  ;;  %v5371_v24 = vpop.f32.mrb[201].mxu1  ;;  %v5573_v16 = vadd.f32 %v17928_v52, %v17966_v25  ;;  %v20002_v25 = vld [vmem:[#allocation80_spill] sm:$0xff] }
 0x40f   : > { %v7682_v31 = vpop.f32.mrb[56].mxu0  ;;  %v18141_v4 = vpop.f32.mrb[202].mxu1  ;;  %20000 = vst [vmem:[#allocation78_spill] sm:$0xff] %v18144_v53 }
 0x410   : > { %v14818_v15 = vpack.c.bf16 %v8372_v43, %v8371_v19  ;;  %v8117_v51 = vadd.f32 %v17790_v20, %v7682_v31  ;;  %v7684_v1 = vpop.f32.mrb[57].mxu0  ;;  %10146 = vmatprep.mubr.bf16.mxu1 %v13738_v50  ;;  %v5374_v56 = vpop.f32.mrb[203].mxu1  ;;  %v5702_v19 = vadd.f32 %v5574_v17, %v20001_v45  ;;  %v13639_v43 = vpack.c.bf16 %v18136_v58, %v18144_v53 }
 0x411   : > { %v7685_v13 = vpop.f32.mrb[58].mxu0  ;;  %v5701_v50 = vadd.f32 %v5573_v16, %v20002_v25  ;;  %v5576_v17 = vadd.f32 %v17928_v52, %v17997_v40  ;;  %v5955_v56 = vrot.slane %v18144_v53, 7  ;;  %v20005_v53 = vld [vmem:[#allocation83_spill] sm:$0xff] }
 0x412   : > { %v8245_v8 = vmax.f32 %v8117_v51, 0.0  ;;  %v8118_v24 = vadd.f32 %v17790_v20, %v7685_v13  ;;  %v7687_v59 = vpop.f32.mrb[59].mxu0  ;;  %14819 = vmatmul.mubr.msk.bf16.gmra.mrb[52].mxu1 %vm15828_vm1, %v14818_v15  ;;  %v18160_v45 = vmax.f32 %v5702_v19, 0.0 }
 0x413   : > { %v14643_v25 = vpack.c.bf16 %v5956_v7, %v5955_v56 }
 0x414   : > { %v8246_v41 = vmax.f32 %v8118_v24, 0.0  ;;  %14639 = vmatmul.mubr.msk.bf16.gmra.mrb[164].mxu0 %vm15828_vm1, %v14638_v62  ;;  %v8373_v31 = vrot.slane %v8245_v8, 7  ;;  %20003 = vst [vmem:[#allocation81_spill] sm:$0xff] %v18160_v45  ;;  %v5958_v7 = vrot.slane %v18160_v45, 7 }
 0x415   : > { %7904 = vmatprep.mubr.bf16.mxu0 %v13639_v43  ;;  %v18158_v51 = vpop.f32.mrb[204].mxu1  ;;  %v18168_v43 = vmax.f32 %v5701_v50, 0.0 }
 0x416   : > { %v8374_v28 = vrot.slane %v8246_v41, 7  ;;  %v13739_v59 = vpack.c.bf16 %v8246_v41, %v8245_v8  ;;  %v5379_v15 = vpop.f32.mrb[205].mxu1  ;;  %v5575_v8 = vadd.f32 %v17928_v52, %v17990_v36  ;;  %v20006_v36 = vld [vmem:[#allocation82_spill] sm:$0xff] }
 0x417   : > { %v7690_v1 = vpop.f32.mrb[60].mxu0  ;;  %v18165_v62 = vpop.f32.mrb[206].mxu1  ;;  %20004 = vst [vmem:[#allocation80_spill] sm:$0xff] %v18168_v43 }
 0x418   : > { %v14823_v13 = vpack.c.bf16 %v8374_v28, %v8373_v31  ;;  %v8119_v16 = vadd.f32 %v17790_v20, %v7690_v1  ;;  %v7692_v24 = vpop.f32.mrb[61].mxu0  ;;  %10154 = vmatprep.mubr.bf16.mxu1 %v13739_v59  ;;  %v5382_v19 = vpop.f32.mrb[207].mxu1  ;;  %v5704_v31 = vadd.f32 %v5576_v17, %v20005_v53  ;;  %v13640_v28 = vpack.c.bf16 %v18160_v45, %v18168_v43 }
 0x419   : > { %v7693_v41 = vpop.f32.mrb[62].mxu0  ;;  %v5703_v59 = vadd.f32 %v5575_v8, %v20006_v36  ;;  %v5578_v17 = vadd.f32 %v17928_v52, %v18021_v37  ;;  %v15283_v19 = vld [vmem:[#allocation9] sm:$0xff]  }
 0x41a   : > { %v8247_v40 = vmax.f32 %v8119_v16, 0.0  ;;  %v8120_v15 = vadd.f32 %v17790_v20, %v7693_v41  ;;  %v7695_v58 = vpop.f32.mrb[63].mxu0  ;;  %14824 = vmatmul.mubr.msk.bf16.gmra.mrb[56].mxu1 %vm15828_vm1, %v14823_v13  ;;  %v18184_v53 = vmax.f32 %v5704_v31, 0.0  ;;  %v5957_v41 = vrot.slane %v18168_v43, 7  ;;  %15086 = vmatprep.subr.bf16.mxu0 %v15283_v19 }
 0x41b   : > { %v5577_v31 = vadd.f32 %v17928_v52, %v18014_v3  ;;  %15118 = vmatprep.subr.bf16.mxu1 %v15283_v19  ;;  %15087 = vmatpush3.bf16.msra.mxu0 %v15283_v19 }
 0x41c   : > { %v8248_v50 = vmax.f32 %v8120_v15, 0.0  ;;  %14644 = vmatmul.mubr.msk.bf16.gmra.mrb[168].mxu0 %vm15828_vm1, %v14643_v25  ;;  %v8375_v1 = vrot.slane %v8247_v40, 7  ;;  %20007 = vst [vmem:[#allocation83_spill] sm:$0xff] %v18184_v53  ;;  %v14648_v37 = vpack.c.bf16 %v5958_v7, %v5957_v41  ;;  %15126 = vmatpush3.bf16.msra.mxu1 %v15283_v19 }
 0x41d   : > { %7912 = vmatprep.mubr.bf16.mxu0 %v13640_v28  ;;  %v18182_v16 = vpop.f32.mrb[208].mxu1 }
 0x41e   : > { %v8376_v56 = vrot.slane %v8248_v50, 7  ;;  %v13740_v58 = vpack.c.bf16 %v8248_v50, %v8247_v40  ;;  %v5387_v13 = vpop.f32.mrb[209].mxu1  ;;  %v18192_v40 = vmax.f32 %v5703_v59, 0.0 }
 0x41f   : > { %v7698_v24 = vpop.f32.mrb[64].mxu0  ;;  %v18189_v8 = vpop.f32.mrb[210].mxu1 }
 0x420   : > { %v14828_v25 = vpack.c.bf16 %v8376_v56, %v8375_v1  ;;  %v8121_v15 = vadd.f32 %v17790_v20, %v7698_v24  ;;  %v7700_v28 = vpop.f32.mrb[65].mxu0  ;;  %10162 = vmatprep.mubr.bf16.mxu1 %v13740_v58  ;;  %20008 = vst [vmem:[#allocation82_spill] sm:$0xff] %v18192_v40  ;;  %v5390_v50 = vpop.f32.mrb[211].mxu1  ;;  %v20009_v56 = vld [vmem:[#allocation85_spill] sm:$0xff]  ;;  %v13641_v59 = vpack.c.bf16 %v18184_v53, %v18192_v40  ;;  %v20010_v58 = vld [vmem:[#allocation84_spill] sm:$0xff] }
 0x421   : > { %v7701_v36 = vpop.f32.mrb[66].mxu0  ;;  %v5706_v24 = vadd.f32 %v5578_v17, %v20009_v56  ;;  %v5705_v7 = vadd.f32 %v5577_v31, %v20010_v58  ;;  %v18218_v31 = vld [vmem:[%s19536_s4 + $0x1] ss:$0 sm:$0xff] }
 0x422   : > { %v8249_v13 = vmax.f32 %v8121_v15, 0.0  ;;  %v8122_v45 = vadd.f32 %v17790_v20, %v7701_v36  ;;  %v7703_v1 = vpop.f32.mrb[67].mxu0  ;;  %14829 = vmatmul.mubr.msk.bf16.gmra.mrb[60].mxu1 %vm15828_vm1, %v14828_v25  ;;  %v5960_v20 = vrot.slane %v18184_v53, 7  ;;  %v5580_v25 = vadd.f32 %v17928_v52, %v18045_v14  ;;  %v20013_v53 = vld [vmem:[#allocation87_spill] sm:$0xff] }
 0x423   : > { %v18208_v17 = vmax.f32 %v5706_v24, 0.0  ;;  %v5959_v36 = vrot.slane %v18192_v40, 7  ;;  %v18221_v24 = vmax.f32 %v5705_v7, 0.0  ;;  %v5579_v14 = vadd.f32 %v17928_v52, %v18038_v33  ;;  %v20014_v33 = vld [vmem:[#allocation86_spill] sm:$0xff] }
 0x424   : > { %v8250_v3 = vmax.f32 %v8122_v45, 0.0  ;;  %14649 = vmatmul.mubr.msk.bf16.gmra.mrb[172].mxu0 %vm15828_vm1, %v14648_v37  ;;  %v8377_v41 = vrot.slane %v8249_v13, 7  ;;  %v5708_v40 = vadd.f32 %v5580_v25, %v20013_v53  ;;  %v5582_v25 = vadd.f32 %v17928_v52, %v18069_v29 }
 0x425   : > { %7920 = vmatprep.mubr.bf16.mxu0 %v13641_v59  ;;  %v18206_v28 = vpop.f32.mrb[212].mxu1  ;;  %20011 = vst [vmem:[#allocation85_spill] sm:$0xff] %v18208_v17  ;;  %20012 = vst [vmem:[#allocation84_spill] sm:$0xff] %v18221_v24  ;;  %v14653_v58 = vpack.c.bf16 %v5960_v20, %v5959_v36  ;;  %v5962_v20 = vrot.slane %v18208_v17, 7 }
 0x426   : > { %v8378_v15 = vrot.slane %v8250_v3, 7  ;;  %v13741_v19 = vpack.c.bf16 %v8250_v3, %v8249_v13  ;;  %v5395_v50 = vpop.f32.mrb[213].mxu1  ;;  %v18237_v53 = vmax.f32 %v5708_v40, 0.0  ;;  %v5581_v40 = vadd.f32 %v17928_v52, %v18062_v26  ;;  %v20018_v26 = vld [vmem:[#allocation88_spill] sm:$0xff] }
 0x427   : > { %v7706_v45 = vpop.f32.mrb[68].mxu0  ;;  %v18213_v1 = vpop.f32.mrb[214].mxu1 }
 0x428   : > { %v14833_v37 = vpack.c.bf16 %v8378_v15, %v8377_v41  ;;  %v8123_v13 = vadd.f32 %v18218_v31, %v7706_v45  ;;  %v7708_v56 = vpop.f32.mrb[69].mxu0  ;;  %10170 = vmatprep.mubr.bf16.mxu1 %v13741_v19  ;;  %v5398_v59 = vpop.f32.mrb[215].mxu1  ;;  %v13642_v19 = vpack.c.bf16 %v18208_v17, %v18221_v24  ;;  %v5707_v45 = vadd.f32 %v5579_v14, %v20014_v33 }
 0x429   : > { %v7709_v3 = vpop.f32.mrb[70].mxu0  ;;  %20015 = vst [vmem:[#allocation87_spill] sm:$0xff] %v18237_v53 }
 0x42a   : > { %v8251_v41 = vmax.f32 %v8123_v13, 0.0  ;;  %v8124_v15 = vadd.f32 %v18218_v31, %v7709_v3  ;;  %v7711_v50 = vpop.f32.mrb[71].mxu0  ;;  %14834 = vmatmul.mubr.msk.bf16.gmra.mrb[64].mxu1 %vm15828_vm1, %v14833_v37  ;;  %v18245_v33 = vmax.f32 %v5707_v45, 0.0 }
 0x42c   : > { %v8252_v7 = vmax.f32 %v8124_v15, 0.0  ;;  %14654 = vmatmul.mubr.msk.bf16.gmra.mrb[176].mxu0 %vm15828_vm1, %v14653_v58  ;;  %v8379_v36 = vrot.slane %v8251_v41, 7  ;;  %v5961_v15 = vrot.slane %v18221_v24, 7  ;;  %20016 = vst [vmem:[#allocation86_spill] sm:$0xff] %v18245_v33  ;;  %v20017_v24 = vld [vmem:[#allocation89_spill] sm:$0xff] }
 0x42d   : > { %7928 = vmatprep.mubr.bf16.mxu0 %v13642_v19  ;;  %v18235_v59 = vpop.f32.mrb[216].mxu1 }
 0x42e   : > { %v8380_v13 = vrot.slane %v8252_v7, 7  ;;  %v13742_v56 = vpack.c.bf16 %v8252_v7, %v8251_v41  ;;  %v5403_v37 = vpop.f32.mrb[217].mxu1  ;;  %v14658_v17 = vpack.c.bf16 %v5962_v20, %v5961_v15  ;;  %v5964_v20 = vrot.slane %v18237_v53, 7 }
 0x42f   : > { %v7714_v3 = vpop.f32.mrb[72].mxu0  ;;  %v18242_v50 = vpop.f32.mrb[218].mxu1 }
 0x430   : > { %v14838_v58 = vpack.c.bf16 %v8380_v13, %v8379_v36  ;;  %v8125_v14 = vadd.f32 %v18218_v31, %v7714_v3  ;;  %v7716_v19 = vpop.f32.mrb[73].mxu0  ;;  %10178 = vmatprep.mubr.bf16.mxu1 %v13742_v56  ;;  %v5406_v41 = vpop.f32.mrb[219].mxu1  ;;  %v5710_v36 = vadd.f32 %v5582_v25, %v20017_v24  ;;  %v13643_v13 = vpack.c.bf16 %v18237_v53, %v18245_v33 }
 0x431   : > { %v7717_v7 = vpop.f32.mrb[74].mxu0  ;;  %v5709_v56 = vadd.f32 %v5581_v40, %v20018_v26  ;;  %v5584_v25 = vadd.f32 %v17928_v52, %v18093_v39  ;;  %v5963_v41 = vrot.slane %v18245_v33, 7  ;;  %v20021_v33 = vld [vmem:[#allocation91_spill] sm:$0xff] }
 0x432   : > { %v8253_v29 = vmax.f32 %v8125_v14, 0.0  ;;  %v8126_v37 = vadd.f32 %v18218_v31, %v7717_v7  ;;  %v7719_v43 = vpop.f32.mrb[75].mxu0  ;;  %14839 = vmatmul.mubr.msk.bf16.gmra.mrb[68].mxu1 %vm15828_vm1, %v14838_v58  ;;  %v18261_v24 = vmax.f32 %v5710_v36, 0.0 }
 0x433   : > { %v14663_v26 = vpack.c.bf16 %v5964_v20, %v5963_v41 }
 0x434   : > { %v8254_v45 = vmax.f32 %v8126_v37, 0.0  ;;  %14659 = vmatmul.mubr.msk.bf16.gmra.mrb[180].mxu0 %vm15828_vm1, %v14658_v17  ;;  %v8381_v3 = vrot.slane %v8253_v29, 7  ;;  %20019 = vst [vmem:[#allocation89_spill] sm:$0xff] %v18261_v24  ;;  %v5966_v20 = vrot.slane %v18261_v24, 7 }
 0x435   : > { %7936 = vmatprep.mubr.bf16.mxu0 %v13643_v13  ;;  %v18259_v14 = vpop.f32.mrb[220].mxu1  ;;  %v18269_v13 = vmax.f32 %v5709_v56, 0.0 }
 0x436   : > { %v8382_v15 = vrot.slane %v8254_v45, 7  ;;  %v13743_v43 = vpack.c.bf16 %v8254_v45, %v8253_v29  ;;  %v5411_v58 = vpop.f32.mrb[221].mxu1  ;;  %v5583_v29 = vadd.f32 %v17928_v52, %v18086_v61  ;;  %v20022_v61 = vld [vmem:[#allocation90_spill] sm:$0xff] }
 0x437   : > { %v7722_v19 = vpop.f32.mrb[76].mxu0  ;;  %v18266_v7 = vpop.f32.mrb[222].mxu1  ;;  %20020 = vst [vmem:[#allocation88_spill] sm:$0xff] %v18269_v13 }
 0x438   : > { %v14843_v17 = vpack.c.bf16 %v8382_v15, %v8381_v3  ;;  %v8127_v40 = vadd.f32 %v18218_v31, %v7722_v19  ;;  %v7724_v37 = vpop.f32.mrb[77].mxu0  ;;  %10186 = vmatprep.mubr.bf16.mxu1 %v13743_v43  ;;  %v5414_v36 = vpop.f32.mrb[223].mxu1  ;;  %v5712_v3 = vadd.f32 %v5584_v25, %v20021_v33  ;;  %v13644_v15 = vpack.c.bf16 %v18261_v24, %v18269_v13 }
 0x439   : > { %v7725_v45 = vpop.f32.mrb[78].mxu0  ;;  %v5711_v43 = vadd.f32 %v5583_v29, %v20022_v61  ;;  %v5586_v25 = vadd.f32 %v17928_v52, %v18117_v2  ;;  %v5965_v36 = vrot.slane %v18269_v13, 7  ;;  %v20025_v13 = vld [vmem:[#allocation93_spill] sm:$0xff] }
 0x43a   : > { %v8255_v39 = vmax.f32 %v8127_v40, 0.0  ;;  %v8128_v58 = vadd.f32 %v18218_v31, %v7725_v45  ;;  %v7727_v53 = vpop.f32.mrb[79].mxu0  ;;  %14844 = vmatmul.mubr.msk.bf16.gmra.mrb[72].mxu1 %vm15828_vm1, %v14843_v17  ;;  %v18285_v33 = vmax.f32 %v5712_v3, 0.0 }
 0x43b   : > { %v14668_v61 = vpack.c.bf16 %v5966_v20, %v5965_v36 }
 0x43c   : > { %v8256_v56 = vmax.f32 %v8128_v58, 0.0  ;;  %14664 = vmatmul.mubr.msk.bf16.gmra.mrb[184].mxu0 %vm15828_vm1, %v14663_v26  ;;  %v8383_v19 = vrot.slane %v8255_v39, 7  ;;  %20023 = vst [vmem:[#allocation91_spill] sm:$0xff] %v18285_v33  ;;  %v5968_v20 = vrot.slane %v18285_v33, 7 }
 0x43d   : > { %7944 = vmatprep.mubr.bf16.mxu0 %v13644_v15  ;;  %v18283_v40 = vpop.f32.mrb[224].mxu1  ;;  %v18293_v15 = vmax.f32 %v5711_v43, 0.0 }
 0x43e   : > { %v8384_v41 = vrot.slane %v8256_v56, 7  ;;  %v13744_v53 = vpack.c.bf16 %v8256_v56, %v8255_v39  ;;  %v5419_v17 = vpop.f32.mrb[225].mxu1  ;;  %v5585_v39 = vadd.f32 %v17928_v52, %v18110_v18  ;;  %v20026_v18 = vld [vmem:[#allocation92_spill] sm:$0xff] }
 0x43f   : > { %v7730_v37 = vpop.f32.mrb[80].mxu0  ;;  %v18290_v26 = vpop.f32.mrb[226].mxu1  ;;  %20024 = vst [vmem:[#allocation90_spill] sm:$0xff] %v18293_v15 }
 0x440   : > { %v14848_v45 = vpack.c.bf16 %v8384_v41, %v8383_v19  ;;  %v8129_v29 = vadd.f32 %v18218_v31, %v7730_v37  ;;  %v7732_v58 = vpop.f32.mrb[81].mxu0  ;;  %10194 = vmatprep.mubr.bf16.mxu1 %v13744_v53  ;;  %v5422_v3 = vpop.f32.mrb[227].mxu1  ;;  %v5714_v19 = vadd.f32 %v5586_v25, %v20025_v13  ;;  %v13645_v41 = vpack.c.bf16 %v18285_v33, %v18293_v15 }
 0x441   : > { %v7733_v56 = vpop.f32.mrb[82].mxu0  ;;  %v5713_v53 = vadd.f32 %v5585_v39, %v20026_v18  ;;  %v5588_v25 = vadd.f32 %v17928_v52, %v18141_v4  ;;  %v5967_v3 = vrot.slane %v18293_v15, 7  ;;  %v20029_v15 = vld [vmem:[#allocation95_spill] sm:$0xff] }
 0x442   : > { %v8257_v2 = vmax.f32 %v8129_v29, 0.0  ;;  %v8130_v17 = vadd.f32 %v18218_v31, %v7733_v56  ;;  %v7735_v24 = vpop.f32.mrb[83].mxu0  ;;  %14849 = vmatmul.mubr.msk.bf16.gmra.mrb[76].mxu1 %vm15828_vm1, %v14848_v45  ;;  %v18309_v13 = vmax.f32 %v5714_v19, 0.0 }
 0x443   : > { %v14673_v18 = vpack.c.bf16 %v5968_v20, %v5967_v3 }
 0x444   : > { %v8258_v43 = vmax.f32 %v8130_v17, 0.0  ;;  %14669 = vmatmul.mubr.msk.bf16.gmra.mrb[188].mxu0 %vm15828_vm1, %v14668_v61  ;;  %v8385_v37 = vrot.slane %v8257_v2, 7  ;;  %20027 = vst [vmem:[#allocation93_spill] sm:$0xff] %v18309_v13  ;;  %v5970_v20 = vrot.slane %v18309_v13, 7 }
 0x445   : > { %7952 = vmatprep.mubr.bf16.mxu0 %v13645_v41  ;;  %v18307_v29 = vpop.f32.mrb[228].mxu1  ;;  %v18317_v41 = vmax.f32 %v5713_v53, 0.0 }
 0x446   : > { %v8386_v36 = vrot.slane %v8258_v43, 7  ;;  %v13745_v24 = vpack.c.bf16 %v8258_v43, %v8257_v2  ;;  %v5427_v45 = vpop.f32.mrb[229].mxu1  ;;  %v5587_v2 = vadd.f32 %v17928_v52, %v18134_v38  ;;  %v20030_v38 = vld [vmem:[#allocation94_spill] sm:$0xff] }
 0x447   : > { %v7738_v58 = vpop.f32.mrb[84].mxu0  ;;  %v18314_v61 = vpop.f32.mrb[230].mxu1  ;;  %20028 = vst [vmem:[#allocation92_spill] sm:$0xff] %v18317_v41 }
 0x448   : > { %v14853_v56 = vpack.c.bf16 %v8386_v36, %v8385_v37  ;;  %v8131_v39 = vadd.f32 %v18218_v31, %v7738_v58  ;;  %v7740_v17 = vpop.f32.mrb[85].mxu0  ;;  %10202 = vmatprep.mubr.bf16.mxu1 %v13745_v24  ;;  %v5430_v19 = vpop.f32.mrb[231].mxu1  ;;  %v5716_v37 = vadd.f32 %v5588_v25, %v20029_v15  ;;  %v13646_v36 = vpack.c.bf16 %v18309_v13, %v18317_v41 }
 0x449   : > { %v7741_v43 = vpop.f32.mrb[86].mxu0  ;;  %v5715_v24 = vadd.f32 %v5587_v2, %v20030_v38  ;;  %v5590_v25 = vadd.f32 %v17928_v52, %v18165_v62  ;;  %v5969_v19 = vrot.slane %v18317_v41, 7 }
 0x44a   : > { %v8259_v4 = vmax.f32 %v8131_v39, 0.0  ;;  %v8132_v45 = vadd.f32 %v18218_v31, %v7741_v43  ;;  %v7743_v33 = vpop.f32.mrb[87].mxu0  ;;  %14854 = vmatmul.mubr.msk.bf16.gmra.mrb[80].mxu1 %vm15828_vm1, %v14853_v56  ;;  %v18333_v15 = vmax.f32 %v5716_v37, 0.0 }
 0x44c   : > { %v8260_v53 = vmax.f32 %v8132_v45, 0.0  ;;  %14674 = vmatmul.mubr.msk.bf16.gmra.mrb[192].mxu0 %vm15828_vm1, %v14673_v18  ;;  %v8387_v58 = vrot.slane %v8259_v4, 7  ;;  %20031 = vst [vmem:[#allocation95_spill] sm:$0xff] %v18333_v15 }
 0x44d   : > { %7960 = vmatprep.mubr.bf16.mxu0 %v13646_v36  ;;  %v18331_v39 = vpop.f32.mrb[232].mxu1  ;;  %v18341_v36 = vmax.f32 %v5715_v24, 0.0 }
 0x44e   : > { %v8388_v3 = vrot.slane %v8260_v53, 7  ;;  %v13746_v33 = vpack.c.bf16 %v8260_v53, %v8259_v4  ;;  %v5435_v56 = vpop.f32.mrb[233].mxu1  ;;  %v18346_v4 = vld [vmem:[%s19538_s6] ss:$0 sm:$0xff]  ;;  %v14678_v53 = vpack.c.bf16 %v5970_v20, %v5969_v19  ;;  %v5972_v20 = vrot.slane %v18333_v15, 7 }
 0x44f   : > { %v7746_v17 = vpop.f32.mrb[88].mxu0  ;;  %v18338_v18 = vpop.f32.mrb[234].mxu1  ;;  %20032 = vst [vmem:[#allocation94_spill] sm:$0xff] %v18341_v36  ;;  %v5589_v52 = vadd.f32 %v18346_v4, %v18158_v51  ;;  %v20033_v56 = vld [vmem:[#allocation97_spill] sm:$0xff]  ;;  %v13647_v24 = vpack.c.bf16 %v18333_v15, %v18341_v36  ;;  %v20034_v51 = vld [vmem:[#allocation96_spill] sm:$0xff] }
 0x450   : > { %v14858_v43 = vpack.c.bf16 %v8388_v3, %v8387_v58  ;;  %v8133_v2 = vadd.f32 %v18218_v31, %v7746_v17  ;;  %v7748_v45 = vpop.f32.mrb[89].mxu0  ;;  %10210 = vmatprep.mubr.bf16.mxu1 %v13746_v33  ;;  %v5438_v62 = vpop.f32.mrb[235].mxu1  ;;  %v5718_v17 = vadd.f32 %v5590_v25, %v20033_v56  ;;  %v5971_v56 = vrot.slane %v18341_v36, 7  ;;  %v20037_v36 = vld [vmem:[#allocation99_spill] sm:$0xff] }
 0x451   : > { %v7749_v37 = vpop.f32.mrb[90].mxu0  ;;  %v5717_v45 = vadd.f32 %v5589_v52, %v20034_v51 }
 0x452   : > { %v8261_v38 = vmax.f32 %v8133_v2, 0.0  ;;  %v8134_v58 = vadd.f32 %v18218_v31, %v7749_v37  ;;  %v7751_v3 = vpop.f32.mrb[91].mxu0  ;;  %14859 = vmatmul.mubr.msk.bf16.gmra.mrb[84].mxu1 %vm15828_vm1, %v14858_v43  ;;  %v18362_v25 = vmax.f32 %v5718_v17, 0.0  ;;  %v5592_v43 = vadd.f32 %v18346_v4, %v18189_v8 }
 0x453   : > { %v18370_v51 = vmax.f32 %v5717_v45, 0.0  ;;  %v14683_v15 = vpack.c.bf16 %v5972_v20, %v5971_v56 }
 0x454   : > { %v8262_v33 = vmax.f32 %v8134_v58, 0.0  ;;  %14679 = vmatmul.mubr.msk.bf16.gmra.mrb[196].mxu0 %vm15828_vm1, %v14678_v53  ;;  %v8389_v19 = vrot.slane %v8261_v38, 7  ;;  %20035 = vst [vmem:[#allocation97_spill] sm:$0xff] %v18362_v25 }
 0x455   : > { %7968 = vmatprep.mubr.bf16.mxu0 %v13647_v24  ;;  %v18360_v37 = vpop.f32.mrb[236].mxu1  ;;  %20036 = vst [vmem:[#allocation96_spill] sm:$0xff] %v18370_v51  ;;  %v13648_v45 = vpack.c.bf16 %v18362_v25, %v18370_v51 }
 0x456   : > { %v8390_v2 = vrot.slane %v8262_v33, 7  ;;  %v13747_v62 = vpack.c.bf16 %v8262_v33, %v8261_v38  ;;  %v5443_v3 = vpop.f32.mrb[237].mxu1  ;;  %v5591_v38 = vadd.f32 %v18346_v4, %v18182_v16  ;;  %v20038_v16 = vld [vmem:[#allocation98_spill] sm:$0xff] }
 0x457   : > { %v7754_v58 = vpop.f32.mrb[92].mxu0  ;;  %v18367_v13 = vpop.f32.mrb[238].mxu1 }
 0x458   : > { %v14863_v53 = vpack.c.bf16 %v8390_v2, %v8389_v19  ;;  %v8135_v52 = vadd.f32 %v18218_v31, %v7754_v58  ;;  %v7756_v24 = vpop.f32.mrb[93].mxu0  ;;  %10218 = vmatprep.mubr.bf16.mxu1 %v13747_v62  ;;  %v5446_v17 = vpop.f32.mrb[239].mxu1  ;;  %v5720_v19 = vadd.f32 %v5592_v43, %v20037_v36  ;;  %v5594_v2 = vadd.f32 %v18346_v4, %v18213_v1 }
 0x459   : > { %v7757_v33 = vpop.f32.mrb[94].mxu0  ;;  %v5719_v20 = vadd.f32 %v5591_v38, %v20038_v16  ;;  %v5974_v36 = vrot.slane %v18362_v25, 7  ;;  %v20040_v24 = vld [vmem:[#allocation101_spill] sm:$0xff]  ;;  %v5595_v38 = vadd.f32 %v18346_v4, %v18235_v59 }
 0x45a   : > { %v8263_v8 = vmax.f32 %v8135_v52, 0.0  ;;  %v8136_v3 = vadd.f32 %v18218_v31, %v7757_v33  ;;  %v7759_v41 = vpop.f32.mrb[95].mxu0  ;;  %14864 = vmatmul.mubr.msk.bf16.gmra.mrb[88].mxu1 %vm15828_vm1, %v14863_v53  ;;  %v5973_v53 = vrot.slane %v18370_v51, 7  ;;  %v18391_v52 = vmax.f32 %v5720_v19, 0.0  ;;  %v20042_v19 = vld [vmem:[#allocation100_spill] sm:$0xff] }
 0x45b   : > { %v5593_v41 = vadd.f32 %v18346_v4, %v18206_v28  ;;  %v5722_v17 = vadd.f32 %v5594_v2, %v20040_v24  ;;  %v5596_v28 = vadd.f32 %v18346_v4, %v18242_v50  ;;  %v18401_v16 = vmax.f32 %v5719_v20, 0.0 }
 0x45c   : > { %v8264_v62 = vmax.f32 %v8136_v3, 0.0  ;;  %14684 = vmatmul.mubr.msk.bf16.gmra.mrb[200].mxu0 %vm15828_vm1, %v14683_v15  ;;  %v8391_v43 = vrot.slane %v8263_v8, 7  ;;  %20039 = vst [vmem:[#allocation99_spill] sm:$0xff] %v18391_v52  ;;  %v14688_v51 = vpack.c.bf16 %v5974_v36, %v5973_v53 }
 0x45d   : > { %7976 = vmatprep.mubr.bf16.mxu0 %v13648_v45  ;;  %v18388_v56 = vpop.f32.mrb[240].mxu1  ;;  %20041 = vst [vmem:[#allocation98_spill] sm:$0xff] %v18401_v16  ;;  %v5721_v25 = vadd.f32 %v5593_v41, %v20042_v19  ;;  %v18405_v50 = vmax.f32 %v5722_v17, 0.0  ;;  %v13649_v20 = vpack.c.bf16 %v18391_v52, %v18401_v16  ;;  %v20044_v41 = vld [vmem:[#allocation102_spill] sm:$0xff] }
 0x45e   : > { %v8392_v1 = vrot.slane %v8264_v62, 7  ;;  %v13748_v58 = vpack.c.bf16 %v8264_v62, %v8263_v8  ;;  %v5451_v15 = vpop.f32.mrb[241].mxu1 }
 0x45f   : > { %v7762_v33 = vpop.f32.mrb[96].mxu0  ;;  %v18398_v45 = vpop.f32.mrb[242].mxu1  ;;  %v15284_v15 = vld [vmem:[#allocation9 + $0x8] sm:$0xff]   ;;  %20043 = vst [vmem:[#allocation101_spill] sm:$0xff] %v18405_v50  ;;  %v18418_v17 = vmax.f32 %v5721_v25, 0.0  ;;  %v5599_v25 = vadd.f32 %v18346_v4, %v18283_v40 }
 0x460   : > { %v14868_v3 = vpack.c.bf16 %v8392_v1, %v8391_v43  ;;  %v8137_v8 = vadd.f32 %v18218_v31, %v7762_v33  ;;  %v7764_v62 = vpop.f32.mrb[97].mxu0  ;;  %10226 = vmatprep.mubr.bf16.mxu1 %v13748_v58  ;;  %v5454_v2 = vpop.f32.mrb[243].mxu1  ;;  %v5598_v43 = vadd.f32 %v18346_v4, %v18266_v7  ;;  %15088 = vmatprep.subr.bf16.mxu0 %v15284_v15  ;;  %v20045_v58 = vld [vmem:[#allocation103_spill] sm:$0xff]  ;;  %v5976_v33 = vrot.slane %v18391_v52, 7 }
 0x461   : > { %v7765_v24 = vpop.f32.mrb[98].mxu0  ;;  %v5723_v1 = vadd.f32 %v5595_v38, %v20044_v41  ;;  %v5724_v36 = vadd.f32 %v5596_v28, %v20045_v58  ;;  %15119 = vmatprep.subr.bf16.mxu1 %v15284_v15  ;;  %20046 = vst [vmem:[#allocation100_spill] sm:$0xff] %v18418_v17  ;;  %v5597_v7 = vadd.f32 %v18346_v4, %v18259_v14  ;;  %v20047_v62 = vld [vmem:[#allocation105_spill] sm:$0xff] }
 0x462   : > { %v8265_v57 = vmax.f32 %v8137_v8, 0.0  ;;  %v8138_v59 = vadd.f32 %v18218_v31, %v7765_v24  ;;  %v7767_v23 = vpop.f32.mrb[99].mxu0  ;;  %14869 = vmatmul.mubr.msk.bf16.gmra.mrb[92].mxu1 %vm15828_vm1, %v14868_v3  ;;  %15089 = vmatpush3.bf16.msra.mxu0 %v15284_v15  ;;  %v5726_v19 = vadd.f32 %v5598_v43, %v20047_v62  ;;  %v5600_v14 = vadd.f32 %v18346_v4, %v18290_v26 }
 0x463   : > { %v5975_v23 = vrot.slane %v18401_v16, 7  ;;  %15127 = vmatpush3.bf16.msra.mxu1 %v15284_v15  ;;  %v5977_v43 = vrot.slane %v18418_v17, 7  ;;  %v5602_v26 = vadd.f32 %v18346_v4, %v18314_v61 }
 0x464   : > { %v8266_v53 = vmax.f32 %v8138_v59, 0.0  ;;  %14689 = vmatmul.mubr.msk.bf16.gmra.mrb[204].mxu0 %vm15828_vm1, %v14688_v51  ;;  %v8393_v3 = vrot.slane %v8265_v57, 7  ;;  %v5978_v51 = vrot.slane %v18405_v50, 7  ;;  %v18431_v59 = vmax.f32 %v5723_v1, 0.0 }
 0x465   : > { %7984 = vmatprep.mubr.bf16.mxu0 %v13649_v20  ;;  %v18423_v28 = vpop.f32.mrb[244].mxu1  ;;  %v18433_v20 = vmax.f32 %v5724_v36, 0.0  ;;  %v14693_v1 = vpack.c.bf16 %v5976_v33, %v5975_v23  ;;  %v5601_v33 = vadd.f32 %v18346_v4, %v18307_v29 }
 0x466   : > { %v8394_v38 = vrot.slane %v8266_v53, 7  ;;  %v13749_v8 = vpack.c.bf16 %v8266_v53, %v8265_v57  ;;  %v5459_v2 = vpop.f32.mrb[245].mxu1  ;;  %20048 = vst [vmem:[#allocation102_spill] sm:$0xff] %v18431_v59  ;;  %v20050_v53 = vld [vmem:[#allocation104_spill] sm:$0xff]  ;;  %v5979_v61 = vrot.slane %v18431_v59, 7 }
 0x467   : > { %v7770_v24 = vpop.f32.mrb[100].mxu0  ;;  %20049 = vst [vmem:[#allocation103_spill] sm:$0xff] %v18433_v20  ;;  %v18435_v41 = vpop.f32.mrb[246].mxu1  ;;  %v5725_v40 = vadd.f32 %v5597_v7, %v20050_v53  ;;  %v5728_v7 = vadd.f32 %v5600_v14, %v20053_v46  ;;  %v5980_v23 = vrot.slane %v18433_v20, 7  ;;  %v5604_v46 = vadd.f32 %v18346_v4, %v18338_v18 }
 0x468   : > { %v14873_v57 = vpack.c.bf16 %v8394_v38, %v8393_v3  ;;  %v8139_v15 = vadd.f32 %v18218_v31, %v7770_v24  ;;  %v7772_v58 = vpop.f32.mrb[101].mxu0  ;;  %10234 = vmatprep.mubr.bf16.mxu1 %v13749_v8  ;;  %v5462_v62 = vpop.f32.mrb[247].mxu1  ;;  %v13650_v38 = vpack.c.bf16 %v18405_v50, %v18418_v17  ;;  %v14698_v24 = vpack.c.bf16 %v5978_v51, %v5977_v43  ;;  %v20052_v8 = vld [vmem:[#allocation106_spill] sm:$0xff] }
 0x469   : > { %v7773_v2 = vpop.f32.mrb[102].mxu0  ;;  %v18445_v58 = vmax.f32 %v5726_v19, 0.0  ;;  %v5727_v16 = vadd.f32 %v5599_v25, %v20052_v8  ;;  %v18457_v51 = vmax.f32 %v5725_v40, 0.0  ;;  %v20055_v19 = vld [vmem:[#allocation109_spill] sm:$0xff]  ;;  %v13651_v14 = vpack.c.bf16 %v18433_v20, %v18431_v59 }
 0x46a   : > { %v8267_v52 = vmax.f32 %v8139_v15, 0.0  ;;  %v8140_v36 = vadd.f32 %v18218_v31, %v7773_v2  ;;  %v7775_v3 = vpop.f32.mrb[103].mxu0  ;;  %14874 = vmatmul.mubr.msk.bf16.gmra.mrb[96].mxu1 %vm15828_vm1, %v14873_v57  ;;  %v5730_v25 = vadd.f32 %v5602_v26, %v20055_v19  ;;  %v5606_v57 = vadd.f32 %v18346_v4, %v18367_v13 }
 0x46b   : > { %20051 = vst [vmem:[#allocation105_spill] sm:$0xff] %v18445_v58  ;;  %20054 = vst [vmem:[#allocation104_spill] sm:$0xff] %v18457_v51  ;;  %v5982_v40 = vrot.slane %v18445_v58, 7  ;;  %v18469_v2 = vmax.f32 %v5727_v16, 0.0  ;;  %v18471_v26 = vmax.f32 %v5728_v7, 0.0  ;;  %v5603_v18 = vadd.f32 %v18346_v4, %v18331_v39  ;;  %v20056_v3 = vld [vmem:[#allocation108_spill] sm:$0xff] }
 0x46c   : > { %v8268_v15 = vmax.f32 %v8140_v36, 0.0  ;;  %14694 = vmatmul.mubr.msk.bf16.gmra.mrb[208].mxu0 %vm15828_vm1, %v14693_v1  ;;  %v8395_v43 = vrot.slane %v8267_v52, 7  ;;  %v5605_v13 = vadd.f32 %v18346_v4, %v18360_v37  ;;  %v18481_v16 = vpack.c.bf16 %v5980_v23, %v5979_v61  ;;  %v20058_v39 = vld [vmem:[#allocation111_spill] sm:$0xff]  ;;  %v20060_v23 = vld [vmem:[#allocation110_spill] sm:$0xff] }
 0x46d   : > { %7992 = vmatprep.mubr.bf16.mxu0 %v13650_v38  ;;  %v18466_v62 = vpop.f32.mrb[248].mxu1  ;;  %v5729_v38 = vadd.f32 %v5601_v33, %v20056_v3  ;;  %v5981_v7 = vrot.slane %v18457_v51, 7  ;;  %v18484_v20 = vmax.f32 %v5730_v25, 0.0  ;;  %v20059_v3 = vld [vmem:[#allocation113_spill] sm:$0xff]  ;;  %v5983_v61 = vrot.slane %v18469_v2, 7 }
 0x46e   : > { %v8396_v29 = vrot.slane %v8268_v15, 7  ;;  %v13750_v53 = vpack.c.bf16 %v8268_v15, %v8267_v52  ;;  %v5467_v1 = vpop.f32.mrb[249].mxu1  ;;  %v5734_v50 = vadd.f32 %v5606_v57, %v20059_v3  ;;  %v5731_v25 = vadd.f32 %v5603_v18, %v20060_v23 }
 0x46f   : > { %v7778_v36 = vpop.f32.mrb[104].mxu0  ;;  %v18478_v52 = vpop.f32.mrb[250].mxu1  ;;  %20057 = vst [vmem:[#allocation106_spill] sm:$0xff] %v18484_v20  ;;  %v5732_v1 = vadd.f32 %v5604_v46, %v20058_v39  ;;  %v5608_v46 = vadd.f32 %v18346_v4, %v18398_v45  ;;  %v18500_v57 = vmax.f32 %v5729_v38, 0.0  ;;  %v5607_v45 = vadd.f32 %v18346_v4, %v18388_v56 }
 0x470   : > { %v14878_v8 = vpack.c.bf16 %v8396_v29, %v8395_v43  ;;  %v8141_v15 = vadd.f32 %v18218_v31, %v7778_v36  ;;  %v7780_v19 = vpop.f32.mrb[105].mxu0  ;;  %10242 = vmatprep.mubr.bf16.mxu1 %v13750_v53  ;;  %v5470_v59 = vpop.f32.mrb[251].mxu1  ;;  %v13652_v36 = vpack.c.bf16 %v18445_v58, %v18457_v51  ;;  %v18491_v53 = vpack.c.bf16 %v5982_v40, %v5981_v7 }
 0x471   : > { %v7781_v33 = vpop.f32.mrb[106].mxu0  ;;  %v5984_v59 = vrot.slane %v18471_v26, 7  ;;  %v5986_v40 = vrot.slane %v18484_v20, 7  ;;  %v18506_v7 = vmax.f32 %v5732_v1, 0.0  ;;  %v5609_v1 = vadd.f32 %v18346_v4, %v18423_v28  ;;  %v20063_v28 = vld [vmem:[#allocation114_spill] sm:$0xff] }
 0x472   : > { %v8269_v37 = vmax.f32 %v8141_v15, 0.0  ;;  %v8142_v43 = vadd.f32 %v18218_v31, %v7781_v33  ;;  %v7783_v29 = vpop.f32.mrb[107].mxu0  ;;  %14879 = vmatmul.mubr.msk.bf16.gmra.mrb[100].mxu1 %vm15828_vm1, %v14878_v8  ;;  %v20061_v15 = vld [vmem:[#allocation112_spill] sm:$0xff]  ;;  %v18512_v8 = vmax.f32 %v5734_v50, 0.0  ;;  %v5610_v56 = vadd.f32 %v18346_v4, %v18435_v41 }
 0x473   : > { %v5733_v19 = vadd.f32 %v5605_v13, %v20061_v15  ;;  %v5985_v15 = vrot.slane %v18500_v57, 7 }
 0x474   : > { %v8270_v39 = vmax.f32 %v8142_v43, 0.0  ;;  %14699 = vmatmul.mubr.msk.bf16.gmra.mrb[212].mxu0 %vm15828_vm1, %v14698_v24  ;;  %v8397_v38 = vrot.slane %v8269_v37, 7  ;;  %v18514_v43 = vmax.f32 %v5731_v25, 0.0  ;;  %v20062_v24 = vld [vmem:[#allocation115_spill] sm:$0xff] }
 0x475   : > { %8000 = vmatprep.mubr.bf16.mxu0 %v13651_v14  ;;  %v5473_v3 = vpop.f32.mrb[252].mxu1  ;;  %v5736_v29 = vadd.f32 %v5608_v46, %v20062_v24  ;;  %v18522_v50 = vmax.f32 %v5733_v19, 0.0  ;;  %v5988_v46 = vrot.slane %v18506_v7, 7  ;;  %v5735_v24 = vadd.f32 %v5607_v45, %v20063_v28  ;;  %v20065_v45 = vld [vmem:[#allocation117_spill] sm:$0xff] }
 0x476   : > { %v8398_v33 = vrot.slane %v8270_v39, 7  ;;  %v13751_v13 = vpack.c.bf16 %v8270_v39, %v8269_v37  ;;  %v5475_v14 = vpop.f32.mrb[253].mxu1  ;;  %v18525_v39 = vpack.c.bf16 %v5984_v59, %v5983_v61  ;;  %v18531_v17 = vpack.c.bf16 %v5986_v40, %v5985_v15 }
 0x477   : > { %v7786_v23 = vpop.f32.mrb[108].mxu0  ;;  %v5476_v58 = vpop.f32.mrb[254].mxu1  ;;  %v5990_v19 = vrot.slane %v18512_v8, 7  ;;  %v5987_v61 = vrot.slane %v18514_v43, 7  ;;  %v18536_v59 = vmax.f32 %v5736_v29, 0.0  ;;  %v5989_v40 = vrot.slane %v18522_v50, 7 }
 0x478   : > { %v14883_v18 = vpack.c.bf16 %v8398_v33, %v8397_v38  ;;  %v8143_v37 = vadd.f32 %v18218_v31, %v7786_v23  ;;  %v7788_v25 = vpop.f32.mrb[109].mxu0  ;;  %10250 = vmatprep.mubr.bf16.mxu1 %v13751_v13  ;;  %v5478_v51 = vpop.f32.mrb[255].mxu1  ;;  %v20064_v13 = vld [vmem:[#allocation116_spill] sm:$0xff]  ;;  %v5612_v15 = vadd.f32 %v18346_v4, %v18478_v52  ;;  %v18551_v29 = vld [vmem:[%s19538_s6 + $0x1] ss:$0 sm:$0xff]  ;;  %v5611_v52 = vadd.f32 %v18346_v4, %v18466_v62 }
 0x479   : > { %v7789_v41 = vpop.f32.mrb[110].mxu0  ;;  %v5737_v25 = vadd.f32 %v5609_v1, %v20064_v13  ;;  %v5738_v51 = vadd.f32 %v5610_v56, %v20065_v45  ;;  %v18555_v56 = vpack.c.bf16 %v5988_v46, %v5987_v61  ;;  %v5992_v45 = vrot.slane %v18536_v59, 7 }
 0x47a   : > { %v8271_v38 = vmax.f32 %v8143_v37, 0.0  ;;  %v8144_v33 = vadd.f32 %v18218_v31, %v7789_v41  ;;  %v7791_v23 = vpop.f32.mrb[111].mxu0  ;;  %14884 = vmatmul.mubr.msk.bf16.gmra.mrb[104].mxu1 %vm15828_vm1, %v14883_v18  ;;  %v18557_v18 = vmax.f32 %v5735_v24, 0.0  ;;  %v5613_v28 = vadd.f32 %v18346_v4, %v5473_v3 }
 0x47b   : > { %v18566_v1 = vmax.f32 %v5737_v25, 0.0  ;;  %v18568_v46 = vmax.f32 %v5738_v51, 0.0  ;;  %v20067_v25 = vld [vmem:[#allocation118_spill] sm:$0xff] }
 0x47c   : > { %v8272_v37 = vmax.f32 %v8144_v33, 0.0  ;;  %14704 = vmatmul.mubr.msk.bf16.gmra.mrb[216].mxu0 %vm15828_vm1, %v18481_v16  ;;  %v18563_v16 = vpack.c.bf16 %v5990_v19, %v5989_v40  ;;  %v8399_v41 = vrot.slane %v8271_v38, 7  ;;  %v5739_v35 = vadd.f32 %v5611_v52, %v20067_v25 }
 0x47d   : > { %8008 = vmatprep.mubr.bf16.mxu0 %v13652_v36  ;;  %v10044_v13 = vpop.f32.mrb[0].mxu1  ;;  %v20066_v36 = vld [vmem:[#allocation119_spill] sm:$0xff] }
 0x47e   : > { %v8400_v33 = vrot.slane %v8272_v37, 7  ;;  %v13752_v23 = vpack.c.bf16 %v8272_v37, %v8271_v38  ;;  %v10563_v24 = vadd.f32 %v18551_v29, %v10044_v13  ;;  %v10046_v61 = vpop.f32.mrb[1].mxu1  ;;  %v5740_v14 = vadd.f32 %v5612_v15, %v20066_v36 }
 0x47f   : > { %v7794_v62 = vpop.f32.mrb[112].mxu0  ;;  %v10047_v60 = vpop.f32.mrb[2].mxu1  ;;  %v5991_v37 = vrot.slane %v18557_v18, 7  ;;  %v5614_v15 = vadd.f32 %v18346_v4, %v5476_v58 }
 0x480   : > { %v14888_v19 = vpack.c.bf16 %v8400_v33, %v8399_v41  ;;  %v8145_v40 = vadd.f32 %v18218_v31, %v7794_v62  ;;  %v7796_v38 = vpop.f32.mrb[113].mxu0  ;;  %10258 = vmatprep.mubr.bf16.mxu1 %v13752_v23  ;;  %v10691_v51 = vadd.f32 %v10563_v24, %v17109_v48  ;;  %v10564_v13 = vadd.f32 %v18551_v29, %v10047_v60  ;;  %v10049_v61 = vpop.f32.mrb[3].mxu1 }
 0x481   : > { %v7797_v22 = vpop.f32.mrb[114].mxu0  ;;  %v18582_v23 = vpack.c.bf16 %v5992_v45, %v5991_v37  ;;  %v5994_v62 = vrot.slane %v18568_v46, 7  ;;  %v5993_v60 = vrot.slane %v18566_v1, 7  ;;  %v18589_v4 = vmax.f32 %v5740_v14, 0.0 }
 0x482   : > { %v8273_v36 = vmax.f32 %v8145_v40, 0.0  ;;  %v8146_v3 = vadd.f32 %v18218_v31, %v7797_v22  ;;  %v7799_v41 = vpop.f32.mrb[115].mxu0  ;;  %v10819_v52 = vmax.f32 %v10691_v51, 0.0  ;;  %v10692_v48 = vadd.f32 %v10564_v13, %v17102_v30  ;;  %14889 = vmatmul.mubr.msk.bf16.gmra.mrb[108].mxu1 %vm15828_vm1, %v14888_v19 }
 0x483   : > { %v5741_v22 = vadd.f32 %v5613_v28, %v17073_v9  ;;  %v18595_v45 = vmax.f32 %v5739_v35, 0.0  ;;  %v20068_v30 = vpack.c.bf16 %v18471_v26, %v18469_v2  ;;  %v5742_v14 = vadd.f32 %v5614_v15, %v17075_v12 }
 0x484   : > { %v8274_v58 = vmax.f32 %v8146_v3, 0.0  ;;  %14709 = vmatmul.mubr.msk.bf16.gmra.mrb[220].mxu0 %vm15828_vm1, %v18491_v53  ;;  %v10947_v24 = vrot.slane %v10819_v52, 4  ;;  %v10820_v40 = vmax.f32 %v10692_v48, 0.0  ;;  %v8401_v38 = vrot.slane %v8273_v36, 7 }
 0x485   : > { %8016 = vmatprep.mubr.bf16.mxu0 %v20068_v30  ;;  %v10052_v37 = vpop.f32.mrb[4].mxu1  ;;  %v18603_v25 = vpack.c.bf16 %v5994_v62, %v5993_v60  ;;  %v5996_v3 = vrot.slane %v18589_v4, 7  ;;  %v18607_v41 = vmax.f32 %v5741_v22, 0.0 }
 0x486   : > { %v8402_v9 = vrot.slane %v8274_v58, 7  ;;  %v13753_v28 = vpack.c.bf16 %v8274_v58, %v8273_v36  ;;  %v10948_v53 = vadd.f32 %v10947_v24, %v10819_v52  ;;  %v10953_v35 = vrot.slane %v10820_v40, 4  ;;  %v10054_v13 = vpop.f32.mrb[5].mxu1 }
 0x487   : > { %v10565_v51 = vadd.f32 %v18551_v29, %v10052_v37  ;;  %v7802_v61 = vpop.f32.mrb[116].mxu0  ;;  %v10055_v12 = vpop.f32.mrb[6].mxu1  ;;  %v5995_v37 = vrot.slane %v18595_v45, 7  ;;  %v18613_v13 = vmax.f32 %v5742_v14, 0.0 }
 0x488   : > { %v14893_v48 = vpack.c.bf16 %v8402_v9, %v8401_v38  ;;  %v8147_v30 = vadd.f32 %v18218_v31, %v7802_v61  ;;  %v7804_v15 = vpop.f32.mrb[117].mxu0  ;;  %10266 = vmatprep.mubr.bf16.mxu1 %v13753_v28  ;;  %v10949_v36 = vrot.slane %v10948_v53, 2  ;;  %v10954_v58 = vadd.f32 %v10953_v35, %v10820_v40  ;;  %v10057_v60 = vpop.f32.mrb[7].mxu1  ;;  %v20069_v28 = vld [vmem:[#allocation120_spill] sm:$0xff] }
 0x489   : > { %v10693_v62 = vadd.f32 %v10565_v51, %v17138_v47  ;;  %v10566_v52 = vadd.f32 %v18551_v29, %v10055_v12  ;;  %v7805_v24 = vpop.f32.mrb[118].mxu0  ;;  %v18619_v47 = vpack.c.bf16 %v5996_v3, %v5995_v37 }
 0x48a   : > { %v8275_v22 = vmax.f32 %v8147_v30, 0.0  ;;  %v8148_v38 = vadd.f32 %v18218_v31, %v7805_v24  ;;  %v7807_v9 = vpop.f32.mrb[119].mxu0  ;;  %v10950_v61 = vadd.f32 %v10949_v36, %v10948_v53  ;;  %v10955_v19 = vrot.slane %v10954_v58, 2  ;;  %14894 = vmatmul.mubr.msk.bf16.gmra.mrb[112].mxu1 %vm15828_vm1, %v14893_v48 }
 0x48b   : > { %v10821_v15 = vmax.f32 %v10693_v62, 0.0  ;;  %v10694_v33 = vadd.f32 %v10566_v52, %v20069_v28  ;;  %v20070_v36 = vpack.c.bf16 %v18484_v20, %v18500_v57 }
 0x48c   : > { %v8276_v35 = vmax.f32 %v8148_v38, 0.0  ;;  %14714 = vmatmul.mubr.msk.bf16.gmra.mrb[224].mxu0 %vm15828_vm1, %v18525_v39  ;;  %v10951_v53 = vrot.slane %v10950_v61, 1  ;;  %v10956_v51 = vadd.f32 %v10955_v19, %v10954_v58  ;;  %v8403_v48 = vrot.slane %v8275_v22, 7 }
 0x48d   : > { %v10959_v30 = vrot.slane %v10821_v15, 4  ;;  %v10822_v12 = vmax.f32 %v10694_v33, 0.0  ;;  %8024 = vmatprep.mubr.bf16.mxu0 %v20070_v36  ;;  %v10060_v60 = vpop.f32.mrb[8].mxu1 }
 0x48e   : > { %v8404_v62 = vrot.slane %v8276_v35, 7  ;;  %v13754_v52 = vpack.c.bf16 %v8276_v35, %v8275_v22  ;;  %v10952_v24 = vadd.f32 %v10951_v53, %v10950_v61  ;;  %v10957_v39 = vrot.slane %v10956_v51, 1  ;;  %v10062_v9 = vpop.f32.mrb[9].mxu1 }
 0x48f   : > { %v10960_v37 = vadd.f32 %v10959_v30, %v10821_v15  ;;  %v10965_v38 = vrot.slane %v10822_v12, 4  ;;  %v7810_v28 = vpop.f32.mrb[120].mxu0  ;;  %v10567_v33 = vadd.f32 %v18551_v29, %v10060_v60  ;;  %v10063_v14 = vpop.f32.mrb[10].mxu1 }
 0x490   : > { %v14898_v19 = vpack.c.bf16 %v8404_v62, %v8403_v48  ;;  %v8149_v58 = vadd.f32 %v18218_v31, %v7810_v28  ;;  %v7812_v36 = vpop.f32.mrb[121].mxu0  ;;  %10274 = vmatprep.mubr.bf16.mxu1 %v13754_v52  ;;  %v11716_v40 = vmul.f32 0.125, %v10952_v24  ;;  %v10958_v22 = vadd.f32 %v10957_v39, %v10956_v51  ;;  %v10065_v53 = vpop.f32.mrb[11].mxu1 }
 0x491   : > { %v10961_v35 = vrot.slane %v10960_v37, 2  ;;  %v10966_v61 = vadd.f32 %v10965_v38, %v10822_v12  ;;  %v7813_v15 = vpop.f32.mrb[122].mxu0  ;;  %v10695_v30 = vadd.f32 %v10567_v33, %v17162_v55  ;;  %v10568_v48 = vadd.f32 %v18551_v29, %v10063_v14 }
 0x492   : > { %v8277_v9 = vmax.f32 %v8149_v58, 0.0  ;;  %v8150_v62 = vadd.f32 %v18218_v31, %v7813_v15  ;;  %v7815_v60 = vpop.f32.mrb[123].mxu0  ;;  %v11844_v28 = vpack.c.bf16 %v11716_v40, %v11716_v40  ;;  %v11717_v36 = vmul.f32 0.125, %v10958_v22  ;;  %14899 = vmatmul.mubr.msk.bf16.gmra.mrb[116].mxu1 %vm15828_vm1, %v14898_v19 }
 0x493   : > { %v10962_v52 = vadd.f32 %v10961_v35, %v10960_v37  ;;  %v10967_v20 = vrot.slane %v10966_v61, 2  ;;  %v10823_v51 = vmax.f32 %v10695_v30, 0.0  ;;  %v10696_v12 = vadd.f32 %v10568_v48, %v17154_v54 }
 0x494   : > { %v8405_v24 = vrot.slane %v8277_v9, 7  ;;  %v8278_v39 = vmax.f32 %v8150_v62, 0.0  ;;  %14719 = vmatmul.mubr.msk.bf16.gmra.mrb[228].mxu0 %vm15828_vm1, %v18531_v17  ;;  %v12123_v55 = vunpack.c.l.b16 %v11844_v28  ;;  %v11845_v14 = vpack.c.bf16 %v11717_v36, %v11717_v36 }
 0x495   : > { %v10963_v31 = vrot.slane %v10962_v52, 1  ;;  %v10968_v38 = vadd.f32 %v10967_v20, %v10966_v61  ;;  %v20071_v40 = vpack.c.bf16 %v18506_v7, %v18514_v43  ;;  %v10971_v37 = vrot.slane %v10823_v51, 4  ;;  %v10068_v22 = vpop.f32.mrb[12].mxu1  ;;  %v18651_v20 = vld [vmem:[%s19536_s4 + $0x1] ss:$0 sm:$0xff] }
 0x496   : > { %v10824_v33 = vmax.f32 %v10696_v12, 0.0  ;;  %v8406_v19 = vrot.slane %v8278_v39, 7  ;;  %v13755_v58 = vpack.c.bf16 %v8278_v39, %v8277_v9  ;;  %v12124_v35 = vunpack.c.l.b16 %v11845_v14  ;;  %v10070_v30 = vpop.f32.mrb[13].mxu1 }
 0x497   : > { %8032 = vmatprep.mubr.bf16.mxu0 %v20071_v40  ;;  %v10964_v54 = vadd.f32 %v10963_v31, %v10962_v52  ;;  %v10969_v53 = vrot.slane %v10968_v38, 1  ;;  %v10569_v15 = vadd.f32 %v18551_v29, %v10068_v22  ;;  %v7818_v17 = vpop.f32.mrb[124].mxu0  ;;  %v10972_v48 = vadd.f32 %v10971_v37, %v10823_v51  ;;  %v10071_v28 = vpop.f32.mrb[14].mxu1 }
 0x498   : > { %v10977_v62 = vrot.slane %v10824_v33, 4  ;;  %v14903_v60 = vpack.c.bf16 %v8406_v19, %v8405_v24  ;;  %v8151_v61 = vadd.f32 %v18651_v20, %v7818_v17  ;;  %v7820_v9 = vpop.f32.mrb[125].mxu0  ;;  %10282 = vmatprep.mubr.bf16.mxu1 %v13755_v58  ;;  %v18655_v36 = vsel %vm12251_vm2, %v12124_v35, %v12123_v55  ;;  %v10073_v51 = vpop.f32.mrb[15].mxu1  ;;  %v15285_v55 = vld [vmem:[#allocation9 + $0x10] sm:$0xff]  }
 0x499   : > { %v11718_v52 = vmul.f32 0.125, %v10964_v54  ;;  %v10970_v12 = vadd.f32 %v10969_v53, %v10968_v38  ;;  %v10697_v39 = vadd.f32 %v10569_v15, %v17187_v44  ;;  %v7821_v14 = vpop.f32.mrb[126].mxu0  ;;  %v10973_v24 = vrot.slane %v10972_v48, 2  ;;  %15090 = vmatprep.subr.bf16.mxu0 %v15285_v55  ;;  %15120 = vmatprep.subr.bf16.mxu1 %v15285_v55 }
 0x49a   : > { %v10978_v31 = vadd.f32 %v10977_v62, %v10824_v33  ;;  %v8279_v40 = vmax.f32 %v8151_v61, 0.0  ;;  %v10570_v37 = vadd.f32 %v18551_v29, %v10071_v28  ;;  %v7823_v19 = vpop.f32.mrb[127].mxu0  ;;  %v8152_v58 = vadd.f32 %v18651_v20, %v7821_v14  ;;  %14904 = vmatmul.mubr.msk.bf16.gmra.mrb[120].mxu1 %vm15828_vm1, %v14903_v60  ;;  %15091 = vmatpush3.bf16.msra.mxu0 %v15285_v55 }
 0x49b   : > { %v11846_v22 = vpack.c.bf16 %v11718_v52, %v11718_v52  ;;  %v11719_v30 = vmul.f32 0.125, %v10970_v12  ;;  %v10825_v17 = vmax.f32 %v10697_v39, 0.0  ;;  %v20072_v38 = vrot.slane %v18607_v41, 7  ;;  %15128 = vmatpush3.bf16.msra.mxu1 %v15285_v55 }
 0x49c   : > { %v20073_v44 = vrot.slane %v18613_v13, 7  ;;  %v10974_v33 = vadd.f32 %v10973_v24, %v10972_v48  ;;  %v10979_v54 = vrot.slane %v10978_v31, 2  ;;  %v10698_v53 = vadd.f32 %v10570_v37, %v17179_v0  ;;  %14724 = vmatmul.mubr.msk.bf16.gmra.mrb[232].mxu0 %vm15828_vm1, %v18555_v56 }
 0x49d   : > { %v11847_v15 = vpack.c.bf16 %v11719_v30, %v11719_v30  ;;  %v10983_v62 = vrot.slane %v10825_v17, 4  ;;  %v8407_v61 = vrot.slane %v8279_v40, 7  ;;  %v8280_v28 = vmax.f32 %v8152_v58, 0.0  ;;  %v10076_v39 = vpop.f32.mrb[16].mxu1 }
 0x49e   : > { %v18666_v35 = vpack.c.bf16 %v20073_v44, %v20072_v38  ;;  %v20074_v60 = vpack.c.bf16 %v18512_v8, %v18522_v50  ;;  %v18675_v9 = vunpack.c.l.b16 %v11846_v22  ;;  %v10975_v52 = vrot.slane %v10974_v33, 1  ;;  %v10078_v24 = vpop.f32.mrb[17].mxu1 }
 0x49f   : > { %v10980_v48 = vadd.f32 %v10979_v54, %v10978_v31  ;;  %v10826_v12 = vmax.f32 %v10698_v53, 0.0  ;;  %v18677_v0 = vunpack.c.l.b16 %v11847_v15  ;;  %v10984_v56 = vadd.f32 %v10983_v62, %v10825_v17  ;;  %v7826_v37 = vpop.f32.mrb[128].mxu0  ;;  %v10079_v38 = vpop.f32.mrb[18].mxu1  ;;  %v15287_v24 = vld [vmem:[#allocation9 + $0x20] sm:$0xff]  }
 0x4a0   : > { %8040 = vmatprep.mubr.bf16.mxu0 %v20074_v60  ;;  %v8408_v51 = vrot.slane %v8280_v28, 7  ;;  %v13756_v14 = vpack.c.bf16 %v8280_v28, %v8279_v40  ;;  %v10976_v19 = vadd.f32 %v10975_v52, %v10974_v33  ;;  %v10571_v22 = vadd.f32 %v18551_v29, %v10076_v39  ;;  %v7828_v44 = vpop.f32.mrb[129].mxu0  ;;  %v10081_v60 = vpop.f32.mrb[19].mxu1  ;;  %v15286_v40 = vld [vmem:[#allocation9 + $0x18] sm:$0xff]  }
 0x4a1   : > { %v10981_v30 = vrot.slane %v10980_v48, 1  ;;  %v10989_v58 = vrot.slane %v10826_v12, 4  ;;  %v10985_v31 = vrot.slane %v10984_v56, 2  ;;  %v8153_v53 = vadd.f32 %v18651_v20, %v7826_v37  ;;  %v7829_v17 = vpop.f32.mrb[130].mxu0  ;;  %15092 = vmatprep.subr.bf16.mxu0 %v15286_v40  ;;  %15121 = vmatprep.subr.bf16.mxu1 %v15286_v40 }
 0x4a2   : > { %v14908_v54 = vpack.c.bf16 %v8408_v51, %v8407_v61  ;;  %v10572_v15 = vadd.f32 %v18551_v29, %v10079_v38  ;;  %10290 = vmatprep.mubr.bf16.mxu1 %v13756_v14  ;;  %v11720_v62 = vmul.f32 0.125, %v10976_v19  ;;  %v10699_v33 = vadd.f32 %v10571_v22, %v17211_v10  ;;  %v7831_v52 = vpop.f32.mrb[131].mxu0  ;;  %15093 = vmatpush3.bf16.msra.mxu0 %v15286_v40 }
 0x4a3   : > { %v10982_v28 = vadd.f32 %v10981_v30, %v10980_v48  ;;  %v10990_v55 = vadd.f32 %v10989_v58, %v10826_v12  ;;  %v10986_v39 = vadd.f32 %v10985_v31, %v10984_v56  ;;  %v8281_v3 = vmax.f32 %v8153_v53, 0.0  ;;  %15094 = vmatprep.subr.bf16.mxu0 %v15287_v24  ;;  %15129 = vmatpush3.bf16.msra.mxu1 %v15286_v40 }
 0x4a4   : > { %v10700_v44 = vadd.f32 %v10572_v15, %v17203_v49  ;;  %v8154_v61 = vadd.f32 %v18651_v20, %v7829_v17  ;;  %14909 = vmatmul.mubr.msk.bf16.gmra.mrb[124].mxu1 %vm15828_vm1, %v14908_v54  ;;  %v11848_v51 = vpack.c.bf16 %v11720_v62, %v11720_v62  ;;  %v10827_v19 = vmax.f32 %v10699_v33, 0.0  ;;  %14729 = vmatmul.mubr.msk.bf16.gmra.mrb[236].mxu0 %vm15828_vm1, %v18563_v16 }
 0x4a5   : > { %v11721_v14 = vmul.f32 0.125, %v10982_v28  ;;  %v10991_v37 = vrot.slane %v10990_v55, 2  ;;  %v10987_v10 = vrot.slane %v10986_v39, 1  ;;  %v8409_v48 = vrot.slane %v8281_v3, 7  ;;  %v10084_v31 = vpop.f32.mrb[20].mxu1  ;;  %15122 = vmatprep.subr.bf16.mxu1 %v15287_v24 }
 0x4a6   : > { %v10828_v12 = vmax.f32 %v10700_v44, 0.0  ;;  %v8282_v56 = vmax.f32 %v8154_v61, 0.0  ;;  %v20075_v49 = vpack.c.bf16 %v18536_v59, %v18557_v18  ;;  %v18693_v30 = vunpack.c.l.b16 %v11848_v51  ;;  %v10086_v60 = vpop.f32.mrb[21].mxu1  ;;  %15095 = vmatpush3.bf16.msra.mxu0 %v15287_v24 }
 0x4a7   : > { %v11849_v58 = vpack.c.bf16 %v11721_v14, %v11721_v14  ;;  %v10992_v22 = vadd.f32 %v10991_v37, %v10990_v55  ;;  %v10995_v38 = vrot.slane %v10827_v19, 4  ;;  %v10988_v54 = vadd.f32 %v10987_v10, %v10986_v39  ;;  %v7834_v17 = vpop.f32.mrb[132].mxu0  ;;  %v10087_v44 = vpop.f32.mrb[22].mxu1  ;;  %15130 = vmatpush3.bf16.msra.mxu1 %v15287_v24 }
 0x4a8   : > { %8048 = vmatprep.mubr.bf16.mxu0 %v20075_v49  ;;  %v11001_v16 = vrot.slane %v10828_v12, 4  ;;  %v8410_v53 = vrot.slane %v8282_v56, 7  ;;  %v13757_v15 = vpack.c.bf16 %v8282_v56, %v8281_v3  ;;  %v10573_v52 = vadd.f32 %v18551_v29, %v10084_v31  ;;  %v7836_v61 = vpop.f32.mrb[133].mxu0  ;;  %v10089_v39 = vpop.f32.mrb[23].mxu1  ;;  %v15288_v3 = vld [vmem:[#allocation9 + $0x28] sm:$0xff]  }
 0x4a9   : > { %v18695_v62 = vunpack.c.l.b16 %v11849_v58  ;;  %v10993_v28 = vrot.slane %v10992_v22, 1  ;;  %v10996_v33 = vadd.f32 %v10995_v38, %v10827_v19  ;;  %v11722_v55 = vmul.f32 0.125, %v10988_v54  ;;  %v7837_v37 = vpop.f32.mrb[134].mxu0  ;;  %v15289_v38 = vld [vmem:[#allocation9 + $0x30] sm:$0xff]   ;;  %15096 = vmatprep.subr.bf16.mxu0 %v15288_v3  ;;  %15123 = vmatprep.subr.bf16.mxu1 %v15288_v3 }
 0x4aa   : > { %v11002_v51 = vadd.f32 %v11001_v16, %v10828_v12  ;;  %v14913_v14 = vpack.c.bf16 %v8410_v53, %v8409_v48  ;;  %v8155_v40 = vadd.f32 %v18651_v20, %v7834_v17  ;;  %10298 = vmatprep.mubr.bf16.mxu1 %v13757_v15  ;;  %v10701_v49 = vadd.f32 %v10573_v52, %v17235_v6  ;;  %v7839_v58 = vpop.f32.mrb[135].mxu0 }
 0x4ab   : > { %v10994_v10 = vadd.f32 %v10993_v28, %v10992_v22  ;;  %v10997_v56 = vrot.slane %v10996_v33, 2  ;;  %v10574_v19 = vadd.f32 %v18551_v29, %v10087_v44  ;;  %v11850_v31 = vpack.c.bf16 %v11722_v55, %v11722_v55  ;;  %15097 = vmatpush3.bf16.msra.mxu0 %v15288_v3  ;;  %15131 = vmatpush3.bf16.msra.mxu1 %v15288_v3 }
 0x4ac   : > { %v11003_v54 = vrot.slane %v11002_v51, 2  ;;  %v8283_v12 = vmax.f32 %v8155_v40, 0.0  ;;  %v8156_v48 = vadd.f32 %v18651_v20, %v7837_v37  ;;  %14914 = vmatmul.mubr.msk.bf16.gmra.mrb[128].mxu1 %vm15828_vm1, %v14913_v14  ;;  %v10829_v53 = vmax.f32 %v10701_v49, 0.0  ;;  %14734 = vmatmul.mubr.msk.bf16.gmra.mrb[240].mxu0 %vm15828_vm1, %v18582_v23 }
 0x4ad   : > { %v18704_v16 = vmul.f32 0.125, %v10994_v10  ;;  %v10998_v22 = vadd.f32 %v10997_v56, %v10996_v33  ;;  %v10702_v6 = vadd.f32 %v10574_v19, %v17227_v42  ;;  %v18710_v24 = vunpack.c.l.b16 %v11850_v31  ;;  %v10092_v61 = vpop.f32.mrb[24].mxu1  ;;  %15098 = vmatprep.subr.bf16.mxu0 %v15289_v38  ;;  %15124 = vmatprep.subr.bf16.mxu1 %v15289_v38 }
 0x4ae   : > { %v11004_v15 = vadd.f32 %v11003_v54, %v11002_v51  ;;  %v8411_v60 = vrot.slane %v8283_v12, 7  ;;  %v8284_v17 = vmax.f32 %v8156_v48, 0.0  ;;  %v20076_v28 = vpack.c.bf16 %v18568_v46, %v18566_v1  ;;  %v10094_v40 = vpop.f32.mrb[25].mxu1 }
 0x4af   : > { %v10999_v52 = vrot.slane %v10998_v22, 1  ;;  %v11007_v33 = vrot.slane %v10829_v53, 4  ;;  %v10830_v44 = vmax.f32 %v10702_v6, 0.0  ;;  %v11851_v42 = vpack.c.bf16 %v18704_v16, %v18704_v16  ;;  %v7842_v39 = vpop.f32.mrb[136].mxu0  ;;  %v10095_v19 = vpop.f32.mrb[26].mxu1  ;;  %15099 = vmatpush3.bf16.msra.mxu0 %v15289_v38  ;;  %15132 = vmatpush3.bf16.msra.mxu1 %v15289_v38 }
 0x4b0   : > { %8056 = vmatprep.mubr.bf16.mxu0 %v20076_v28  ;;  %v11005_v23 = vrot.slane %v11004_v15, 1  ;;  %v8412_v55 = vrot.slane %v8284_v17, 7  ;;  %v13758_v14 = vpack.c.bf16 %v8284_v17, %v8283_v12  ;;  %v10575_v51 = vadd.f32 %v18551_v29, %v10092_v61  ;;  %v7844_v58 = vpop.f32.mrb[137].mxu0  ;;  %v10097_v16 = vpop.f32.mrb[27].mxu1 }
 0x4b1   : > { %v11000_v37 = vadd.f32 %v10999_v52, %v10998_v22  ;;  %v11008_v10 = vadd.f32 %v11007_v33, %v10829_v53  ;;  %v11013_v56 = vrot.slane %v10830_v44, 4  ;;  %v8157_v49 = vadd.f32 %v18651_v20, %v7842_v39  ;;  %v7845_v12 = vpop.f32.mrb[138].mxu0  ;;  %v15290_v53 = vld [vmem:[#allocation9 + $0x38] sm:$0xff]  }
 0x4b2   : > { %v11006_v31 = vadd.f32 %v11005_v23, %v11004_v15  ;;  %v14918_v54 = vpack.c.bf16 %v8412_v55, %v8411_v60  ;;  %v10703_v48 = vadd.f32 %v10575_v51, %v17259_v11  ;;  %v10576_v3 = vadd.f32 %v18551_v29, %v10095_v19  ;;  %10306 = vmatprep.mubr.bf16.mxu1 %v13758_v14  ;;  %v7847_v22 = vpop.f32.mrb[139].mxu0 }
 0x4b3   : > { %v11724_v6 = vmul.f32 0.125, %v11000_v37  ;;  %v11009_v17 = vrot.slane %v11008_v10, 2  ;;  %v11014_v28 = vadd.f32 %v11013_v56, %v10830_v44  ;;  %v8285_v61 = vmax.f32 %v8157_v49, 0.0  ;;  %15100 = vmatprep.subr.bf16.mxu0 %v15290_v53  ;;  %15125 = vmatprep.subr.bf16.mxu1 %v15290_v53 }
 0x4b4   : > { %v11725_v52 = vmul.f32 0.125, %v11006_v31  ;;  %v10831_v33 = vmax.f32 %v10703_v48, 0.0  ;;  %v10704_v15 = vadd.f32 %v10576_v3, %v17251_v27  ;;  %v8158_v60 = vadd.f32 %v18651_v20, %v7845_v12  ;;  %14919 = vmatmul.mubr.msk.bf16.gmra.mrb[132].mxu1 %vm15828_vm1, %v14918_v54  ;;  %14739 = vmatmul.mubr.msk.bf16.gmra.mrb[244].mxu0 %vm15828_vm1, %v18603_v25 }
 0x4b5   : > { %v11852_v11 = vpack.c.bf16 %v11724_v6, %v11724_v6  ;;  %v11010_v23 = vadd.f32 %v11009_v17, %v11008_v10  ;;  %v11015_v55 = vrot.slane %v11014_v28, 2  ;;  %v8413_v14 = vrot.slane %v8285_v61, 7  ;;  %v10100_v10 = vpop.f32.mrb[28].mxu1  ;;  %15101 = vmatpush3.bf16.msra.mxu0 %v15290_v53  ;;  %15133 = vmatpush3.bf16.msra.mxu1 %v15290_v53 }
 0x4b6   : > { %v11853_v44 = vpack.c.bf16 %v11725_v52, %v11725_v52  ;;  %v11019_v38 = vrot.slane %v10831_v33, 4  ;;  %v10832_v51 = vmax.f32 %v10704_v15, 0.0  ;;  %v8286_v40 = vmax.f32 %v8158_v60, 0.0  ;;  %v10102_v54 = vpop.f32.mrb[29].mxu1 }
 0x4b7   : > { %v20077_v27 = vpack.c.bf16 %v18589_v4, %v18595_v45  ;;  %v12131_v39 = vunpack.c.l.b16 %v11852_v11  ;;  %v11011_v37 = vrot.slane %v11010_v23, 1  ;;  %v11016_v56 = vadd.f32 %v11015_v55, %v11014_v28  ;;  %v7850_v48 = vpop.f32.mrb[140].mxu0  ;;  %v10103_v17 = vpop.f32.mrb[30].mxu1 }
 0x4b8   : > { %v18731_v49 = vunpack.c.l.b16 %v11851_v42  ;;  %v12132_v19 = vunpack.c.l.b16 %v11853_v44  ;;  %v11020_v25 = vadd.f32 %v11019_v38, %v10831_v33  ;;  %v11025_v58 = vrot.slane %v10832_v51, 4  ;;  %v7852_v22 = vpop.f32.mrb[141].mxu0  ;;  %v10105_v53 = vpop.f32.mrb[31].mxu1 }
 0x4b9   : > { %8064 = vmatprep.mubr.bf16.mxu0 %v20077_v27  ;;  %v8414_v31 = vrot.slane %v8286_v40, 7  ;;  %v11012_v3 = vadd.f32 %v11011_v37, %v11010_v23  ;;  %v11017_v16 = vrot.slane %v11016_v56, 1  ;;  %v13759_v12 = vpack.c.bf16 %v8286_v40, %v8285_v61  ;;  %v7853_v60 = vpop.f32.mrb[142].mxu0 }
 0x4ba   : > { %v10577_v6 = vadd.f32 %v18551_v29, %v10100_v10  ;;  %v12265_v28 = vsel %vm12251_vm2, %v12132_v19, %v12131_v39  ;;  %v11021_v42 = vrot.slane %v11020_v25, 2  ;;  %v11026_v52 = vadd.f32 %v11025_v58, %v10832_v51  ;;  %v7855_v23 = vpop.f32.mrb[143].mxu0 }
 0x4bb   : > { %v14923_v15 = vpack.c.bf16 %v8414_v31, %v8413_v14  ;;  %v11726_v11 = vmul.f32 0.125, %v11012_v3  ;;  %v11018_v33 = vadd.f32 %v11017_v16, %v11016_v56  ;;  %v8159_v44 = vadd.f32 %v18651_v20, %v7850_v48  ;;  %10314 = vmatprep.mubr.bf16.mxu1 %v13759_v12 }
 0x4bc   : > { %v10705_v55 = vadd.f32 %v10577_v6, %v17284_v5  ;;  %v11022_v61 = vadd.f32 %v11021_v42, %v11020_v25  ;;  %v11027_v38 = vrot.slane %v11026_v52, 2  ;;  %v10578_v40 = vadd.f32 %v18551_v29, %v10103_v17  ;;  %14744 = vmatmul.mubr.msk.bf16.gmra.mrb[248].mxu0 %vm15828_vm1, %v18619_v47 }
 0x4bd   : > { %v8160_v27 = vadd.f32 %v18651_v20, %v7853_v60  ;;  %14924 = vmatmul.mubr.msk.bf16.gmra.mrb[136].mxu1 %vm15828_vm1, %v14923_v15  ;;  %v11854_v14 = vpack.c.bf16 %v11726_v11, %v11726_v11  ;;  %v11727_v51 = vmul.f32 0.125, %v11018_v33  ;;  %v8287_v37 = vmax.f32 %v8159_v44, 0.0  ;;  %v10108_v3 = vpop.f32.mrb[32].mxu1 }
 0x4be   : > { %v10833_v39 = vmax.f32 %v10705_v55, 0.0  ;;  %v11023_v5 = vrot.slane %v11022_v61, 1  ;;  %v11028_v56 = vadd.f32 %v11027_v38, %v11026_v52  ;;  %v10706_v10 = vadd.f32 %v10578_v40, %v17276_v21  ;;  %v10110_v22 = vpop.f32.mrb[33].mxu1 }
 0x4bf   : > { %v8288_v19 = vmax.f32 %v8160_v27, 0.0  ;;  %v20078_v25 = vpack.c.bf16 %v18613_v13, %v18607_v41  ;;  %v12133_v58 = vunpack.c.l.b16 %v11854_v14  ;;  %v11855_v31 = vpack.c.bf16 %v11727_v51, %v11727_v51  ;;  %v7858_v47 = vpop.f32.mrb[144].mxu0  ;;  %v10111_v53 = vpop.f32.mrb[34].mxu1 }
 0x4c0   : > { %v11031_v54 = vrot.slane %v10833_v39, 4  ;;  %v8415_v48 = vrot.slane %v8287_v37, 7  ;;  %v11024_v16 = vadd.f32 %v11023_v5, %v11022_v61  ;;  %v11029_v12 = vrot.slane %v11028_v56, 1  ;;  %v7860_v60 = vpop.f32.mrb[145].mxu0  ;;  %v10113_v23 = vpop.f32.mrb[35].mxu1 }
 0x4c1   : > { %8072 = vmatprep.mubr.bf16.mxu0 %v20078_v25  ;;  %v10834_v6 = vmax.f32 %v10706_v10, 0.0  ;;  %v8416_v17 = vrot.slane %v8288_v19, 7  ;;  %v18749_v42 = vsel %vm12253_vm3, %v12133_v58, %v12265_v28  ;;  %v18751_v21 = vunpack.c.l.b16 %v11855_v31  ;;  %v7861_v61 = vpop.f32.mrb[146].mxu0 }
 0x4c2   : > { %v11032_v52 = vadd.f32 %v11031_v54, %v10833_v39  ;;  %v13760_v15 = vpack.c.bf16 %v8288_v19, %v8287_v37  ;;  %v11728_v11 = vmul.f32 0.125, %v11024_v16  ;;  %v11030_v33 = vadd.f32 %v11029_v12, %v11028_v56  ;;  %v7863_v14 = vpop.f32.mrb[147].mxu0 }
 0x4c3   : > { %v11037_v55 = vrot.slane %v10834_v6, 4  ;;  %v14928_v44 = vpack.c.bf16 %v8416_v17, %v8415_v48  ;;  %v10579_v40 = vadd.f32 %v18551_v29, %v10108_v3  ;;  %v8161_v27 = vadd.f32 %v18651_v20, %v7858_v47 }
 0x4c4   : > { %v11033_v38 = vrot.slane %v11032_v52, 2  ;;  %v10580_v28 = vadd.f32 %v18551_v29, %v10111_v53  ;;  %10322 = vmatprep.mubr.bf16.mxu1 %v13760_v15  ;;  %v11856_v51 = vpack.c.bf16 %v11728_v11, %v11728_v11  ;;  %v11729_v39 = vmul.f32 0.125, %v11030_v33  ;;  %14749 = vmatmul.mubr.msk.bf16.gmra.mrb[252].mxu0 %vm15828_vm1, %v18666_v35 }
 0x4c5   : > { %v11038_v37 = vadd.f32 %v11037_v55, %v10834_v6  ;;  %v8162_v5 = vadd.f32 %v18651_v20, %v7861_v61  ;;  %14929 = vmatmul.mubr.msk.bf16.gmra.mrb[140].mxu1 %vm15828_vm1, %v14928_v44  ;;  %v10707_v10 = vadd.f32 %v10579_v40, %v17308_v63  ;;  %v8289_v19 = vmax.f32 %v8161_v27, 0.0  ;;  %v10116_v17 = vpop.f32.mrb[36].mxu1 }
 0x4c6   : > { %v11034_v56 = vadd.f32 %v11033_v38, %v11032_v52  ;;  %v10708_v25 = vadd.f32 %v10580_v28, %v17300_v32  ;;  %v18764_v58 = vunpack.c.l.b16 %v11856_v51  ;;  %v11857_v31 = vpack.c.bf16 %v11729_v39, %v11729_v39  ;;  %v10118_v32 = vpop.f32.mrb[37].mxu1  ;;  %v20079_v39 = vld [vmem:[#allocation122_spill] sm:$0xff] }
 0x4c7   : > { %v11039_v54 = vrot.slane %v11038_v37, 2  ;;  %v8290_v48 = vmax.f32 %v8162_v5, 0.0  ;;  %v10835_v16 = vmax.f32 %v10707_v10, 0.0  ;;  %v8417_v12 = vrot.slane %v8289_v19, 7  ;;  %v7866_v15 = vpop.f32.mrb[148].mxu0  ;;  %v10119_v33 = vpop.f32.mrb[38].mxu1 }
 0x4c8   : > { %v11035_v3 = vrot.slane %v11034_v56, 1  ;;  %v10836_v6 = vmax.f32 %v10708_v25, 0.0  ;;  %v18766_v22 = vunpack.c.l.b16 %v11857_v31  ;;  %v10581_v11 = vadd.f32 %v18551_v29, %v10116_v17  ;;  %v7868_v55 = vpop.f32.mrb[149].mxu0  ;;  %v10121_v40 = vpop.f32.mrb[39].mxu1 }
 0x4c9   : > { %v11040_v63 = vadd.f32 %v11039_v54, %v11038_v37  ;;  %v8418_v47 = vrot.slane %v8290_v48, 7  ;;  %v13761_v52 = vpack.c.bf16 %v8290_v48, %v8289_v19  ;;  %v11043_v60 = vrot.slane %v10835_v16, 4  ;;  %v7869_v27 = vpop.f32.mrb[150].mxu0  ;;  %v20080_v19 = vld [vmem:[#allocation121_spill] sm:$0xff] }
 0x4ca   : > { %v11036_v53 = vadd.f32 %v11035_v3, %v11034_v56  ;;  %v11049_v35 = vrot.slane %v10836_v6, 4  ;;  %v8163_v61 = vadd.f32 %v18651_v20, %v7866_v15  ;;  %v10582_v38 = vadd.f32 %v18551_v29, %v10119_v33  ;;  %v7871_v5 = vpop.f32.mrb[151].mxu0 }
 0x4cb   : > { %v11041_v44 = vrot.slane %v11040_v63, 1  ;;  %v14933_v23 = vpack.c.bf16 %v8418_v47, %v8417_v12  ;;  %10330 = vmatprep.mubr.bf16.mxu1 %v13761_v52  ;;  %v11044_v14 = vadd.f32 %v11043_v60, %v10835_v16  ;;  %v10709_v37 = vadd.f32 %v10581_v11, %v20079_v39 }
 0x4cc   : > { %v11730_v28 = vmul.f32 0.125, %v11036_v53  ;;  %v11050_v51 = vadd.f32 %v11049_v35, %v10836_v6  ;;  %v8291_v10 = vmax.f32 %v8163_v61, 0.0  ;;  %v10710_v25 = vadd.f32 %v10582_v38, %v20080_v19 }
 0x4cd   : > { %v11042_v56 = vadd.f32 %v11041_v44, %v11040_v63  ;;  %v8164_v31 = vadd.f32 %v18651_v20, %v7869_v27  ;;  %14934 = vmatmul.mubr.msk.bf16.gmra.mrb[144].mxu1 %vm15828_vm1, %v14933_v23  ;;  %v11045_v48 = vrot.slane %v11044_v14, 2  ;;  %v10837_v12 = vmax.f32 %v10709_v37, 0.0  ;;  %v10124_v53 = vpop.f32.mrb[40].mxu1 }
 0x4ce   : > { %v11858_v54 = vpack.c.bf16 %v11730_v28, %v11730_v28  ;;  %v11051_v3 = vrot.slane %v11050_v51, 2  ;;  %v8419_v16 = vrot.slane %v8291_v10, 7  ;;  %v10838_v6 = vmax.f32 %v10710_v25, 0.0  ;;  %v10126_v55 = vpop.f32.mrb[41].mxu1 }
 0x4cf   : > { %v18776_v17 = vmul.f32 0.125, %v11042_v56  ;;  %v8292_v47 = vmax.f32 %v8164_v31, 0.0  ;;  %v11046_v63 = vadd.f32 %v11045_v48, %v11044_v14  ;;  %v11055_v15 = vrot.slane %v10837_v12, 4  ;;  %v7874_v44 = vpop.f32.mrb[152].mxu0  ;;  %v10127_v27 = vpop.f32.mrb[42].mxu1 }
 0x4d0   : > { %v18778_v52 = vunpack.c.l.b16 %v11858_v54  ;;  %v11052_v32 = vadd.f32 %v11051_v3, %v11050_v51  ;;  %v11061_v60 = vrot.slane %v10838_v6, 4  ;;  %v10583_v33 = vadd.f32 %v18551_v29, %v10124_v53  ;;  %v7876_v28 = vpop.f32.mrb[153].mxu0  ;;  %v20081_v51 = vld [vmem:[#allocation124_spill] sm:$0xff]  ;;  %v10129_v56 = vpop.f32.mrb[43].mxu1 }
 0x4d1   : > { %v8420_v35 = vrot.slane %v8292_v47, 7  ;;  %v13762_v11 = vpack.c.bf16 %v8292_v47, %v8291_v10  ;;  %v11047_v23 = vrot.slane %v11046_v63, 1  ;;  %v11056_v38 = vadd.f32 %v11055_v15, %v10837_v12  ;;  %v7877_v10 = vpop.f32.mrb[154].mxu0  ;;  %v20082_v47 = vld [vmem:[#allocation123_spill] sm:$0xff] }
 0x4d2   : > { %v11053_v61 = vrot.slane %v11052_v32, 1  ;;  %v8165_v40 = vadd.f32 %v18651_v20, %v7874_v44  ;;  %v11062_v39 = vadd.f32 %v11061_v60, %v10838_v6  ;;  %v10711_v37 = vadd.f32 %v10583_v33, %v20081_v51  ;;  %v7879_v48 = vpop.f32.mrb[155].mxu0 }
 0x4d3   : > { %v14938_v14 = vpack.c.bf16 %v8420_v35, %v8419_v16  ;;  %v10584_v5 = vadd.f32 %v18551_v29, %v10127_v27  ;;  %10338 = vmatprep.mubr.bf16.mxu1 %v13762_v11  ;;  %v11048_v19 = vadd.f32 %v11047_v23, %v11046_v63  ;;  %v11057_v31 = vrot.slane %v11056_v38, 2 }
 0x4d4   : > { %v11054_v25 = vadd.f32 %v11053_v61, %v11052_v32  ;;  %v8293_v54 = vmax.f32 %v8165_v40, 0.0  ;;  %v11063_v3 = vrot.slane %v11062_v39, 2  ;;  %v10839_v12 = vmax.f32 %v10711_v37, 0.0 }
 0x4d5   : > { %v10712_v15 = vadd.f32 %v10584_v5, %v20082_v47  ;;  %v8166_v16 = vadd.f32 %v18651_v20, %v7877_v10  ;;  %14939 = vmatmul.mubr.msk.bf16.gmra.mrb[148].mxu1 %vm15828_vm1, %v14938_v14  ;;  %v11732_v29 = vmul.f32 0.125, %v11048_v19  ;;  %v11058_v53 = vadd.f32 %v11057_v31, %v11056_v38  ;;  %v10132_v61 = vpop.f32.mrb[44].mxu1 }
 0x4d6   : > { %v11733_v6 = vmul.f32 0.125, %v11054_v25  ;;  %v8421_v60 = vrot.slane %v8293_v54, 7  ;;  %v11064_v63 = vadd.f32 %v11063_v3, %v11062_v39  ;;  %v11067_v32 = vrot.slane %v10839_v12, 4  ;;  %v10134_v51 = vpop.f32.mrb[45].mxu1 }
 0x4d7   : > { %v10840_v35 = vmax.f32 %v10712_v15, 0.0  ;;  %v8294_v11 = vmax.f32 %v8166_v16, 0.0  ;;  %v11860_v33 = vpack.c.bf16 %v11732_v29, %v11732_v29  ;;  %v11059_v44 = vrot.slane %v11058_v53, 1  ;;  %v7882_v37 = vpop.f32.mrb[156].mxu0  ;;  %v10135_v10 = vpop.f32.mrb[46].mxu1 }
 0x4d8   : > { %v11861_v55 = vpack.c.bf16 %v11733_v6, %v11733_v6  ;;  %v11859_v23 = vpack.c.bf16 %v18776_v17, %v18776_v17  ;;  %v11065_v40 = vrot.slane %v11064_v63, 1  ;;  %v11068_v27 = vadd.f32 %v11067_v32, %v10839_v12  ;;  %v7884_v19 = vpop.f32.mrb[157].mxu0  ;;  %v10137_v47 = vpop.f32.mrb[47].mxu1 }
 0x4d9   : > { %v11073_v28 = vrot.slane %v10840_v35, 4  ;;  %v8422_v14 = vrot.slane %v8294_v11, 7  ;;  %v12139_v38 = vunpack.c.l.b16 %v11860_v33  ;;  %v11060_v56 = vadd.f32 %v11059_v44, %v11058_v53  ;;  %v7885_v15 = vpop.f32.mrb[158].mxu0 }
 0x4da   : > { %v12140_v5 = vunpack.c.l.b16 %v11861_v55  ;;  %v13763_v39 = vpack.c.bf16 %v8294_v11, %v8293_v54  ;;  %v11066_v25 = vadd.f32 %v11065_v40, %v11064_v63  ;;  %v11069_v31 = vrot.slane %v11068_v27, 2  ;;  %v7887_v6 = vpop.f32.mrb[159].mxu0 }
 0x4db   : > { %v11074_v48 = vadd.f32 %v11073_v28, %v10840_v35  ;;  %v14943_v3 = vpack.c.bf16 %v8422_v14, %v8421_v60  ;;  %v11734_v16 = vmul.f32 0.125, %v11060_v56  ;;  %v12138_v12 = vunpack.c.l.b16 %v11859_v23 }
 0x4dc   : > { %v12272_v17 = vsel %vm12251_vm2, %v12140_v5, %v12139_v38  ;;  %v12254_v29 = vsel %vm12253_vm3, %v18675_v9, %v18655_v36  ;;  %10346 = vmatprep.mubr.bf16.mxu1 %v13763_v39  ;;  %v11735_v53 = vmul.f32 0.125, %v11066_v25  ;;  %v11070_v54 = vadd.f32 %v11069_v31, %v11068_v27  ;;  %v18806_v36 = vld [vmem:[%s19538_s6 + $0x1] ss:$0 sm:$0xff] }
 0x4dd   : > { %v11075_v32 = vrot.slane %v11074_v48, 2  ;;  %v12256_v63 = vsel %vm12255_vm4, %v18677_v0, %v12254_v29  ;;  %14944 = vmatmul.mubr.msk.bf16.gmra.mrb[152].mxu1 %vm15828_vm1, %v14943_v3  ;;  %v11862_v60 = vpack.c.bf16 %v11734_v16, %v11734_v16  ;;  %v12267_v11 = vsel %vm12255_vm4, %v18751_v21, %v18749_v42  ;;  %v20083_v21 = vld [vmem:[#allocation126_spill] sm:$0xff]  ;;  %v10140_v27 = vpop.f32.mrb[48].mxu1 }
 0x4de   : > { %v12258_v35 = vsel %vm12257_vm5, %v18693_v30, %v12256_v63  ;;  %v10585_v9 = vadd.f32 %v18806_v36, %v10132_v61  ;;  %v11863_v33 = vpack.c.bf16 %v11735_v53, %v11735_v53  ;;  %v11071_v0 = vrot.slane %v11070_v54, 1  ;;  %v10142_v38 = vpop.f32.mrb[49].mxu1 }
 0x4df   : > { %v11076_v55 = vadd.f32 %v11075_v32, %v11074_v48  ;;  %v12260_v44 = vsel %vm12259_vm6, %v18695_v62, %v12258_v35  ;;  %v12141_v23 = vunpack.c.l.b16 %v11862_v60  ;;  %v12268_v42 = vsel %vm12257_vm5, %v18764_v58, %v12267_v11  ;;  %v7890_v5 = vpop.f32.mrb[160].mxu0  ;;  %v10143_v58 = vpop.f32.mrb[50].mxu1  ;;  %v20084_v35 = vld [vmem:[#allocation125_spill] sm:$0xff] }
 0x4e0   : > { %v12262_v30 = vsel %vm12261_vm7, %v18710_v24, %v12260_v44  ;;  %v10713_v40 = vadd.f32 %v10585_v9, %v20083_v21  ;;  %v12142_v28 = vunpack.c.l.b16 %v11863_v33  ;;  %v11072_v14 = vadd.f32 %v11071_v0, %v11070_v54  ;;  %v7892_v19 = vpop.f32.mrb[161].mxu0  ;;  %v20085_v44 = vld [vmem:[#allocation18_spill] sm:$0xff] }
 0x4e1   : > { %v11077_v51 = vrot.slane %v11076_v55, 1  ;;  %v12264_v61 = vsel %vm12263_vm8, %v18731_v49, %v12262_v30  ;;  %v12273_v62 = vsel %vm12253_vm3, %v12141_v23, %v12272_v17  ;;  %v12269_v56 = vsel %vm12259_vm6, %v18766_v22, %v12268_v42  ;;  %v10145_v49 = vpop.f32.mrb[51].mxu1  ;;  %v7893_v47 = vpop.f32.mrb[162].mxu0  ;;  %v20086_v19 = vld [vmem:[#allocation19_spill] sm:$0xff] }
 0x4e2   : > { %v10841_v24 = vmax.f32 %v10713_v40, 0.0  ;;  %v8167_v39 = vadd.f32 %v18651_v20, %v7882_v37  ;;  %v12274_v25 = vsel %vm12255_vm4, %v12142_v28, %v12273_v62  ;;  %v11736_v31 = vmul.f32 0.125, %v11072_v14  ;;  %v7895_v6 = vpop.f32.mrb[163].mxu0 }
 0x4e3   : > { %v11078_v48 = vadd.f32 %v11077_v51, %v11076_v55  ;;  %v12270_v3 = vsel %vm12261_vm7, %v18778_v52, %v12269_v56  ;;  %v10586_v22 = vadd.f32 %v18806_v36, %v10135_v10  ;;  %v8168_v32 = vadd.f32 %v18651_v20, %v7885_v15 }
 0x4e4   : > { %v12271_v16 = vsel %vm12263_vm8, %v12138_v12, %v12270_v3  ;;  %v11079_v17 = vrot.slane %v10841_v24, 4  ;;  %v8295_v29 = vmax.f32 %v8167_v39, 0.0  ;;  %v11864_v53 = vpack.c.bf16 %v11736_v31, %v11736_v31 }
 0x4e5   : > { %v11737_v37 = vmul.f32 0.125, %v11078_v48  ;;  %v12370_v54 = vpack.c.b16 %v12271_v16, %v12264_v61  ;;  %v10714_v11 = vadd.f32 %v10586_v22, %v20084_v35  ;;  %v10587_v52 = vadd.f32 %v18806_v36, %v10140_v27  ;;  %v10148_v42 = vpop.f32.mrb[52].mxu1 }
 0x4e6   : > { %v11080_v63 = vadd.f32 %v11079_v17, %v10841_v24  ;;  %v8423_v60 = vrot.slane %v8295_v29, 7  ;;  %v12143_v9 = vunpack.c.l.b16 %v11864_v53  ;;  %v8296_v12 = vmax.f32 %v8168_v32, 0.0  ;;  %v10150_v14 = vpop.f32.mrb[53].mxu1 }
 0x4e7   : > { %v11865_v33 = vpack.c.bf16 %v11737_v37, %v11737_v37  ;;  %15102 = vmatprep.mubr.bf16.mxu0 %v12370_v54  ;;  %v8169_v0 = vadd.f32 %v18651_v20, %v7890_v5  ;;  %v10842_v10 = vmax.f32 %v10714_v11, 0.0  ;;  %v10715_v23 = vadd.f32 %v10587_v52, %v20085_v44  ;;  %v7898_v27 = vpop.f32.mrb[164].mxu0  ;;  %v10151_v56 = vpop.f32.mrb[54].mxu1  ;;  %v20087_v52 = vld [vmem:[#allocation20_spill] sm:$0xff] }
 0x4e8   : > { %v11081_v55 = vrot.slane %v11080_v63, 2  ;;  %v10588_v30 = vadd.f32 %v18806_v36, %v10143_v58  ;;  %v12275_v15 = vsel %vm12257_vm5, %v12143_v9, %v12274_v25  ;;  %v8424_v40 = vrot.slane %v8296_v12, 7  ;;  %v7900_v5 = vpop.f32.mrb[165].mxu0  ;;  %v10153_v25 = vpop.f32.mrb[55].mxu1 }
 0x4e9   : > { %v12144_v21 = vunpack.c.l.b16 %v11865_v33  ;;  %v13764_v28 = vpack.c.bf16 %v8296_v12, %v8295_v29  ;;  %v11085_v61 = vrot.slane %v10842_v10, 4  ;;  %v10843_v38 = vmax.f32 %v10715_v23, 0.0  ;;  %v7901_v48 = vpop.f32.mrb[166].mxu0  ;;  %v18847_v5 = vld [vmem:[%s19536_s4 + $0x1] ss:$0 sm:$0xff] }
 0x4ea   : > { %v11082_v51 = vadd.f32 %v11081_v55, %v11080_v63  ;;  %v8297_v62 = vmax.f32 %v8169_v0, 0.0  ;;  %v14948_v39 = vpack.c.bf16 %v8424_v40, %v8423_v60  ;;  %v10716_v31 = vadd.f32 %v10588_v30, %v20086_v19  ;;  %v7903_v29 = vpop.f32.mrb[167].mxu0 }
 0x4eb   : > { %v12276_v24 = vsel %vm12259_vm6, %v12144_v21, %v12275_v15  ;;  %10354 = vmatprep.mubr.bf16.mxu1 %v13764_v28  ;;  %v8170_v58 = vadd.f32 %v18651_v20, %v7893_v47  ;;  %v11086_v49 = vadd.f32 %v11085_v61, %v10842_v10  ;;  %v11091_v16 = vrot.slane %v10843_v38, 4 }
 0x4ec   : > { %v11083_v3 = vrot.slane %v11082_v51, 1  ;;  %v8425_v17 = vrot.slane %v8297_v62, 7  ;;  %v10844_v22 = vmax.f32 %v10716_v31, 0.0  ;;  %14949 = vmatmul.mubr.msk.bf16.gmra.mrb[156].mxu1 %vm15828_vm1, %v14948_v39  ;;  %v10589_v53 = vadd.f32 %v18806_v36, %v10148_v42  ;;  %v20088_v42 = vld [vmem:[#allocation21_spill] sm:$0xff] }
 0x4ed   : > { %v8298_v6 = vmax.f32 %v8170_v58, 0.0  ;;  %v8171_v37 = vadd.f32 %v18651_v20, %v7898_v27  ;;  %v11087_v32 = vrot.slane %v11086_v49, 2  ;;  %v11092_v63 = vadd.f32 %v11091_v16, %v10843_v38  ;;  %v10156_v10 = vpop.f32.mrb[56].mxu1 }
 0x4ee   : > { %v11084_v54 = vadd.f32 %v11083_v3, %v11082_v51  ;;  %v10590_v47 = vadd.f32 %v18806_v36, %v10151_v56  ;;  %v11097_v60 = vrot.slane %v10844_v22, 4  ;;  %v10717_v9 = vadd.f32 %v10589_v53, %v20087_v52  ;;  %v10158_v15 = vpop.f32.mrb[57].mxu1 }
 0x4ef   : > { %v8426_v35 = vrot.slane %v8298_v6, 7  ;;  %v13765_v11 = vpack.c.bf16 %v8298_v6, %v8297_v62  ;;  %v11088_v12 = vadd.f32 %v11087_v32, %v11086_v49  ;;  %v11093_v0 = vrot.slane %v11092_v63, 2  ;;  %v7906_v21 = vpop.f32.mrb[168].mxu0  ;;  %v10159_v51 = vpop.f32.mrb[58].mxu1 }
 0x4f0   : > { %v11738_v33 = vmul.f32 0.125, %v11084_v54  ;;  %v8299_v55 = vmax.f32 %v8171_v37, 0.0  ;;  %v11098_v44 = vadd.f32 %v11097_v60, %v10844_v22  ;;  %v10845_v30 = vmax.f32 %v10717_v9, 0.0  ;;  %v7908_v61 = vpop.f32.mrb[169].mxu0  ;;  %v10161_v19 = vpop.f32.mrb[59].mxu1 }
 0x4f1   : > { %v14953_v23 = vpack.c.bf16 %v8426_v35, %v8425_v17  ;;  %v10718_v20 = vadd.f32 %v10590_v47, %v20088_v42  ;;  %10362 = vmatprep.mubr.bf16.mxu1 %v13765_v11  ;;  %v11089_v28 = vrot.slane %v11088_v12, 1  ;;  %v11094_v14 = vadd.f32 %v11093_v0, %v11092_v63  ;;  %v7909_v31 = vpop.f32.mrb[170].mxu0 }
 0x4f2   : > { %v11866_v40 = vpack.c.bf16 %v11738_v33, %v11738_v33  ;;  %v8427_v27 = vrot.slane %v8299_v55, 7  ;;  %v11099_v38 = vrot.slane %v11098_v44, 2  ;;  %v11103_v62 = vrot.slane %v10845_v30, 4  ;;  %v7911_v16 = vpop.f32.mrb[171].mxu0 }
 0x4f3   : > { %v10846_v56 = vmax.f32 %v10718_v20, 0.0  ;;  %v8172_v39 = vadd.f32 %v18847_v5, %v7901_v48  ;;  %v11090_v25 = vadd.f32 %v11089_v28, %v11088_v12  ;;  %v11095_v3 = vrot.slane %v11094_v14, 1  ;;  %v20089_v48 = vld [vmem:[#allocation22_spill] sm:$0xff] }
 0x4f4   : > { %v12145_v58 = vunpack.c.l.b16 %v11866_v40  ;;  %v10591_v49 = vadd.f32 %v18806_v36, %v10156_v10  ;;  %v11100_v17 = vadd.f32 %v11099_v38, %v11098_v44  ;;  %v11104_v29 = vadd.f32 %v11103_v62, %v10845_v30  ;;  %14954 = vmatmul.mubr.msk.bf16.gmra.mrb[160].mxu1 %vm15828_vm1, %v14953_v23 }
 0x4f5   : > { %v11109_v22 = vrot.slane %v10846_v56, 4  ;;  %v8300_v6 = vmax.f32 %v8172_v39, 0.0  ;;  %v11739_v37 = vmul.f32 0.125, %v11090_v25  ;;  %v11096_v54 = vadd.f32 %v11095_v3, %v11094_v14  ;;  %v10164_v12 = vpop.f32.mrb[60].mxu1 }
 0x4f6   : > { %v12277_v53 = vsel %vm12261_vm7, %v12145_v58, %v12276_v24  ;;  %v10719_v32 = vadd.f32 %v10591_v49, %v20089_v48  ;;  %v11101_v63 = vrot.slane %v11100_v17, 1  ;;  %v11105_v47 = vrot.slane %v11104_v29, 2  ;;  %v10166_v23 = vpop.f32.mrb[61].mxu1 }
 0x4f7   : > { %v11110_v60 = vadd.f32 %v11109_v22, %v10846_v56  ;;  %v8428_v35 = vrot.slane %v8300_v6, 7  ;;  %v11867_v11 = vpack.c.bf16 %v11739_v37, %v11739_v37  ;;  %v11740_v52 = vmul.f32 0.125, %v11096_v54  ;;  %v7914_v42 = vpop.f32.mrb[172].mxu0  ;;  %v10167_v28 = vpop.f32.mrb[62].mxu1 }
 0x4f8   : > { %v13766_v9 = vpack.c.bf16 %v8300_v6, %v8299_v55  ;;  %v10847_v33 = vmax.f32 %v10719_v32, 0.0  ;;  %v11102_v0 = vadd.f32 %v11101_v63, %v11100_v17  ;;  %v11106_v10 = vadd.f32 %v11105_v47, %v11104_v29  ;;  %v7916_v14 = vpop.f32.mrb[173].mxu0  ;;  %v10169_v56 = vpop.f32.mrb[63].mxu1  ;;  %v20090_v17 = vld [vmem:[#allocation23_spill] sm:$0xff] }
 0x4f9   : > { %v11111_v44 = vrot.slane %v11110_v60, 2  ;;  %v14958_v30 = vpack.c.bf16 %v8428_v35, %v8427_v27  ;;  %v12146_v24 = vunpack.c.l.b16 %v11867_v11  ;;  %v11868_v20 = vpack.c.bf16 %v11740_v52, %v11740_v52  ;;  %v7917_v39 = vpop.f32.mrb[174].mxu0 }
 0x4fa   : > { %v11115_v15 = vrot.slane %v10847_v33, 4  ;;  %v8173_v40 = vadd.f32 %v18847_v5, %v7906_v21  ;;  %10370 = vmatprep.mubr.bf16.mxu1 %v13766_v9  ;;  %v11741_v61 = vmul.f32 0.125, %v11102_v0  ;;  %v11107_v38 = vrot.slane %v11106_v10, 1  ;;  %v7919_v3 = vpop.f32.mrb[175].mxu0 }
 0x4fb   : > { %v11112_v62 = vadd.f32 %v11111_v44, %v11110_v60  ;;  %v10592_v55 = vadd.f32 %v18806_v36, %v10159_v51  ;;  %v18858_v19 = vsel %vm12263_vm8, %v12146_v24, %v12277_v53  ;;  %v12147_v27 = vunpack.c.l.b16 %v11868_v20  ;;  %v20091_v60 = vld [vmem:[#allocation24_spill] sm:$0xff] }
 0x4fc   : > { %v11116_v58 = vadd.f32 %v11115_v15, %v10847_v33  ;;  %v8301_v25 = vmax.f32 %v8173_v40, 0.0  ;;  %v11869_v49 = vpack.c.bf16 %v11741_v61, %v11741_v61  ;;  %v11108_v16 = vadd.f32 %v11107_v38, %v11106_v10  ;;  %14959 = vmatmul.mubr.msk.bf16.gmra.mrb[164].mxu1 %vm15828_vm1, %v14958_v30 }
 0x4fd   : > { %v11113_v21 = vrot.slane %v11112_v62, 1  ;;  %v10720_v29 = vadd.f32 %v10592_v55, %v20090_v17  ;;  %v8174_v51 = vadd.f32 %v18847_v5, %v7909_v31  ;;  %v10593_v37 = vadd.f32 %v18806_v36, %v10164_v12  ;;  %v10172_v52 = vpop.f32.mrb[64].mxu1 }
 0x4fe   : > { %v11117_v22 = vrot.slane %v11116_v58, 2  ;;  %v8429_v6 = vrot.slane %v8301_v25, 7  ;;  %v12148_v53 = vunpack.c.l.b16 %v11869_v49  ;;  %v11742_v54 = vmul.f32 0.125, %v11108_v16  ;;  %v10174_v44 = vpop.f32.mrb[65].mxu1 }
 0x4ff   : > { %v11114_v48 = vadd.f32 %v11113_v21, %v11112_v62  ;;  %v10848_v32 = vmax.f32 %v10720_v29, 0.0  ;;  %v8302_v47 = vmax.f32 %v8174_v51, 0.0  ;;  %v10721_v35 = vadd.f32 %v10593_v37, %v20091_v60  ;;  %v7922_v31 = vpop.f32.mrb[176].mxu0  ;;  %v10175_v20 = vpop.f32.mrb[66].mxu1 }
 0x500   : > { %v11118_v63 = vadd.f32 %v11117_v22, %v11116_v58  ;;  %v8175_v11 = vadd.f32 %v18847_v5, %v7914_v42  ;;  %v12279_v9 = vsel %vm12251_vm2, %v12148_v53, %v12147_v27  ;;  %v11870_v33 = vpack.c.bf16 %v11742_v54, %v11742_v54  ;;  %v7924_v15 = vpop.f32.mrb[177].mxu0  ;;  %v10177_v62 = vpop.f32.mrb[67].mxu1  ;;  %v20092_v22 = vld [vmem:[#allocation25_spill] sm:$0xff] }
 0x501   : > { %v11743_v0 = vmul.f32 0.125, %v11114_v48  ;;  %v11121_v10 = vrot.slane %v10848_v32, 4  ;;  %v8430_v12 = vrot.slane %v8302_v47, 7  ;;  %v13767_v23 = vpack.c.bf16 %v8302_v47, %v8301_v25  ;;  %v7925_v42 = vpop.f32.mrb[178].mxu0 }
 0x502   : > { %v11119_v30 = vrot.slane %v11118_v63, 1  ;;  %v10849_v24 = vmax.f32 %v10721_v35, 0.0  ;;  %v12149_v40 = vunpack.c.l.b16 %v11870_v33  ;;  %v8303_v38 = vmax.f32 %v8175_v11, 0.0  ;;  %v7927_v3 = vpop.f32.mrb[179].mxu0  ;;  %v20093_v11 = vld [vmem:[#allocation26_spill] sm:$0xff] }
 0x503   : > { %v11871_v14 = vpack.c.bf16 %v11743_v0, %v11743_v0  ;;  %v11122_v61 = vadd.f32 %v11121_v10, %v10848_v32  ;;  %v14963_v56 = vpack.c.bf16 %v8430_v12, %v8429_v6  ;;  %v10594_v58 = vadd.f32 %v18806_v36, %v10167_v28  ;;  %10378 = vmatprep.mubr.bf16.mxu1 %v13767_v23 }
 0x504   : > { %v11120_v55 = vadd.f32 %v11119_v30, %v11118_v63  ;;  %v11127_v27 = vrot.slane %v10849_v24, 4  ;;  %v12280_v49 = vsel %vm12253_vm3, %v12149_v40, %v12279_v9  ;;  %v8431_v21 = vrot.slane %v8303_v38, 7 }
 0x505   : > { %v12150_v16 = vunpack.c.l.b16 %v11871_v14  ;;  %v11123_v25 = vrot.slane %v11122_v61, 2  ;;  %v10722_v51 = vadd.f32 %v10594_v58, %v20092_v22  ;;  %v8176_v37 = vadd.f32 %v18847_v5, %v7917_v39  ;;  %14964 = vmatmul.mubr.msk.bf16.gmra.mrb[168].mxu1 %vm15828_vm1, %v14963_v56  ;;  %v10180_v60 = vpop.f32.mrb[68].mxu1 }
 0x506   : > { %v11744_v17 = vmul.f32 0.125, %v11120_v55  ;;  %v11128_v29 = vadd.f32 %v11127_v27, %v10849_v24  ;;  %v10595_v28 = vadd.f32 %v18806_v36, %v10172_v52  ;;  %v8177_v54 = vadd.f32 %v18847_v5, %v7922_v31  ;;  %v10182_v0 = vpop.f32.mrb[69].mxu1 }
 0x507   : > { %v12281_v6 = vsel %vm12255_vm4, %v12150_v16, %v12280_v49  ;;  %v11124_v53 = vadd.f32 %v11123_v25, %v11122_v61  ;;  %v10850_v63 = vmax.f32 %v10722_v51, 0.0  ;;  %v8304_v47 = vmax.f32 %v8176_v37, 0.0  ;;  %v7930_v10 = vpop.f32.mrb[180].mxu0  ;;  %v10183_v52 = vpop.f32.mrb[70].mxu1  ;;  %v20094_v16 = vld [vmem:[#allocation27_spill] sm:$0xff] }
 0x508   : > { %v11872_v48 = vpack.c.bf16 %v11744_v17, %v11744_v17  ;;  %v11129_v32 = vrot.slane %v11128_v29, 2  ;;  %v10723_v9 = vadd.f32 %v10595_v28, %v20093_v11  ;;  %v8305_v33 = vmax.f32 %v8177_v54, 0.0  ;;  %v7932_v24 = vpop.f32.mrb[181].mxu0  ;;  %v10185_v61 = vpop.f32.mrb[71].mxu1 }
 0x509   : > { %v11125_v35 = vrot.slane %v11124_v53, 1  ;;  %v10596_v39 = vadd.f32 %v18806_v36, %v10175_v20  ;;  %v11133_v12 = vrot.slane %v10850_v63, 4  ;;  %v8432_v23 = vrot.slane %v8304_v47, 7  ;;  %v7933_v62 = vpop.f32.mrb[182].mxu0 }
 0x50a   : > { %v12151_v44 = vunpack.c.l.b16 %v11872_v48  ;;  %v11130_v30 = vadd.f32 %v11129_v32, %v11128_v29  ;;  %v13768_v15 = vpack.c.bf16 %v8304_v47, %v8303_v38  ;;  %v10851_v40 = vmax.f32 %v10723_v9, 0.0  ;;  %v7935_v20 = vpop.f32.mrb[183].mxu0  ;;  %v20095_v48 = vld [vmem:[#allocation28_spill] sm:$0xff] }
 0x50b   : > { %v11126_v31 = vadd.f32 %v11125_v35, %v11124_v53  ;;  %v8433_v14 = vrot.slane %v8305_v33, 7  ;;  %v11134_v27 = vadd.f32 %v11133_v12, %v10850_v63  ;;  %v14968_v58 = vpack.c.bf16 %v8432_v23, %v8431_v21 }
 0x50c   : > { %v12282_v55 = vsel %vm12257_vm5, %v12151_v44, %v12281_v6  ;;  %v11131_v56 = vrot.slane %v11130_v30, 1  ;;  %v11139_v49 = vrot.slane %v10851_v40, 4  ;;  %v10724_v25 = vadd.f32 %v10596_v39, %v20094_v16  ;;  %10386 = vmatprep.mubr.bf16.mxu1 %v13768_v15 }
 0x50d   : > { %v11745_v3 = vmul.f32 0.125, %v11126_v31  ;;  %v8178_v17 = vadd.f32 %v18847_v5, %v7925_v42  ;;  %v11135_v22 = vrot.slane %v11134_v27, 2  ;;  %14969 = vmatmul.mubr.msk.bf16.gmra.mrb[172].mxu1 %vm15828_vm1, %v14968_v58  ;;  %v10597_v38 = vadd.f32 %v18806_v36, %v10180_v60  ;;  %v10188_v47 = vpop.f32.mrb[72].mxu1 }
 0x50e   : > { %v11132_v29 = vadd.f32 %v11131_v56, %v11130_v30  ;;  %v8179_v51 = vadd.f32 %v18847_v5, %v7930_v10  ;;  %v11140_v6 = vadd.f32 %v11139_v49, %v10851_v40  ;;  %v10852_v21 = vmax.f32 %v10724_v25, 0.0  ;;  %v10190_v39 = vpop.f32.mrb[73].mxu1 }
 0x50f   : > { %v11873_v37 = vpack.c.bf16 %v11745_v3, %v11745_v3  ;;  %v8306_v53 = vmax.f32 %v8178_v17, 0.0  ;;  %v11136_v54 = vadd.f32 %v11135_v22, %v11134_v27  ;;  %v10725_v32 = vadd.f32 %v10597_v38, %v20095_v48  ;;  %v7938_v0 = vpop.f32.mrb[184].mxu0  ;;  %v18887_v12 = vpop.f32.mrb[74].mxu1 }
 0x510   : > { %v11746_v28 = vmul.f32 0.125, %v11132_v29  ;;  %v8307_v63 = vmax.f32 %v8179_v51, 0.0  ;;  %v11141_v35 = vrot.slane %v11140_v6, 2  ;;  %v11145_v11 = vrot.slane %v10852_v21, 4  ;;  %v7940_v23 = vpop.f32.mrb[185].mxu0  ;;  %v10193_v61 = vpop.f32.mrb[75].mxu1 }
 0x511   : > { %v12152_v42 = vunpack.c.l.b16 %v11873_v37  ;;  %v8434_v9 = vrot.slane %v8306_v53, 7  ;;  %v11137_v60 = vrot.slane %v11136_v54, 1  ;;  %v13769_v30 = vpack.c.bf16 %v8306_v53, %v8305_v33  ;;  %v7941_v56 = vpop.f32.mrb[186].mxu0  ;;  %v20096_v37 = vld [vmem:[#allocation29_spill] sm:$0xff] }
 0x512   : > { %v11874_v44 = vpack.c.bf16 %v11746_v28, %v11746_v28  ;;  %v10853_v10 = vmax.f32 %v10725_v32, 0.0  ;;  %v11142_v31 = vadd.f32 %v11141_v35, %v11140_v6  ;;  %v11146_v15 = vadd.f32 %v11145_v11, %v10852_v21  ;;  %v7943_v49 = vpop.f32.mrb[187].mxu0 }
 0x513   : > { %v12283_v24 = vsel %vm12259_vm6, %v12152_v42, %v12282_v55  ;;  %v14973_v40 = vpack.c.bf16 %v8434_v9, %v8433_v14  ;;  %v11138_v58 = vadd.f32 %v11137_v60, %v11136_v54  ;;  %v8435_v3 = vrot.slane %v8307_v63, 7  ;;  %10394 = vmatprep.mubr.bf16.mxu1 %v13769_v30  ;;  %v20097_v54 = vld [vmem:[#allocation30_spill] sm:$0xff] }
 0x514   : > { %v12153_v27 = vunpack.c.l.b16 %v11874_v44  ;;  %v11151_v20 = vrot.slane %v10853_v10, 4  ;;  %v11143_v16 = vrot.slane %v11142_v31, 1  ;;  %v11147_v25 = vrot.slane %v11146_v15, 2 }
 0x515   : > { %v10598_v33 = vadd.f32 %v18806_v36, %v10183_v52  ;;  %v8180_v17 = vadd.f32 %v18847_v5, %v7933_v62  ;;  %v11747_v55 = vmul.f32 0.125, %v11138_v58  ;;  %14974 = vmatmul.mubr.msk.bf16.gmra.mrb[176].mxu1 %vm15828_vm1, %v14973_v40  ;;  %v10599_v14 = vadd.f32 %v18806_v36, %v10188_v47  ;;  %v10196_v48 = vpop.f32.mrb[76].mxu1 }
 0x516   : > { %v12284_v29 = vsel %vm12261_vm7, %v12153_v27, %v12283_v24  ;;  %v11152_v22 = vadd.f32 %v11151_v20, %v10853_v10  ;;  %v11144_v38 = vadd.f32 %v11143_v16, %v11142_v31  ;;  %v11148_v51 = vadd.f32 %v11147_v25, %v11146_v15  ;;  %v10198_v9 = vpop.f32.mrb[77].mxu1 }
 0x517   : > { %v10726_v6 = vadd.f32 %v10598_v33, %v20096_v37  ;;  %v8308_v21 = vmax.f32 %v8180_v17, 0.0  ;;  %v11875_v53 = vpack.c.bf16 %v11747_v55, %v11747_v55  ;;  %v10727_v52 = vadd.f32 %v10599_v14, %v20097_v54  ;;  %v7946_v39 = vpop.f32.mrb[188].mxu0  ;;  %v10199_v10 = vpop.f32.mrb[78].mxu1 }
 0x518   : > { %v11153_v28 = vrot.slane %v11152_v22, 2  ;;  %v8181_v62 = vadd.f32 %v18847_v5, %v7938_v0  ;;  %v11748_v32 = vmul.f32 0.125, %v11144_v38  ;;  %v11149_v42 = vrot.slane %v11148_v51, 1  ;;  %v7948_v23 = vpop.f32.mrb[189].mxu0  ;;  %v10201_v61 = vpop.f32.mrb[79].mxu1 }
 0x519   : > { %v10854_v35 = vmax.f32 %v10726_v6, 0.0  ;;  %v8436_v11 = vrot.slane %v8308_v21, 7  ;;  %v12154_v44 = vunpack.c.l.b16 %v11875_v53  ;;  %v13770_v60 = vpack.c.bf16 %v8308_v21, %v8307_v63  ;;  %v7949_v27 = vpop.f32.mrb[190].mxu0  ;;  %v20098_v21 = vld [vmem:[#allocation31_spill] sm:$0xff] }
 0x51a   : > { %v11154_v47 = vadd.f32 %v11153_v28, %v11152_v22  ;;  %v10855_v30 = vmax.f32 %v10727_v52, 0.0  ;;  %v11876_v24 = vpack.c.bf16 %v11748_v32, %v11748_v32  ;;  %v11150_v31 = vadd.f32 %v11149_v42, %v11148_v51  ;;  %v7951_v16 = vpop.f32.mrb[191].mxu0  ;;  %v20099_v32 = vld [vmem:[#allocation32_spill] sm:$0xff] }
 0x51b   : > { %v11157_v15 = vrot.slane %v10854_v35, 4  ;;  %v14978_v40 = vpack.c.bf16 %v8436_v11, %v8435_v3  ;;  %v12285_v0 = vsel %vm12263_vm8, %v12154_v44, %v12284_v29  ;;  %v8309_v49 = vmax.f32 %v8181_v62, 0.0  ;;  %10402 = vmatprep.mubr.bf16.mxu1 %v13770_v60 }
 0x51c   : > { %v11155_v58 = vrot.slane %v11154_v47, 1  ;;  %v11163_v20 = vrot.slane %v10855_v30, 4  ;;  %v12371_v25 = vpack.c.b16 %v12285_v0, %v18858_v19  ;;  %v12155_v33 = vunpack.c.l.b16 %v11876_v24 }
 0x51d   : > { %v11749_v63 = vmul.f32 0.125, %v11150_v31  ;;  %v11158_v17 = vadd.f32 %v11157_v15, %v10854_v35  ;;  %v8437_v14 = vrot.slane %v8309_v49, 7  ;;  %v10600_v3 = vadd.f32 %v18806_v36, %v18887_v12  ;;  %14979 = vmatmul.mubr.msk.bf16.gmra.mrb[180].mxu1 %vm15828_vm1, %v14978_v40  ;;  %v10204_v54 = vpop.f32.mrb[80].mxu1 }
 0x51e   : > { %v11156_v55 = vadd.f32 %v11155_v58, %v11154_v47  ;;  %v11164_v22 = vadd.f32 %v11163_v20, %v10855_v30  ;;  %v8182_v51 = vadd.f32 %v18847_v5, %v7941_v56  ;;  %15103 = vmatmul.mubr.bf16.vlgmr.msra.gmra.mrb[0].mxu0 %v12371_v25  ;;  %v10601_v37 = vadd.f32 %v18806_v36, %v10196_v48  ;;  %v10206_v35 = vpop.f32.mrb[81].mxu1 }
 0x51f   : > { %v11877_v29 = vpack.c.bf16 %v11749_v63, %v11749_v63  ;;  %v11159_v38 = vrot.slane %v11158_v17, 2  ;;  %v10728_v53 = vadd.f32 %v10600_v3, %v20098_v21  ;;  %v8183_v28 = vadd.f32 %v18847_v5, %v7946_v39  ;;  %v7954_v11 = vpop.f32.mrb[192].mxu0  ;;  %v10207_v60 = vpop.f32.mrb[82].mxu1 }
 0x520   : > { %v11750_v19 = vmul.f32 0.125, %v11156_v55  ;;  %v11165_v6 = vrot.slane %v11164_v22, 2  ;;  %v8310_v12 = vmax.f32 %v8182_v51, 0.0  ;;  %v10729_v42 = vadd.f32 %v10601_v37, %v20099_v32  ;;  %v7956_v48 = vpop.f32.mrb[193].mxu0  ;;  %v10209_v39 = vpop.f32.mrb[83].mxu1 }
 0x521   : > { %v12156_v52 = vunpack.c.l.b16 %v11877_v29  ;;  %v11160_v62 = vadd.f32 %v11159_v38, %v11158_v17  ;;  %v10856_v56 = vmax.f32 %v10728_v53, 0.0  ;;  %v8311_v47 = vmax.f32 %v8183_v28, 0.0  ;;  %v7957_v15 = vpop.f32.mrb[194].mxu0  ;;  %v20100_v29 = vld [vmem:[#allocation33_spill] sm:$0xff] }
 0x522   : > { %v11878_v9 = vpack.c.bf16 %v11750_v19, %v11750_v19  ;;  %v11166_v44 = vadd.f32 %v11165_v6, %v11164_v22  ;;  %v8438_v24 = vrot.slane %v8310_v12, 7  ;;  %v13771_v31 = vpack.c.bf16 %v8310_v12, %v8309_v49  ;;  %v7959_v20 = vpop.f32.mrb[195].mxu0 }
 0x523   : > { %v12286_v30 = vsel %vm12251_vm2, %v12156_v52, %v12155_v33  ;;  %v11161_v23 = vrot.slane %v11160_v62, 1  ;;  %v11169_v0 = vrot.slane %v10856_v56, 4  ;;  %v10857_v58 = vmax.f32 %v10729_v42, 0.0 }
 0x524   : > { %v12157_v40 = vunpack.c.l.b16 %v11878_v9  ;;  %v11167_v61 = vrot.slane %v11166_v44, 1  ;;  %v14983_v25 = vpack.c.bf16 %v8438_v24, %v8437_v14  ;;  %v8439_v63 = vrot.slane %v8311_v47, 7  ;;  %10410 = vmatprep.mubr.bf16.mxu1 %v13771_v31 }
 0x525   : > { %v11162_v16 = vadd.f32 %v11161_v23, %v11160_v62  ;;  %v10602_v17 = vadd.f32 %v18806_v36, %v10199_v10  ;;  %v11170_v22 = vadd.f32 %v11169_v0, %v10856_v56  ;;  %v11175_v3 = vrot.slane %v10857_v58, 4  ;;  %v10212_v21 = vpop.f32.mrb[84].mxu1  ;;  %v20101_v62 = vld [vmem:[#allocation34_spill] sm:$0xff] }
 0x526   : > { %v18913_v55 = vsel %vm12253_vm3, %v12157_v40, %v12286_v30  ;;  %v11168_v33 = vadd.f32 %v11167_v61, %v11166_v44  ;;  %v8184_v51 = vadd.f32 %v18847_v5, %v7949_v27  ;;  %14984 = vmatmul.mubr.msk.bf16.gmra.mrb[184].mxu1 %vm15828_vm1, %v14983_v25  ;;  %v10603_v14 = vadd.f32 %v18806_v36, %v10204_v54  ;;  %v10214_v32 = vpop.f32.mrb[85].mxu1 }
 0x527   : > { %v11751_v49 = vmul.f32 0.125, %v11162_v16  ;;  %v10730_v38 = vadd.f32 %v10602_v17, %v20100_v29  ;;  %v11171_v19 = vrot.slane %v11170_v22, 2  ;;  %v11176_v10 = vadd.f32 %v11175_v3, %v10857_v58  ;;  %v7962_v42 = vpop.f32.mrb[196].mxu0  ;;  %v10215_v56 = vpop.f32.mrb[86].mxu1  ;;  %v20102_v29 = vld [vmem:[#allocation35_spill] sm:$0xff] }
 0x528   : > { %v11752_v37 = vmul.f32 0.125, %v11168_v33  ;;  %v8185_v6 = vadd.f32 %v18847_v5, %v7954_v11  ;;  %v8312_v52 = vmax.f32 %v8184_v51, 0.0  ;;  %v10731_v12 = vadd.f32 %v10603_v14, %v20101_v62  ;;  %v7964_v48 = vpop.f32.mrb[197].mxu0  ;;  %v10217_v11 = vpop.f32.mrb[87].mxu1 }
 0x529   : > { %v11879_v53 = vpack.c.bf16 %v11751_v49, %v11751_v49  ;;  %v10858_v28 = vmax.f32 %v10730_v38, 0.0  ;;  %v11172_v27 = vadd.f32 %v11171_v19, %v11170_v22  ;;  %v11177_v9 = vrot.slane %v11176_v10, 2  ;;  %v7965_v31 = vpop.f32.mrb[198].mxu0 }
 0x52a   : > { %v11880_v35 = vpack.c.bf16 %v11752_v37, %v11752_v37  ;;  %v8313_v44 = vmax.f32 %v8185_v6, 0.0  ;;  %v8440_v23 = vrot.slane %v8312_v52, 7  ;;  %v13772_v24 = vpack.c.bf16 %v8312_v52, %v8311_v47  ;;  %v7967_v58 = vpop.f32.mrb[199].mxu0 }
 0x52b   : > { %v18922_v54 = vunpack.c.l.b16 %v11879_v53  ;;  %v11181_v30 = vrot.slane %v10858_v28, 4  ;;  %v11173_v40 = vrot.slane %v11172_v27, 1  ;;  %v11178_v61 = vadd.f32 %v11177_v9, %v11176_v10 }
 0x52c   : > { %v18924_v39 = vunpack.c.l.b16 %v11880_v35  ;;  %v10859_v0 = vmax.f32 %v10731_v12, 0.0  ;;  %v14988_v16 = vpack.c.bf16 %v8440_v23, %v8439_v63  ;;  %v8441_v25 = vrot.slane %v8313_v44, 7  ;;  %10418 = vmatprep.mubr.bf16.mxu1 %v13772_v24 }
 0x52d   : > { %v11182_v20 = vadd.f32 %v11181_v30, %v10858_v28  ;;  %v10604_v17 = vadd.f32 %v18806_v36, %v10207_v60  ;;  %v11174_v33 = vadd.f32 %v11173_v40, %v11172_v27  ;;  %v11179_v22 = vrot.slane %v11178_v61, 1  ;;  %v10220_v10 = vpop.f32.mrb[88].mxu1  ;;  %v20103_v28 = vld [vmem:[#allocation36_spill] sm:$0xff] }
 0x52e   : > { %v11187_v3 = vrot.slane %v10859_v0, 4  ;;  %v8186_v49 = vadd.f32 %v18847_v5, %v7957_v15  ;;  %14989 = vmatmul.mubr.msk.bf16.gmra.mrb[188].mxu1 %vm15828_vm1, %v14988_v16  ;;  %v10605_v51 = vadd.f32 %v18806_v36, %v10212_v21  ;;  %v8187_v14 = vadd.f32 %v18847_v5, %v7962_v42  ;;  %v10222_v62 = vpop.f32.mrb[89].mxu1 }
 0x52f   : > { %v11183_v47 = vrot.slane %v11182_v20, 2  ;;  %v10732_v38 = vadd.f32 %v10604_v17, %v20102_v29  ;;  %v11753_v63 = vmul.f32 0.125, %v11174_v33  ;;  %v11180_v37 = vadd.f32 %v11179_v22, %v11178_v61  ;;  %v7970_v12 = vpop.f32.mrb[200].mxu0  ;;  %v10223_v48 = vpop.f32.mrb[90].mxu1 }
 0x530   : > { %v11188_v19 = vadd.f32 %v11187_v3, %v10859_v0  ;;  %v8314_v60 = vmax.f32 %v8186_v49, 0.0  ;;  %v10733_v52 = vadd.f32 %v10605_v51, %v20103_v28  ;;  %v8315_v15 = vmax.f32 %v8187_v14, 0.0  ;;  %v7972_v21 = vpop.f32.mrb[201].mxu0  ;;  %v10225_v11 = vpop.f32.mrb[91].mxu1 }
 0x531   : > { %v11184_v6 = vadd.f32 %v11183_v47, %v11182_v20  ;;  %v10860_v53 = vmax.f32 %v10732_v38, 0.0  ;;  %v11881_v32 = vpack.c.bf16 %v11753_v63, %v11753_v63  ;;  %v11754_v35 = vmul.f32 0.125, %v11180_v37  ;;  %v7973_v40 = vpop.f32.mrb[202].mxu0  ;;  %v20104_v37 = vld [vmem:[#allocation37_spill] sm:$0xff] }
 0x532   : > { %v11189_v27 = vrot.slane %v11188_v19, 2  ;;  %v8442_v9 = vrot.slane %v8314_v60, 7  ;;  %v13773_v23 = vpack.c.bf16 %v8314_v60, %v8313_v44  ;;  %v10861_v24 = vmax.f32 %v10733_v52, 0.0  ;;  %v7975_v16 = vpop.f32.mrb[203].mxu0  ;;  %v20105_v52 = vld [vmem:[#allocation38_spill] sm:$0xff] }
 0x533   : > { %v11185_v30 = vrot.slane %v11184_v6, 1  ;;  %v11193_v42 = vrot.slane %v10860_v53, 4  ;;  %v18934_v61 = vunpack.c.l.b16 %v11881_v32  ;;  %v11882_v0 = vpack.c.bf16 %v11754_v35, %v11754_v35 }
 0x534   : > { %v11190_v58 = vadd.f32 %v11189_v27, %v11188_v19  ;;  %v14993_v20 = vpack.c.bf16 %v8442_v9, %v8441_v25  ;;  %v11199_v22 = vrot.slane %v10861_v24, 4  ;;  %v8443_v3 = vrot.slane %v8315_v15, 7  ;;  %10426 = vmatprep.mubr.bf16.mxu1 %v13773_v23 }
 0x535   : > { %v11186_v17 = vadd.f32 %v11185_v30, %v11184_v6  ;;  %v11194_v33 = vadd.f32 %v11193_v42, %v10860_v53  ;;  %v18936_v49 = vunpack.c.l.b16 %v11882_v0  ;;  %v10606_v29 = vadd.f32 %v18806_v36, %v10215_v56  ;;  %v10228_v53 = vpop.f32.mrb[92].mxu1 }
 0x536   : > { %v11191_v47 = vrot.slane %v11190_v58, 1  ;;  %v8188_v44 = vadd.f32 %v18847_v5, %v7965_v31  ;;  %v11200_v14 = vadd.f32 %v11199_v22, %v10861_v24  ;;  %14994 = vmatmul.mubr.msk.bf16.gmra.mrb[192].mxu1 %vm15828_vm1, %v14993_v20  ;;  %v10607_v25 = vadd.f32 %v18806_v36, %v10220_v10  ;;  %v10230_v32 = vpop.f32.mrb[93].mxu1 }
 0x537   : > { %v18940_v38 = vmul.f32 0.125, %v11186_v17  ;;  %v11195_v51 = vrot.slane %v11194_v33, 2  ;;  %v10734_v19 = vadd.f32 %v10606_v29, %v20104_v37  ;;  %v8189_v6 = vadd.f32 %v18847_v5, %v7970_v12  ;;  %v7978_v35 = vpop.f32.mrb[204].mxu0  ;;  %v18949_v10 = vpop.f32.mrb[94].mxu1 }
 0x538   : > { %v11192_v63 = vadd.f32 %v11191_v47, %v11190_v58  ;;  %v8316_v60 = vmax.f32 %v8188_v44, 0.0  ;;  %v11201_v56 = vrot.slane %v11200_v14, 2  ;;  %v10735_v31 = vadd.f32 %v10607_v25, %v20105_v52  ;;  %v7980_v42 = vpop.f32.mrb[205].mxu0  ;;  %v10233_v0 = vpop.f32.mrb[95].mxu1 }
 0x539   : > { %v11196_v28 = vadd.f32 %v11195_v51, %v11194_v33  ;;  %v10608_v62 = vadd.f32 %v18806_v36, %v10223_v48  ;;  %v10862_v9 = vmax.f32 %v10734_v19, 0.0  ;;  %v8317_v12 = vmax.f32 %v8189_v6, 0.0  ;;  %v7981_v58 = vpop.f32.mrb[206].mxu0  ;;  %v20106_v33 = vld [vmem:[#allocation39_spill] sm:$0xff] }
 0x53a   : > { %v11756_v27 = vmul.f32 0.125, %v11192_v63  ;;  %v8444_v21 = vrot.slane %v8316_v60, 7  ;;  %v13774_v30 = vpack.c.bf16 %v8316_v60, %v8315_v15  ;;  %v11202_v24 = vadd.f32 %v11201_v56, %v11200_v14  ;;  %v7983_v22 = vpop.f32.mrb[207].mxu0 }
 0x53b   : > { %v11197_v23 = vrot.slane %v11196_v28, 1  ;;  %v10863_v11 = vmax.f32 %v10735_v31, 0.0  ;;  %v11205_v16 = vrot.slane %v10862_v9, 4  ;;  %v10736_v48 = vadd.f32 %v10608_v62, %v20106_v33 }
 0x53c   : > { %v11884_v20 = vpack.c.bf16 %v11756_v27, %v11756_v27  ;;  %v14998_v17 = vpack.c.bf16 %v8444_v21, %v8443_v3  ;;  %10434 = vmatprep.mubr.bf16.mxu1 %v13774_v30  ;;  %v11203_v29 = vrot.slane %v11202_v24, 1  ;;  %v8445_v15 = vrot.slane %v8317_v12, 7 }
 0x53d   : > { %v11198_v47 = vadd.f32 %v11197_v23, %v11196_v28  ;;  %v11211_v44 = vrot.slane %v10863_v11, 4  ;;  %v11206_v25 = vadd.f32 %v11205_v16, %v10862_v9  ;;  %v10864_v63 = vmax.f32 %v10736_v48, 0.0  ;;  %v10236_v31 = vpop.f32.mrb[96].mxu1  ;;  %v20107_v9 = vld [vmem:[#allocation40_spill] sm:$0xff] }
 0x53e   : > { %v12163_v51 = vunpack.c.l.b16 %v11884_v20  ;;  %v8190_v14 = vadd.f32 %v18847_v5, %v7973_v40  ;;  %v11204_v19 = vadd.f32 %v11203_v29, %v11202_v24  ;;  %14999 = vmatmul.mubr.msk.bf16.gmra.mrb[196].mxu1 %vm15828_vm1, %v14998_v17  ;;  %v10609_v3 = vadd.f32 %v18806_v36, %v10228_v53  ;;  %v10238_v40 = vpop.f32.mrb[97].mxu1 }
 0x53f   : > { %v11757_v37 = vmul.f32 0.125, %v11198_v47  ;;  %v11212_v60 = vadd.f32 %v11211_v44, %v10863_v11  ;;  %v11207_v6 = vrot.slane %v11206_v25, 2  ;;  %v11217_v56 = vrot.slane %v10864_v63, 4  ;;  %v7986_v30 = vpop.f32.mrb[208].mxu0  ;;  %v18958_v0 = vpop.f32.mrb[98].mxu1 }
 0x540   : > { %v8318_v52 = vmax.f32 %v8190_v14, 0.0  ;;  %v8191_v28 = vadd.f32 %v18847_v5, %v7978_v35  ;;  %v11758_v32 = vmul.f32 0.125, %v11204_v19  ;;  %v10737_v21 = vadd.f32 %v10609_v3, %v20107_v9  ;;  %v7988_v36 = vpop.f32.mrb[209].mxu0  ;;  %v10241_v35 = vpop.f32.mrb[99].mxu1 }
 0x541   : > { %v11885_v62 = vpack.c.bf16 %v11757_v37, %v11757_v37  ;;  %v11213_v27 = vrot.slane %v11212_v60, 2  ;;  %v11208_v42 = vadd.f32 %v11207_v6, %v11206_v25  ;;  %v11218_v23 = vadd.f32 %v11217_v56, %v10864_v63  ;;  %v7989_v33 = vpop.f32.mrb[210].mxu0 }
 0x542   : > { %v8446_v24 = vrot.slane %v8318_v52, 7  ;;  %v13775_v11 = vpack.c.bf16 %v8318_v52, %v8317_v12  ;;  %v11886_v20 = vpack.c.bf16 %v11758_v32, %v11758_v32  ;;  %v10865_v17 = vmax.f32 %v10737_v21, 0.0  ;;  %v7991_v44 = vpop.f32.mrb[211].mxu0  ;;  %v20108_v32 = vld [vmem:[#allocation41_spill] sm:$0xff] }
 0x543   : > { %v12164_v53 = vunpack.c.l.b16 %v11885_v62  ;;  %v11214_v16 = vadd.f32 %v11213_v27, %v11212_v60  ;;  %v11209_v48 = vrot.slane %v11208_v42, 1  ;;  %v11219_v22 = vrot.slane %v11218_v23, 2  ;;  %v18964_v60 = vld [vmem:[%s19538_s6 + $0x1] ss:$0 sm:$0xff] }
 0x544   : > { %v15003_v47 = vpack.c.bf16 %v8446_v24, %v8445_v15  ;;  %v8319_v29 = vmax.f32 %v8191_v28, 0.0  ;;  %10442 = vmatprep.mubr.bf16.mxu1 %v13775_v11  ;;  %v12165_v63 = vunpack.c.l.b16 %v11886_v20  ;;  %v11223_v12 = vrot.slane %v10865_v17, 4  ;;  %v20109_v20 = vld [vmem:[#allocation42_spill] sm:$0xff] }
 0x545   : > { %v12293_v25 = vsel %vm12251_vm2, %v12164_v53, %v12163_v51  ;;  %v11215_v14 = vrot.slane %v11214_v16, 1  ;;  %v11210_v37 = vadd.f32 %v11209_v48, %v11208_v42  ;;  %v11220_v19 = vadd.f32 %v11219_v22, %v11218_v23  ;;  %v10244_v21 = vpop.f32.mrb[100].mxu1 }
 0x546   : > { %v8447_v3 = vrot.slane %v8319_v29, 7  ;;  %v10610_v6 = vadd.f32 %v18964_v60, %v18949_v10  ;;  %v18969_v15 = vsel %vm12253_vm3, %v12165_v63, %v12293_v25  ;;  %v11224_v52 = vadd.f32 %v11223_v12, %v10865_v17  ;;  %15004 = vmatmul.mubr.msk.bf16.gmra.mrb[200].mxu1 %vm15828_vm1, %v15003_v47  ;;  %v10246_v24 = vpop.f32.mrb[101].mxu1 }
 0x547   : > { %v11216_v56 = vadd.f32 %v11215_v14, %v11214_v16  ;;  %v8192_v51 = vadd.f32 %v18847_v5, %v7981_v58  ;;  %v11759_v28 = vmul.f32 0.125, %v11210_v37  ;;  %v11221_v62 = vrot.slane %v11220_v19, 1  ;;  %v7994_v11 = vpop.f32.mrb[212].mxu0  ;;  %v10247_v17 = vpop.f32.mrb[102].mxu1 }
 0x548   : > { %v10738_v27 = vadd.f32 %v10610_v6, %v20108_v32  ;;  %v10611_v9 = vadd.f32 %v18964_v60, %v10236_v31  ;;  %v11225_v42 = vrot.slane %v11224_v52, 2  ;;  %v8193_v23 = vadd.f32 %v18847_v5, %v7986_v30  ;;  %v7996_v35 = vpop.f32.mrb[213].mxu0  ;;  %v10249_v31 = vpop.f32.mrb[103].mxu1 }
 0x549   : > { %v11760_v40 = vmul.f32 0.125, %v11216_v56  ;;  %v8320_v10 = vmax.f32 %v8192_v51, 0.0  ;;  %v11887_v36 = vpack.c.bf16 %v11759_v28, %v11759_v28  ;;  %v11222_v53 = vadd.f32 %v11221_v62, %v11220_v19  ;;  %v7997_v25 = vpop.f32.mrb[214].mxu0 }
 0x54a   : > { %v10866_v58 = vmax.f32 %v10738_v27, 0.0  ;;  %v10739_v16 = vadd.f32 %v10611_v9, %v20109_v20  ;;  %v11226_v22 = vadd.f32 %v11225_v42, %v11224_v52  ;;  %v7999_v37 = vpop.f32.mrb[215].mxu0  ;;  %v8321_v51 = vmax.f32 %v8193_v23, 0.0  ;;  %v20110_v23 = vld [vmem:[#allocation43_spill] sm:$0xff]  ;;  %v20111_v20 = vld [vmem:[#allocation44_spill] sm:$0xff] }
 0x54b   : > { %v11888_v48 = vpack.c.bf16 %v11760_v40, %v11760_v40  ;;  %v8448_v47 = vrot.slane %v8320_v10, 7  ;;  %v13776_v44 = vpack.c.bf16 %v8320_v10, %v8319_v29  ;;  %v18978_v63 = vunpack.c.l.b16 %v11887_v36 }
 0x54c   : > { %v11761_v14 = vmul.f32 0.125, %v11222_v53  ;;  %v11229_v12 = vrot.slane %v10866_v58, 4  ;;  %v10867_v30 = vmax.f32 %v10739_v16, 0.0  ;;  %v11227_v19 = vrot.slane %v11226_v22, 1 }
 0x54d   : > { %v18980_v6 = vunpack.c.l.b16 %v11888_v48  ;;  %v15008_v56 = vpack.c.bf16 %v8448_v47, %v8447_v3  ;;  %10450 = vmatprep.mubr.bf16.mxu1 %v13776_v44  ;;  %v10612_v29 = vadd.f32 %v18964_v60, %v18958_v0  ;;  %v8449_v27 = vrot.slane %v8321_v51, 7  ;;  %v10252_v36 = vpop.f32.mrb[104].mxu1 }
 0x54e   : > { %v11889_v28 = vpack.c.bf16 %v11761_v14, %v11761_v14  ;;  %v11230_v62 = vadd.f32 %v11229_v12, %v10866_v58  ;;  %v11235_v32 = vrot.slane %v10867_v30, 4  ;;  %v11228_v52 = vadd.f32 %v11227_v19, %v11226_v22  ;;  %v10254_v35 = vpop.f32.mrb[105].mxu1 }
 0x54f   : > { %v8194_v9 = vadd.f32 %v18847_v5, %v7989_v33  ;;  %15009 = vmatmul.mubr.msk.bf16.gmra.mrb[204].mxu1 %vm15828_vm1, %v15008_v56  ;;  %v10613_v40 = vadd.f32 %v18964_v60, %v10244_v21  ;;  %v10740_v24 = vadd.f32 %v10612_v29, %v20110_v23  ;;  %v8195_v16 = vadd.f32 %v18847_v5, %v7994_v11  ;;  %v8002_v33 = vpop.f32.mrb[216].mxu0  ;;  %v10255_v44 = vpop.f32.mrb[106].mxu1 }
 0x550   : > { %v18988_v42 = vunpack.c.l.b16 %v11889_v28  ;;  %v11231_v3 = vrot.slane %v11230_v62, 2  ;;  %v11236_v10 = vadd.f32 %v11235_v32, %v10867_v30  ;;  %v11762_v53 = vmul.f32 0.125, %v11228_v52  ;;  %v8004_v31 = vpop.f32.mrb[217].mxu0  ;;  %v10257_v19 = vpop.f32.mrb[107].mxu1 }
 0x551   : > { %v8322_v58 = vmax.f32 %v8194_v9, 0.0  ;;  %v10741_v0 = vadd.f32 %v10613_v40, %v20111_v20  ;;  %v10868_v47 = vmax.f32 %v10740_v24, 0.0  ;;  %v10614_v21 = vadd.f32 %v18964_v60, %v10247_v17  ;;  %v8005_v56 = vpop.f32.mrb[218].mxu0  ;;  %v20112_v40 = vld [vmem:[#allocation45_spill] sm:$0xff] }
 0x552   : > { %v11232_v48 = vadd.f32 %v11231_v3, %v11230_v62  ;;  %v11237_v22 = vrot.slane %v11236_v10, 2  ;;  %v11890_v14 = vpack.c.bf16 %v11762_v53, %v11762_v53  ;;  %v8323_v52 = vmax.f32 %v8195_v16, 0.0  ;;  %v8007_v5 = vpop.f32.mrb[219].mxu0 }
 0x553   : > { %v8450_v12 = vrot.slane %v8322_v58, 7  ;;  %v13777_v30 = vpack.c.bf16 %v8322_v58, %v8321_v51  ;;  %v10869_v37 = vmax.f32 %v10741_v0, 0.0  ;;  %v11241_v29 = vrot.slane %v10868_v47, 4 }
 0x554   : > { %v11233_v28 = vrot.slane %v11232_v48, 1  ;;  %v11238_v32 = vadd.f32 %v11237_v22, %v11236_v10  ;;  %v18994_v11 = vunpack.c.l.b16 %v11890_v14  ;;  %v10742_v3 = vadd.f32 %v10614_v21, %v20112_v40  ;;  %v19000_v10 = vld [vmem:[%s19536_s4 + $0x1] ss:$0 sm:$0xff] }
 0x555   : > { %v15013_v62 = vpack.c.bf16 %v8450_v12, %v8449_v27  ;;  %v11247_v9 = vrot.slane %v10869_v37, 4  ;;  %10458 = vmatprep.mubr.bf16.mxu1 %v13777_v30  ;;  %v11242_v24 = vadd.f32 %v11241_v29, %v10868_v47  ;;  %v8451_v53 = vrot.slane %v8323_v52, 7  ;;  %v19007_v22 = vpop.f32.mrb[108].mxu1  ;;  %v20113_v14 = vld [vmem:[#allocation46_spill] sm:$0xff] }
 0x556   : > { %v11234_v17 = vadd.f32 %v11233_v28, %v11232_v48  ;;  %v11239_v23 = vrot.slane %v11238_v32, 1  ;;  %v10870_v58 = vmax.f32 %v10742_v3, 0.0  ;;  %v8196_v20 = vadd.f32 %v19000_v10, %v7997_v25  ;;  %v10262_v30 = vpop.f32.mrb[109].mxu1 }
 0x557   : > { %v11248_v51 = vadd.f32 %v11247_v9, %v10869_v37  ;;  %15014 = vmatmul.mubr.msk.bf16.gmra.mrb[208].mxu1 %vm15828_vm1, %v15013_v62  ;;  %v10615_v27 = vadd.f32 %v18964_v60, %v10252_v36  ;;  %v11243_v35 = vrot.slane %v11242_v24, 2  ;;  %v8197_v48 = vadd.f32 %v19000_v10, %v8002_v33  ;;  %v19010_v37 = vpop.f32.mrb[220].mxu0  ;;  %v19013_v29 = vpop.f32.mrb[110].mxu1 }
 0x558   : > { %v11763_v0 = vmul.f32 0.125, %v11234_v17  ;;  %v11240_v16 = vadd.f32 %v11239_v23, %v11238_v32  ;;  %v11253_v21 = vrot.slane %v10870_v58, 4  ;;  %v8324_v31 = vmax.f32 %v8196_v20, 0.0  ;;  %v8012_v32 = vpop.f32.mrb[221].mxu0  ;;  %v10265_v40 = vpop.f32.mrb[111].mxu1 }
 0x559   : > { %v11249_v47 = vrot.slane %v11248_v51, 2  ;;  %v10743_v12 = vadd.f32 %v10615_v27, %v20113_v14  ;;  %v11244_v19 = vadd.f32 %v11243_v35, %v11242_v24  ;;  %v8325_v28 = vmax.f32 %v8197_v48, 0.0  ;;  %v19015_v3 = vpop.f32.mrb[222].mxu0  ;;  %v20114_v48 = vld [vmem:[#allocation47_spill] sm:$0xff] }
 0x55a   : > { %v11764_v25 = vmul.f32 0.125, %v11240_v16  ;;  %v10616_v36 = vadd.f32 %v18964_v60, %v10255_v44  ;;  %v11254_v33 = vadd.f32 %v11253_v21, %v10870_v58  ;;  %v8452_v62 = vrot.slane %v8324_v31, 7  ;;  %v8015_v14 = vpop.f32.mrb[223].mxu0 }
 0x55b   : > { %v11250_v5 = vadd.f32 %v11249_v47, %v11248_v51  ;;  %v13778_v9 = vpack.c.bf16 %v8324_v31, %v8323_v52  ;;  %v11245_v23 = vrot.slane %v11244_v19, 1  ;;  %v10871_v20 = vmax.f32 %v10743_v12, 0.0 }
 0x55c   : > { %v11892_v17 = vpack.c.bf16 %v11764_v25, %v11764_v25  ;;  %v8453_v27 = vrot.slane %v8325_v28, 7  ;;  %v11255_v24 = vrot.slane %v11254_v33, 2  ;;  %v15018_v35 = vpack.c.bf16 %v8452_v62, %v8451_v53 }
 0x55d   : > { %v11251_v16 = vrot.slane %v11250_v5, 1  ;;  %v10744_v44 = vadd.f32 %v10616_v36, %v20114_v48  ;;  %10466 = vmatprep.mubr.bf16.mxu1 %v13778_v9  ;;  %v11246_v32 = vadd.f32 %v11245_v23, %v11244_v19  ;;  %v11259_v51 = vrot.slane %v10871_v20, 4  ;;  %v19023_v36 = vpop.f32.mrb[112].mxu1 }
 0x55e   : > { %v12171_v30 = vunpack.c.l.b16 %v11892_v17  ;;  %v8198_v58 = vadd.f32 %v19000_v10, %v8005_v56  ;;  %v11256_v47 = vadd.f32 %v11255_v24, %v11254_v33  ;;  %v11883_v31 = vpack.c.bf16 %v18940_v38, %v18940_v38  ;;  %v10270_v56 = vpop.f32.mrb[113].mxu1 }
 0x55f   : > { %v11252_v52 = vadd.f32 %v11251_v16, %v11250_v5  ;;  %v10872_v21 = vmax.f32 %v10744_v44, 0.0  ;;  %15019 = vmatmul.mubr.msk.bf16.gmra.mrb[212].mxu1 %vm15828_vm1, %v15018_v35  ;;  %v11765_v12 = vmul.f32 0.125, %v11246_v32  ;;  %v11260_v25 = vadd.f32 %v11259_v51, %v10871_v20  ;;  %v19025_v5 = vpop.f32.mrb[224].mxu0  ;;  %v19027_v24 = vpop.f32.mrb[114].mxu1 }
 0x560   : > { %v8326_v53 = vmax.f32 %v8198_v58, 0.0  ;;  %v11891_v62 = vpack.c.bf16 %v11763_v0, %v11763_v0  ;;  %v11257_v19 = vrot.slane %v11256_v47, 1  ;;  %v12162_v17 = vunpack.c.l.b16 %v11883_v31  ;;  %v8020_v38 = vpop.f32.mrb[225].mxu0  ;;  %v10273_v44 = vpop.f32.mrb[115].mxu1 }
 0x561   : > { %v11766_v9 = vmul.f32 0.125, %v11252_v52  ;;  %v11265_v40 = vrot.slane %v10872_v21, 4  ;;  %v11893_v33 = vpack.c.bf16 %v11765_v12, %v11765_v12  ;;  %v11261_v23 = vrot.slane %v11260_v25, 2  ;;  %v19029_v32 = vpop.f32.mrb[226].mxu0  ;;  %v20115_v38 = vld [vmem:[#allocation48_spill] sm:$0xff] }
 0x562   : > { %v8454_v14 = vrot.slane %v8326_v53, 7  ;;  %v13779_v16 = vpack.c.bf16 %v8326_v53, %v8325_v28  ;;  %v11258_v20 = vadd.f32 %v11257_v19, %v11256_v47  ;;  %v12170_v0 = vunpack.c.l.b16 %v11891_v62  ;;  %v8023_v12 = vpop.f32.mrb[227].mxu0 }
 0x563   : > { %v11894_v35 = vpack.c.bf16 %v11766_v9, %v11766_v9  ;;  %v11266_v48 = vadd.f32 %v11265_v40, %v10872_v21  ;;  %v12172_v51 = vunpack.c.l.b16 %v11893_v33  ;;  %v11262_v58 = vadd.f32 %v11261_v23, %v11260_v25 }
 0x564   : > { %v15023_v52 = vpack.c.bf16 %v8454_v14, %v8453_v27  ;;  %v12288_v31 = vsel %vm12255_vm4, %v18922_v54, %v18913_v55  ;;  %10474 = vmatprep.mubr.bf16.mxu1 %v13779_v16  ;;  %v11767_v53 = vmul.f32 0.125, %v11258_v20  ;;  %v12295_v27 = vsel %vm12255_vm4, %v18978_v63, %v18969_v15 }
 0x565   : > { %v12173_v28 = vunpack.c.l.b16 %v11894_v35  ;;  %v11267_v56 = vrot.slane %v11266_v48, 2  ;;  %v12289_v47 = vsel %vm12257_vm5, %v18924_v39, %v12288_v31  ;;  %v12300_v21 = vsel %vm12251_vm2, %v12172_v51, %v12171_v30  ;;  %v19052_v15 = vpop.f32.mrb[116].mxu1 }
 0x566   : > { %v11263_v62 = vrot.slane %v11262_v58, 1  ;;  %v12290_v9 = vsel %vm12259_vm6, %v18934_v61, %v12289_v47  ;;  %v11895_v54 = vpack.c.bf16 %v11767_v53, %v11767_v53  ;;  %v12296_v61 = vsel %vm12257_vm5, %v18980_v6, %v12295_v27  ;;  %v10278_v14 = vpop.f32.mrb[117].mxu1 }
 0x567   : > { %v12301_v55 = vsel %vm12253_vm3, %v12173_v28, %v12300_v21  ;;  %v11268_v25 = vadd.f32 %v11267_v56, %v11266_v48  ;;  %v12291_v19 = vsel %vm12261_vm7, %v18936_v49, %v12290_v9  ;;  %15024 = vmatmul.mubr.msk.bf16.gmra.mrb[216].mxu1 %vm15828_vm1, %v15023_v52  ;;  %v10617_v40 = vadd.f32 %v18964_v60, %v19007_v22  ;;  %v19058_v16 = vpop.f32.mrb[228].mxu0  ;;  %v10279_v20 = vpop.f32.mrb[118].mxu1 }
 0x568   : > { %v11264_v39 = vadd.f32 %v11263_v62, %v11262_v58  ;;  %v12292_v30 = vsel %vm12263_vm8, %v12162_v17, %v12291_v19  ;;  %v12174_v63 = vunpack.c.l.b16 %v11895_v54  ;;  %v12297_v23 = vsel %vm12259_vm6, %v18988_v42, %v12296_v61  ;;  %v8028_v48 = vpop.f32.mrb[229].mxu0  ;;  %v10281_v58 = vpop.f32.mrb[119].mxu1  ;;  %v20117_v19 = vld [vmem:[#allocation50_spill] sm:$0xff] }
 0x569   : > { %v11269_v33 = vrot.slane %v11268_v25, 1  ;;  %v8199_v49 = vadd.f32 %v19000_v10, %v19010_v37  ;;  %v12298_v6 = vsel %vm12261_vm7, %v18994_v11, %v12297_v23  ;;  %v10745_v35 = vadd.f32 %v10617_v40, %v20115_v38  ;;  %v19067_v52 = vpop.f32.mrb[230].mxu0  ;;  %v20116_v11 = vld [vmem:[#allocation49_spill] sm:$0xff] }
 0x56a   : > { %v11768_v17 = vmul.f32 0.125, %v11264_v39  ;;  %v10618_v22 = vadd.f32 %v18964_v60, %v19013_v29  ;;  %v12302_v44 = vsel %vm12255_vm4, %v12174_v63, %v12301_v55  ;;  %v12299_v51 = vsel %vm12263_vm8, %v12170_v0, %v12298_v6  ;;  %v8031_v56 = vpop.f32.mrb[231].mxu0 }
 0x56b   : > { %v11270_v42 = vadd.f32 %v11269_v33, %v11268_v25  ;;  %v8327_v37 = vmax.f32 %v8199_v49, 0.0  ;;  %v12372_v12 = vpack.c.b16 %v12299_v51, %v12292_v30  ;;  %v10873_v28 = vmax.f32 %v10745_v35, 0.0 }
 0x56c   : > { %v11896_v31 = vpack.c.bf16 %v11768_v17, %v11768_v17  ;;  %v10746_v53 = vadd.f32 %v10618_v22, %v20116_v11  ;;  %v8200_v29 = vadd.f32 %v19000_v10, %v19015_v3  ;;  %v10619_v62 = vadd.f32 %v18964_v60, %v19023_v36  ;;  %v20118_v22 = vld [vmem:[#allocation51_spill] sm:$0xff] }
 0x56d   : > { %v11769_v47 = vmul.f32 0.125, %v11270_v42  ;;  %v8455_v21 = vrot.slane %v8327_v37, 7  ;;  %15106 = vmatprep.mubr.bf16.mxu0 %v12372_v12  ;;  %v11271_v0 = vrot.slane %v10873_v28, 4  ;;  %v8201_v55 = vadd.f32 %v19000_v10, %v19025_v5  ;;  %v10284_v36 = vpop.f32.mrb[120].mxu1 }
 0x56e   : > { %v12175_v9 = vunpack.c.l.b16 %v11896_v31  ;;  %v10874_v27 = vmax.f32 %v10746_v53, 0.0  ;;  %v8328_v25 = vmax.f32 %v8200_v29, 0.0  ;;  %v10747_v39 = vadd.f32 %v10619_v62, %v20117_v19  ;;  %v10286_v17 = vpop.f32.mrb[121].mxu1 }
 0x56f   : > { %v11897_v54 = vpack.c.bf16 %v11769_v47, %v11769_v47  ;;  %v10620_v30 = vadd.f32 %v18964_v60, %v19027_v24  ;;  %v11272_v3 = vadd.f32 %v11271_v0, %v10873_v28  ;;  %v8329_v63 = vmax.f32 %v8201_v55, 0.0  ;;  %v19080_v6 = vpop.f32.mrb[232].mxu0  ;;  %v19083_v42 = vpop.f32.mrb[122].mxu1  ;;  %v20119_v55 = vld [vmem:[#allocation52_spill] sm:$0xff] }
 0x570   : > { %v12303_v61 = vsel %vm12257_vm5, %v12175_v9, %v12302_v44  ;;  %v11277_v40 = vrot.slane %v10874_v27, 4  ;;  %v8456_v23 = vrot.slane %v8328_v25, 7  ;;  %v13780_v49 = vpack.c.bf16 %v8328_v25, %v8327_v37  ;;  %v8036_v24 = vpop.f32.mrb[233].mxu0  ;;  %v10289_v31 = vpop.f32.mrb[123].mxu1 }
 0x571   : > { %v12176_v33 = vunpack.c.l.b16 %v11897_v54  ;;  %v10875_v14 = vmax.f32 %v10747_v39, 0.0  ;;  %v11273_v5 = vrot.slane %v11272_v3, 2  ;;  %v8457_v35 = vrot.slane %v8329_v63, 7  ;;  %v19090_v12 = vpop.f32.mrb[234].mxu0 }
 0x572   : > { %v11278_v38 = vadd.f32 %v11277_v40, %v10874_v27  ;;  %v10748_v48 = vadd.f32 %v10620_v30, %v20118_v22  ;;  %v15028_v51 = vpack.c.bf16 %v8456_v23, %v8455_v21  ;;  %10482 = vmatprep.mubr.bf16.mxu1 %v13780_v49  ;;  %v8202_v37 = vadd.f32 %v19000_v10, %v19029_v32  ;;  %v8039_v47 = vpop.f32.mrb[235].mxu0 }
 0x573   : > { %v19086_v44 = vsel %vm12259_vm6, %v12176_v33, %v12303_v61  ;;  %v11283_v58 = vrot.slane %v10875_v14, 4  ;;  %v11274_v28 = vadd.f32 %v11273_v5, %v11272_v3  ;;  %v10621_v56 = vadd.f32 %v18964_v60, %v19052_v15 }
 0x574   : > { %v11279_v11 = vrot.slane %v11278_v38, 2  ;;  %v10876_v53 = vmax.f32 %v10748_v48, 0.0  ;;  %v8330_v62 = vmax.f32 %v8202_v37, 0.0  ;;  %15029 = vmatmul.mubr.msk.bf16.gmra.mrb[220].mxu1 %vm15828_vm1, %v15028_v51  ;;  %v8203_v21 = vadd.f32 %v19000_v10, %v19058_v16 }
 0x575   : > { %v11284_v29 = vadd.f32 %v11283_v58, %v10875_v14  ;;  %v10622_v32 = vadd.f32 %v18964_v60, %v10279_v20  ;;  %v11275_v9 = vrot.slane %v11274_v28, 1  ;;  %v10749_v54 = vadd.f32 %v10621_v56, %v20119_v55  ;;  %v20120_v20 = vld [vmem:[#allocation53_spill] sm:$0xff] }
 0x576   : > { %v11280_v0 = vadd.f32 %v11279_v11, %v11278_v38  ;;  %v11289_v27 = vrot.slane %v10876_v53, 4  ;;  %v8458_v19 = vrot.slane %v8330_v62, 7  ;;  %v13781_v39 = vpack.c.bf16 %v8330_v62, %v8329_v63 }
 0x577   : > { %v11285_v25 = vrot.slane %v11284_v29, 2  ;;  %v8331_v15 = vmax.f32 %v8203_v21, 0.0  ;;  %v11276_v30 = vadd.f32 %v11275_v9, %v11274_v28  ;;  %v10877_v40 = vmax.f32 %v10749_v54, 0.0  ;;  %v19100_v33 = vpop.f32.mrb[124].mxu1  ;;  %v19105_v5 = vpop.f32.mrb[236].mxu0 }
 0x578   : > { %v11281_v61 = vrot.slane %v11280_v0, 1  ;;  %v11290_v3 = vadd.f32 %v11289_v27, %v10876_v53  ;;  %v15033_v49 = vpack.c.bf16 %v8458_v19, %v8457_v35  ;;  %v10750_v14 = vadd.f32 %v10622_v32, %v20120_v20  ;;  %10490 = vmatprep.mubr.bf16.mxu1 %v13781_v39  ;;  %v10294_v17 = vpop.f32.mrb[125].mxu1  ;;  %v8044_v51 = vpop.f32.mrb[237].mxu0 }
 0x579   : > { %v11286_v23 = vadd.f32 %v11285_v25, %v11284_v29  ;;  %v19102_v16 = vrot.slane %v8331_v15, 7  ;;  %v11770_v38 = vmul.f32 0.125, %v11276_v30  ;;  %v11295_v48 = vrot.slane %v10877_v40, 4  ;;  %v19107_v24 = vpop.f32.mrb[126].mxu1  ;;  %v19112_v11 = vpop.f32.mrb[238].mxu0 }
 0x57a   : > { %v11282_v22 = vadd.f32 %v11281_v61, %v11280_v0  ;;  %v11291_v63 = vrot.slane %v11290_v3, 2  ;;  %v10878_v37 = vmax.f32 %v10750_v14, 0.0  ;;  %v8204_v35 = vadd.f32 %v19000_v10, %v19067_v52  ;;  %v10297_v28 = vpop.f32.mrb[127].mxu1  ;;  %v8047_v62 = vpop.f32.mrb[239].mxu0  ;;  %v20121_v0 = vld [vmem:[#allocation54_spill] sm:$0xff] }
 0x57b   : > { %v11287_v58 = vrot.slane %v11286_v23, 1  ;;  %v10623_v31 = vadd.f32 %v18964_v60, %v10284_v36  ;;  %v11898_v53 = vpack.c.bf16 %v11770_v38, %v11770_v38  ;;  %v11296_v29 = vadd.f32 %v11295_v48, %v10877_v40 }
 0x57c   : > { %v11771_v56 = vmul.f32 0.125, %v11282_v22  ;;  %v11292_v47 = vadd.f32 %v11291_v63, %v11290_v3  ;;  %v11301_v32 = vrot.slane %v10878_v37, 4  ;;  %v8332_v9 = vmax.f32 %v8204_v35, 0.0  ;;  %15034 = vmatmul.mubr.msk.bf16.gmra.mrb[224].mxu1 %vm15828_vm1, %v15033_v49 }
 0x57d   : > { %v11288_v21 = vadd.f32 %v11287_v58, %v11286_v23  ;;  %v10751_v27 = vadd.f32 %v10623_v31, %v20121_v0  ;;  %v12177_v55 = vunpack.c.l.b16 %v11898_v53  ;;  %v11297_v36 = vrot.slane %v11296_v29, 2  ;;  %v20122_v0 = vld [vmem:[#allocation55_spill] sm:$0xff] }
 0x57e   : > { %v11899_v52 = vpack.c.bf16 %v11771_v56, %v11771_v56  ;;  %v11293_v54 = vrot.slane %v11292_v47, 1  ;;  %v11302_v19 = vadd.f32 %v11301_v32, %v10878_v37  ;;  %v8460_v39 = vrot.slane %v8332_v9, 7 }
 0x57f   : > { %v11772_v25 = vmul.f32 0.125, %v11288_v21  ;;  %v13782_v30 = vpack.c.bf16 %v8332_v9, %v8331_v15  ;;  %v12305_v61 = vsel %vm12261_vm7, %v12177_v55, %v19086_v44  ;;  %v11298_v23 = vadd.f32 %v11297_v36, %v11296_v29  ;;  %v19119_v20 = vpop.f32.mrb[128].mxu1  ;;  %v19122_v63 = vpop.f32.mrb[240].mxu0 }
 0x580   : > { %v12178_v3 = vunpack.c.l.b16 %v11899_v52  ;;  %v11294_v40 = vadd.f32 %v11293_v54, %v11292_v47  ;;  %v11303_v49 = vrot.slane %v11302_v19, 2  ;;  %v15038_v17 = vpack.c.bf16 %v8460_v39, %v19102_v16  ;;  %v10302_v22 = vpop.f32.mrb[129].mxu1  ;;  %v8052_v37 = vpop.f32.mrb[241].mxu0 }
 0x581   : > { %v11900_v14 = vpack.c.bf16 %v11772_v25, %v11772_v25  ;;  %v10879_v38 = vmax.f32 %v10751_v27, 0.0  ;;  %10498 = vmatprep.mubr.bf16.mxu1 %v13782_v30  ;;  %v11299_v51 = vrot.slane %v11298_v23, 1  ;;  %v8205_v44 = vadd.f32 %v19000_v10, %v19080_v6  ;;  %v19129_v58 = vpop.f32.mrb[130].mxu1  ;;  %v19133_v56 = vpop.f32.mrb[242].mxu0  ;;  %v20123_v30 = vld [vmem:[#allocation56_spill] sm:$0xff] }
 0x582   : > { %v19125_v48 = vsel %vm12263_vm8, %v12178_v3, %v12305_v61  ;;  %v11773_v15 = vmul.f32 0.125, %v11294_v40  ;;  %v11304_v31 = vadd.f32 %v11303_v49, %v11302_v19  ;;  %v10624_v16 = vadd.f32 %v18964_v60, %v19083_v42  ;;  %v10305_v53 = vpop.f32.mrb[131].mxu1  ;;  %v8055_v32 = vpop.f32.mrb[243].mxu0 }
 0x583   : > { %v12179_v35 = vunpack.c.l.b16 %v11900_v14  ;;  %v11307_v28 = vrot.slane %v10879_v38, 4  ;;  %v11300_v29 = vadd.f32 %v11299_v51, %v11298_v23  ;;  %v8333_v62 = vmax.f32 %v8205_v44, 0.0 }
 0x584   : > { %v11901_v47 = vpack.c.bf16 %v11773_v15, %v11773_v15  ;;  %v8206_v21 = vadd.f32 %v19000_v10, %v19090_v12  ;;  %v11305_v6 = vrot.slane %v11304_v31, 1  ;;  %v10752_v27 = vadd.f32 %v10624_v16, %v20122_v0  ;;  %15039 = vmatmul.mubr.msk.bf16.gmra.mrb[228].mxu1 %vm15828_vm1, %v15038_v17 }
 0x585   : > { %v11308_v9 = vadd.f32 %v11307_v28, %v10879_v38  ;;  %v10625_v42 = vadd.f32 %v18964_v60, %v19100_v33  ;;  %v11774_v52 = vmul.f32 0.125, %v11300_v29  ;;  %v8461_v54 = vrot.slane %v8333_v62, 7 }
 0x586   : > { %v12180_v55 = vunpack.c.l.b16 %v11901_v47  ;;  %v8334_v36 = vmax.f32 %v8206_v21, 0.0  ;;  %v11306_v25 = vadd.f32 %v11305_v6, %v11304_v31  ;;  %v10880_v39 = vmax.f32 %v10752_v27, 0.0 }
 0x587   : > { %v11309_v19 = vrot.slane %v11308_v9, 2  ;;  %v10753_v12 = vadd.f32 %v10625_v42, %v20123_v30  ;;  %v11902_v3 = vpack.c.bf16 %v11774_v52, %v11774_v52  ;;  %v19144_v14 = vpop.f32.mrb[132].mxu1  ;;  %v19146_v15 = vpop.f32.mrb[244].mxu0  ;;  %v8207_v37 = vadd.f32 %v19000_v10, %v19105_v5 }
 0x588   : > { %v12307_v61 = vsel %vm12251_vm2, %v12180_v55, %v12179_v35  ;;  %v8462_v40 = vrot.slane %v8334_v36, 7  ;;  %v13783_v23 = vpack.c.bf16 %v8334_v36, %v8333_v62  ;;  %v11775_v49 = vmul.f32 0.125, %v11306_v25  ;;  %v10310_v22 = vpop.f32.mrb[133].mxu1  ;;  %v8060_v28 = vpop.f32.mrb[245].mxu0 }
 0x589   : > { %v11310_v17 = vadd.f32 %v11309_v19, %v11308_v9  ;;  %v11313_v38 = vrot.slane %v10880_v39, 4  ;;  %v10881_v33 = vmax.f32 %v10753_v12, 0.0  ;;  %v12181_v51 = vunpack.c.l.b16 %v11902_v3  ;;  %v19152_v31 = vpop.f32.mrb[134].mxu1  ;;  %v19154_v21 = vpop.f32.mrb[246].mxu0  ;;  %v20124_v9 = vld [vmem:[#allocation57_spill] sm:$0xff] }
 0x58a   : > { %v15043_v44 = vpack.c.bf16 %v8462_v40, %v8461_v54  ;;  %v10626_v35 = vadd.f32 %v18964_v60, %v19107_v24  ;;  %10506 = vmatprep.mubr.bf16.mxu1 %v13783_v23  ;;  %v11903_v16 = vpack.c.bf16 %v11775_v49, %v11775_v49  ;;  %v10313_v62 = vpop.f32.mrb[135].mxu1  ;;  %v8335_v6 = vmax.f32 %v8207_v37, 0.0  ;;  %v8063_v24 = vpop.f32.mrb[247].mxu0  ;;  %v20125_v23 = vld [vmem:[#allocation58_spill] sm:$0xff] }
 0x58b   : > { %v11311_v53 = vrot.slane %v11310_v17, 1  ;;  %v11314_v47 = vadd.f32 %v11313_v38, %v10880_v39  ;;  %v11319_v29 = vrot.slane %v10881_v33, 4  ;;  %v12308_v32 = vsel %vm12253_vm3, %v12181_v51, %v12307_v61  ;;  %v20126_v24 = vld [vmem:[#allocation59_spill] sm:$0xff] }
 0x58c   : > { %v10754_v0 = vadd.f32 %v10626_v35, %v20124_v9  ;;  %v8208_v5 = vadd.f32 %v19000_v10, %v19112_v11  ;;  %v12182_v27 = vunpack.c.l.b16 %v11903_v16  ;;  %15044 = vmatmul.mubr.msk.bf16.gmra.mrb[232].mxu1 %vm15828_vm1, %v15043_v44  ;;  %v8463_v54 = vrot.slane %v8335_v6, 7 }
 0x58d   : > { %v11312_v42 = vadd.f32 %v11311_v53, %v11310_v17  ;;  %v11315_v55 = vrot.slane %v11314_v47, 2  ;;  %v11320_v52 = vadd.f32 %v11319_v29, %v10881_v33  ;;  %v10627_v19 = vadd.f32 %v18964_v60, %v19119_v20 }
 0x58e   : > { %v10882_v36 = vmax.f32 %v10754_v0, 0.0  ;;  %v8336_v25 = vmax.f32 %v8208_v5, 0.0  ;;  %v12309_v39 = vsel %vm12255_vm4, %v12182_v27, %v12308_v32  ;;  %v8209_v51 = vadd.f32 %v19000_v10, %v19122_v63 }
 0x58f   : > { %v11776_v30 = vmul.f32 0.125, %v11312_v42  ;;  %v11316_v12 = vadd.f32 %v11315_v55, %v11314_v47  ;;  %v11321_v61 = vrot.slane %v11320_v52, 2  ;;  %v10755_v49 = vadd.f32 %v10627_v19, %v20125_v23  ;;  %v19170_v20 = vpop.f32.mrb[248].mxu0 }
 0x590   : > { %v11325_v11 = vrot.slane %v10882_v36, 4  ;;  %v8464_v3 = vrot.slane %v8336_v25, 7  ;;  %v13784_v40 = vpack.c.bf16 %v8336_v25, %v8335_v6  ;;  %v19166_v17 = vpop.f32.mrb[136].mxu1  ;;  %v10628_v16 = vadd.f32 %v18964_v60, %v19129_v58  ;;  %v8068_v47 = vpop.f32.mrb[249].mxu0 }
 0x591   : > { %v11904_v38 = vpack.c.bf16 %v11776_v30, %v11776_v30  ;;  %v11317_v33 = vrot.slane %v11316_v12, 1  ;;  %v11322_v22 = vadd.f32 %v11321_v61, %v11320_v52  ;;  %v10318_v44 = vpop.f32.mrb[137].mxu1  ;;  %v10883_v28 = vmax.f32 %v10755_v49, 0.0  ;;  %v19176_v0 = vpop.f32.mrb[250].mxu0 }
 0x592   : > { %v11326_v37 = vadd.f32 %v11325_v11, %v10882_v36  ;;  %v15048_v35 = vpack.c.bf16 %v8464_v3, %v8463_v54  ;;  %10514 = vmatprep.mubr.bf16.mxu1 %v13784_v40  ;;  %v19174_v53 = vpop.f32.mrb[138].mxu1  ;;  %v8337_v6 = vmax.f32 %v8209_v51, 0.0  ;;  %v10756_v27 = vadd.f32 %v10628_v16, %v20126_v24  ;;  %v8071_v55 = vpop.f32.mrb[251].mxu0  ;;  %v20127_v44 = vld [vmem:[#allocation60_spill] sm:$0xff] }
 0x593   : > { %v12183_v29 = vunpack.c.l.b16 %v11904_v38  ;;  %v11318_v62 = vadd.f32 %v11317_v33, %v11316_v12  ;;  %v11323_v32 = vrot.slane %v11322_v22, 1  ;;  %v10321_v9 = vpop.f32.mrb[139].mxu1  ;;  %v11331_v5 = vrot.slane %v10883_v28, 4 }
 0x594   : > { %v11327_v63 = vrot.slane %v11326_v37, 2  ;;  %v8210_v42 = vadd.f32 %v19000_v10, %v19133_v56  ;;  %v8465_v36 = vrot.slane %v8337_v6, 7  ;;  %15049 = vmatmul.mubr.msk.bf16.gmra.mrb[236].mxu1 %vm15828_vm1, %v15048_v35  ;;  %v10884_v30 = vmax.f32 %v10756_v27, 0.0 }
 0x595   : > { %v12310_v58 = vsel %vm12257_vm5, %v12183_v29, %v12309_v39  ;;  %v11777_v52 = vmul.f32 0.125, %v11318_v62  ;;  %v11324_v54 = vadd.f32 %v11323_v32, %v11322_v22  ;;  %v11332_v19 = vadd.f32 %v11331_v5, %v10883_v28 }
 0x596   : > { %v11328_v25 = vadd.f32 %v11327_v63, %v11326_v37  ;;  %v8338_v12 = vmax.f32 %v8210_v42, 0.0  ;;  %v10629_v3 = vadd.f32 %v18964_v60, %v19144_v14  ;;  %v8211_v56 = vadd.f32 %v19000_v10, %v19146_v15 }
 0x597   : > { %v11905_v61 = vpack.c.bf16 %v11777_v52, %v11777_v52  ;;  %v11778_v11 = vmul.f32 0.125, %v11324_v54  ;;  %v11333_v39 = vrot.slane %v11332_v19, 2  ;;  %v11337_v23 = vrot.slane %v10884_v30, 4  ;;  %v19191_v28 = vpop.f32.mrb[252].mxu0 }
 0x598   : > { %v11329_v40 = vrot.slane %v11328_v25, 1  ;;  %v8466_v49 = vrot.slane %v8338_v12, 7  ;;  %v19188_v38 = vpop.f32.mrb[140].mxu1  ;;  %v13785_v51 = vpack.c.bf16 %v8338_v12, %v8337_v6  ;;  %v10757_v37 = vadd.f32 %v10629_v3, %v20127_v44  ;;  %v8076_v15 = vpop.f32.mrb[253].mxu0 }
 0x599   : > { %v12184_v33 = vunpack.c.l.b16 %v11905_v61  ;;  %v11906_v22 = vpack.c.bf16 %v11778_v11, %v11778_v11  ;;  %v10326_v35 = vpop.f32.mrb[141].mxu1  ;;  %v11334_v47 = vadd.f32 %v11333_v39, %v11332_v19  ;;  %v11338_v14 = vadd.f32 %v11337_v23, %v10884_v30  ;;  %v19196_v6 = vpop.f32.mrb[254].mxu0  ;;  %v20128_v11 = vld [vmem:[#allocation61_spill] sm:$0xff] }
 0x59a   : > { %v11330_v16 = vadd.f32 %v11329_v40, %v11328_v25  ;;  %v15053_v29 = vpack.c.bf16 %v8466_v49, %v8465_v36  ;;  %v19193_v62 = vpop.f32.mrb[142].mxu1  ;;  %v10885_v63 = vmax.f32 %v10757_v37, 0.0  ;;  %v8339_v5 = vmax.f32 %v8211_v56, 0.0  ;;  %10522 = vmatprep.mubr.bf16.mxu1 %v13785_v51  ;;  %v8079_v54 = vpop.f32.mrb[255].mxu0  ;;  %v20129_v35 = vld [vmem:[#allocation62_spill] sm:$0xff] }
 0x59b   : > { %v12311_v32 = vsel %vm12259_vm6, %v12184_v33, %v12310_v58  ;;  %v12185_v9 = vunpack.c.l.b16 %v11906_v22  ;;  %v10329_v24 = vpop.f32.mrb[143].mxu1  ;;  %v11335_v42 = vrot.slane %v11334_v47, 1  ;;  %v11339_v55 = vrot.slane %v11338_v14, 2 }
 0x59c   : > { %v11779_v27 = vmul.f32 0.125, %v11330_v16  ;;  %v10630_v52 = vadd.f32 %v18964_v60, %v19152_v31  ;;  %v11343_v25 = vrot.slane %v10885_v63, 4  ;;  %v8467_v19 = vrot.slane %v8339_v5, 7  ;;  %15054 = vmatmul.mubr.msk.bf16.gmra.mrb[240].mxu1 %vm15828_vm1, %v15053_v29 }
 0x59d   : > { %v12312_v36 = vsel %vm12261_vm7, %v12185_v9, %v12311_v32  ;;  %v8212_v58 = vadd.f32 %v19000_v10, %v19154_v21  ;;  %v11336_v12 = vadd.f32 %v11335_v42, %v11334_v47  ;;  %v11340_v61 = vadd.f32 %v11339_v55, %v11338_v14 }
 0x59e   : > { %v11907_v30 = vpack.c.bf16 %v11779_v27, %v11779_v27  ;;  %v10758_v3 = vadd.f32 %v10630_v52, %v20128_v11  ;;  %v11344_v56 = vadd.f32 %v11343_v25, %v10885_v63  ;;  %v10631_v31 = vadd.f32 %v18964_v60, %v19166_v17 }
 0x59f   : > { %v8340_v40 = vmax.f32 %v8212_v58, 0.0  ;;  %v8213_v39 = vadd.f32 %v19000_v10, %v19170_v20  ;;  %v11780_v49 = vmul.f32 0.125, %v11336_v12  ;;  %v11341_v33 = vrot.slane %v11340_v61, 1 }
 0x5a0   : > { %v12186_v23 = vunpack.c.l.b16 %v11907_v30  ;;  %v10886_v21 = vmax.f32 %v10758_v3, 0.0  ;;  %v19210_v22 = vpop.f32.mrb[144].mxu1  ;;  %v11345_v51 = vrot.slane %v11344_v56, 2  ;;  %v10759_v16 = vadd.f32 %v10631_v31, %v20129_v35  ;;  %v20130_v3 = vld [vmem:[#allocation63_spill] sm:$0xff] }
 0x5a1   : > { %v8468_v44 = vrot.slane %v8340_v40, 7  ;;  %v13786_v37 = vpack.c.bf16 %v8340_v40, %v8339_v5  ;;  %v10334_v47 = vpop.f32.mrb[145].mxu1  ;;  %v11908_v29 = vpack.c.bf16 %v11780_v49, %v11780_v49  ;;  %v11342_v15 = vadd.f32 %v11341_v33, %v11340_v61 }
 0x5a2   : > { %v12313_v14 = vsel %vm12263_vm8, %v12186_v23, %v12312_v36  ;;  %v11349_v17 = vrot.slane %v10886_v21, 4  ;;  %v19214_v32 = vpop.f32.mrb[146].mxu1  ;;  %v11346_v9 = vadd.f32 %v11345_v51, %v11344_v56  ;;  %v10887_v24 = vmax.f32 %v10759_v16, 0.0 }
 0x5a3   : > { %v12373_v20 = vpack.c.b16 %v12313_v14, %v19125_v48  ;;  %v15058_v63 = vpack.c.bf16 %v8468_v44, %v8467_v19  ;;  %10530 = vmatprep.mubr.bf16.mxu1 %v13786_v37  ;;  %v10337_v27 = vpop.f32.mrb[147].mxu1  ;;  %v12187_v42 = vunpack.c.l.b16 %v11908_v29  ;;  %v11781_v55 = vmul.f32 0.125, %v11342_v15 }
 0x5a4   : > { %v11350_v5 = vadd.f32 %v11349_v17, %v10886_v21  ;;  %v8341_v52 = vmax.f32 %v8213_v39, 0.0  ;;  %v11347_v54 = vrot.slane %v11346_v9, 1  ;;  %v11355_v25 = vrot.slane %v10887_v24, 4  ;;  %v20131_v39 = vld [vmem:[#allocation64_spill] sm:$0xff] }
 0x5a5   : > { %v10632_v36 = vadd.f32 %v18964_v60, %v19174_v53  ;;  %v8214_v58 = vadd.f32 %v19000_v10, %v19176_v0  ;;  %15059 = vmatmul.mubr.msk.bf16.gmra.mrb[244].mxu1 %vm15828_vm1, %v15058_v63  ;;  %15107 = vmatmul.mubr.bf16.gmra.mrb[4].mxu0 %v12373_v20  ;;  %v11909_v48 = vpack.c.bf16 %v11781_v55, %v11781_v55 }
 0x5a6   : > { %v11351_v19 = vrot.slane %v11350_v5, 2  ;;  %v8469_v30 = vrot.slane %v8341_v52, 7  ;;  %v10633_v12 = vadd.f32 %v18964_v60, %v19188_v38  ;;  %v11348_v61 = vadd.f32 %v11347_v54, %v11346_v9 }
 0x5a7   : > { %v11356_v11 = vadd.f32 %v11355_v25, %v10887_v24  ;;  %v10760_v56 = vadd.f32 %v10632_v36, %v20130_v3  ;;  %v8342_v40 = vmax.f32 %v8214_v58, 0.0  ;;  %v12188_v31 = vunpack.c.l.b16 %v11909_v48  ;;  %v19233_v24 = vld [vmem:[%s19538_s6 + $0x1] ss:$0 sm:$0xff]  ;;  %v20132_v58 = vld [vmem:[#allocation65_spill] sm:$0xff] }
 0x5a8   : > { %v11352_v53 = vadd.f32 %v11351_v19, %v11350_v5  ;;  %v10761_v23 = vadd.f32 %v10633_v12, %v20131_v39  ;;  %v8215_v0 = vadd.f32 %v19000_v10, %v19191_v28  ;;  %v10340_v49 = vpop.f32.mrb[148].mxu1  ;;  %v11782_v33 = vmul.f32 0.125, %v11348_v61 }
 0x5a9   : > { %v11357_v21 = vrot.slane %v11356_v11, 2  ;;  %v10888_v51 = vmax.f32 %v10760_v56, 0.0  ;;  %v8470_v44 = vrot.slane %v8342_v40, 7  ;;  %v10342_v37 = vpop.f32.mrb[149].mxu1  ;;  %v12314_v60 = vsel %vm12251_vm2, %v12188_v31, %v12187_v42 }
 0x5aa   : > { %v11353_v38 = vrot.slane %v11352_v53, 1  ;;  %v13787_v35 = vpack.c.bf16 %v8342_v40, %v8341_v52  ;;  %v10889_v16 = vmax.f32 %v10761_v23, 0.0  ;;  %v10343_v47 = vpop.f32.mrb[150].mxu1  ;;  %v11910_v14 = vpack.c.bf16 %v11782_v33, %v11782_v33 }
 0x5ab   : > { %v11358_v29 = vadd.f32 %v11357_v21, %v11356_v11  ;;  %v11361_v15 = vrot.slane %v10888_v51, 4  ;;  %v15063_v17 = vpack.c.bf16 %v8470_v44, %v8469_v30  ;;  %v10345_v20 = vpop.f32.mrb[151].mxu1  ;;  %v8343_v28 = vmax.f32 %v8215_v0, 0.0  ;;  %v20133_v21 = vld [vmem:[#allocation66_spill] sm:$0xff] }
 0x5ac   : > { %v11354_v9 = vadd.f32 %v11353_v38, %v11352_v53  ;;  %v11367_v63 = vrot.slane %v10889_v16, 4  ;;  %v10634_v27 = vadd.f32 %v19233_v24, %v19193_v62  ;;  %10538 = vmatprep.mubr.bf16.mxu1 %v13787_v35  ;;  %v12189_v42 = vunpack.c.l.b16 %v11910_v14 }
 0x5ad   : > { %v11359_v55 = vrot.slane %v11358_v29, 1  ;;  %v11362_v5 = vadd.f32 %v11361_v15, %v10888_v51  ;;  %v8216_v52 = vadd.f32 %v19000_v10, %v19196_v6  ;;  %15064 = vmatmul.mubr.msk.bf16.gmra.mrb[248].mxu1 %vm15828_vm1, %v15063_v17  ;;  %v8471_v36 = vrot.slane %v8343_v28, 7 }
 0x5ae   : > { %v11783_v54 = vmul.f32 0.125, %v11354_v9  ;;  %v11368_v25 = vadd.f32 %v11367_v63, %v10889_v16  ;;  %v10762_v48 = vadd.f32 %v10634_v27, %v20132_v58  ;;  %v19243_v19 = vsel %vm12253_vm3, %v12189_v42, %v12314_v60  ;;  %v20134_v9 = vld [vmem:[#allocation67_spill] sm:$0xff] }
 0x5af   : > { %v11360_v30 = vadd.f32 %v11359_v55, %v11358_v29  ;;  %v11363_v62 = vrot.slane %v11362_v5, 2  ;;  %v8344_v12 = vmax.f32 %v8216_v52, 0.0  ;;  %v10635_v10 = vadd.f32 %v19233_v24, %v19210_v22 }
 0x5b0   : > { %v11911_v61 = vpack.c.bf16 %v11783_v54, %v11783_v54  ;;  %v11369_v11 = vrot.slane %v11368_v25, 2  ;;  %v10890_v3 = vmax.f32 %v10762_v48, 0.0  ;;  %v10348_v6 = vpop.f32.mrb[152].mxu1  ;;  %v10636_v35 = vadd.f32 %v19233_v24, %v19214_v32  ;;  %v20135_v32 = vld [vmem:[#allocation68_spill] sm:$0xff] }
 0x5b1   : > { %v11784_v56 = vmul.f32 0.125, %v11360_v30  ;;  %v11364_v40 = vadd.f32 %v11363_v62, %v11362_v5  ;;  %v8472_v31 = vrot.slane %v8344_v12, 7  ;;  %v13788_v53 = vpack.c.bf16 %v8344_v12, %v8343_v28  ;;  %v10350_v39 = vpop.f32.mrb[153].mxu1 }
 0x5b2   : > { %v12190_v23 = vunpack.c.l.b16 %v11911_v61  ;;  %v11370_v0 = vadd.f32 %v11369_v11, %v11368_v25  ;;  %v11373_v33 = vrot.slane %v10890_v3, 4  ;;  %v10763_v51 = vadd.f32 %v10635_v10, %v20133_v21  ;;  %v10351_v44 = vpop.f32.mrb[154].mxu1  ;;  %v20136_v25 = vld [vmem:[#allocation69_spill] sm:$0xff]  ;;  %v20137_v11 = vld [vmem:[#allocation70_spill] sm:$0xff] }
 0x5b3   : > { %v11912_v37 = vpack.c.bf16 %v11784_v56, %v11784_v56  ;;  %v11365_v60 = vrot.slane %v11364_v40, 1  ;;  %v15068_v38 = vpack.c.bf16 %v8472_v31, %v8471_v36  ;;  %10546 = vmatprep.mubr.bf16.mxu1 %v13788_v53  ;;  %v10353_v22 = vpop.f32.mrb[155].mxu1  ;;  %v10637_v15 = vadd.f32 %v19233_v24, %v10340_v49 }
 0x5b4   : > { %v11371_v16 = vrot.slane %v11370_v0, 1  ;;  %v11374_v14 = vadd.f32 %v11373_v33, %v10890_v3  ;;  %v10891_v29 = vmax.f32 %v10763_v51, 0.0  ;;  %v10764_v63 = vadd.f32 %v10636_v35, %v20134_v9 }
 0x5b5   : > { %v12191_v17 = vunpack.c.l.b16 %v11912_v37  ;;  %v11366_v20 = vadd.f32 %v11365_v60, %v11364_v40  ;;  %15069 = vmatmul.mubr.msk.bf16.gmra.mrb[252].mxu1 %vm15828_vm1, %v15068_v38  ;;  %v10638_v28 = vadd.f32 %v19233_v24, %v10343_v47  ;;  %v10765_v5 = vadd.f32 %v10637_v15, %v20135_v32 }
 0x5b6   : > { %v11372_v27 = vadd.f32 %v11371_v16, %v11370_v0  ;;  %v11375_v42 = vrot.slane %v11374_v14, 2  ;;  %v11379_v55 = vrot.slane %v10891_v29, 4  ;;  %v10892_v54 = vmax.f32 %v10764_v63, 0.0  ;;  %v20138_v63 = vld [vmem:[#allocation71_spill] sm:$0xff] }
 0x5b7   : > { %v11785_v52 = vmul.f32 0.125, %v11366_v20  ;;  %v10766_v36 = vadd.f32 %v10638_v28, %v20136_v25  ;;  %v10639_v49 = vadd.f32 %v19233_v24, %v10348_v6  ;;  %v10893_v62 = vmax.f32 %v10765_v5, 0.0 }
 0x5b8   : > { %v11786_v58 = vmul.f32 0.125, %v11372_v27  ;;  %v11376_v48 = vadd.f32 %v11375_v42, %v11374_v14  ;;  %v11380_v30 = vadd.f32 %v11379_v55, %v10891_v29  ;;  %v11385_v34 = vrot.slane %v10892_v54, 4 }
 0x5b9   : > { %v11913_v12 = vpack.c.bf16 %v11785_v52, %v11785_v52  ;;  %v10894_v61 = vmax.f32 %v10766_v36, 0.0  ;;  %v10767_v47 = vadd.f32 %v10639_v49, %v20137_v11  ;;  %v11391_v40 = vrot.slane %v10893_v62, 4 }
 0x5ba   : > { %v11914_v3 = vpack.c.bf16 %v11786_v58, %v11786_v58  ;;  %v11377_v10 = vrot.slane %v11376_v48, 1  ;;  %v11381_v56 = vrot.slane %v11380_v30, 2  ;;  %v11386_v53 = vadd.f32 %v11385_v34, %v10892_v54 }
 0x5bb   : > { %v12192_v31 = vunpack.c.l.b16 %v11913_v12  ;;  %v11397_v39 = vrot.slane %v10894_v61, 4  ;;  %v10895_v0 = vmax.f32 %v10767_v47, 0.0  ;;  %v11392_v51 = vadd.f32 %v11391_v40, %v10893_v62 }
 0x5bc   : > { %v19259_v33 = vunpack.c.l.b16 %v11914_v3  ;;  %v11378_v6 = vadd.f32 %v11377_v10, %v11376_v48  ;;  %v11382_v21 = vadd.f32 %v11381_v56, %v11380_v30  ;;  %v11387_v37 = vrot.slane %v11386_v53, 2  ;;  %v20139_v3 = vld [vmem:[#allocation72_spill] sm:$0xff] }
 0x5bd   : > { %v11398_v60 = vadd.f32 %v11397_v39, %v10894_v61  ;;  %v11403_v38 = vrot.slane %v10895_v0, 4  ;;  %v10640_v35 = vadd.f32 %v19233_v24, %v10351_v44  ;;  %v11393_v14 = vrot.slane %v11392_v51, 2 }
 0x5be   : > { %v11787_v22 = vmul.f32 0.125, %v11378_v6  ;;  %v11383_v16 = vrot.slane %v11382_v21, 1  ;;  %v12316_v29 = vsel %vm12255_vm4, %v12190_v23, %v19243_v19  ;;  %v11388_v15 = vadd.f32 %v11387_v37, %v11386_v53 }
 0x5bf   : > { %v11399_v20 = vrot.slane %v11398_v60, 2  ;;  %v11404_v9 = vadd.f32 %v11403_v38, %v10895_v0  ;;  %v10768_v28 = vadd.f32 %v10640_v35, %v20138_v63  ;;  %v11394_v42 = vadd.f32 %v11393_v14, %v11392_v51  ;;  %v10356_v55 = vpop.f32.mrb[156].mxu1  ;;  %v20140_v51 = vld [vmem:[#allocation73_spill] sm:$0xff] }
 0x5c0   : > { %v11384_v27 = vadd.f32 %v11383_v16, %v11382_v21  ;;  %v11915_v32 = vpack.c.bf16 %v11787_v22, %v11787_v22  ;;  %v12317_v5 = vsel %vm12257_vm5, %v12191_v17, %v12316_v29  ;;  %v11389_v52 = vrot.slane %v11388_v15, 1  ;;  %v10358_v36 = vpop.f32.mrb[157].mxu1 }
 0x5c1   : > { %v11400_v54 = vadd.f32 %v11399_v20, %v11398_v60  ;;  %v11405_v44 = vrot.slane %v11404_v9, 2  ;;  %v10896_v25 = vmax.f32 %v10768_v28, 0.0  ;;  %v11395_v58 = vrot.slane %v11394_v42, 1  ;;  %v10359_v23 = vpop.f32.mrb[158].mxu1 }
 0x5c2   : > { %v11788_v49 = vmul.f32 0.125, %v11384_v27  ;;  %v10641_v19 = vadd.f32 %v19233_v24, %v10356_v55  ;;  %v12194_v48 = vunpack.c.l.b16 %v11915_v32  ;;  %v11390_v30 = vadd.f32 %v11389_v52, %v11388_v15  ;;  %v10361_v61 = vpop.f32.mrb[159].mxu1 }
 0x5c3   : > { %v11401_v62 = vrot.slane %v11400_v54, 1  ;;  %v11406_v12 = vadd.f32 %v11405_v44, %v11404_v9  ;;  %v11409_v34 = vrot.slane %v10896_v25, 4  ;;  %v11396_v47 = vadd.f32 %v11395_v58, %v11394_v42 }
 0x5c4   : > { %v11916_v11 = vpack.c.bf16 %v11788_v49, %v11788_v49  ;;  %v10769_v17 = vadd.f32 %v10641_v19, %v20139_v3  ;;  %v10642_v10 = vadd.f32 %v19233_v24, %v10359_v23  ;;  %v11789_v56 = vmul.f32 0.125, %v11390_v30  ;;  %v20141_v30 = vld [vmem:[#allocation74_spill] sm:$0xff] }
 0x5c5   : > { %v11402_v40 = vadd.f32 %v11401_v62, %v11400_v54  ;;  %v11407_v53 = vrot.slane %v11406_v12, 1  ;;  %v11410_v39 = vadd.f32 %v11409_v34, %v10896_v25  ;;  %v11790_v6 = vmul.f32 0.125, %v11396_v47 }
 0x5c6   : > { %v12195_v0 = vunpack.c.l.b16 %v11916_v11  ;;  %v10897_v21 = vmax.f32 %v10769_v17, 0.0  ;;  %v10770_v37 = vadd.f32 %v10642_v10, %v20140_v51  ;;  %v11917_v60 = vpack.c.bf16 %v11789_v56, %v11789_v56 }
 0x5c7   : > { %v11791_v38 = vmul.f32 0.125, %v11402_v40  ;;  %v11408_v35 = vadd.f32 %v11407_v53, %v11406_v12  ;;  %v11411_v22 = vrot.slane %v11410_v39, 2  ;;  %v11918_v16 = vpack.c.bf16 %v11790_v6, %v11790_v6  ;;  %v10364_v15 = vpop.f32.mrb[160].mxu1  ;;  %v20142_v40 = vld [vmem:[#allocation75_spill] sm:$0xff] }
 0x5c8   : > { %v11415_v14 = vrot.slane %v10897_v21, 4  ;;  %v10898_v29 = vmax.f32 %v10770_v37, 0.0  ;;  %v12318_v20 = vsel %vm12259_vm6, %v12192_v31, %v12317_v5  ;;  %v12196_v9 = vunpack.c.l.b16 %v11917_v60  ;;  %v10366_v42 = vpop.f32.mrb[161].mxu1 }
 0x5c9   : > { %v11919_v63 = vpack.c.bf16 %v11791_v38, %v11791_v38  ;;  %v11792_v28 = vmul.f32 0.125, %v11408_v35  ;;  %v11412_v27 = vadd.f32 %v11411_v22, %v11410_v39  ;;  %v12197_v55 = vunpack.c.l.b16 %v11918_v16  ;;  %v10367_v44 = vpop.f32.mrb[162].mxu1 }
 0x5ca   : > { %v11416_v32 = vadd.f32 %v11415_v14, %v10897_v21  ;;  %v11421_v52 = vrot.slane %v10898_v29, 4  ;;  %v10643_v54 = vadd.f32 %v19233_v24, %v10364_v15  ;;  %v12321_v25 = vsel %vm12251_vm2, %v12196_v9, %v12195_v0  ;;  %v10369_v19 = vpop.f32.mrb[163].mxu1 }
 0x5cb   : > { %v12198_v36 = vunpack.c.l.b16 %v11919_v63  ;;  %v11920_v49 = vpack.c.bf16 %v11792_v28, %v11792_v28  ;;  %v11413_v58 = vrot.slane %v11412_v27, 1  ;;  %v12322_v23 = vsel %vm12253_vm3, %v12197_v55, %v12321_v25 }
 0x5cc   : > { %v11417_v31 = vrot.slane %v11416_v32, 2  ;;  %v11422_v5 = vadd.f32 %v11421_v52, %v10898_v29  ;;  %v10771_v62 = vadd.f32 %v10643_v54, %v20141_v30  ;;  %v10644_v61 = vadd.f32 %v19233_v24, %v10367_v44  ;;  %v20144_v54 = vld [vmem:[#allocation77_spill] sm:$0xff] }
 0x5cd   : > { %v12199_v12 = vunpack.c.l.b16 %v11920_v49  ;;  %v11414_v34 = vadd.f32 %v11413_v58, %v11412_v27  ;;  %v12319_v11 = vsel %vm12261_vm7, %v19259_v33, %v12318_v20  ;;  %v12323_v39 = vsel %vm12255_vm4, %v12198_v36, %v12322_v23  ;;  %v20143_v20 = vld [vmem:[#allocation76_spill] sm:$0xff] }
 0x5ce   : > { %v11418_v47 = vadd.f32 %v11417_v31, %v11416_v32  ;;  %v11423_v3 = vrot.slane %v11422_v5, 2  ;;  %v10899_v17 = vmax.f32 %v10771_v62, 0.0  ;;  %v19279_v10 = vsel %vm12263_vm8, %v12194_v48, %v12319_v11 }
 0x5cf   : > { %v11793_v56 = vmul.f32 0.125, %v11414_v34  ;;  %v10772_v53 = vadd.f32 %v10644_v61, %v20142_v40  ;;  %v10372_v51 = vpop.f32.mrb[164].mxu1  ;;  %v12324_v37 = vsel %vm12257_vm5, %v12199_v12, %v12323_v39 }
 0x5d0   : > { %v11419_v0 = vrot.slane %v11418_v47, 1  ;;  %v11424_v6 = vadd.f32 %v11423_v3, %v11422_v5  ;;  %v11427_v21 = vrot.slane %v10899_v17, 4  ;;  %v10645_v33 = vadd.f32 %v19233_v24, %v10372_v51  ;;  %v10374_v35 = vpop.f32.mrb[165].mxu1  ;;  %v20145_v51 = vld [vmem:[#allocation78_spill] sm:$0xff] }
 0x5d1   : > { %v11921_v60 = vpack.c.bf16 %v11793_v56, %v11793_v56  ;;  %v10900_v38 = vmax.f32 %v10772_v53, 0.0  ;;  %v10375_v14 = vpop.f32.mrb[166].mxu1 }
 0x5d2   : > { %v11420_v22 = vadd.f32 %v11419_v0, %v11418_v47  ;;  %v11425_v16 = vrot.slane %v11424_v6, 1  ;;  %v11428_v48 = vadd.f32 %v11427_v21, %v10899_v17  ;;  %v10773_v9 = vadd.f32 %v10645_v33, %v20143_v20  ;;  %v10377_v28 = vpop.f32.mrb[167].mxu1 }
 0x5d3   : > { %v12200_v29 = vunpack.c.l.b16 %v11921_v60  ;;  %v11433_v15 = vrot.slane %v10900_v38, 4  ;;  %v10646_v63 = vadd.f32 %v19233_v24, %v10375_v14 }
 0x5d4   : > { %v11794_v27 = vmul.f32 0.125, %v11420_v22  ;;  %v11426_v42 = vadd.f32 %v11425_v16, %v11424_v6  ;;  %v11429_v55 = vrot.slane %v11428_v48, 2  ;;  %v10901_v52 = vmax.f32 %v10773_v9, 0.0 }
 0x5d5   : > { %v11434_v32 = vadd.f32 %v11433_v15, %v10900_v38  ;;  %v10774_v44 = vadd.f32 %v10646_v63, %v20144_v54  ;;  %v12325_v25 = vsel %vm12259_vm6, %v12200_v29, %v12324_v37  ;;  %v20146_v29 = vld [vmem:[#allocation79_spill] sm:$0xff] }
 0x5d6   : > { %v11922_v36 = vpack.c.bf16 %v11794_v27, %v11794_v27  ;;  %v11795_v49 = vmul.f32 0.125, %v11426_v42  ;;  %v11430_v58 = vadd.f32 %v11429_v55, %v11428_v48  ;;  %v11439_v23 = vrot.slane %v10901_v52, 4 }
 0x5d7   : > { %v11435_v19 = vrot.slane %v11434_v32, 2  ;;  %v10902_v31 = vmax.f32 %v10774_v44, 0.0 }
 0x5d8   : > { %v12201_v5 = vunpack.c.l.b16 %v11922_v36  ;;  %v11431_v30 = vrot.slane %v11430_v58, 1  ;;  %v11923_v62 = vpack.c.bf16 %v11795_v49, %v11795_v49  ;;  %v11440_v34 = vadd.f32 %v11439_v23, %v10901_v52  ;;  %v10380_v11 = vpop.f32.mrb[168].mxu1 }
 0x5d9   : > { %v11436_v12 = vadd.f32 %v11435_v19, %v11434_v32  ;;  %v11445_v61 = vrot.slane %v10902_v31, 4  ;;  %v10647_v3 = vadd.f32 %v19233_v24, %v10380_v11  ;;  %v10382_v17 = vpop.f32.mrb[169].mxu1 }
 0x5da   : > { %v11432_v47 = vadd.f32 %v11431_v30, %v11430_v58  ;;  %v12202_v56 = vunpack.c.l.b16 %v11923_v62  ;;  %v12326_v40 = vsel %vm12261_vm7, %v12201_v5, %v12325_v25  ;;  %v11441_v39 = vrot.slane %v11440_v34, 2  ;;  %v10383_v6 = vpop.f32.mrb[170].mxu1  ;;  %v20147_v62 = vld [vmem:[#allocation80_spill] sm:$0xff] }
 0x5db   : > { %v11437_v53 = vrot.slane %v11436_v12, 1  ;;  %v11446_v0 = vadd.f32 %v11445_v61, %v10902_v31  ;;  %v10775_v37 = vadd.f32 %v10647_v3, %v20145_v51  ;;  %v10648_v60 = vadd.f32 %v19233_v24, %v10383_v6  ;;  %v10385_v38 = vpop.f32.mrb[171].mxu1 }
 0x5dc   : > { %v11796_v21 = vmul.f32 0.125, %v11432_v47  ;;  %v12327_v33 = vsel %vm12263_vm8, %v12202_v56, %v12326_v40  ;;  %v11442_v22 = vadd.f32 %v11441_v39, %v11440_v34 }
 0x5dd   : > { %v11438_v35 = vadd.f32 %v11437_v53, %v11436_v12  ;;  %v11447_v16 = vrot.slane %v11446_v0, 2  ;;  %v12374_v48 = vpack.c.b16 %v12327_v33, %v19279_v10  ;;  %v10903_v14 = vmax.f32 %v10775_v37, 0.0  ;;  %v20148_v53 = vld [vmem:[#allocation81_spill] sm:$0xff] }
 0x5de   : > { %v10776_v15 = vadd.f32 %v10648_v60, %v20146_v29  ;;  %v11924_v20 = vpack.c.bf16 %v11796_v21, %v11796_v21  ;;  %v11443_v63 = vrot.slane %v11442_v22, 1 }
 0x5df   : > { %v11797_v9 = vmul.f32 0.125, %v11438_v35  ;;  %v11448_v28 = vadd.f32 %v11447_v16, %v11446_v0  ;;  %15110 = vmatprep.mubr.bf16.mxu1 %v12374_v48  ;;  %v11451_v27 = vrot.slane %v10903_v14, 4 }
 0x5e0   : > { %v10904_v42 = vmax.f32 %v10776_v15, 0.0  ;;  %v11444_v32 = vadd.f32 %v11443_v63, %v11442_v22  ;;  %v10388_v54 = vpop.f32.mrb[172].mxu1  ;;  %v12203_v10 = vunpack.c.l.b16 %v11924_v20 }
 0x5e1   : > { %v11925_v55 = vpack.c.bf16 %v11797_v9, %v11797_v9  ;;  %v11449_v52 = vrot.slane %v11448_v28, 1  ;;  %v11452_v44 = vadd.f32 %v11451_v27, %v10903_v14  ;;  %v10649_v36 = vadd.f32 %v19233_v24, %v10388_v54  ;;  %v10390_v49 = vpop.f32.mrb[173].mxu1 }
 0x5e2   : > { %v11457_v25 = vrot.slane %v10904_v42, 4  ;;  %v11798_v19 = vmul.f32 0.125, %v11444_v32  ;;  %v10391_v31 = vpop.f32.mrb[174].mxu1  ;;  %v20149_v32 = vld [vmem:[#allocation82_spill] sm:$0xff] }
 0x5e3   : > { %v12204_v58 = vunpack.c.l.b16 %v11925_v55  ;;  %v11450_v23 = vadd.f32 %v11449_v52, %v11448_v28  ;;  %v11453_v5 = vrot.slane %v11452_v44, 2  ;;  %v10777_v12 = vadd.f32 %v10649_v36, %v20147_v62  ;;  %v10393_v61 = vpop.f32.mrb[175].mxu1  ;;  %v19311_v62 = vld [vmem:[%s19540_s8] ss:$0 sm:$0xff] }
 0x5e4   : > { %v11458_v30 = vadd.f32 %v11457_v25, %v10904_v42  ;;  %v10650_v34 = vadd.f32 %v19233_v24, %v10391_v31  ;;  %v11926_v47 = vpack.c.bf16 %v11798_v19, %v11798_v19 }
 0x5e5   : > { %v12328_v11 = vsel %vm12251_vm2, %v12204_v58, %v12203_v10  ;;  %v11799_v3 = vmul.f32 0.125, %v11450_v23  ;;  %v11454_v17 = vadd.f32 %v11453_v5, %v11452_v44  ;;  %v10905_v40 = vmax.f32 %v10777_v12, 0.0  ;;  %v20150_v58 = vld [vmem:[#allocation83_spill] sm:$0xff] }
 0x5e6   : > { %v11459_v56 = vrot.slane %v11458_v30, 2  ;;  %v10778_v39 = vadd.f32 %v10650_v34, %v20148_v53  ;;  %v12205_v0 = vunpack.c.l.b16 %v11926_v47 }
 0x5e7   : > { %v11927_v6 = vpack.c.bf16 %v11799_v3, %v11799_v3  ;;  %v11455_v21 = vrot.slane %v11454_v17, 1  ;;  %v11463_v37 = vrot.slane %v10905_v40, 4 }
 0x5e8   : > { %v11460_v51 = vadd.f32 %v11459_v56, %v11458_v30  ;;  %v10906_v60 = vmax.f32 %v10778_v39, 0.0  ;;  %v12329_v38 = vsel %vm12253_vm3, %v12205_v0, %v12328_v11  ;;  %v10396_v35 = vpop.f32.mrb[176].mxu1 }
 0x5e9   : > { %v12206_v33 = vunpack.c.l.b16 %v11927_v6  ;;  %v11456_v22 = vadd.f32 %v11455_v21, %v11454_v17  ;;  %v11464_v48 = vadd.f32 %v11463_v37, %v10905_v40  ;;  %v10398_v29 = vpop.f32.mrb[177].mxu1  ;;  %v10651_v20 = vadd.f32 %v19233_v24, %v10396_v35 }
 0x5ea   : > { %v11461_v16 = vrot.slane %v11460_v51, 1  ;;  %v11469_v14 = vrot.slane %v10906_v60, 4  ;;  %v10399_v9 = vpop.f32.mrb[178].mxu1 }
 0x5eb   : > { %v12330_v15 = vsel %vm12255_vm4, %v12206_v33, %v12329_v38  ;;  %v11800_v63 = vmul.f32 0.125, %v11456_v22  ;;  %v11465_v27 = vrot.slane %v11464_v48, 2  ;;  %v10401_v55 = vpop.f32.mrb[179].mxu1  ;;  %v10779_v52 = vadd.f32 %v10651_v20, %v20149_v32 }
 0x5ec   : > { %v11462_v28 = vadd.f32 %v11461_v16, %v11460_v51  ;;  %v11470_v42 = vadd.f32 %v11469_v14, %v10906_v60  ;;  %v10652_v54 = vadd.f32 %v19233_v24, %v10399_v9  ;;  %v20151_v14 = vld [vmem:[#allocation84_spill] sm:$0xff] }
 0x5ed   : > { %v11928_v44 = vpack.c.bf16 %v11800_v63, %v11800_v63  ;;  %v11466_v36 = vadd.f32 %v11465_v27, %v11464_v48  ;;  %v10907_v10 = vmax.f32 %v10779_v52, 0.0 }
 0x5ee   : > { %v11801_v25 = vmul.f32 0.125, %v11462_v28  ;;  %v11471_v49 = vrot.slane %v11470_v42, 2  ;;  %v10780_v19 = vadd.f32 %v10652_v54, %v20150_v58  ;;  %v20152_v28 = vld [vmem:[#allocation85_spill] sm:$0xff] }
 0x5ef   : > { %v12207_v23 = vunpack.c.l.b16 %v11928_v44  ;;  %v11467_v5 = vrot.slane %v11466_v36, 1  ;;  %v11475_v12 = vrot.slane %v10907_v10, 4 }
 0x5f0   : > { %v11929_v31 = vpack.c.bf16 %v11801_v25, %v11801_v25  ;;  %v11472_v30 = vadd.f32 %v11471_v49, %v11470_v42  ;;  %v10908_v34 = vmax.f32 %v10780_v19, 0.0  ;;  %v10404_v61 = vpop.f32.mrb[180].mxu1 }
 0x5f1   : > { %v12331_v11 = vsel %vm12257_vm5, %v12207_v23, %v12330_v15  ;;  %v11468_v3 = vadd.f32 %v11467_v5, %v11466_v36  ;;  %v10406_v56 = vpop.f32.mrb[181].mxu1  ;;  %v15104_v40 = vpop.f32.mrb[0].mxu0  ;;  %v11476_v53 = vadd.f32 %v11475_v12, %v10907_v10  ;;  %v10653_v0 = vadd.f32 %v19233_v24, %v10404_v61 }
 0x5f2   : > { %v12208_v47 = vunpack.c.l.b16 %v11929_v31  ;;  %v11473_v17 = vrot.slane %v11472_v30, 1  ;;  %v11481_v39 = vrot.slane %v10908_v34, 4  ;;  %v12477_v6 = vadd.f32 %v15104_v40, %v19311_v62  ;;  %v10407_v21 = vpop.f32.mrb[182].mxu1  ;;  %v12468_v51 = vpop.f32.mrb[1].mxu0 }
 0x5f3   : > { %v11802_v60 = vmul.f32 0.125, %v11468_v3  ;;  %v10654_v33 = vadd.f32 %v19233_v24, %v10407_v21  ;;  %v10409_v35 = vpop.f32.mrb[183].mxu1  ;;  %v15105_v22 = vpop.f32.mrb[2].mxu0  ;;  %v11477_v16 = vrot.slane %v11476_v53, 2  ;;  %v10781_v29 = vadd.f32 %v10653_v0, %v20151_v14 }
 0x5f4   : > { %v12332_v37 = vsel %vm12259_vm6, %v12208_v47, %v12331_v11  ;;  %v11474_v38 = vadd.f32 %v11473_v17, %v11472_v30  ;;  %v11482_v48 = vadd.f32 %v11481_v39, %v10908_v34  ;;  %12533 = vst [vmem:[%s19319_s24 + $0x10] sm:$0xff] %v12477_v6  ;;  %v12469_v15 = vadd.f32 %v19311_v62, %v12468_v51  ;;  %v12471_v20 = vpop.f32.mrb[3].mxu0  ;;  %v20153_v39 = vld [vmem:[#allocation86_spill] sm:$0xff] }
 0x5f5   : > { %v11930_v9 = vpack.c.bf16 %v11802_v60, %v11802_v60  ;;  %v10782_v27 = vadd.f32 %v10654_v33, %v20152_v28  ;;  %v12480_v42 = vadd.f32 %v15105_v22, %v19311_v62  ;;  %v11478_v55 = vadd.f32 %v11477_v16, %v11476_v53  ;;  %v20154_v22 = vld [vmem:[#allocation87_spill] sm:$0xff] }
 0x5f6   : > { %v11803_v63 = vmul.f32 0.125, %v11474_v38  ;;  %v11483_v32 = vrot.slane %v11482_v48, 2  ;;  %v10909_v52 = vmax.f32 %v10781_v29, 0.0  ;;  %12531 = vst [vmem:[%s19319_s24] sm:$0xff] %v12469_v15  ;;  %v12472_v54 = vadd.f32 %v19311_v62, %v12471_v20 }
 0x5f7   : > { %v12209_v44 = vunpack.c.l.b16 %v11930_v9  ;;  %v10910_v36 = vmax.f32 %v10782_v27, 0.0  ;;  %12534 = vst [vmem:[%s19319_s24 + $0x18] sm:$0xff] %v12480_v42  ;;  %v11479_v49 = vrot.slane %v11478_v55, 1 }
 0x5f8   : > { %v11931_v25 = vpack.c.bf16 %v11803_v63, %v11803_v63  ;;  %v11484_v10 = vadd.f32 %v11483_v32, %v11482_v48  ;;  %v11487_v58 = vrot.slane %v10909_v52, 4  ;;  %12532 = vst [vmem:[%s19319_s24 + $0x8] sm:$0xff] %v12472_v54 }
 0x5f9   : > { %v12333_v19 = vsel %vm12261_vm7, %v12209_v44, %v12332_v37  ;;  %v11493_v31 = vrot.slane %v10910_v36, 4  ;;  %v10412_v5 = vpop.f32.mrb[184].mxu1  ;;  %v11480_v30 = vadd.f32 %v11479_v49, %v11478_v55 }
 0x5fa   : > { %v12210_v23 = vunpack.c.l.b16 %v11931_v25  ;;  %v11485_v12 = vrot.slane %v11484_v10, 1  ;;  %v11488_v34 = vadd.f32 %v11487_v58, %v10909_v52  ;;  %v10655_v61 = vadd.f32 %v19233_v24, %v10412_v5  ;;  %v10414_v11 = vpop.f32.mrb[185].mxu1 }
 0x5fb   : > { %v11494_v3 = vadd.f32 %v11493_v31, %v10910_v36  ;;  %v10415_v17 = vpop.f32.mrb[186].mxu1  ;;  %v11804_v56 = vmul.f32 0.125, %v11480_v30 }
 0x5fc   : > { %v19332_v47 = vsel %vm12263_vm8, %v12210_v23, %v12333_v19  ;;  %v11486_v40 = vadd.f32 %v11485_v12, %v11484_v10  ;;  %v11489_v53 = vrot.slane %v11488_v34, 2  ;;  %v10783_v0 = vadd.f32 %v10655_v61, %v20153_v39  ;;  %v10417_v6 = vpop.f32.mrb[187].mxu1  ;;  %v20155_v10 = vld [vmem:[#allocation88_spill] sm:$0xff] }
 0x5fd   : > { %v11495_v21 = vrot.slane %v11494_v3, 2  ;;  %v10656_v51 = vadd.f32 %v19233_v24, %v10415_v17  ;;  %v11932_v37 = vpack.c.bf16 %v11804_v56, %v11804_v56 }
 0x5fe   : > { %v11805_v60 = vmul.f32 0.125, %v11486_v40  ;;  %v11490_v38 = vadd.f32 %v11489_v53, %v11488_v34  ;;  %v10911_v33 = vmax.f32 %v10783_v0, 0.0 }
 0x5ff   : > { %v11496_v35 = vadd.f32 %v11495_v21, %v11494_v3  ;;  %v10784_v16 = vadd.f32 %v10656_v51, %v20154_v22  ;;  %v12211_v15 = vunpack.c.l.b16 %v11932_v37  ;;  %v20156_v3 = vld [vmem:[#allocation89_spill] sm:$0xff] }
 0x600   : > { %v11933_v48 = vpack.c.bf16 %v11805_v60, %v11805_v60  ;;  %v11491_v14 = vrot.slane %v11490_v38, 1  ;;  %v11499_v29 = vrot.slane %v10911_v33, 4 }
 0x601   : > { %v11497_v20 = vrot.slane %v11496_v35, 1  ;;  %v10912_v9 = vmax.f32 %v10784_v16, 0.0  ;;  %v10420_v63 = vpop.f32.mrb[188].mxu1 }
 0x602   : > { %v12212_v28 = vunpack.c.l.b16 %v11933_v48  ;;  %v11492_v27 = vadd.f32 %v11491_v14, %v11490_v38  ;;  %v11500_v42 = vadd.f32 %v11499_v29, %v10911_v33  ;;  %v10657_v55 = vadd.f32 %v19233_v24, %v10420_v63  ;;  %v10422_v32 = vpop.f32.mrb[189].mxu1 }
 0x603   : > { %v11498_v52 = vadd.f32 %v11497_v20, %v11496_v35  ;;  %v11505_v54 = vrot.slane %v10912_v9, 4  ;;  %v10423_v44 = vpop.f32.mrb[190].mxu1 }
 0x604   : > { %v12335_v25 = vsel %vm12251_vm2, %v12212_v28, %v12211_v15  ;;  %v11806_v36 = vmul.f32 0.125, %v11492_v27  ;;  %v11501_v49 = vrot.slane %v11500_v42, 2  ;;  %v10785_v58 = vadd.f32 %v10657_v55, %v20155_v10  ;;  %v10425_v19 = vpop.f32.mrb[191].mxu1  ;;  %v20157_v15 = vld [vmem:[#allocation90_spill] sm:$0xff] }
 0x605   : > { %v11807_v23 = vmul.f32 0.125, %v11498_v52  ;;  %v11506_v31 = vadd.f32 %v11505_v54, %v10912_v9  ;;  %v10658_v5 = vadd.f32 %v19233_v24, %v10423_v44  ;;  %v20158_v52 = vld [vmem:[#allocation91_spill] sm:$0xff] }
 0x606   : > { %v11934_v30 = vpack.c.bf16 %v11806_v36, %v11806_v36  ;;  %v11502_v12 = vadd.f32 %v11501_v49, %v11500_v42  ;;  %v10913_v34 = vmax.f32 %v10785_v58, 0.0 }
 0x607   : > { %v11935_v61 = vpack.c.bf16 %v11807_v23, %v11807_v23  ;;  %v11507_v11 = vrot.slane %v11506_v31, 2  ;;  %v10786_v17 = vadd.f32 %v10658_v5, %v20156_v3 }
 0x608   : > { %v12213_v56 = vunpack.c.l.b16 %v11934_v30  ;;  %v11503_v40 = vrot.slane %v11502_v12, 1  ;;  %v11511_v53 = vrot.slane %v10913_v34, 4 }
 0x609   : > { %v12214_v39 = vunpack.c.l.b16 %v11935_v61  ;;  %v11508_v0 = vadd.f32 %v11507_v11, %v11506_v31  ;;  %v10914_v6 = vmax.f32 %v10786_v17, 0.0  ;;  %v10428_v21 = vpop.f32.mrb[192].mxu1 }
 0x60a   : > { %v12336_v51 = vsel %vm12253_vm3, %v12213_v56, %v12335_v25  ;;  %v11504_v37 = vadd.f32 %v11503_v40, %v11502_v12  ;;  %v11512_v60 = vadd.f32 %v11511_v53, %v10913_v34  ;;  %v10659_v38 = vadd.f32 %v19233_v24, %v10428_v21  ;;  %v10430_v33 = vpop.f32.mrb[193].mxu1 }
 0x60b   : > { %v12337_v35 = vsel %vm12255_vm4, %v12214_v39, %v12336_v51  ;;  %v11509_v22 = vrot.slane %v11508_v0, 1  ;;  %v11517_v16 = vrot.slane %v10914_v6, 4  ;;  %v10431_v48 = vpop.f32.mrb[194].mxu1 }
 0x60c   : > { %v11808_v14 = vmul.f32 0.125, %v11504_v37  ;;  %v11513_v29 = vrot.slane %v11512_v60, 2  ;;  %v10787_v20 = vadd.f32 %v10659_v38, %v20157_v15  ;;  %v10660_v9 = vadd.f32 %v19233_v24, %v10431_v48  ;;  %v10433_v63 = vpop.f32.mrb[195].mxu1  ;;  %v20159_v37 = vld [vmem:[#allocation92_spill] sm:$0xff] }
 0x60d   : > { %v11510_v28 = vadd.f32 %v11509_v22, %v11508_v0  ;;  %v11518_v27 = vadd.f32 %v11517_v16, %v10914_v6  ;;  %v20160_v22 = vld [vmem:[#allocation93_spill] sm:$0xff] }
 0x60e   : > { %v11936_v42 = vpack.c.bf16 %v11808_v14, %v11808_v14  ;;  %v11514_v55 = vadd.f32 %v11513_v29, %v11512_v60  ;;  %v10915_v32 = vmax.f32 %v10787_v20, 0.0  ;;  %v10788_v54 = vadd.f32 %v10660_v9, %v20158_v52 }
 0x60f   : > { %v11809_v44 = vmul.f32 0.125, %v11510_v28  ;;  %v11519_v25 = vrot.slane %v11518_v27, 2 }
 0x610   : > { %v12215_v36 = vunpack.c.l.b16 %v11936_v42  ;;  %v11515_v49 = vrot.slane %v11514_v55, 1  ;;  %v11523_v10 = vrot.slane %v10915_v32, 4  ;;  %v10916_v58 = vmax.f32 %v10788_v54, 0.0 }
 0x611   : > { %v11937_v19 = vpack.c.bf16 %v11809_v44, %v11809_v44  ;;  %v11520_v23 = vadd.f32 %v11519_v25, %v11518_v27  ;;  %v10436_v31 = vpop.f32.mrb[196].mxu1 }
 0x612   : > { %v12338_v5 = vsel %vm12257_vm5, %v12215_v36, %v12337_v35  ;;  %v11516_v30 = vadd.f32 %v11515_v49, %v11514_v55  ;;  %v11524_v12 = vadd.f32 %v11523_v10, %v10915_v32  ;;  %v11529_v34 = vrot.slane %v10916_v58, 4  ;;  %v10438_v61 = vpop.f32.mrb[197].mxu1 }
 0x613   : > { %v12216_v11 = vunpack.c.l.b16 %v11937_v19  ;;  %v11521_v3 = vrot.slane %v11520_v23, 1  ;;  %v10661_v17 = vadd.f32 %v19233_v24, %v10436_v31  ;;  %v10439_v56 = vpop.f32.mrb[198].mxu1 }
 0x614   : > { %v11810_v40 = vmul.f32 0.125, %v11516_v30  ;;  %v11525_v53 = vrot.slane %v11524_v12, 2  ;;  %v11530_v39 = vadd.f32 %v11529_v34, %v10916_v58  ;;  %v10662_v0 = vadd.f32 %v19233_v24, %v10439_v56  ;;  %v10441_v6 = vpop.f32.mrb[199].mxu1 }
 0x615   : > { %v12339_v21 = vsel %vm12259_vm6, %v12216_v11, %v12338_v5  ;;  %v11522_v51 = vadd.f32 %v11521_v3, %v11520_v23  ;;  %v10789_v60 = vadd.f32 %v10661_v17, %v20159_v37 }
 0x616   : > { %v11938_v38 = vpack.c.bf16 %v11810_v40, %v11810_v40  ;;  %v11526_v33 = vadd.f32 %v11525_v53, %v11524_v12  ;;  %v11531_v35 = vrot.slane %v11530_v39, 2  ;;  %v10790_v16 = vadd.f32 %v10662_v0, %v20160_v22  ;;  %v20161_v12 = vld [vmem:[#allocation94_spill] sm:$0xff]  ;;  %v20162_v53 = vld [vmem:[#allocation95_spill] sm:$0xff] }
 0x617   : > { %v11811_v48 = vmul.f32 0.125, %v11522_v51  ;;  %v10917_v14 = vmax.f32 %v10789_v60, 0.0 }
 0x618   : > { %v12217_v29 = vunpack.c.l.b16 %v11938_v38  ;;  %v11527_v15 = vrot.slane %v11526_v33, 1  ;;  %v11532_v20 = vadd.f32 %v11531_v35, %v11530_v39  ;;  %v10918_v9 = vmax.f32 %v10790_v16, 0.0 }
 0x619   : > { %v11939_v63 = vpack.c.bf16 %v11811_v48, %v11811_v48  ;;  %v11535_v28 = vrot.slane %v10917_v14, 4  ;;  %v10444_v27 = vpop.f32.mrb[200].mxu1 }
 0x61a   : > { %v12340_v42 = vsel %vm12261_vm7, %v12217_v29, %v12339_v21  ;;  %v11528_v55 = vadd.f32 %v11527_v15, %v11526_v33  ;;  %v11533_v32 = vrot.slane %v11532_v20, 1  ;;  %v11541_v52 = vrot.slane %v10918_v9, 4  ;;  %v10446_v54 = vpop.f32.mrb[201].mxu1 }
 0x61b   : > { %v12218_v44 = vunpack.c.l.b16 %v11939_v63  ;;  %v11536_v25 = vadd.f32 %v11535_v28, %v10917_v14  ;;  %v10663_v36 = vadd.f32 %v19233_v24, %v10444_v27  ;;  %v10447_v49 = vpop.f32.mrb[202].mxu1 }
 0x61c   : > { %v11812_v10 = vmul.f32 0.125, %v11528_v55  ;;  %v11534_v58 = vadd.f32 %v11533_v32, %v11532_v20  ;;  %v11542_v19 = vadd.f32 %v11541_v52, %v10918_v9  ;;  %v10664_v23 = vadd.f32 %v19233_v24, %v10447_v49  ;;  %v10449_v31 = vpop.f32.mrb[203].mxu1  ;;  %v20163_v9 = vld [vmem:[#allocation96_spill] sm:$0xff] }
 0x61d   : > { %v12341_v5 = vsel %vm12263_vm8, %v12218_v44, %v12340_v42  ;;  %v11537_v30 = vrot.slane %v11536_v25, 2  ;;  %v10791_v34 = vadd.f32 %v10663_v36, %v20161_v12  ;;  %v20164_v44 = vld [vmem:[#allocation97_spill] sm:$0xff] }
 0x61e   : > { %v12375_v61 = vpack.c.b16 %v12341_v5, %v19332_v47  ;;  %v11940_v11 = vpack.c.bf16 %v11812_v10, %v11812_v10  ;;  %v11813_v3 = vmul.f32 0.125, %v11534_v58  ;;  %v11543_v17 = vrot.slane %v11542_v19, 2 }
 0x61f   : > { %v11538_v56 = vadd.f32 %v11537_v30, %v11536_v25  ;;  %v10919_v40 = vmax.f32 %v10791_v34, 0.0  ;;  %v10792_v39 = vadd.f32 %v10664_v23, %v20162_v53 }
 0x620   : > { %v11941_v0 = vpack.c.bf16 %v11813_v3, %v11813_v3  ;;  %v11544_v6 = vadd.f32 %v11543_v17, %v11542_v19  ;;  %15111 = vmatmul.mubr.bf16.vlgmr.msra.gmra.mrb[0].mxu1 %v12375_v61  ;;  %v12219_v38 = vunpack.c.l.b16 %v11940_v11 }
 0x621   : > { %v11539_v21 = vrot.slane %v11538_v56, 1  ;;  %v11547_v51 = vrot.slane %v10919_v40, 4  ;;  %v10920_v37 = vmax.f32 %v10792_v39, 0.0 }
 0x622   : > { %v10452_v60 = vpop.f32.mrb[204].mxu1  ;;  %v12220_v33 = vunpack.c.l.b16 %v11941_v0  ;;  %v11545_v35 = vrot.slane %v11544_v6, 1 }
 0x623   : > { %v10665_v22 = vadd.f32 %v19233_v24, %v10452_v60  ;;  %v10454_v47 = vpop.f32.mrb[205].mxu1  ;;  %v11540_v16 = vadd.f32 %v11539_v21, %v11538_v56  ;;  %v11548_v48 = vadd.f32 %v11547_v51, %v10919_v40  ;;  %v11553_v14 = vrot.slane %v10920_v37, 4  ;;  %v20165_v21 = vld [vmem:[#allocation98_spill] sm:$0xff] }
 0x624   : > { %v10455_v29 = vpop.f32.mrb[206].mxu1  ;;  %v12342_v15 = vsel %vm12251_vm2, %v12220_v33, %v12219_v38  ;;  %v11546_v20 = vadd.f32 %v11545_v35, %v11544_v6 }
 0x625   : > { %v10793_v63 = vadd.f32 %v10665_v22, %v20163_v9  ;;  %v10666_v28 = vadd.f32 %v19233_v24, %v10455_v29  ;;  %v10457_v27 = vpop.f32.mrb[207].mxu1  ;;  %v11814_v42 = vmul.f32 0.125, %v11540_v16  ;;  %v11549_v55 = vrot.slane %v11548_v48, 2 }
 0x626   : > { %v11554_v32 = vadd.f32 %v11553_v14, %v10920_v37  ;;  %v11815_v52 = vmul.f32 0.125, %v11546_v20  ;;  %v19372_v37 = vld [vmem:[%s19538_s6 + $0x1] ss:$0 sm:$0xff] }
 0x627   : > { %v10921_v54 = vmax.f32 %v10793_v63, 0.0  ;;  %v10794_v25 = vadd.f32 %v10666_v28, %v20164_v44  ;;  %v11942_v36 = vpack.c.bf16 %v11814_v42, %v11814_v42  ;;  %v11550_v49 = vadd.f32 %v11549_v55, %v11548_v48  ;;  %v20166_v48 = vld [vmem:[#allocation99_spill] sm:$0xff] }
 0x628   : > { %v11555_v10 = vrot.slane %v11554_v32, 2  ;;  %v11943_v58 = vpack.c.bf16 %v11815_v52, %v11815_v52 }
 0x629   : > { %v11559_v19 = vrot.slane %v10921_v54, 4  ;;  %v10922_v23 = vmax.f32 %v10794_v25, 0.0  ;;  %v12221_v31 = vunpack.c.l.b16 %v11942_v36  ;;  %v11551_v5 = vrot.slane %v11550_v49, 1 }
 0x62a   : > { %v11556_v30 = vadd.f32 %v11555_v10, %v11554_v32  ;;  %v10460_v12 = vpop.f32.mrb[208].mxu1  ;;  %v12222_v34 = vunpack.c.l.b16 %v11943_v58 }
 0x62b   : > { %v11560_v61 = vadd.f32 %v11559_v19, %v10921_v54  ;;  %v11565_v11 = vrot.slane %v10922_v23, 4  ;;  %v10667_v3 = vadd.f32 %v19233_v24, %v10460_v12  ;;  %v10462_v17 = vpop.f32.mrb[209].mxu1  ;;  %v12343_v56 = vsel %vm12253_vm3, %v12221_v31, %v12342_v15  ;;  %v20167_v12 = vld [vmem:[#allocation100_spill] sm:$0xff] }
 0x62c   : > { %v11552_v40 = vadd.f32 %v11551_v5, %v11550_v49  ;;  %v11557_v53 = vrot.slane %v11556_v30, 1  ;;  %v10463_v39 = vpop.f32.mrb[210].mxu1  ;;  %v12344_v35 = vsel %vm12255_vm4, %v12222_v34, %v12343_v56 }
 0x62d   : > { %v11561_v0 = vrot.slane %v11560_v61, 2  ;;  %v11566_v6 = vadd.f32 %v11565_v11, %v10922_v23  ;;  %v10795_v51 = vadd.f32 %v10667_v3, %v20165_v21  ;;  %v10668_v60 = vadd.f32 %v19372_v37, %v10463_v39  ;;  %v10465_v38 = vpop.f32.mrb[211].mxu1  ;;  %v20168_v39 = vld [vmem:[#allocation101_spill] sm:$0xff] }
 0x62e   : > { %v11816_v33 = vmul.f32 0.125, %v11552_v40  ;;  %v11558_v24 = vadd.f32 %v11557_v53, %v11556_v30 }
 0x62f   : > { %v11562_v22 = vadd.f32 %v11561_v0, %v11560_v61  ;;  %v11567_v47 = vrot.slane %v11566_v6, 2  ;;  %v10923_v16 = vmax.f32 %v10795_v51, 0.0  ;;  %v10796_v14 = vadd.f32 %v10668_v60, %v20166_v48 }
 0x630   : > { %v11944_v29 = vpack.c.bf16 %v11816_v33, %v11816_v33  ;;  %v11817_v15 = vmul.f32 0.125, %v11558_v24 }
 0x631   : > { %v11563_v20 = vrot.slane %v11562_v22, 1  ;;  %v11568_v9 = vadd.f32 %v11567_v47, %v11566_v6  ;;  %v11571_v63 = vrot.slane %v10923_v16, 4  ;;  %v10924_v28 = vmax.f32 %v10796_v14, 0.0 }
 0x632   : > { %v12223_v27 = vunpack.c.l.b16 %v11944_v29  ;;  %v11945_v42 = vpack.c.bf16 %v11817_v15, %v11817_v15  ;;  %v10468_v55 = vpop.f32.mrb[212].mxu1 }
 0x633   : > { %v11564_v32 = vadd.f32 %v11563_v20, %v11562_v22  ;;  %v11569_v52 = vrot.slane %v11568_v9, 1  ;;  %v11572_v54 = vadd.f32 %v11571_v63, %v10923_v16  ;;  %v11577_v44 = vrot.slane %v10924_v28, 4  ;;  %v10470_v25 = vpop.f32.mrb[213].mxu1 }
 0x634   : > { %v12224_v36 = vunpack.c.l.b16 %v11945_v42  ;;  %v10669_v49 = vadd.f32 %v19372_v37, %v10468_v55  ;;  %v10471_v10 = vpop.f32.mrb[214].mxu1  ;;  %v12345_v58 = vsel %vm12257_vm5, %v12223_v27, %v12344_v35 }
 0x635   : > { %v11818_v19 = vmul.f32 0.125, %v11564_v32  ;;  %v11570_v23 = vadd.f32 %v11569_v52, %v11568_v9  ;;  %v11573_v31 = vrot.slane %v11572_v54, 2  ;;  %v11578_v5 = vadd.f32 %v11577_v44, %v10924_v28  ;;  %v10473_v30 = vpop.f32.mrb[215].mxu1  ;;  %v20169_v28 = vld [vmem:[#allocation102_spill] sm:$0xff] }
 0x636   : > { %v10797_v34 = vadd.f32 %v10669_v49, %v20167_v12  ;;  %v10670_v61 = vadd.f32 %v19372_v37, %v10471_v10  ;;  %v12346_v11 = vsel %vm12259_vm6, %v12224_v36, %v12345_v58  ;;  %v20170_v49 = vld [vmem:[#allocation103_spill] sm:$0xff] }
 0x637   : > { %v11946_v3 = vpack.c.bf16 %v11818_v19, %v11818_v19  ;;  %v11819_v17 = vmul.f32 0.125, %v11570_v23  ;;  %v11574_v56 = vadd.f32 %v11573_v31, %v11572_v54  ;;  %v11579_v40 = vrot.slane %v11578_v5, 2 }
 0x638   : > { %v10925_v53 = vmax.f32 %v10797_v34, 0.0  ;;  %v10798_v0 = vadd.f32 %v10670_v61, %v20168_v39 }
 0x639   : > { %v12225_v6 = vunpack.c.l.b16 %v11946_v3  ;;  %v11575_v21 = vrot.slane %v11574_v56, 1  ;;  %v11580_v51 = vadd.f32 %v11579_v40, %v11578_v5  ;;  %v11947_v60 = vpack.c.bf16 %v11819_v17, %v11819_v17 }
 0x63a   : > { %v11583_v38 = vrot.slane %v10925_v53, 4  ;;  %v10926_v33 = vmax.f32 %v10798_v0, 0.0  ;;  %v10476_v24 = vpop.f32.mrb[216].mxu1 }
 0x63b   : > { %v11576_v35 = vadd.f32 %v11575_v21, %v11574_v56  ;;  %v11581_v22 = vrot.slane %v11580_v51, 1  ;;  %v10671_v47 = vadd.f32 %v19372_v37, %v10476_v24  ;;  %v10478_v16 = vpop.f32.mrb[217].mxu1  ;;  %v12226_v48 = vunpack.c.l.b16 %v11947_v60 }
 0x63c   : > { %v11584_v14 = vadd.f32 %v11583_v38, %v10925_v53  ;;  %v11589_v29 = vrot.slane %v10926_v33, 4  ;;  %v10479_v15 = vpop.f32.mrb[218].mxu1  ;;  %v12347_v20 = vsel %vm12261_vm7, %v12225_v6, %v12346_v11 }
 0x63d   : > { %v11820_v9 = vmul.f32 0.125, %v11576_v35  ;;  %v11582_v63 = vadd.f32 %v11581_v22, %v11580_v51  ;;  %v10799_v27 = vadd.f32 %v10671_v47, %v20169_v28  ;;  %v10672_v42 = vadd.f32 %v19372_v37, %v10479_v15  ;;  %v10481_v55 = vpop.f32.mrb[219].mxu1 }
 0x63e   : > { %v11585_v32 = vrot.slane %v11584_v14, 2  ;;  %v11590_v52 = vadd.f32 %v11589_v29, %v10926_v33  ;;  %v19388_v54 = vsel %vm12263_vm8, %v12226_v48, %v12347_v20  ;;  %v20171_v20 = vld [vmem:[#allocation104_spill] sm:$0xff] }
 0x63f   : > { %v11948_v44 = vpack.c.bf16 %v11820_v9, %v11820_v9  ;;  %v11821_v25 = vmul.f32 0.125, %v11582_v63  ;;  %v10927_v36 = vmax.f32 %v10799_v27, 0.0  ;;  %v10800_v10 = vadd.f32 %v10672_v42, %v20170_v49 }
 0x640   : > { %v11586_v58 = vadd.f32 %v11585_v32, %v11584_v14  ;;  %v11591_v19 = vrot.slane %v11590_v52, 2 }
 0x641   : > { %v11949_v23 = vpack.c.bf16 %v11821_v25, %v11821_v25  ;;  %v11595_v31 = vrot.slane %v10927_v36, 4  ;;  %v10928_v5 = vmax.f32 %v10800_v10, 0.0  ;;  %v12227_v34 = vunpack.c.l.b16 %v11948_v44  ;;  %v20172_v44 = vld [vmem:[#allocation105_spill] sm:$0xff] }
 0x642   : > { %v11587_v30 = vrot.slane %v11586_v58, 1  ;;  %v11592_v12 = vadd.f32 %v11591_v19, %v11590_v52 }
 0x643   : > { %v12228_v61 = vunpack.c.l.b16 %v11949_v23  ;;  %v11596_v11 = vadd.f32 %v11595_v31, %v10927_v36  ;;  %v11601_v3 = vrot.slane %v10928_v5, 4 }
 0x644   : > { %v11588_v17 = vadd.f32 %v11587_v30, %v11586_v58  ;;  %v11593_v56 = vrot.slane %v11592_v12, 1 }
 0x645   : > { %v12349_v40 = vsel %vm12251_vm2, %v12228_v61, %v12227_v34  ;;  %v11597_v53 = vrot.slane %v11596_v11, 2  ;;  %v11602_v39 = vadd.f32 %v11601_v3, %v10928_v5 }
 0x646   : > { %v11822_v0 = vmul.f32 0.125, %v11588_v17  ;;  %v11594_v6 = vadd.f32 %v11593_v56, %v11592_v12 }
 0x647   : > { %v11598_v21 = vadd.f32 %v11597_v53, %v11596_v11  ;;  %v11603_v51 = vrot.slane %v11602_v39, 2  ;;  %v10484_v33 = vpop.f32.mrb[220].mxu1 }
 0x648   : > { %v11950_v60 = vpack.c.bf16 %v11822_v0, %v11822_v0  ;;  %v11823_v38 = vmul.f32 0.125, %v11594_v6  ;;  %v10673_v22 = vadd.f32 %v19372_v37, %v10484_v33  ;;  %v10486_v47 = vpop.f32.mrb[221].mxu1 }
 0x649   : > { %v11599_v24 = vrot.slane %v11598_v21, 1  ;;  %v11604_v35 = vadd.f32 %v11603_v51, %v11602_v39  ;;  %v10487_v14 = vpop.f32.mrb[222].mxu1 }
 0x64a   : > { %v12229_v16 = vunpack.c.l.b16 %v11950_v60  ;;  %v11951_v48 = vpack.c.bf16 %v11823_v38, %v11823_v38  ;;  %v10801_v9 = vadd.f32 %v10673_v22, %v20171_v20  ;;  %v10674_v63 = vadd.f32 %v19372_v37, %v10487_v14  ;;  %v10489_v28 = vpop.f32.mrb[223].mxu1 }
 0x64b   : > { %v11600_v29 = vadd.f32 %v11599_v24, %v11598_v21  ;;  %v11605_v15 = vrot.slane %v11604_v35, 1 }
 0x64c   : > { %v12350_v27 = vsel %vm12253_vm3, %v12229_v16, %v12349_v40  ;;  %v12230_v42 = vunpack.c.l.b16 %v11951_v48  ;;  %v10929_v52 = vmax.f32 %v10801_v9, 0.0  ;;  %v10802_v25 = vadd.f32 %v10674_v63, %v20172_v44 }
 0x64d   : > { %v11824_v55 = vmul.f32 0.125, %v11600_v29  ;;  %v11606_v32 = vadd.f32 %v11605_v15, %v11604_v35 }
 0x64e   : > { %v12351_v36 = vsel %vm12255_vm4, %v12230_v42, %v12350_v27  ;;  %v11607_v58 = vrot.slane %v10929_v52, 4  ;;  %v10930_v19 = vmax.f32 %v10802_v25, 0.0 }
 0x64f   : > { %v11952_v49 = vpack.c.bf16 %v11824_v55, %v11824_v55  ;;  %v11825_v10 = vmul.f32 0.125, %v11606_v32  ;;  %v10492_v23 = vpop.f32.mrb[224].mxu1 }
 0x650   : > { %v11608_v30 = vadd.f32 %v11607_v58, %v10929_v52  ;;  %v11613_v12 = vrot.slane %v10930_v19, 4  ;;  %v10494_v34 = vpop.f32.mrb[225].mxu1  ;;  %v10675_v61 = vadd.f32 %v19372_v37, %v10492_v23 }
 0x651   : > { %v12231_v31 = vunpack.c.l.b16 %v11952_v49  ;;  %v11953_v5 = vpack.c.bf16 %v11825_v10, %v11825_v10  ;;  %v10495_v11 = vpop.f32.mrb[226].mxu1  ;;  %v20173_v49 = vld [vmem:[#allocation106_spill] sm:$0xff] }
 0x652   : > { %v11609_v17 = vrot.slane %v11608_v30, 2  ;;  %v11614_v56 = vadd.f32 %v11613_v12, %v10930_v19  ;;  %v10676_v40 = vadd.f32 %v19372_v37, %v10495_v11  ;;  %v10497_v53 = vpop.f32.mrb[227].mxu1  ;;  %v10803_v39 = vadd.f32 %v10675_v61, %v18469_v2 }
 0x653   : > { %v12232_v3 = vunpack.c.l.b16 %v11953_v5  ;;  %v12352_v0 = vsel %vm12257_vm5, %v12231_v31, %v12351_v36 }
 0x654   : > { %v11610_v6 = vadd.f32 %v11609_v17, %v11608_v30  ;;  %v11615_v21 = vrot.slane %v11614_v56, 2  ;;  %v10804_v51 = vadd.f32 %v10676_v40, %v18471_v26  ;;  %v10931_v38 = vmax.f32 %v10803_v39, 0.0 }
 0x655   : > { %v12353_v60 = vsel %vm12259_vm6, %v12232_v3, %v12352_v0 }
 0x656   : > { %v11611_v33 = vrot.slane %v11610_v6, 1  ;;  %v11616_v24 = vadd.f32 %v11615_v21, %v11614_v56  ;;  %v10932_v35 = vmax.f32 %v10804_v51, 0.0  ;;  %v11619_v22 = vrot.slane %v10931_v38, 4 }
 0x657   : > { %v10500_v47 = vpop.f32.mrb[228].mxu1 }
 0x658   : > { %v11612_v16 = vadd.f32 %v11611_v33, %v11610_v6  ;;  %v11617_v48 = vrot.slane %v11616_v24, 1  ;;  %v11625_v14 = vrot.slane %v10932_v35, 4  ;;  %v10677_v29 = vadd.f32 %v19372_v37, %v10500_v47  ;;  %v10502_v2 = vpop.f32.mrb[229].mxu1 }
 0x659   : > { %v11620_v15 = vadd.f32 %v11619_v22, %v10931_v38  ;;  %v10503_v20 = vpop.f32.mrb[230].mxu1 }
 0x65a   : > { %v11826_v9 = vmul.f32 0.125, %v11612_v16  ;;  %v11618_v63 = vadd.f32 %v11617_v48, %v11616_v24  ;;  %v11626_v28 = vadd.f32 %v11625_v14, %v10932_v35  ;;  %v10805_v26 = vadd.f32 %v10677_v29, %v18500_v57  ;;  %v10505_v27 = vpop.f32.mrb[231].mxu1 }
 0x65b   : > { %v11621_v42 = vrot.slane %v11620_v15, 2  ;;  %v10678_v55 = vadd.f32 %v19372_v37, %v10503_v20 }
 0x65c   : > { %v11954_v32 = vpack.c.bf16 %v11826_v9, %v11826_v9  ;;  %v11827_v52 = vmul.f32 0.125, %v11618_v63  ;;  %v11627_v44 = vrot.slane %v11626_v28, 2  ;;  %v10933_v25 = vmax.f32 %v10805_v26, 0.0 }
 0x65d   : > { %v11622_v36 = vadd.f32 %v11621_v42, %v11620_v15  ;;  %v10806_v10 = vadd.f32 %v10678_v55, %v20173_v49 }
 0x65e   : > { %v12233_v58 = vunpack.c.l.b16 %v11954_v32  ;;  %v11628_v19 = vadd.f32 %v11627_v44, %v11626_v28  ;;  %v11631_v23 = vrot.slane %v10933_v25, 4  ;;  %v11955_v31 = vpack.c.bf16 %v11827_v52, %v11827_v52 }
 0x65f   : > { %v11623_v5 = vrot.slane %v11622_v36, 1  ;;  %v10934_v30 = vmax.f32 %v10806_v10, 0.0  ;;  %v10508_v12 = vpop.f32.mrb[232].mxu1 }
 0x660   : > { %v11629_v34 = vrot.slane %v11628_v19, 1  ;;  %v11632_v57 = vadd.f32 %v11631_v23, %v10933_v25  ;;  %v10679_v61 = vadd.f32 %v19372_v37, %v10508_v12  ;;  %v10510_v11 = vpop.f32.mrb[233].mxu1  ;;  %v12234_v3 = vunpack.c.l.b16 %v11955_v31 }
 0x661   : > { %v11624_v17 = vadd.f32 %v11623_v5, %v11622_v36  ;;  %v11637_v56 = vrot.slane %v10934_v30, 4  ;;  %v10511_v40 = vpop.f32.mrb[234].mxu1  ;;  %v12354_v53 = vsel %vm12261_vm7, %v12233_v58, %v12353_v60 }
 0x662   : > { %v11630_v39 = vadd.f32 %v11629_v34, %v11628_v19  ;;  %v11633_v0 = vrot.slane %v11632_v57, 2  ;;  %v10807_v6 = vadd.f32 %v10679_v61, %v18514_v43  ;;  %v10680_v21 = vadd.f32 %v19372_v37, %v10511_v40  ;;  %v10513_v51 = vpop.f32.mrb[235].mxu1 }
 0x663   : > { %v11828_v38 = vmul.f32 0.125, %v11624_v17  ;;  %v11638_v33 = vadd.f32 %v11637_v56, %v10934_v30  ;;  %v12355_v24 = vsel %vm12263_vm8, %v12234_v3, %v12354_v53 }
 0x664   : > { %v11829_v35 = vmul.f32 0.125, %v11630_v39  ;;  %v11634_v22 = vadd.f32 %v11633_v0, %v11632_v57  ;;  %v10935_v47 = vmax.f32 %v10807_v6, 0.0  ;;  %v10808_v16 = vadd.f32 %v10680_v21, %v18506_v7 }
 0x665   : > { %v11956_v48 = vpack.c.bf16 %v11828_v38, %v11828_v38  ;;  %v11639_v14 = vrot.slane %v11638_v33, 2  ;;  %v12376_v60 = vpack.c.b16 %v12355_v24, %v19388_v54 }
 0x666   : > { %v11957_v29 = vpack.c.bf16 %v11829_v35, %v11829_v35  ;;  %v11635_v2 = vrot.slane %v11634_v22, 1  ;;  %v11643_v15 = vrot.slane %v10935_v47, 4  ;;  %v10936_v43 = vmax.f32 %v10808_v16, 0.0 }
 0x667   : > { %v12235_v20 = vunpack.c.l.b16 %v11956_v48  ;;  %v11640_v9 = vadd.f32 %v11639_v14, %v11638_v33  ;;  %15114 = vmatprep.mubr.bf16.mxu1 %v12376_v60  ;;  %v10516_v63 = vpop.f32.mrb[236].mxu1 }
 0x668   : > { %v12236_v28 = vunpack.c.l.b16 %v11957_v29  ;;  %v11636_v26 = vadd.f32 %v11635_v2, %v11634_v22  ;;  %v11644_v27 = vadd.f32 %v11643_v15, %v10935_v47  ;;  %v11649_v42 = vrot.slane %v10936_v43, 4  ;;  %v10518_v55 = vpop.f32.mrb[237].mxu1 }
 0x669   : > { %v11641_v32 = vrot.slane %v11640_v9, 1  ;;  %v10681_v7 = vadd.f32 %v19372_v37, %v10516_v63  ;;  %v10519_v52 = vpop.f32.mrb[238].mxu1 }
 0x66a   : > { %v12356_v44 = vsel %vm12251_vm2, %v12236_v28, %v12235_v20  ;;  %v11830_v54 = vmul.f32 0.125, %v11636_v26  ;;  %v11645_v25 = vrot.slane %v11644_v27, 2  ;;  %v11650_v36 = vadd.f32 %v11649_v42, %v10936_v43  ;;  %v10521_v49 = vpop.f32.mrb[239].mxu1 }
 0x66b   : > { %v11642_v10 = vadd.f32 %v11641_v32, %v11640_v9  ;;  %v10809_v58 = vadd.f32 %v10681_v7, %v18522_v50  ;;  %v10682_v19 = vadd.f32 %v19372_v37, %v10519_v52 }
 0x66c   : > { %v11958_v23 = vpack.c.bf16 %v11830_v54, %v11830_v54  ;;  %v11646_v31 = vadd.f32 %v11645_v25, %v11644_v27  ;;  %v11651_v5 = vrot.slane %v11650_v36, 2 }
 0x66d   : > { %v11831_v30 = vmul.f32 0.125, %v11642_v10  ;;  %v10937_v12 = vmax.f32 %v10809_v58, 0.0  ;;  %v10810_v34 = vadd.f32 %v10682_v19, %v18512_v8 }
 0x66e   : > { %v12237_v57 = vunpack.c.l.b16 %v11958_v23  ;;  %v11647_v61 = vrot.slane %v11646_v31, 1  ;;  %v11652_v11 = vadd.f32 %v11651_v5, %v11650_v36 }
 0x66f   : > { %v11959_v3 = vpack.c.bf16 %v11831_v30, %v11831_v30  ;;  %v11655_v17 = vrot.slane %v10937_v12, 4  ;;  %v10938_v56 = vmax.f32 %v10810_v34, 0.0  ;;  %v10524_v40 = vpop.f32.mrb[240].mxu1 }
 0x670   : > { %v12357_v53 = vsel %vm12253_vm3, %v12237_v57, %v12356_v44  ;;  %v11648_v39 = vadd.f32 %v11647_v61, %v11646_v31  ;;  %v11653_v50 = vrot.slane %v11652_v11, 1  ;;  %v10683_v0 = vadd.f32 %v19372_v37, %v10524_v40  ;;  %v10526_v6 = vpop.f32.mrb[241].mxu1 }
 0x671   : > { %v12238_v21 = vunpack.c.l.b16 %v11959_v3  ;;  %v11656_v51 = vadd.f32 %v11655_v17, %v10937_v12  ;;  %v11661_v38 = vrot.slane %v10938_v56, 4  ;;  %v10527_v33 = vpop.f32.mrb[242].mxu1 }
 0x672   : > { %v11832_v24 = vmul.f32 0.125, %v11648_v39  ;;  %v11654_v8 = vadd.f32 %v11653_v50, %v11652_v11  ;;  %v10811_v35 = vadd.f32 %v10683_v0, %v18557_v18  ;;  %v10684_v22 = vadd.f32 %v19372_v37, %v10527_v33  ;;  %v10529_v47 = vpop.f32.mrb[243].mxu1 }
 0x673   : > { %v12358_v16 = vsel %vm12255_vm4, %v12238_v21, %v12357_v53  ;;  %v11657_v48 = vrot.slane %v11656_v51, 2  ;;  %v11662_v14 = vadd.f32 %v11661_v38, %v10938_v56 }
 0x674   : > { %v11960_v60 = vpack.c.bf16 %v11832_v24, %v11832_v24  ;;  %v11833_v29 = vmul.f32 0.125, %v11654_v8  ;;  %v10939_v2 = vmax.f32 %v10811_v35, 0.0  ;;  %v10812_v15 = vadd.f32 %v10684_v22, %v18536_v59 }
 0x675   : > { %v11658_v43 = vadd.f32 %v11657_v48, %v11656_v51  ;;  %v11663_v20 = vrot.slane %v11662_v14, 2 }
 0x676   : > { %v12239_v9 = vunpack.c.l.b16 %v11960_v60  ;;  %v11961_v63 = vpack.c.bf16 %v11833_v29, %v11833_v29  ;;  %v11667_v28 = vrot.slane %v10939_v2, 4  ;;  %v10940_v26 = vmax.f32 %v10812_v15, 0.0 }
 0x677   : > { %v11659_v27 = vrot.slane %v11658_v43, 1  ;;  %v11664_v18 = vadd.f32 %v11663_v20, %v11662_v14 }
 0x678   : > { %v10532_v42 = vpop.f32.mrb[244].mxu1  ;;  %v15108_v55 = vpop.f32.mrb[4].mxu0  ;;  %v12359_v32 = vsel %vm12257_vm5, %v12239_v9, %v12358_v16  ;;  %v12240_v7 = vunpack.c.l.b16 %v11961_v63  ;;  %v11668_v52 = vadd.f32 %v11667_v28, %v10939_v2  ;;  %v11673_v44 = vrot.slane %v10940_v26, 4 }
 0x679   : > { %v10534_v54 = vpop.f32.mrb[245].mxu1  ;;  %v12484_v25 = vpop.f32.mrb[5].mxu0  ;;  %v11660_v36 = vadd.f32 %v11659_v27, %v11658_v43  ;;  %v11665_v59 = vrot.slane %v11664_v18, 1  ;;  %v10685_v49 = vadd.f32 %v19372_v37, %v10532_v42  ;;  %v12493_v10 = vadd.f32 %v15108_v55, %v19311_v62  ;;  %v19436_v62 = vld [vmem:[%s19540_s8] ss:$0 sm:$0xff] }
 0x67a   : > { %v10535_v58 = vpop.f32.mrb[246].mxu1  ;;  %v15109_v19 = vpop.f32.mrb[6].mxu0  ;;  %v12360_v23 = vsel %vm12259_vm6, %v12240_v7, %v12359_v32  ;;  %v11669_v31 = vrot.slane %v11668_v52, 2  ;;  %v11674_v5 = vadd.f32 %v11673_v44, %v10940_v26  ;;  %v12485_v3 = vadd.f32 %v19436_v62, %v12484_v25 }
 0x67b   : > { %v10686_v30 = vadd.f32 %v19372_v37, %v10535_v58  ;;  %v10537_v12 = vpop.f32.mrb[247].mxu1  ;;  %v12487_v34 = vpop.f32.mrb[7].mxu0  ;;  %v11834_v57 = vmul.f32 0.125, %v11660_v36  ;;  %v11666_v61 = vadd.f32 %v11665_v59, %v11664_v18  ;;  %v10813_v11 = vadd.f32 %v10685_v49, %v18566_v1  ;;  %12537 = vst [vmem:[%s19319_s24 + $0x30] sm:$0xff] %v12493_v10 }
 0x67c   : > { %v11670_v17 = vadd.f32 %v11669_v31, %v11668_v52  ;;  %v11675_v56 = vrot.slane %v11674_v5, 2  ;;  %v12496_v53 = vadd.f32 %v19436_v62, %v15109_v19  ;;  %12535 = vst [vmem:[%s19319_s24 + $0x20] sm:$0xff] %v12485_v3  ;;  %v12488_v1 = vadd.f32 %v19436_v62, %v12487_v34 }
 0x67d   : > { %v10814_v40 = vadd.f32 %v10686_v30, %v18568_v46  ;;  %v11962_v39 = vpack.c.bf16 %v11834_v57, %v11834_v57  ;;  %v11835_v50 = vmul.f32 0.125, %v11666_v61  ;;  %v10941_v0 = vmax.f32 %v10813_v11, 0.0 }
 0x67e   : > { %v11671_v6 = vrot.slane %v11670_v17, 1  ;;  %v11676_v21 = vadd.f32 %v11675_v56, %v11674_v5  ;;  %12538 = vst [vmem:[%s19319_s24 + $0x38] sm:$0xff] %v12496_v53  ;;  %12536 = vst [vmem:[%s19319_s24 + $0x28] sm:$0xff] %v12488_v1 }
 0x67f   : > { %v10942_v51 = vmax.f32 %v10814_v40, 0.0  ;;  %v12241_v38 = vunpack.c.l.b16 %v11962_v39  ;;  %v11963_v33 = vpack.c.bf16 %v11835_v50, %v11835_v50  ;;  %v11679_v24 = vrot.slane %v10941_v0, 4 }
 0x680   : > { %v10540_v8 = vpop.f32.mrb[248].mxu1  ;;  %v11672_v35 = vadd.f32 %v11671_v6, %v11670_v17  ;;  %v11677_v22 = vrot.slane %v11676_v21, 1 }
 0x681   : > { %v11685_v46 = vrot.slane %v10942_v51, 4  ;;  %v10687_v47 = vadd.f32 %v19372_v37, %v10540_v8  ;;  %v10542_v16 = vpop.f32.mrb[249].mxu1  ;;  %v12361_v48 = vsel %vm12261_vm7, %v12241_v38, %v12360_v23  ;;  %v12242_v14 = vunpack.c.l.b16 %v11963_v33 }
 0x682   : > { %v11680_v60 = vadd.f32 %v11679_v24, %v10941_v0  ;;  %v10543_v29 = vpop.f32.mrb[250].mxu1  ;;  %v11836_v2 = vmul.f32 0.125, %v11672_v35  ;;  %v11678_v15 = vadd.f32 %v11677_v22, %v11676_v21 }
 0x683   : > { %v11686_v43 = vadd.f32 %v11685_v46, %v10942_v51  ;;  %v10815_v20 = vadd.f32 %v10687_v47, %v18595_v45  ;;  %v10545_v9 = vpop.f32.mrb[251].mxu1  ;;  %v19449_v63 = vsel %vm12263_vm8, %v12242_v14, %v12361_v48  ;;  %v10688_v26 = vadd.f32 %v19372_v37, %v10543_v29 }
 0x684   : > { %v11681_v28 = vrot.slane %v11680_v60, 2  ;;  %v11964_v27 = vpack.c.bf16 %v11836_v2, %v11836_v2  ;;  %v11837_v18 = vmul.f32 0.125, %v11678_v15 }
 0x685   : > { %v11687_v42 = vrot.slane %v11686_v43, 2  ;;  %v10943_v55 = vmax.f32 %v10815_v20, 0.0  ;;  %v10816_v7 = vadd.f32 %v10688_v26, %v18589_v4 }
 0x686   : > { %v11682_v32 = vadd.f32 %v11681_v28, %v11680_v60  ;;  %v11965_v52 = vpack.c.bf16 %v11837_v18, %v11837_v18  ;;  %v12243_v25 = vunpack.c.l.b16 %v11964_v27 }
 0x687   : > { %v11688_v44 = vadd.f32 %v11687_v42, %v11686_v43  ;;  %v11691_v54 = vrot.slane %v10943_v55, 4  ;;  %v10944_v45 = vmax.f32 %v10816_v7, 0.0 }
 0x688   : > { %v11683_v36 = vrot.slane %v11682_v32, 1  ;;  %v10548_v59 = vpop.f32.mrb[252].mxu1  ;;  %v12244_v49 = vunpack.c.l.b16 %v11965_v52 }
 0x689   : > { %v11689_v10 = vrot.slane %v11688_v44, 1  ;;  %v11692_v58 = vadd.f32 %v11691_v54, %v10943_v55  ;;  %v10689_v19 = vadd.f32 %v19372_v37, %v10548_v59  ;;  %v10550_v23 = vpop.f32.mrb[253].mxu1  ;;  %v11697_v5 = vrot.slane %v10944_v45, 4 }
 0x68a   : > { %v11684_v31 = vadd.f32 %v11683_v36, %v11682_v32  ;;  %v10551_v30 = vpop.f32.mrb[254].mxu1  ;;  %v12363_v12 = vsel %vm12251_vm2, %v12244_v49, %v12243_v25 }
 0x68b   : > { %v11690_v34 = vadd.f32 %v11689_v10, %v11688_v44  ;;  %v11693_v4 = vrot.slane %v11692_v58, 2  ;;  %v10817_v57 = vadd.f32 %v10689_v19, %v18607_v41  ;;  %v10553_v61 = vpop.f32.mrb[255].mxu1  ;;  %v11698_v3 = vadd.f32 %v11697_v5, %v10944_v45 }
 0x68c   : > { %v11838_v11 = vmul.f32 0.125, %v11684_v31  ;;  %v10690_v17 = vadd.f32 %v19372_v37, %v10551_v30 }
 0x68d   : > { %v11839_v56 = vmul.f32 0.125, %v11690_v34  ;;  %v11694_v40 = vadd.f32 %v11693_v4, %v11692_v58  ;;  %v10945_v53 = vmax.f32 %v10817_v57, 0.0  ;;  %v11699_v50 = vrot.slane %v11698_v3, 2 }
 0x68e   : > { %v11966_v39 = vpack.c.bf16 %v11838_v11, %v11838_v11  ;;  %v10818_v0 = vadd.f32 %v10690_v17, %v18613_v13 }
 0x68f   : > { %v11967_v1 = vpack.c.bf16 %v11839_v56, %v11839_v56  ;;  %v11695_v6 = vrot.slane %v11694_v40, 1  ;;  %v11703_v21 = vrot.slane %v10945_v53, 4  ;;  %v11700_v38 = vadd.f32 %v11699_v50, %v11698_v3 }
 0x690   : > { %v12245_v51 = vunpack.c.l.b16 %v11966_v39  ;;  %v10946_v33 = vmax.f32 %v10818_v0, 0.0 }
 0x691   : > { %v12246_v24 = vunpack.c.l.b16 %v11967_v1  ;;  %v11696_v41 = vadd.f32 %v11695_v6, %v11694_v40  ;;  %v11704_v8 = vadd.f32 %v11703_v21, %v10945_v53  ;;  %v11701_v22 = vrot.slane %v11700_v38, 1 }
 0x692   : > { %v12364_v35 = vsel %vm12253_vm3, %v12245_v51, %v12363_v12  ;;  %v11709_v37 = vrot.slane %v10946_v33, 4 }
 0x693   : > { %v12365_v46 = vsel %vm12255_vm4, %v12246_v24, %v12364_v35  ;;  %v11840_v47 = vmul.f32 0.125, %v11696_v41  ;;  %v11705_v16 = vrot.slane %v11704_v8, 2  ;;  %v11702_v48 = vadd.f32 %v11701_v22, %v11700_v38 }
 0x694   : > { %v11710_v14 = vadd.f32 %v11709_v37, %v10946_v33 }
 0x695   : > { %v11968_v13 = vpack.c.bf16 %v11840_v47, %v11840_v47  ;;  %v11706_v60 = vadd.f32 %v11705_v16, %v11704_v8  ;;  %v11841_v29 = vmul.f32 0.125, %v11702_v48 }
 0x696   : > { %v11711_v2 = vrot.slane %v11710_v14, 2 }
 0x697   : > { %v12247_v15 = vunpack.c.l.b16 %v11968_v13  ;;  %v11707_v43 = vrot.slane %v11706_v60, 1  ;;  %v11969_v20 = vpack.c.bf16 %v11841_v29, %v11841_v29 }
 0x698   : > { %v11712_v9 = vadd.f32 %v11711_v2, %v11710_v14 }
 0x699   : > { %v12366_v28 = vsel %vm12257_vm5, %v12247_v15, %v12365_v46  ;;  %v11708_v26 = vadd.f32 %v11707_v43, %v11706_v60  ;;  %v12248_v27 = vunpack.c.l.b16 %v11969_v20 }
 0x69a   : > { %v11713_v18 = vrot.slane %v11712_v9, 1 }
 0x69b   : > { %v11842_v42 = vmul.f32 0.125, %v11708_v26  ;;  %v12367_v55 = vsel %vm12259_vm6, %v12248_v27, %v12366_v28 }
 0x69c   : > { %v11714_v32 = vadd.f32 %v11713_v18, %v11712_v9 }
 0x69d   : > { %v11970_v7 = vpack.c.bf16 %v11842_v42, %v11842_v42 }
 0x69e   : > { %v11843_v52 = vmul.f32 0.125, %v11714_v32 }
 0x69f   : > { %v12249_v44 = vunpack.c.l.b16 %v11970_v7 }
 0x6a0   : > { %v11971_v54 = vpack.c.bf16 %v11843_v52, %v11843_v52 }
 0x6a1   : > { %v12368_v25 = vsel %vm12261_vm7, %v12249_v44, %v12367_v55 }
 0x6a2   : > { %v12250_v36 = vunpack.c.l.b16 %v11971_v54 }
 0x6a4   : > { %v12369_v45 = vsel %vm12263_vm8, %v12250_v36, %v12368_v25 }
 0x6a5   : > { %v12377_v59 = vpack.c.b16 %v12369_v45, %v19449_v63 }
 0x6a7   : > { %15115 = vmatmul.mubr.bf16.gmra.mrb[4].mxu1 %v12377_v59 }
 0x6f3   : > { %v15112_v49 = vpop.f32.mrb[0].mxu1 }
 0x6f4   : > { %v12509_v10 = vadd.f32 %v19436_v62, %v15112_v49  ;;  %v12500_v58 = vpop.f32.mrb[1].mxu1 }
 0x6f5   : > { %v12501_v19 = vadd.f32 %v19436_v62, %v12500_v58  ;;  %v15113_v23 = vpop.f32.mrb[2].mxu1 }
 0x6f6   : > { %12541 = vst [vmem:[%s19319_s24 + $0x50] sm:$0xff] %v12509_v10  ;;  %v12512_v31 = vadd.f32 %v19436_v62, %v15113_v23  ;;  %v12503_v5 = vpop.f32.mrb[3].mxu1 }
 0x6f7   : > { %12539 = vst [vmem:[%s19319_s24 + $0x40] sm:$0xff] %v12501_v19  ;;  %v12504_v30 = vadd.f32 %v19436_v62, %v12503_v5 }
 0x6f8   : > { %12542 = vst [vmem:[%s19319_s24 + $0x58] sm:$0xff] %v12512_v31 }
 0x6f9   : > { %12540 = vst [vmem:[%s19319_s24 + $0x48] sm:$0xff] %v12504_v30 }
 0x77a   : > { %v15116_v63 = vpop.f32.mrb[4].mxu1 }
 0x77b   : > { %v12525_v12 = vadd.f32 %v19436_v62, %v15116_v63  ;;  %v12516_v34 = vpop.f32.mrb[5].mxu1 }
 0x77c   : > { %v12517_v4 = vadd.f32 %v19436_v62, %v12516_v34  ;;  %v15117_v57 = vpop.f32.mrb[6].mxu1 }
 0x77d   : > { %12545 = vst [vmem:[%s19319_s24 + $0x70] sm:$0xff] %v12525_v12  ;;  %v12528_v61 = vadd.f32 %v19436_v62, %v15117_v57  ;;  %v12519_v11 = vpop.f32.mrb[7].mxu1 }
 0x77e   : > { %12543 = vst [vmem:[%s19319_s24 + $0x60] sm:$0xff] %v12517_v4  ;;  %v12520_v3 = vadd.f32 %v19436_v62, %v12519_v11 }
 0x77f   : > { %12546 = vst [vmem:[%s19319_s24 + $0x78] sm:$0xff] %v12528_v61 }
 0x780   : > { %12544 = vst [vmem:[%s19319_s24 + $0x68] sm:$0xff] %v12520_v3 }
 0x781   : > { %15439 = shalt.err (!%p15436_p4)
}
 0x782   : > { %s15440_s24 = scalar_lea.hbm %s19482_s21, 2048  ;;  %s15444_s18 = scalar_lea.hbm %s20174_s26, 4096 }
 0x783   : > { %p15441_p9 = scmp.ne.s32.totalorder %s19482_s21, %s15440_s24  ;;  %p15445_p8 = scmp.lt.u32.totalorder %s19482_s21, %s20174_s26 }
 0x784   : > { %p15446_p13 = scmp.lt.u32.totalorder %s15444_s18, %s15440_s24  ;;  %p15448_p10 = scmp.lt.u32.totalorder %s15440_s24, %s19482_s21 }
 0x785   : > { %p15442_p0 = pnand %p15441_p9, %p15718_p5 }
 0x786   : > { %p15447_p6 = por %p15446_p13, %p15445_p8 }
 0x787   : > { %p15443_p11 = pneg %p15442_p0 }
 0x788   : > { %p15449_p3 = por %p15448_p10, %p15447_p6 }
 0x78a   : > { %p15450_p7 = pnand %p15449_p3, %p15443_p11 }
 0x78c   : > { %15453 = shalt.err (!%p15450_p7)
}
 0x78d   : > { %s15512_s22 = smov 128   ;;  %s15513_s20 = smov 8  }
 0x78e   : > { %15148 = dma.vmem_to_hbm [thread:$0]  (%p15718_p5), %s19484_s28, 2048, %s19482_s21, %s12548_s13, %s15512_s22, %s15512_s22, %s15513_s20  }
 0x78f PF: > { %s20175_s9 = sld [smem:[#allocation16_spill]]  ;;  %s20176_s30 = sld [smem:[#allocation17_spill]] }
 0x790   : > { %p20178_p1 = scmp.ge.s32.totalorder %s15500_s12, 2 }
 0x795   : > { %s12576_s25 = sand.u32 1, %s20175_s9   ;;  %p20177_p12 = scmp.ne.s32.totalorder %s20176_s30, 0 }
 0x796   : > { %s12577_s24 = scalar_lea.sflag [#allocation5], %s12576_s25 }
 0x797   : > { %p15165_p2 = pnand %p20178_p1, %p20177_p12 }
 0x799   : > { %15483 = dma.done.wait (!%p15165_p2), %s12577_s24, 2048  }
 0x79a   : > { %15485 = vsyncadd (!%p15165_p2), %s12577_s24, 4294965248  ;;  %p24_p4 = scmp.ge.s32.totalorder %s15704_s14, 4   ;;  %s20179_s30 = smov %s15492_s10 }
 0x79b   : > { %s20180_s10 = smov %s15496_s11  ;;  %s20181_s11 = smov %s15714_s16 }
 0x79c   : > { %s20182_s12 = smov %s15704_s14  ;;  %26 = sbr.rel (!%p24_p4) target bundleno = 9 (0x9), region = 117 }
 0x7a3   :  { %12582 = vsyncpa [#allocation4], 1 }
 0x7a4   :  { %12584 = vsyncpa [#allocation4 + $0x1], 1 }
 0x7a5   :  { %12585 = vsyncpa [#allocation7], 1 }
 0x7a6   :  { %12586 = vsyncpa [#allocation10], 1 }
 0x7a7   :  { %12587 = vsyncpa [#allocation5], 1 }
 0x7a8   :  { %12589 = vsyncpa [#allocation5 + $0x1], 1 }

</bundles_post_ra>
